<compile_context>
chip_gen: v7x
topology: tpu7x:2x2x1
jax: 0.10.0
libtpu: 0.0.40
codegen_flags: <defaults>
</compile_context>

<pallas_src>
import jax
import jax.numpy as jnp
from jax import lax
from jax.experimental import pallas as pl
from jax.experimental.pallas import tpu as pltpu

B = 64              # batch (kernel is batch-agnostic; 64 amortizes weight DMA)
SEQ = 16            # token sequence length for the BERT stub
VOCAB = 128         # tiny vocab for the BERT stub
NUM_CLASSES = 9
OUT_PAD = 128       # lane-dense padded classifier width (sliced to 9 outside)
D_MODEL = 512
V34_IN = 50         # cat([v3, v4]) feature count
V34_PAD = 64        # padded in-dim for the audio_v34 linear


# --------------------------- static layout tables ----------------------------

def _offsets(entries):
    offs, off = {}, 0
    for name, n in entries:
        offs[name] = (off, n)
        off += n
    return offs, off


# (name, in_dim, out_dim) for every int8 weight streamed into the kernel.
WEIGHT_SPECS = [
    ('w_pool', 768, 768),      # BERT pooler dense (folded into kernel)
    ('wt', 768, 512),          # text_fc
    ('wa1', 512, 256),         # audio_v1_fc (BN1 folded downstream)
    ('wa34', V34_PAD, 128),    # audio_v34_fc (padded 50->64, BN34 folded downstream)
    ('wac_v1', 256, 256),      # audio_combined_fc, rows fed by BN1(audio_v1)
    ('wac_v34', 128, 256),     # audio_combined_fc, rows fed by BN34(audio_v34)
    ('wv', 512, 256),          # visual_fc (BNv folded downstream)
    ('wam', 256, 1024),        # merged: [ta attention V (rows 0:256) | fusion audio cols]
    ('wvm', 256, 1024),        # merged: [BNv-folded tv V | BNv-folded fusion visual cols]
    ('ta_wo', 512, 512),       # text-audio attention out_proj
    ('tv_wo', 512, 512),       # text-visual attention out_proj
    ('wf_att', 512, 512),      # fusion_fc, attended-features columns
    ('wc1', 512, 256),         # classifier hidden
    ('wc2', 256, OUT_PAD),     # classifier out (padded 9->128)
]
WEIGHT_ORDER = [n for n, _, _ in WEIGHT_SPECS]
SCALE_OFF, SCALE_TOTAL = _offsets([(n, o) for n, _, o in WEIGHT_SPECS])

BIAS_SPECS = [
    ('b_pool', 768), ('bt', 512), ('ba1', 256), ('ba34', 128), ('bac', 256),
    ('bv', 256), ('ta_bv', 512), ('tv_bv', 512), ('ta_bo', 512),
    ('tv_bo', 512), ('bf', 512), ('bc1', 256), ('bc2', OUT_PAD),
]
BIAS_OFF, BIAS_TOTAL = _offsets(BIAS_SPECS)


# -------------------------------- the kernel ---------------------------------

def emotion_kernel(
    text_ref, v1_ref, v34_ref, a2_ref,
    wpool_ref, wt_ref, wa1_ref, wa34_ref,
    wac1_ref, wac34_ref, wv_ref,
    wam_ref, wvm_ref, tao_ref, tvo_ref,
    wfa_ref, wc1_ref, wc2_ref,
    sc_ref, bs_ref,
    out_ref,
):
    bf16 = jnp.bfloat16
    relu = lambda x: jnp.maximum(x, 0.0)

    def qmm(x_bf16, w_ref, name):
        # int8 weight -> bf16 on the VPU, MXU matmul with f32 accumulation,
        # per-output-channel dequant scale applied to the (small) result.
        off, n = SCALE_OFF[name]
        w = w_ref[...].astype(bf16)
        acc = jnp.dot(x_bf16, w, preferred_element_type=jnp.float32)
        return acc * sc_ref[:, off:off + n]

    def bias(name):
        off, n = BIAS_OFF[name]
        return bs_ref[:, off:off + n]

    # BERT pooler (folded in): tanh(masked_mean_emb @ W_pool + b_pool)
    text_pooled = jnp.tanh(qmm(text_ref[...], wpool_ref, 'w_pool')
                           + bias('b_pool')).astype(bf16)

    # text_fc: Linear(768,512) + ReLU (+ Dropout = identity)
    text_features = relu(qmm(text_pooled, wt_ref, 'wt') + bias('bt'))      # [B,512]

    # audio branches (eval-BN folded downstream)
    audio_v1 = relu(qmm(v1_ref[...], wa1_ref, 'wa1') + bias('ba1')).astype(bf16)
    audio_v34 = relu(qmm(v34_ref[...], wa34_ref, 'wa34') + bias('ba34')).astype(bf16)

    # audio_combined_fc: split-weight matmul instead of a [B,384] concat
    audio_features = relu(qmm(audio_v1, wac1_ref, 'wac_v1')
                          + qmm(audio_v34, wac34_ref, 'wac_v34')
                          + bias('bac')).astype(bf16)                       # [B,256]

    # visual_fc (eval-BN folded downstream)
    visual_features = relu(qmm(a2_ref[...], wv_ref, 'wv') + bias('bv')).astype(bf16)

    # Merged matmuls that share an LHS: attention-V columns | fusion columns.
    audio_comb = qmm(audio_features, wam_ref, 'wam')                        # [B,1024]
    visual_comb = qmm(visual_features, wvm_ref, 'wvm')                      # [B,1024]

    # Cross-modal attention with kv-seq-len 1: softmax over one key == 1, so
    # attn_out = out_proj(V).  V-block biases added here, then out_proj.
    ta_v = (audio_comb[:, :D_MODEL] + bias('ta_bv')).astype(bf16)
    tv_v = (visual_comb[:, :D_MODEL] + bias('tv_bv')).astype(bf16)
    ta = qmm(ta_v, tao_ref, 'ta_wo') + bias('ta_bo')
    tv = qmm(tv_v, tvo_ref, 'tv_wo') + bias('tv_bo')

    attended = (text_features + ta + tv).astype(bf16)                       # [B,512]

    # fusion_fc: Linear(1024,512) + ReLU, split-weight matmul (no concat);
    # the audio / visual contributions come straight from the merged matmuls.
    fused = relu(qmm(attended, wfa_ref, 'wf_att')
                 + audio_comb[:, D_MODEL:]
                 + visual_comb[:, D_MODEL:]
                 + bias('bf')).astype(bf16)                                 # [B,512]

    # classifier: Linear(512,256) + ReLU (+ Dropout) + Linear(256, 9 padded to 128)
    h = relu(qmm(fused, wc1_ref, 'wc1') + bias('bc1')).astype(bf16)
    out_ref[...] = qmm(h, wc2_ref, 'wc2') + bias('bc2')                     # [B,128]


# ------------------------------ glue / wrapper --------------------------------

@jax.jit
def multimodal_emotion_forward(input_ids, attention_mask, v1, v3, v4, a2, kp):
    # TODO(synk): the pretrained BERT encoder has no clean in-kernel equivalent;
    # replaced by a deterministic stub (embedding lookup -> masked mean); the
    # pooler dense + tanh IS computed inside the kernel.
    emb = kp['embed'][input_ids]                                 # [B, S, 768]
    mask = attention_mask.astype(jnp.float32)[..., None]         # [B, S, 1]
    text_mean = (emb * mask).sum(axis=1) / jnp.maximum(mask.sum(axis=1), 1.0)

    batch = input_ids.shape[0]
    v34 = jnp.concatenate(                                       # torch.cat([v3, v4]) + pad 50->64
        [v3, v4, jnp.zeros((batch, V34_PAD - V34_IN), v3.dtype)], axis=1)

    acts = [text_mean.astype(jnp.bfloat16), v1.astype(jnp.bfloat16),
            v34.astype(jnp.bfloat16), a2.astype(jnp.bfloat16)]
    weights = [kp[name] for name in WEIGHT_ORDER]
    args = acts + weights + [kp['scales'], kp['biases']]

    flops = 2 * batch * sum(i * o for _, i, o in WEIGHT_SPECS)
    bytes_accessed = sum(int(a.size) * a.dtype.itemsize for a in args)
    bytes_accessed += batch * OUT_PAD * 4

    out = pl.pallas_call(
        emotion_kernel,
        out_shape=jax.ShapeDtypeStruct((batch, OUT_PAD), jnp.float32),
        in_specs=[pl.BlockSpec(memory_space=pltpu.MemorySpace.VMEM)] * len(args),
        out_specs=pl.BlockSpec(memory_space=pltpu.MemorySpace.VMEM),
        compiler_params=pltpu.CompilerParams(vmem_limit_bytes=32 * 1024 * 1024),
        cost_estimate=pl.CostEstimate(flops=flops, transcendentals=batch * 768,
                                      bytes_accessed=bytes_accessed),
    )(*args)
    return out[:, :NUM_CLASSES]


# ---------------------------- parameter creation ------------------------------

def _init_linear(key, fan_in, fan_out):
    k1, k2 = jax.random.split(key)
    bound = 1.0 / (fan_in ** 0.5)
    w = jax.random.uniform(k1, (fan_in, fan_out), jnp.float32, -bound, bound)
    b = jax.random.uniform(k2, (1, fan_out), jnp.float32, -bound, bound)
    return w, b


def _init_bn(n):
    # rows: gamma, beta, running_mean, running_var (PyTorch defaults)
    return jnp.stack([jnp.ones((n,), jnp.float32),
                      jnp.zeros((n,), jnp.float32),
                      jnp.zeros((n,), jnp.float32),
                      jnp.ones((n,), jnp.float32)], axis=0)


def _bn_scale_shift(bn, eps=1e-5):
    gamma, beta, mean, var = bn[0], bn[1], bn[2], bn[3]
    s = gamma * lax.rsqrt(var + eps)
    t = beta - mean * s
    return s, t                       # BN(x) == x * s + t  (eval mode)


def make_params(key):
    """Raw, PyTorch-layout parameters (f32, full QKV matrices, raw BN stats)."""
    keys = jax.random.split(key, 16)
    p = {}
    p['wt'], p['bt'] = _init_linear(keys[0], 768, 512)
    p['wa1'], p['ba1'] = _init_linear(keys[1], 512, 256)
    p['bn1'] = _init_bn(256)
    p['wa34'], p['ba34'] = _init_linear(keys[2], V34_IN, 128)
    p['bn34'] = _init_bn(128)
    p['wac'], p['bac'] = _init_linear(keys[3], 384, 256)
    p['wv'], p['bv'] = _init_linear(keys[4], 512, 256)
    p['bnv'] = _init_bn(256)
    p['ta_wqkv'], p['ta_bqkv'] = _init_linear(keys[5], 512, 3 * D_MODEL)
    p['ta_wo'], p['ta_bo'] = _init_linear(keys[6], 512, 512)
    p['tv_wqkv'], p['tv_bqkv'] = _init_linear(keys[7], 512, 3 * D_MODEL)
    p['tv_wo'], p['tv_bo'] = _init_linear(keys[8], 512, 512)
    p['wf'], p['bf'] = _init_linear(keys[9], 1024, 512)
    p['wc1'], p['bc1'] = _init_linear(keys[10], 512, 256)
    p['wc2'], p['bc2'] = _init_linear(keys[11], 256, NUM_CLASSES)
    # BERT stub params
    p['embed'] = jax.random.normal(keys[12], (VOCAB, 768), jnp.float32) * 0.02
    p['w_pool'], p['b_pool'] = _init_linear(keys[13], 768, 768)
    return p


# --------------------------- parameter preparation ----------------------------

def _quantize(w):
    """Symmetric per-output-channel int8 quantization."""
    absmax = jnp.max(jnp.abs(w), axis=0)
    scale = jnp.maximum(absmax, 1e-8) / 127.0
    wq = jnp.clip(jnp.round(w / scale[None, :]), -127.0, 127.0).astype(jnp.int8)
    return wq, scale.astype(jnp.float32)


def prepare_kernel_params(p, eps=1e-5):
    """One-time, exact-then-quantized re-parameterization:
       * slice the used V block (rows 0:256, cols 2d:3d) of each attention QKV,
       * fold eval-BN affines into the linears that consume the BN outputs,
       * merge matmuls that share an LHS along the output dim,
       * pad ragged dims (50->64 in, 9->128 out),
       * quantize every weight to int8 with per-column scales; biases stay f32
         and are packed into one flat operand, scales into another."""
    d = D_MODEL
    s1, t1 = _bn_scale_shift(p['bn1'], eps)      # BN over audio_v1   (256)
    s34, t34 = _bn_scale_shift(p['bn34'], eps)   # BN over audio_v34  (128)
    sv, tvb = _bn_scale_shift(p['bnv'], eps)     # BN over visual     (256)

    # audio_combined_fc consumes [BN1(audio_v1) | BN34(audio_v34)]:
    wac_v1_raw = p['wac'][:256, :]
    wac_v34_raw = p['wac'][256:, :]
    wac_v1 = s1[:, None] * wac_v1_raw
    wac_v34 = s34[:, None] * wac_v34_raw
    bac = p['bac'] + t1 @ wac_v1_raw + t34 @ wac_v34_raw

    # attention V blocks: kv seq len 1 -> only V matters; kv zero-padded 256->512
    # -> only rows 0:256 of the V weight contribute.
    ta_wv = p['ta_wqkv'][:256, 2 * d:3 * d]
    ta_bv = p['ta_bqkv'][:, 2 * d:3 * d]
    tv_wv_raw = p['tv_wqkv'][:256, 2 * d:3 * d]
    tv_wv = sv[:, None] * tv_wv_raw                        # fold visual BN scale
    tv_bv = p['tv_bqkv'][:, 2 * d:3 * d] + tvb @ tv_wv_raw

    # fusion_fc consumes [attended | audio_features | BNv(visual)]:
    wf_att = p['wf'][:512, :]
    wf_aud = p['wf'][512:768, :]
    wf_vis_raw = p['wf'][768:, :]
    wf_vis = sv[:, None] * wf_vis_raw
    bf = p['bf'] + tvb @ wf_vis_raw

    # merge matmuls that share an LHS
    wam = jnp.concatenate([ta_wv, wf_aud], axis=1)         # audio_features  @ [256,1024]
    wvm = jnp.concatenate([tv_wv, wf_vis], axis=1)         # visual_features @ [256,1024]

    # padding for alignment / lane-dense output
    wa34 = jnp.concatenate(
        [p['wa34'], jnp.zeros((V34_PAD - V34_IN, 128), jnp.float32)], axis=0)
    wc2 = jnp.concatenate(
        [p['wc2'], jnp.zeros((256, OUT_PAD - NUM_CLASSES), jnp.float32)], axis=1)
    bc2 = jnp.concatenate(
        [p['bc2'], jnp.zeros((1, OUT_PAD - NUM_CLASSES), jnp.float32)], axis=1)

    float_w = {
        'w_pool': p['w_pool'], 'wt': p['wt'], 'wa1': p['wa1'], 'wa34': wa34,
        'wac_v1': wac_v1, 'wac_v34': wac_v34, 'wv': p['wv'],
        'wam': wam, 'wvm': wvm, 'ta_wo': p['ta_wo'], 'tv_wo': p['tv_wo'],
        'wf_att': wf_att, 'wc1': p['wc1'], 'wc2': wc2,
    }
    bias_map = {
        'b_pool': p['b_pool'], 'bt': p['bt'], 'ba1': p['ba1'], 'ba34': p['ba34'],
        'bac': bac, 'bv': p['bv'], 'ta_bv': ta_bv, 'tv_bv': tv_bv,
        'ta_bo': p['ta_bo'], 'tv_bo': p['tv_bo'], 'bf': bf,
        'bc1': p['bc1'], 'bc2': bc2,
    }

    kp = {}
    scale_parts = []
    for name, in_dim, out_dim in WEIGHT_SPECS:
        wq, sc = _quantize(float_w[name])
        assert wq.shape == (in_dim, out_dim), (name, wq.shape)
        kp[name] = wq
        scale_parts.append(sc)
    kp['scales'] = jnp.concatenate(scale_parts).reshape(1, SCALE_TOTAL)
    kp['biases'] = jnp.concatenate(
        [bias_map[name].reshape(-1) for name, _ in BIAS_SPECS]).reshape(1, BIAS_TOTAL)

    # BERT stub embedding table (used outside the kernel).
    kp['embed'] = p['embed']
    return kp


# ----------------------------------- main --------------------------------------

if __name__ == "__main__":
    root = jax.random.PRNGKey(0)
    k_ids, k_v1, k_v3, k_v4, k_a2, k_params = jax.random.split(root, 6)

    input_ids = jax.random.randint(k_ids, (B, SEQ), 0, VOCAB, dtype=jnp.int32)
    attention_mask = jnp.ones((B, SEQ), jnp.int32)
    v1 = jax.random.normal(k_v1, (B, 512), jnp.float32)
    v3 = jax.random.normal(k_v3, (B, 20), jnp.float32)
    v4 = jax.random.normal(k_v4, (B, 30), jnp.float32)   # cat([v3, v4]) -> 50 features
    a2 = jax.random.normal(k_a2, (B, 512), jnp.float32)

    raw_params = make_params(k_params)
    kparams = jax.tree_util.tree_map(
        jax.block_until_ready, prepare_kernel_params(raw_params))

    logits = multimodal_emotion_forward(
        input_ids, attention_mask, v1, v3, v4, a2, kparams)
    jax.block_until_ready(logits)

    assert logits.shape == (B, NUM_CLASSES), logits.shape
    assert bool(jnp.all(jnp.isfinite(logits)))
    print("KERNEL_OK")
</pallas_src>

<mosaic_0001>
module attributes {stable_mosaic.version = 11 : i64} {
  func.func @emotion_kernel(%arg0: memref<64x768xbf16, #tpu.memory_space<vmem>>, %arg1: memref<64x512xbf16, #tpu.memory_space<vmem>>, %arg2: memref<64x64xbf16, #tpu.memory_space<vmem>>, %arg3: memref<64x512xbf16, #tpu.memory_space<vmem>>, %arg4: memref<768x768xi8, #tpu.memory_space<vmem>>, %arg5: memref<768x512xi8, #tpu.memory_space<vmem>>, %arg6: memref<512x256xi8, #tpu.memory_space<vmem>>, %arg7: memref<64x128xi8, #tpu.memory_space<vmem>>, %arg8: memref<256x256xi8, #tpu.memory_space<vmem>>, %arg9: memref<128x256xi8, #tpu.memory_space<vmem>>, %arg10: memref<512x256xi8, #tpu.memory_space<vmem>>, %arg11: memref<256x1024xi8, #tpu.memory_space<vmem>>, %arg12: memref<256x1024xi8, #tpu.memory_space<vmem>>, %arg13: memref<512x512xi8, #tpu.memory_space<vmem>>, %arg14: memref<512x512xi8, #tpu.memory_space<vmem>>, %arg15: memref<512x512xi8, #tpu.memory_space<vmem>>, %arg16: memref<512x256xi8, #tpu.memory_space<vmem>>, %arg17: memref<256x128xi8, #tpu.memory_space<vmem>>, %arg18: memref<1x6400xf32, #tpu.memory_space<vmem>>, %arg19: memref<1x5120xf32, #tpu.memory_space<vmem>>, %arg20: memref<64x128xf32, #tpu.memory_space<vmem>>) attributes {dimension_semantics = [], scalar_prefetch = 0 : i64, scratch_operands = 0 : i64, tpu.core_type = #tpu.core_type<tc>} {
    %c0 = arith.constant 0 : index
    %c0_0 = arith.constant 0 : index
    %0 = vector.load %arg0[%c0, %c0_0] : memref<64x768xbf16, #tpu.memory_space<vmem>>, vector<64x768xbf16>
    %c0_1 = arith.constant 0 : index
    %c0_2 = arith.constant 0 : index
    %1 = vector.load %arg4[%c0_1, %c0_2] : memref<768x768xi8, #tpu.memory_space<vmem>>, vector<768x768xi8>
    %2 = arith.sitofp %1 : vector<768x768xi8> to vector<768x768xbf16>
    %cst = arith.constant dense<0.000000e+00> : vector<64x768xf32>
    %3 = tpu.matmul %0, %2, %cst {dimension_numbers = #tpu.dot_dimension_numbers<[1], [0], [0], [1], [0, 0, 1, 1], [], []>} : vector<64x768xbf16>, vector<768x768xbf16>, vector<64x768xf32> -> vector<64x768xf32>
    %c0_3 = arith.constant 0 : index
    %c0_4 = arith.constant 0 : index
    %4 = vector.load %arg18[%c0_3, %c0_4] : memref<1x6400xf32, #tpu.memory_space<vmem>>, vector<1x768xf32>
    %5 = vector.broadcast %4 : vector<1x768xf32> to vector<64x768xf32>
    %6 = arith.mulf %3, %5 : vector<64x768xf32>
    %c0_5 = arith.constant 0 : index
    %c0_6 = arith.constant 0 : index
    %7 = vector.load %arg19[%c0_5, %c0_6] : memref<1x5120xf32, #tpu.memory_space<vmem>>, vector<1x768xf32>
    %8 = vector.broadcast %7 : vector<1x768xf32> to vector<64x768xf32>
    %9 = arith.addf %6, %8 : vector<64x768xf32>
    %10 = math.tanh %9 : vector<64x768xf32>
    %11 = arith.truncf %10 : vector<64x768xf32> to vector<64x768xbf16>
    %c0_7 = arith.constant 0 : index
    %c0_8 = arith.constant 0 : index
    %12 = vector.load %arg5[%c0_7, %c0_8] : memref<768x512xi8, #tpu.memory_space<vmem>>, vector<768x512xi8>
    %13 = arith.sitofp %12 : vector<768x512xi8> to vector<768x512xbf16>
    %cst_9 = arith.constant dense<0.000000e+00> : vector<64x512xf32>
    %14 = tpu.matmul %11, %13, %cst_9 {dimension_numbers = #tpu.dot_dimension_numbers<[1], [0], [0], [1], [0, 0, 1, 1], [], []>} : vector<64x768xbf16>, vector<768x512xbf16>, vector<64x512xf32> -> vector<64x512xf32>
    %c0_10 = arith.constant 0 : index
    %c768 = arith.constant 768 : index
    %15 = vector.load %arg18[%c0_10, %c768] : memref<1x6400xf32, #tpu.memory_space<vmem>>, vector<1x512xf32>
    %16 = vector.broadcast %15 : vector<1x512xf32> to vector<64x512xf32>
    %17 = arith.mulf %14, %16 : vector<64x512xf32>
    %c0_11 = arith.constant 0 : index
    %c768_12 = arith.constant 768 : index
    %18 = vector.load %arg19[%c0_11, %c768_12] : memref<1x5120xf32, #tpu.memory_space<vmem>>, vector<1x512xf32>
    %19 = vector.broadcast %18 : vector<1x512xf32> to vector<64x512xf32>
    %20 = arith.addf %17, %19 : vector<64x512xf32>
    %cst_13 = arith.constant 0.000000e+00 : f32
    %21 = vector.broadcast %cst_13 : f32 to vector<64x512xf32>
    %22 = arith.maximumf %20, %21 : vector<64x512xf32>
    %c0_14 = arith.constant 0 : index
    %c0_15 = arith.constant 0 : index
    %23 = vector.load %arg1[%c0_14, %c0_15] : memref<64x512xbf16, #tpu.memory_space<vmem>>, vector<64x512xbf16>
    %c0_16 = arith.constant 0 : index
    %c0_17 = arith.constant 0 : index
    %24 = vector.load %arg6[%c0_16, %c0_17] : memref<512x256xi8, #tpu.memory_space<vmem>>, vector<512x256xi8>
    %25 = arith.sitofp %24 : vector<512x256xi8> to vector<512x256xbf16>
    %cst_18 = arith.constant dense<0.000000e+00> : vector<64x256xf32>
    %26 = tpu.matmul %23, %25, %cst_18 {dimension_numbers = #tpu.dot_dimension_numbers<[1], [0], [0], [1], [0, 0, 1, 1], [], []>} : vector<64x512xbf16>, vector<512x256xbf16>, vector<64x256xf32> -> vector<64x256xf32>
    %c0_19 = arith.constant 0 : index
    %c1280 = arith.constant 1280 : index
    %27 = vector.load %arg18[%c0_19, %c1280] : memref<1x6400xf32, #tpu.memory_space<vmem>>, vector<1x256xf32>
    %28 = vector.broadcast %27 : vector<1x256xf32> to vector<64x256xf32>
    %29 = arith.mulf %26, %28 : vector<64x256xf32>
    %c0_20 = arith.constant 0 : index
    %c1280_21 = arith.constant 1280 : index
    %30 = vector.load %arg19[%c0_20, %c1280_21] : memref<1x5120xf32, #tpu.memory_space<vmem>>, vector<1x256xf32>
    %31 = vector.broadcast %30 : vector<1x256xf32> to vector<64x256xf32>
    %32 = arith.addf %29, %31 : vector<64x256xf32>
    %cst_22 = arith.constant 0.000000e+00 : f32
    %33 = vector.broadcast %cst_22 : f32 to vector<64x256xf32>
    %34 = arith.maximumf %32, %33 : vector<64x256xf32>
    %35 = arith.truncf %34 : vector<64x256xf32> to vector<64x256xbf16>
    %c0_23 = arith.constant 0 : index
    %c0_24 = arith.constant 0 : index
    %36 = vector.load %arg2[%c0_23, %c0_24] : memref<64x64xbf16, #tpu.memory_space<vmem>>, vector<64x64xbf16>
    %c0_25 = arith.constant 0 : index
    %c0_26 = arith.constant 0 : index
    %37 = vector.load %arg7[%c0_25, %c0_26] : memref<64x128xi8, #tpu.memory_space<vmem>>, vector<64x128xi8>
    %38 = arith.sitofp %37 : vector<64x128xi8> to vector<64x128xbf16>
    %cst_27 = arith.constant dense<0.000000e+00> : vector<64x128xf32>
    %39 = tpu.matmul %36, %38, %cst_27 {dimension_numbers = #tpu.dot_dimension_numbers<[1], [0], [0], [1], [0, 0, 1, 1], [], []>} : vector<64x64xbf16>, vector<64x128xbf16>, vector<64x128xf32> -> vector<64x128xf32>
    %c0_28 = arith.constant 0 : index
    %c1536 = arith.constant 1536 : index
    %40 = vector.load %arg18[%c0_28, %c1536] : memref<1x6400xf32, #tpu.memory_space<vmem>>, vector<1x128xf32>
    %41 = vector.broadcast %40 : vector<1x128xf32> to vector<64x128xf32>
    %42 = arith.mulf %39, %41 : vector<64x128xf32>
    %c0_29 = arith.constant 0 : index
    %c1536_30 = arith.constant 1536 : index
    %43 = vector.load %arg19[%c0_29, %c1536_30] : memref<1x5120xf32, #tpu.memory_space<vmem>>, vector<1x128xf32>
    %44 = vector.broadcast %43 : vector<1x128xf32> to vector<64x128xf32>
    %45 = arith.addf %42, %44 : vector<64x128xf32>
    %cst_31 = arith.constant 0.000000e+00 : f32
    %46 = vector.broadcast %cst_31 : f32 to vector<64x128xf32>
    %47 = arith.maximumf %45, %46 : vector<64x128xf32>
    %48 = arith.truncf %47 : vector<64x128xf32> to vector<64x128xbf16>
    %c0_32 = arith.constant 0 : index
    %c0_33 = arith.constant 0 : index
    %49 = vector.load %arg8[%c0_32, %c0_33] : memref<256x256xi8, #tpu.memory_space<vmem>>, vector<256x256xi8>
    %50 = arith.sitofp %49 : vector<256x256xi8> to vector<256x256xbf16>
    %cst_34 = arith.constant dense<0.000000e+00> : vector<64x256xf32>
    %51 = tpu.matmul %35, %50, %cst_34 {dimension_numbers = #tpu.dot_dimension_numbers<[1], [0], [0], [1], [0, 0, 1, 1], [], []>} : vector<64x256xbf16>, vector<256x256xbf16>, vector<64x256xf32> -> vector<64x256xf32>
    %c0_35 = arith.constant 0 : index
    %c1664 = arith.constant 1664 : index
    %52 = vector.load %arg18[%c0_35, %c1664] : memref<1x6400xf32, #tpu.memory_space<vmem>>, vector<1x256xf32>
    %53 = vector.broadcast %52 : vector<1x256xf32> to vector<64x256xf32>
    %54 = arith.mulf %51, %53 : vector<64x256xf32>
    %c0_36 = arith.constant 0 : index
    %c0_37 = arith.constant 0 : index
    %55 = vector.load %arg9[%c0_36, %c0_37] : memref<128x256xi8, #tpu.memory_space<vmem>>, vector<128x256xi8>
    %56 = arith.sitofp %55 : vector<128x256xi8> to vector<128x256xbf16>
    %cst_38 = arith.constant dense<0.000000e+00> : vector<64x256xf32>
    %57 = tpu.matmul %48, %56, %cst_38 {dimension_numbers = #tpu.dot_dimension_numbers<[1], [0], [0], [1], [0, 0, 1, 1], [], []>} : vector<64x128xbf16>, vector<128x256xbf16>, vector<64x256xf32> -> vector<64x256xf32>
    %c0_39 = arith.constant 0 : index
    %c1920 = arith.constant 1920 : index
    %58 = vector.load %arg18[%c0_39, %c1920] : memref<1x6400xf32, #tpu.memory_space<vmem>>, vector<1x256xf32>
    %59 = vector.broadcast %58 : vector<1x256xf32> to vector<64x256xf32>
    %60 = arith.mulf %57, %59 : vector<64x256xf32>
    %61 = arith.addf %54, %60 : vector<64x256xf32>
    %c0_40 = arith.constant 0 : index
    %c1664_41 = arith.constant 1664 : index
    %62 = vector.load %arg19[%c0_40, %c1664_41] : memref<1x5120xf32, #tpu.memory_space<vmem>>, vector<1x256xf32>
    %63 = vector.broadcast %62 : vector<1x256xf32> to vector<64x256xf32>
    %64 = arith.addf %61, %63 : vector<64x256xf32>
    %cst_42 = arith.constant 0.000000e+00 : f32
    %65 = vector.broadcast %cst_42 : f32 to vector<64x256xf32>
    %66 = arith.maximumf %64, %65 : vector<64x256xf32>
    %67 = arith.truncf %66 : vector<64x256xf32> to vector<64x256xbf16>
    %c0_43 = arith.constant 0 : index
    %c0_44 = arith.constant 0 : index
    %68 = vector.load %arg3[%c0_43, %c0_44] : memref<64x512xbf16, #tpu.memory_space<vmem>>, vector<64x512xbf16>
    %c0_45 = arith.constant 0 : index
    %c0_46 = arith.constant 0 : index
    %69 = vector.load %arg10[%c0_45, %c0_46] : memref<512x256xi8, #tpu.memory_space<vmem>>, vector<512x256xi8>
    %70 = arith.sitofp %69 : vector<512x256xi8> to vector<512x256xbf16>
    %cst_47 = arith.constant dense<0.000000e+00> : vector<64x256xf32>
    %71 = tpu.matmul %68, %70, %cst_47 {dimension_numbers = #tpu.dot_dimension_numbers<[1], [0], [0], [1], [0, 0, 1, 1], [], []>} : vector<64x512xbf16>, vector<512x256xbf16>, vector<64x256xf32> -> vector<64x256xf32>
    %c0_48 = arith.constant 0 : index
    %c2176 = arith.constant 2176 : index
    %72 = vector.load %arg18[%c0_48, %c2176] : memref<1x6400xf32, #tpu.memory_space<vmem>>, vector<1x256xf32>
    %73 = vector.broadcast %72 : vector<1x256xf32> to vector<64x256xf32>
    %74 = arith.mulf %71, %73 : vector<64x256xf32>
    %c0_49 = arith.constant 0 : index
    %c1920_50 = arith.constant 1920 : index
    %75 = vector.load %arg19[%c0_49, %c1920_50] : memref<1x5120xf32, #tpu.memory_space<vmem>>, vector<1x256xf32>
    %76 = vector.broadcast %75 : vector<1x256xf32> to vector<64x256xf32>
    %77 = arith.addf %74, %76 : vector<64x256xf32>
    %cst_51 = arith.constant 0.000000e+00 : f32
    %78 = vector.broadcast %cst_51 : f32 to vector<64x256xf32>
    %79 = arith.maximumf %77, %78 : vector<64x256xf32>
    %80 = arith.truncf %79 : vector<64x256xf32> to vector<64x256xbf16>
    %c0_52 = arith.constant 0 : index
    %c0_53 = arith.constant 0 : index
    %81 = vector.load %arg11[%c0_52, %c0_53] : memref<256x1024xi8, #tpu.memory_space<vmem>>, vector<256x1024xi8>
    %82 = arith.sitofp %81 : vector<256x1024xi8> to vector<256x1024xbf16>
    %cst_54 = arith.constant dense<0.000000e+00> : vector<64x1024xf32>
    %83 = tpu.matmul %67, %82, %cst_54 {dimension_numbers = #tpu.dot_dimension_numbers<[1], [0], [0], [1], [0, 0, 1, 1], [], []>} : vector<64x256xbf16>, vector<256x1024xbf16>, vector<64x1024xf32> -> vector<64x1024xf32>
    %c0_55 = arith.constant 0 : index
    %c2432 = arith.constant 2432 : index
    %84 = vector.load %arg18[%c0_55, %c2432] : memref<1x6400xf32, #tpu.memory_space<vmem>>, vector<1x1024xf32>
    %85 = vector.broadcast %84 : vector<1x1024xf32> to vector<64x1024xf32>
    %86 = arith.mulf %83, %85 : vector<64x1024xf32>
    %c0_56 = arith.constant 0 : index
    %c0_57 = arith.constant 0 : index
    %87 = vector.load %arg12[%c0_56, %c0_57] : memref<256x1024xi8, #tpu.memory_space<vmem>>, vector<256x1024xi8>
    %88 = arith.sitofp %87 : vector<256x1024xi8> to vector<256x1024xbf16>
    %cst_58 = arith.constant dense<0.000000e+00> : vector<64x1024xf32>
    %89 = tpu.matmul %80, %88, %cst_58 {dimension_numbers = #tpu.dot_dimension_numbers<[1], [0], [0], [1], [0, 0, 1, 1], [], []>} : vector<64x256xbf16>, vector<256x1024xbf16>, vector<64x1024xf32> -> vector<64x1024xf32>
    %c0_59 = arith.constant 0 : index
    %c3456 = arith.constant 3456 : index
    %90 = vector.load %arg18[%c0_59, %c3456] : memref<1x6400xf32, #tpu.memory_space<vmem>>, vector<1x1024xf32>
    %91 = vector.broadcast %90 : vector<1x1024xf32> to vector<64x1024xf32>
    %92 = arith.mulf %89, %91 : vector<64x1024xf32>
    %93 = vector.extract_strided_slice %86 {offsets = [0, 0], sizes = [64, 512], strides = [1, 1]} : vector<64x1024xf32> to vector<64x512xf32>
    %c0_60 = arith.constant 0 : index
    %c2176_61 = arith.constant 2176 : index
    %94 = vector.load %arg19[%c0_60, %c2176_61] : memref<1x5120xf32, #tpu.memory_space<vmem>>, vector<1x512xf32>
    %95 = vector.broadcast %94 : vector<1x512xf32> to vector<64x512xf32>
    %96 = arith.addf %93, %95 : vector<64x512xf32>
    %97 = arith.truncf %96 : vector<64x512xf32> to vector<64x512xbf16>
    %98 = vector.extract_strided_slice %92 {offsets = [0, 0], sizes = [64, 512], strides = [1, 1]} : vector<64x1024xf32> to vector<64x512xf32>
    %c0_62 = arith.constant 0 : index
    %c2688 = arith.constant 2688 : index
    %99 = vector.load %arg19[%c0_62, %c2688] : memref<1x5120xf32, #tpu.memory_space<vmem>>, vector<1x512xf32>
    %100 = vector.broadcast %99 : vector<1x512xf32> to vector<64x512xf32>
    %101 = arith.addf %98, %100 : vector<64x512xf32>
    %102 = arith.truncf %101 : vector<64x512xf32> to vector<64x512xbf16>
    %c0_63 = arith.constant 0 : index
    %c0_64 = arith.constant 0 : index
    %103 = vector.load %arg13[%c0_63, %c0_64] : memref<512x512xi8, #tpu.memory_space<vmem>>, vector<512x512xi8>
    %104 = arith.sitofp %103 : vector<512x512xi8> to vector<512x512xbf16>
    %cst_65 = arith.constant dense<0.000000e+00> : vector<64x512xf32>
    %105 = tpu.matmul %97, %104, %cst_65 {dimension_numbers = #tpu.dot_dimension_numbers<[1], [0], [0], [1], [0, 0, 1, 1], [], []>} : vector<64x512xbf16>, vector<512x512xbf16>, vector<64x512xf32> -> vector<64x512xf32>
    %c0_66 = arith.constant 0 : index
    %c4480 = arith.constant 4480 : index
    %106 = vector.load %arg18[%c0_66, %c4480] : memref<1x6400xf32, #tpu.memory_space<vmem>>, vector<1x512xf32>
    %107 = vector.broadcast %106 : vector<1x512xf32> to vector<64x512xf32>
    %108 = arith.mulf %105, %107 : vector<64x512xf32>
    %c0_67 = arith.constant 0 : index
    %c3200 = arith.constant 3200 : index
    %109 = vector.load %arg19[%c0_67, %c3200] : memref<1x5120xf32, #tpu.memory_space<vmem>>, vector<1x512xf32>
    %110 = vector.broadcast %109 : vector<1x512xf32> to vector<64x512xf32>
    %111 = arith.addf %108, %110 : vector<64x512xf32>
    %c0_68 = arith.constant 0 : index
    %c0_69 = arith.constant 0 : index
    %112 = vector.load %arg14[%c0_68, %c0_69] : memref<512x512xi8, #tpu.memory_space<vmem>>, vector<512x512xi8>
    %113 = arith.sitofp %112 : vector<512x512xi8> to vector<512x512xbf16>
    %cst_70 = arith.constant dense<0.000000e+00> : vector<64x512xf32>
    %114 = tpu.matmul %102, %113, %cst_70 {dimension_numbers = #tpu.dot_dimension_numbers<[1], [0], [0], [1], [0, 0, 1, 1], [], []>} : vector<64x512xbf16>, vector<512x512xbf16>, vector<64x512xf32> -> vector<64x512xf32>
    %c0_71 = arith.constant 0 : index
    %c4992 = arith.constant 4992 : index
    %115 = vector.load %arg18[%c0_71, %c4992] : memref<1x6400xf32, #tpu.memory_space<vmem>>, vector<1x512xf32>
    %116 = vector.broadcast %115 : vector<1x512xf32> to vector<64x512xf32>
    %117 = arith.mulf %114, %116 : vector<64x512xf32>
    %c0_72 = arith.constant 0 : index
    %c3712 = arith.constant 3712 : index
    %118 = vector.load %arg19[%c0_72, %c3712] : memref<1x5120xf32, #tpu.memory_space<vmem>>, vector<1x512xf32>
    %119 = vector.broadcast %118 : vector<1x512xf32> to vector<64x512xf32>
    %120 = arith.addf %117, %119 : vector<64x512xf32>
    %121 = arith.addf %22, %111 : vector<64x512xf32>
    %122 = arith.addf %121, %120 : vector<64x512xf32>
    %123 = arith.truncf %122 : vector<64x512xf32> to vector<64x512xbf16>
    %c0_73 = arith.constant 0 : index
    %c0_74 = arith.constant 0 : index
    %124 = vector.load %arg15[%c0_73, %c0_74] : memref<512x512xi8, #tpu.memory_space<vmem>>, vector<512x512xi8>
    %125 = arith.sitofp %124 : vector<512x512xi8> to vector<512x512xbf16>
    %cst_75 = arith.constant dense<0.000000e+00> : vector<64x512xf32>
    %126 = tpu.matmul %123, %125, %cst_75 {dimension_numbers = #tpu.dot_dimension_numbers<[1], [0], [0], [1], [0, 0, 1, 1], [], []>} : vector<64x512xbf16>, vector<512x512xbf16>, vector<64x512xf32> -> vector<64x512xf32>
    %c0_76 = arith.constant 0 : index
    %c5504 = arith.constant 5504 : index
    %127 = vector.load %arg18[%c0_76, %c5504] : memref<1x6400xf32, #tpu.memory_space<vmem>>, vector<1x512xf32>
    %128 = vector.broadcast %127 : vector<1x512xf32> to vector<64x512xf32>
    %129 = arith.mulf %126, %128 : vector<64x512xf32>
    %130 = vector.extract_strided_slice %86 {offsets = [0, 512], sizes = [64, 512], strides = [1, 1]} : vector<64x1024xf32> to vector<64x512xf32>
    %131 = arith.addf %129, %130 : vector<64x512xf32>
    %132 = vector.extract_strided_slice %92 {offsets = [0, 512], sizes = [64, 512], strides = [1, 1]} : vector<64x1024xf32> to vector<64x512xf32>
    %133 = arith.addf %131, %132 : vector<64x512xf32>
    %c0_77 = arith.constant 0 : index
    %c4224 = arith.constant 4224 : index
    %134 = vector.load %arg19[%c0_77, %c4224] : memref<1x5120xf32, #tpu.memory_space<vmem>>, vector<1x512xf32>
    %135 = vector.broadcast %134 : vector<1x512xf32> to vector<64x512xf32>
    %136 = arith.addf %133, %135 : vector<64x512xf32>
    %cst_78 = arith.constant 0.000000e+00 : f32
    %137 = vector.broadcast %cst_78 : f32 to vector<64x512xf32>
    %138 = arith.maximumf %136, %137 : vector<64x512xf32>
    %139 = arith.truncf %138 : vector<64x512xf32> to vector<64x512xbf16>
    %c0_79 = arith.constant 0 : index
    %c0_80 = arith.constant 0 : index
    %140 = vector.load %arg16[%c0_79, %c0_80] : memref<512x256xi8, #tpu.memory_space<vmem>>, vector<512x256xi8>
    %141 = arith.sitofp %140 : vector<512x256xi8> to vector<512x256xbf16>
    %cst_81 = arith.constant dense<0.000000e+00> : vector<64x256xf32>
    %142 = tpu.matmul %139, %141, %cst_81 {dimension_numbers = #tpu.dot_dimension_numbers<[1], [0], [0], [1], [0, 0, 1, 1], [], []>} : vector<64x512xbf16>, vector<512x256xbf16>, vector<64x256xf32> -> vector<64x256xf32>
    %c0_82 = arith.constant 0 : index
    %c6016 = arith.constant 6016 : index
    %143 = vector.load %arg18[%c0_82, %c6016] : memref<1x6400xf32, #tpu.memory_space<vmem>>, vector<1x256xf32>
    %144 = vector.broadcast %143 : vector<1x256xf32> to vector<64x256xf32>
    %145 = arith.mulf %142, %144 : vector<64x256xf32>
    %c0_83 = arith.constant 0 : index
    %c4736 = arith.constant 4736 : index
    %146 = vector.load %arg19[%c0_83, %c4736] : memref<1x5120xf32, #tpu.memory_space<vmem>>, vector<1x256xf32>
    %147 = vector.broadcast %146 : vector<1x256xf32> to vector<64x256xf32>
    %148 = arith.addf %145, %147 : vector<64x256xf32>
    %cst_84 = arith.constant 0.000000e+00 : f32
    %149 = vector.broadcast %cst_84 : f32 to vector<64x256xf32>
    %150 = arith.maximumf %148, %149 : vector<64x256xf32>
    %151 = arith.truncf %150 : vector<64x256xf32> to vector<64x256xbf16>
    %c0_85 = arith.constant 0 : index
    %c0_86 = arith.constant 0 : index
    %152 = vector.load %arg17[%c0_85, %c0_86] : memref<256x128xi8, #tpu.memory_space<vmem>>, vector<256x128xi8>
    %153 = arith.sitofp %152 : vector<256x128xi8> to vector<256x128xbf16>
    %cst_87 = arith.constant dense<0.000000e+00> : vector<64x128xf32>
    %154 = tpu.matmul %151, %153, %cst_87 {dimension_numbers = #tpu.dot_dimension_numbers<[1], [0], [0], [1], [0, 0, 1, 1], [], []>} : vector<64x256xbf16>, vector<256x128xbf16>, vector<64x128xf32> -> vector<64x128xf32>
    %c0_88 = arith.constant 0 : index
    %c6272 = arith.constant 6272 : index
    %155 = vector.load %arg18[%c0_88, %c6272] : memref<1x6400xf32, #tpu.memory_space<vmem>>, vector<1x128xf32>
    %156 = vector.broadcast %155 : vector<1x128xf32> to vector<64x128xf32>
    %157 = arith.mulf %154, %156 : vector<64x128xf32>
    %c0_89 = arith.constant 0 : index
    %c4992_90 = arith.constant 4992 : index
    %158 = vector.load %arg19[%c0_89, %c4992_90] : memref<1x5120xf32, #tpu.memory_space<vmem>>, vector<1x128xf32>
    %159 = vector.broadcast %158 : vector<1x128xf32> to vector<64x128xf32>
    %160 = arith.addf %157, %159 : vector<64x128xf32>
    %c0_91 = arith.constant 0 : index
    %c0_92 = arith.constant 0 : index
    %161 = vector.load %arg20[%c0_91, %c0_92] : memref<64x128xf32, #tpu.memory_space<vmem>>, vector<64x128xf32>
    tpu.vector_store %arg20[%c0_91, %c0_92], %160 {strides = array<i32>} : memref<64x128xf32, #tpu.memory_space<vmem>>, vector<64x128xf32>,
    return
  }
}

</mosaic_0001>

<bundles_post_ra>
// kernel: multimodal_emotion_forward.1
= control target key start
LH: loop header
LB: loop body
LE: loop exit
PB: predicated region body
PF: predicated region fallthrough
CT: control target
= control target key end

     0   :  { %vm2849_vm0 = vcmask 523264   ;;  %s12889_s4 = inlined_call_operand.vmem [shape: s8[768,768], index: 4, kind: input, shape index: {}]   ;;  %s12890_s0 = inlined_call_operand.vmem [shape: bf16[64,768], index: 0, kind: input, shape index: {}]   ;;  %s12891_s5 = inlined_call_operand.vmem [shape: s8[768,512], index: 5, kind: input, shape index: {}]   ;;  %s12892_s18 = inlined_call_operand.vmem [shape: f32[1,6400], index: 18, kind: input, shape index: {}]   ;;  %s12893_s19 = inlined_call_operand.vmem [shape: f32[1,5120], index: 19, kind: input, shape index: {}]   ;;  %s12894_s1 = inlined_call_operand.vmem [shape: bf16[64,512], index: 1, kind: input, shape index: {}]   ;;  %s12895_s6 = inlined_call_operand.vmem [shape: s8[512,256], index: 6, kind: input, shape index: {}]   ;;  %s12896_s2 = inlined_call_operand.vmem [shape: bf16[64,64], index: 2, kind: input, shape index: {}]   ;;  %s12897_s7 = inlined_call_operand.vmem [shape: s8[64,128], index: 7, kind: input, shape index: {}]   ;;  %s12898_s8 = inlined_call_operand.vmem [shape: s8[256,256], index: 8, kind: input, shape index: {}]   ;;  %s12899_s9 = inlined_call_operand.vmem [shape: s8[128,256], index: 9, kind: input, shape index: {}]   ;;  %s12900_s10 = inlined_call_operand.vmem [shape: s8[512,256], index: 10, kind: input, shape index: {}]   ;;  %s12901_s3 = inlined_call_operand.vmem [shape: bf16[64,512], index: 3, kind: input, shape index: {}]   ;;  %s12902_s11 = inlined_call_operand.vmem [shape: s8[256,1024], index: 11, kind: input, shape index: {}]   ;;  %s12903_s12 = inlined_call_operand.vmem [shape: s8[256,1024], index: 12, kind: input, shape index: {}]   ;;  %s12904_s13 = inlined_call_operand.vmem [shape: s8[512,512], index: 13, kind: input, shape index: {}]   ;;  %s12905_s14 = inlined_call_operand.vmem [shape: s8[512,512], index: 14, kind: input, shape index: {}]   ;;  %s12906_s15 = inlined_call_operand.vmem [shape: s8[512,512], index: 15, kind: input, shape index: {}]   ;;  %s12907_s16 = inlined_call_operand.vmem [shape: s8[512,256], index: 16, kind: input, shape index: {}]   ;;  %s12908_s17 = inlined_call_operand.vmem [shape: s8[256,128], index: 17, kind: input, shape index: {}]   ;;  %s12909_s20 = inlined_call_operand.vmem [shape: f32[64,128], index: 20, kind: output, shape index: {}]  }
   0x1   :  { %12950 = sst [smem:[#allocation82_spill]] %s12889_s4 }
   0x2   :  { %12951 = sst [smem:[#allocation83_spill]] %s12890_s0  ;;  %s12955_s23 = sld [smem:[#allocation82_spill]] }
   0x3   :  { %12952 = sst [smem:[#allocation84_spill]] %s12891_s5  ;;  %s12956_s28 = sld [smem:[#allocation83_spill]] }
   0x4   :  { %12953 = sst [smem:[#allocation85_spill]] %s12892_s18  ;;  %s12957_s30 = sld [smem:[#allocation84_spill]] }
   0x5   :  { %12954 = sst [smem:[#allocation86_spill]] %s12893_s19  ;;  %s12960_s0 = sld [smem:[#allocation85_spill]] }
   0x6   :  { %s12962_s26 = sld [smem:[#allocation86_spill]] }
   0x8   :  { %v91_v0 = vld [vmem:[%s12955_s23 + $0x8] sm:$0xff]  ;;  %v90_v2 = vld [vmem:[%s12955_s23] sm:$0xff]  ;;  %v97_v10 = vld [vmem:[%s12955_s23 + $0x38] sm:$0xff] }
   0x9   :  { %v139_v1 = vld [vmem:[%s12955_s23 + $0x188] sm:$0xff]  ;;  %v235_v3 = vunpack.c.l.s8.bf16 %v91_v0  ;;  %v241_v4 = vunpack.c.h.s8.bf16 %v91_v0  ;;  %v138_v7 = vld [vmem:[%s12955_s23 + $0x180] sm:$0xff]  ;;  %v234_v8 = vunpack.c.l.s8.bf16 %v90_v2  ;;  %v145_v11 = vld [vmem:[%s12955_s23 + $0x1b8] sm:$0xff]  ;;  %v240_v12 = vunpack.c.h.s8.bf16 %v90_v2 }
   0xa   :  { %v331_v5 = vunpack.c.l.s8.bf16 %v139_v1  ;;  %v337_v6 = vunpack.c.h.s8.bf16 %v139_v1  ;;  %v330_v9 = vunpack.c.l.s8.bf16 %v138_v7  ;;  %v336_v13 = vunpack.c.h.s8.bf16 %v138_v7  ;;  %v96_v16 = vld [vmem:[%s12955_s23 + $0x30] sm:$0xff]  ;;  %v103_v22 = vld [vmem:[%s12955_s23 + $0x68] sm:$0xff]  ;;  %v8268_v24 = vld [vmem:[%s12956_s28 + $0x4] ss:$24 sps:$4 sm:$0xff]  }
   0xb   :  { %642 = vmatprep.subr.bf16.mxu1 %v235_v3  ;;  %v247_v14 = vunpack.c.l.s8.bf16 %v97_v10  ;;  %v343_v15 = vunpack.c.l.s8.bf16 %v145_v11  ;;  %v144_v17 = vld [vmem:[%s12955_s23 + $0x1b0] sm:$0xff]  ;;  %v246_v18 = vunpack.c.l.s8.bf16 %v96_v16  ;;  %v253_v20 = vunpack.c.h.s8.bf16 %v97_v10  ;;  %v151_v23 = vld [vmem:[%s12955_s23 + $0x1e8] sm:$0xff]  ;;  %v102_v30 = vld [vmem:[%s12955_s23 + $0x60] sm:$0xff]  ;;  %674 = vmatprep.mubr.bf16.mxu1 %v8268_v24 }
   0xc   :  { %715 = vmatprep.subr.bf16.mxu0 %v331_v5  ;;  %643 = vmatpush1.bf16.msra.mxu1 %v234_v8  ;;  %v342_v19 = vunpack.c.l.s8.bf16 %v144_v17  ;;  %v349_v21 = vunpack.c.h.s8.bf16 %v145_v11  ;;  %v252_v25 = vunpack.c.h.s8.bf16 %v96_v16  ;;  %v348_v26 = vunpack.c.h.s8.bf16 %v144_v17  ;;  %v8273_v27 = vld [vmem:[%s12956_s28 + $0xc] ss:$24 sps:$4 sm:$0xff]   ;;  %v109_v36 = vld [vmem:[%s12955_s23 + $0x98] sm:$0xff]  ;;  %v108_v40 = vld [vmem:[%s12955_s23 + $0x90] sm:$0xff] }
   0xd   :  { %716 = vmatpush1.bf16.msra.mxu0 %v330_v9  ;;  %644 = vmatprep.subr.bf16.mxu1 %v241_v4  ;;  %v259_v28 = vunpack.c.l.s8.bf16 %v103_v22  ;;  %v355_v29 = vunpack.c.l.s8.bf16 %v151_v23  ;;  %v150_v31 = vld [vmem:[%s12955_s23 + $0x1e0] sm:$0xff]  ;;  %v258_v32 = vunpack.c.l.s8.bf16 %v102_v30  ;;  %v265_v34 = vunpack.c.h.s8.bf16 %v103_v22  ;;  %v157_v37 = vld [vmem:[%s12955_s23 + $0x218] sm:$0xff]  ;;  %v156_v43 = vld [vmem:[%s12955_s23 + $0x210] sm:$0xff] }
   0xe   :  { %717 = vmatprep.subr.bf16.mxu0 %v337_v6  ;;  %747 = vmatprep.mubr.bf16.mxu0 %v8273_v27  ;;  %v354_v33 = vunpack.c.l.s8.bf16 %v150_v31  ;;  %v361_v35 = vunpack.c.h.s8.bf16 %v151_v23  ;;  %v264_v38 = vunpack.c.h.s8.bf16 %v102_v30  ;;  %v360_v39 = vunpack.c.h.s8.bf16 %v150_v31  ;;  %v115_v48 = vld [vmem:[%s12955_s23 + $0xc8] sm:$0xff]  ;;  %v114_v52 = vld [vmem:[%s12955_s23 + $0xc0] sm:$0xff]  ;;  %v121_v60 = vld [vmem:[%s12955_s23 + $0xf8] sm:$0xff] }
   0xf   :  { %v271_v41 = vunpack.c.l.s8.bf16 %v109_v36  ;;  %v367_v42 = vunpack.c.l.s8.bf16 %v157_v37  ;;  %v270_v44 = vunpack.c.l.s8.bf16 %v108_v40  ;;  %v366_v45 = vunpack.c.l.s8.bf16 %v156_v43  ;;  %v163_v49 = vld [vmem:[%s12955_s23 + $0x248] sm:$0xff]  ;;  %v162_v55 = vld [vmem:[%s12955_s23 + $0x240] sm:$0xff]  ;;  %v169_v61 = vld [vmem:[%s12955_s23 + $0x278] sm:$0xff] }
  0x10   :  { %645 = vmatpush1.bf16.msra.mxu1 %v240_v12  ;;  %v277_v46 = vunpack.c.h.s8.bf16 %v109_v36  ;;  %v373_v47 = vunpack.c.h.s8.bf16 %v157_v37  ;;  %v276_v50 = vunpack.c.h.s8.bf16 %v108_v40  ;;  %v372_v51 = vunpack.c.h.s8.bf16 %v156_v43  ;;  %v120_v0 = vld [vmem:[%s12955_s23 + $0xf0] sm:$0xff]  ;;  %v127_v8 = vld [vmem:[%s12955_s23 + $0x128] sm:$0xff]  ;;  %v186_v40 = vld [vmem:[%s12955_s23 + $0x300] sm:$0xff] }
  0x11   :  { %718 = vmatpush1.bf16.msra.mxu0 %v336_v13  ;;  %646 = vmatprep.subr.bf16.mxu1 %v247_v14  ;;  %v283_v53 = vunpack.c.l.s8.bf16 %v115_v48  ;;  %v379_v54 = vunpack.c.l.s8.bf16 %v163_v49  ;;  %v282_v56 = vunpack.c.l.s8.bf16 %v114_v52  ;;  %v378_v57 = vunpack.c.l.s8.bf16 %v162_v55  ;;  %v168_v3 = vld [vmem:[%s12955_s23 + $0x270] sm:$0xff]  ;;  %v175_v9 = vld [vmem:[%s12955_s23 + $0x2a8] sm:$0xff]  ;;  %v126_v14 = vld [vmem:[%s12955_s23 + $0x120] sm:$0xff] }
  0x12   :  { %719 = vmatprep.subr.bf16.mxu0 %v343_v15  ;;  %v289_v58 = vunpack.c.h.s8.bf16 %v115_v48  ;;  %v385_v59 = vunpack.c.h.s8.bf16 %v163_v49  ;;  %v288_v62 = vunpack.c.h.s8.bf16 %v114_v52  ;;  %v384_v63 = vunpack.c.h.s8.bf16 %v162_v55  ;;  %v174_v15 = vld [vmem:[%s12955_s23 + $0x2a0] sm:$0xff]  ;;  %v193_v48 = vld [vmem:[%s12955_s23 + $0x338] sm:$0xff]  ;;  %v99_v49 = vld [vmem:[%s12955_s23 + $0x48] sm:$0xff] }
  0x13   :  { %v295_v1 = vunpack.c.l.s8.bf16 %v121_v60  ;;  %v391_v2 = vunpack.c.l.s8.bf16 %v169_v61  ;;  %v294_v4 = vunpack.c.l.s8.bf16 %v120_v0  ;;  %v390_v5 = vunpack.c.l.s8.bf16 %v168_v3  ;;  %v8363_v43 = vld [vmem:[%s12956_s28 + $0x8] ss:$24 sps:$4 sm:$0xff]  }
  0x14   :  { %647 = vmatpush1.bf16.msra.mxu1 %v246_v18  ;;  %v301_v6 = vunpack.c.h.s8.bf16 %v121_v60  ;;  %v397_v7 = vunpack.c.h.s8.bf16 %v169_v61  ;;  %v300_v10 = vunpack.c.h.s8.bf16 %v120_v0  ;;  %v396_v11 = vunpack.c.h.s8.bf16 %v168_v3  ;;  %v199_v0 = vld [vmem:[%s12955_s23 + $0x368] sm:$0xff] }
  0x15   :  { %720 = vmatpush1.bf16.msra.mxu0 %v342_v19  ;;  %648 = vmatprep.subr.bf16.mxu1 %v253_v20  ;;  %v307_v12 = vunpack.c.l.s8.bf16 %v127_v8  ;;  %v403_v13 = vunpack.c.l.s8.bf16 %v175_v9  ;;  %v306_v16 = vunpack.c.l.s8.bf16 %v126_v14  ;;  %v402_v17 = vunpack.c.l.s8.bf16 %v174_v15  ;;  %v133_v20 = vld [vmem:[%s12955_s23 + $0x158] sm:$0xff]  ;;  %v8415_v3 = vld [vmem:[%s12956_s28 + $0x6c] ss:$24 sps:$4 sm:$0xff]  }
  0x16   :  { %721 = vmatprep.subr.bf16.mxu0 %v349_v21  ;;  %v313_v18 = vunpack.c.h.s8.bf16 %v127_v8  ;;  %v409_v19 = vunpack.c.h.s8.bf16 %v175_v9  ;;  %v181_v21 = vld [vmem:[%s12955_s23 + $0x2d8] sm:$0xff]  ;;  %v312_v22 = vunpack.c.h.s8.bf16 %v126_v14  ;;  %v408_v23 = vunpack.c.h.s8.bf16 %v174_v15  ;;  %v198_v8 = vld [vmem:[%s12955_s23 + $0x360] sm:$0xff]  ;;  %v104_v9 = vld [vmem:[%s12955_s23 + $0x70] sm:$0xff] }
  0x17   :  { %v432_v52 = vunpack.c.h.s8.bf16 %v186_v40  ;;  %v249_v55 = vunpack.c.l.s8.bf16 %v99_v49  ;;  %v457_v14 = vunpack.c.h.s8.bf16 %v199_v0 }
  0x18   :  { %649 = vmatpush1.bf16.msra.mxu1 %v252_v25  ;;  %v319_v25 = vunpack.c.l.s8.bf16 %v133_v20 }
  0x19   :  { %722 = vmatpush1.bf16.msra.mxu0 %v348_v26  ;;  %650 = vmatprep.subr.bf16.mxu1 %v259_v28  ;;  %v415_v26 = vunpack.c.l.s8.bf16 %v181_v21  ;;  %v132_v28 = vld [vmem:[%s12955_s23 + $0x150] sm:$0xff] }
  0x1a   :  { %723 = vmatprep.subr.bf16.mxu0 %v355_v29  ;;  %v180_v29 = vld [vmem:[%s12955_s23 + $0x2d0] sm:$0xff]  ;;  %v318_v30 = vunpack.c.l.s8.bf16 %v132_v28  ;;  %v324_v36 = vunpack.c.h.s8.bf16 %v132_v28 }
  0x1b   :  { %v414_v31 = vunpack.c.l.s8.bf16 %v180_v29  ;;  %v420_v37 = vunpack.c.h.s8.bf16 %v180_v29  ;;  %v8466_v28 = vld [vmem:[%s12956_s28 + $0x90] ss:$24 sps:$4 sm:$0xff]  }
  0x1c   :  { %651 = vmatpush1.bf16.msra.mxu1 %v258_v32  ;;  %v325_v32 = vunpack.c.h.s8.bf16 %v133_v20  ;;  %v456_v20 = vunpack.c.h.s8.bf16 %v198_v8  ;;  %v8471_v29 = vld [vmem:[%s12956_s28 + $0x98] ss:$24 sps:$4 sm:$0xff]  }
  0x1d   :  { %724 = vmatpush1.bf16.msra.mxu0 %v354_v33  ;;  %652 = vmatprep.subr.bf16.mxu1 %v265_v34  ;;  %v421_v33 = vunpack.c.h.s8.bf16 %v181_v21  ;;  %v187_v34 = vld [vmem:[%s12955_s23 + $0x308] sm:$0xff]  ;;  %v266_v21 = vunpack.c.h.s8.bf16 %v104_v9 }
  0x1e   :  { %725 = vmatprep.subr.bf16.mxu0 %v361_v35  ;;  %v93_v35 = vld [vmem:[%s12955_s23 + $0x18] sm:$0xff] }
  0x20   :  { %653 = vmatpush1.bf16.msra.mxu1 %v264_v38  ;;  %v427_v38 = vunpack.c.l.s8.bf16 %v187_v34 }
  0x21   :  { %726 = vmatpush1.bf16.msra.mxu0 %v360_v39  ;;  %654 = vmatprep.subr.bf16.mxu1 %v271_v41  ;;  %v237_v39 = vunpack.c.l.s8.bf16 %v93_v35  ;;  %v92_v41 = vld [vmem:[%s12955_s23 + $0x10] sm:$0xff] }
  0x22   :  { %727 = vmatprep.subr.bf16.mxu0 %v367_v42  ;;  %v8358_v42 = vld [vmem:[%s12956_s28] ss:$24 sps:$4 sm:$0xff]  }
  0x24   :  { %655 = vmatpush1.bf16.msra.mxu1 %v270_v44  ;;  %v426_v44 = vunpack.c.l.s8.bf16 %v186_v40 }
  0x25   :  { %728 = vmatpush1.bf16.msra.mxu0 %v366_v45  ;;  %656 = vmatprep.subr.bf16.mxu1 %v277_v46  ;;  %v236_v45 = vunpack.c.l.s8.bf16 %v92_v41  ;;  %v433_v46 = vunpack.c.h.s8.bf16 %v187_v34  ;;  %v211_v34 = vld [vmem:[%s12955_s23 + $0x3c8] sm:$0xff] }
  0x26   :  { %729 = vmatprep.subr.bf16.mxu0 %v373_v47  ;;  %v243_v47 = vunpack.c.h.s8.bf16 %v93_v35  ;;  %v117_v35 = vld [vmem:[%s12955_s23 + $0xd8] sm:$0xff] }
  0x27   :  { %v285_v40 = vunpack.c.l.s8.bf16 %v117_v35 }
  0x28   :  { %657 = vmatpush1.bf16.msra.mxu1 %v276_v50  ;;  %v8374_v50 = vld [vmem:[%s12956_s28 + $0x34] ss:$24 sps:$4 sm:$0xff]  }
  0x29   :  { %730 = vmatpush1.bf16.msra.mxu0 %v372_v51  ;;  %658 = vmatprep.subr.bf16.mxu1 %v283_v53  ;;  %v8379_v51 = vld [vmem:[%s12956_s28 + $0x3c] ss:$24 sps:$4 sm:$0xff]   ;;  %v242_v53 = vunpack.c.h.s8.bf16 %v92_v41  ;;  %v210_v41 = vld [vmem:[%s12955_s23 + $0x3c0] sm:$0xff] }
  0x2a   :  { %731 = vmatprep.subr.bf16.mxu0 %v379_v54  ;;  %v439_v54 = vunpack.c.l.s8.bf16 %v193_v48 }
  0x2c   :  { %659 = vmatpush1.bf16.msra.mxu1 %v282_v56  ;;  %v192_v56 = vld [vmem:[%s12955_s23 + $0x330] sm:$0xff] }
  0x2d   :  { %732 = vmatpush1.bf16.msra.mxu0 %v378_v57  ;;  %660 = vmatprep.subr.bf16.mxu1 %v289_v58  ;;  %v98_v57 = vld [vmem:[%s12955_s23 + $0x40] sm:$0xff]  ;;  %v8394_v58 = vld [vmem:[%s12956_s28 + $0x30] ss:$24 sps:$4 sm:$0xff]   ;;  %v438_v60 = vunpack.c.l.s8.bf16 %v192_v56 }
  0x2e   :  { %733 = vmatprep.subr.bf16.mxu0 %v385_v59  ;;  %v8399_v59 = vld [vmem:[%s12956_s28 + $0x38] ss:$24 sps:$4 sm:$0xff]   ;;  %v248_v61 = vunpack.c.l.s8.bf16 %v98_v57 }
  0x30   :  { %661 = vmatpush1.bf16.msra.mxu1 %v288_v62  ;;  %v445_v62 = vunpack.c.h.s8.bf16 %v193_v48  ;;  %v291_v48 = vunpack.c.h.s8.bf16 %v117_v35  ;;  %v141_v35 = vld [vmem:[%s12955_s23 + $0x198] sm:$0xff] }
  0x31   :  { %734 = vmatpush1.bf16.msra.mxu0 %v384_v63  ;;  %662 = vmatprep.subr.bf16.mxu1 %v295_v1  ;;  %v255_v63 = vunpack.c.h.s8.bf16 %v99_v49  ;;  %v105_v1 = vld [vmem:[%s12955_s23 + $0x78] sm:$0xff] }
  0x32   :  { %735 = vmatprep.subr.bf16.mxu0 %v391_v2  ;;  %v8410_v2 = vld [vmem:[%s12956_s28 + $0x64] ss:$24 sps:$4 sm:$0xff]   ;;  %v267_v15 = vunpack.c.h.s8.bf16 %v105_v1 }
  0x33   :  { %v217_v49 = vld [vmem:[%s12955_s23 + $0x3f8] sm:$0xff] }
  0x34   :  { %663 = vmatpush1.bf16.msra.mxu1 %v294_v4  ;;  %v444_v4 = vunpack.c.h.s8.bf16 %v192_v56 }
  0x35   :  { %736 = vmatpush1.bf16.msra.mxu0 %v390_v5  ;;  %664 = vmatprep.subr.bf16.mxu1 %v301_v6  ;;  %v254_v5 = vunpack.c.h.s8.bf16 %v98_v57  ;;  %v451_v6 = vunpack.c.l.s8.bf16 %v199_v0  ;;  %v216_v57 = vld [vmem:[%s12955_s23 + $0x3f0] sm:$0xff] }
  0x36   :  { %737 = vmatprep.subr.bf16.mxu0 %v397_v7  ;;  %v261_v7 = vunpack.c.l.s8.bf16 %v105_v1  ;;  %v223_v1 = vld [vmem:[%s12955_s23 + $0x428] sm:$0xff] }
  0x38   :  { %665 = vmatpush1.bf16.msra.mxu1 %v300_v10  ;;  %v8430_v10 = vld [vmem:[%s12956_s28 + $0x60] ss:$24 sps:$4 sm:$0xff]  }
  0x39   :  { %738 = vmatpush1.bf16.msra.mxu0 %v396_v11  ;;  %666 = vmatprep.subr.bf16.mxu1 %v307_v12  ;;  %v8435_v11 = vld [vmem:[%s12956_s28 + $0x68] ss:$24 sps:$4 sm:$0xff]   ;;  %v450_v12 = vunpack.c.l.s8.bf16 %v198_v8 }
  0x3a   :  { %739 = vmatprep.subr.bf16.mxu0 %v403_v13  ;;  %v260_v13 = vunpack.c.l.s8.bf16 %v104_v9  ;;  %v222_v9 = vld [vmem:[%s12955_s23 + $0x420] sm:$0xff] }
  0x3c   :  { %667 = vmatpush1.bf16.msra.mxu1 %v306_v16  ;;  %v205_v16 = vld [vmem:[%s12955_s23 + $0x398] sm:$0xff] }
  0x3d   :  { %740 = vmatpush1.bf16.msra.mxu0 %v402_v17  ;;  %668 = vmatprep.subr.bf16.mxu1 %v313_v18  ;;  %v111_v17 = vld [vmem:[%s12955_s23 + $0xa8] sm:$0xff] }
  0x3e   :  { %741 = vmatprep.subr.bf16.mxu0 %v409_v19  ;;  %v8446_v18 = vld [vmem:[%s12956_s28 + $0x94] ss:$24 sps:$4 sm:$0xff]  }
  0x3f   :  { %v8451_v19 = vld [vmem:[%s12956_s28 + $0x9c] ss:$24 sps:$4 sm:$0xff]  }
  0x40   :  { %669 = vmatpush1.bf16.msra.mxu1 %v312_v22  ;;  %v463_v22 = vunpack.c.l.s8.bf16 %v205_v16 }
  0x41   :  { %742 = vmatpush1.bf16.msra.mxu0 %v408_v23  ;;  %670 = vmatprep.subr.bf16.mxu1 %v319_v25  ;;  %v273_v23 = vunpack.c.l.s8.bf16 %v111_v17  ;;  %v204_v25 = vld [vmem:[%s12955_s23 + $0x390] sm:$0xff] }
  0x42   :  { %743 = vmatprep.subr.bf16.mxu0 %v415_v26  ;;  %v110_v26 = vld [vmem:[%s12955_s23 + $0xa0] sm:$0xff] }
  0x44   :  { %671 = vmatpush1.bf16.msra.mxu1 %v318_v30  ;;  %v462_v30 = vunpack.c.l.s8.bf16 %v204_v25 }
  0x45   :  { %744 = vmatpush1.bf16.msra.mxu0 %v414_v31  ;;  %672 = vmatprep.subr.bf16.mxu1 %v325_v32  ;;  %v272_v31 = vunpack.c.l.s8.bf16 %v110_v26  ;;  %v469_v32 = vunpack.c.h.s8.bf16 %v205_v16 }
  0x46   :  { %745 = vmatprep.subr.bf16.mxu0 %v421_v33  ;;  %v279_v33 = vunpack.c.h.s8.bf16 %v111_v17  ;;  %v229_v17 = vld [vmem:[%s12955_s23 + $0x458] sm:$0xff] }
  0x48   :  { %673 = vmatpush1.bf16.msra.mxu1 %v324_v36  ;;  %v8482_v36 = vld [vmem:[%s12956_s28 + $0x14] ss:$24 sps:$4 sm:$0xff]  }
  0x49   :  { %746 = vmatpush1.bf16.msra.mxu0 %v420_v37  ;;  %861 = vmatprep.subr.bf16.mxu1 %v237_v39  ;;  %v468_v37 = vunpack.c.h.s8.bf16 %v204_v25  ;;  %v475_v39 = vunpack.c.l.s8.bf16 %v211_v34 }
  0x4a   :  { %788 = vmatprep.subr.bf16.mxu0 %v427_v38  ;;  %v278_v38 = vunpack.c.h.s8.bf16 %v110_v26  ;;  %v228_v26 = vld [vmem:[%s12955_s23 + $0x450] sm:$0xff] }
  0x4b   :  { %675 = vmatmul.mubr.bf16.vlgmr.msra.gmra.mrb[0].mxu1 %v8358_v42 }
  0x4c   :  { %748 = vmatmul.mubr.bf16.vlgmr.msra.gmra.mrb[0].mxu0 %v8363_v43  ;;  %862 = vmatpush1.bf16.msra.mxu1 %v236_v45  ;;  %v474_v45 = vunpack.c.l.s8.bf16 %v210_v41 }
  0x4d   :  { %789 = vmatpush1.bf16.msra.mxu0 %v426_v44  ;;  %863 = vmatprep.subr.bf16.mxu1 %v243_v47  ;;  %v116_v44 = vld [vmem:[%s12955_s23 + $0xd0] sm:$0xff]  ;;  %v481_v47 = vunpack.c.h.s8.bf16 %v211_v34 }
  0x4e   :  { %790 = vmatprep.subr.bf16.mxu0 %v433_v46  ;;  %684 = vmatprep.mubr.bf16.mxu1 %v8374_v50  ;;  %v284_v46 = vunpack.c.l.s8.bf16 %v116_v44 }
  0x4f   :  { %757 = vmatprep.mubr.bf16.mxu0 %v8379_v51 }
  0x50   :  { %864 = vmatpush1.bf16.msra.mxu1 %v242_v53  ;;  %v480_v53 = vunpack.c.h.s8.bf16 %v210_v41 }
  0x51   :  { %791 = vmatpush1.bf16.msra.mxu0 %v432_v52  ;;  %865 = vmatprep.subr.bf16.mxu1 %v249_v55  ;;  %v123_v52 = vld [vmem:[%s12955_s23 + $0x108] sm:$0xff]  ;;  %v487_v55 = vunpack.c.l.s8.bf16 %v217_v49 }
  0x52   :  { %792 = vmatprep.subr.bf16.mxu0 %v439_v54  ;;  %v290_v54 = vunpack.c.h.s8.bf16 %v116_v44  ;;  %v297_v56 = vunpack.c.l.s8.bf16 %v123_v52  ;;  %v303_v0 = vunpack.c.h.s8.bf16 %v123_v52  ;;  %v140_v44 = vld [vmem:[%s12955_s23 + $0x190] sm:$0xff] }
  0x53   :  { %685 = vmatmul.mubr.bf16.gmra.mrb[4].mxu1 %v8394_v58 }
  0x54   :  { %758 = vmatmul.mubr.bf16.gmra.mrb[4].mxu0 %v8399_v59  ;;  %866 = vmatpush1.bf16.msra.mxu1 %v248_v61  ;;  %v486_v61 = vunpack.c.l.s8.bf16 %v216_v57 }
  0x55   :  { %793 = vmatpush1.bf16.msra.mxu0 %v438_v60  ;;  %867 = vmatprep.subr.bf16.mxu1 %v255_v63  ;;  %v122_v60 = vld [vmem:[%s12955_s23 + $0x100] sm:$0xff]  ;;  %v493_v63 = vunpack.c.h.s8.bf16 %v217_v49  ;;  %v339_v49 = vunpack.c.h.s8.bf16 %v141_v35 }
  0x56   :  { %794 = vmatprep.subr.bf16.mxu0 %v445_v62  ;;  %694 = vmatprep.mubr.bf16.mxu1 %v8410_v2  ;;  %v296_v62 = vunpack.c.l.s8.bf16 %v122_v60 }
  0x57   :  { %767 = vmatprep.mubr.bf16.mxu0 %v8415_v3 }
  0x58   :  { %868 = vmatpush1.bf16.msra.mxu1 %v254_v5  ;;  %v492_v5 = vunpack.c.h.s8.bf16 %v216_v57 }
  0x59   :  { %795 = vmatpush1.bf16.msra.mxu0 %v444_v4  ;;  %869 = vmatprep.subr.bf16.mxu1 %v261_v7  ;;  %v129_v4 = vld [vmem:[%s12955_s23 + $0x138] sm:$0xff]  ;;  %v499_v7 = vunpack.c.l.s8.bf16 %v223_v1 }
  0x5a   :  { %796 = vmatprep.subr.bf16.mxu0 %v451_v6  ;;  %v302_v6 = vunpack.c.h.s8.bf16 %v122_v60  ;;  %v309_v8 = vunpack.c.l.s8.bf16 %v129_v4  ;;  %v315_v16 = vunpack.c.h.s8.bf16 %v129_v4 }
  0x5b   :  { %695 = vmatmul.mubr.bf16.gmra.mrb[8].mxu1 %v8430_v10 }
  0x5c   :  { %768 = vmatmul.mubr.bf16.gmra.mrb[8].mxu0 %v8435_v11  ;;  %870 = vmatpush1.bf16.msra.mxu1 %v260_v13  ;;  %v498_v13 = vunpack.c.l.s8.bf16 %v222_v9 }
  0x5d   :  { %797 = vmatpush1.bf16.msra.mxu0 %v450_v12  ;;  %871 = vmatprep.subr.bf16.mxu1 %v267_v15  ;;  %v128_v12 = vld [vmem:[%s12955_s23 + $0x130] sm:$0xff]  ;;  %v505_v15 = vunpack.c.h.s8.bf16 %v223_v1 }
  0x5e   :  { %798 = vmatprep.subr.bf16.mxu0 %v457_v14  ;;  %704 = vmatprep.mubr.bf16.mxu1 %v8446_v18  ;;  %v308_v14 = vunpack.c.l.s8.bf16 %v128_v12 }
  0x5f   :  { %777 = vmatprep.mubr.bf16.mxu0 %v8451_v19 }
  0x60   :  { %872 = vmatpush1.bf16.msra.mxu1 %v266_v21  ;;  %v504_v21 = vunpack.c.h.s8.bf16 %v222_v9  ;;  %v107_v9 = vld [vmem:[%s12955_s23 + $0x88] sm:$0xff] }
  0x61   :  { %799 = vmatpush1.bf16.msra.mxu0 %v456_v20  ;;  %873 = vmatprep.subr.bf16.mxu1 %v273_v23  ;;  %v135_v20 = vld [vmem:[%s12955_s23 + $0x168] sm:$0xff]  ;;  %v511_v23 = vunpack.c.l.s8.bf16 %v229_v17 }
  0x62   :  { %800 = vmatprep.subr.bf16.mxu0 %v463_v22  ;;  %v314_v22 = vunpack.c.h.s8.bf16 %v128_v12  ;;  %v321_v25 = vunpack.c.l.s8.bf16 %v135_v20  ;;  %v327_v34 = vunpack.c.h.s8.bf16 %v135_v20  ;;  %v8597_v20 = vld [vmem:[%s12956_s28 + $0x70] ss:$24 sps:$4 sm:$0xff]  }
  0x63   :  { %705 = vmatmul.mubr.bf16.gmra.mrb[12].mxu1 %v8466_v28 }
  0x64   :  { %778 = vmatmul.mubr.bf16.gmra.mrb[12].mxu0 %v8471_v29  ;;  %874 = vmatpush1.bf16.msra.mxu1 %v272_v31  ;;  %v510_v31 = vunpack.c.l.s8.bf16 %v228_v26 }
  0x65   :  { %801 = vmatpush1.bf16.msra.mxu0 %v462_v30  ;;  %875 = vmatprep.subr.bf16.mxu1 %v279_v33  ;;  %v134_v30 = vld [vmem:[%s12955_s23 + $0x160] sm:$0xff]  ;;  %v517_v33 = vunpack.c.h.s8.bf16 %v229_v17 }
  0x66   :  { %802 = vmatprep.subr.bf16.mxu0 %v469_v32  ;;  %820 = vmatprep.mubr.bf16.mxu0 %v8482_v36  ;;  %v320_v32 = vunpack.c.l.s8.bf16 %v134_v30  ;;  %v106_v17 = vld [vmem:[%s12955_s23 + $0x80] sm:$0xff] }
  0x67   :  { %893 = vmatprep.mubr.bf16.mxu1 %v8268_v24 }
  0x68   :  { %876 = vmatpush1.bf16.msra.mxu1 %v278_v38  ;;  %v516_v38 = vunpack.c.h.s8.bf16 %v228_v26  ;;  %v8602_v26 = vld [vmem:[%s12956_s28 + $0xa4] ss:$24 sps:$4 sm:$0xff]  }
  0x69   :  { %803 = vmatpush1.bf16.msra.mxu0 %v468_v37  ;;  %877 = vmatprep.subr.bf16.mxu1 %v285_v40  ;;  %v95_v37 = vld [vmem:[%s12955_s23 + $0x28] sm:$0xff]  ;;  %v333_v40 = vunpack.c.l.s8.bf16 %v141_v35 }
  0x6a   :  { %804 = vmatprep.subr.bf16.mxu0 %v475_v39  ;;  %v326_v39 = vunpack.c.h.s8.bf16 %v134_v30  ;;  %v239_v41 = vunpack.c.l.s8.bf16 %v95_v37  ;;  %v245_v52 = vunpack.c.h.s8.bf16 %v95_v37  ;;  %v159_v30 = vld [vmem:[%s12955_s23 + $0x228] sm:$0xff]  ;;  %v158_v37 = vld [vmem:[%s12955_s23 + $0x220] sm:$0xff] }
  0x6c   :  { %878 = vmatpush1.bf16.msra.mxu1 %v284_v46  ;;  %v8545_v46 = vld [vmem:[%s12956_s28 + $0x10] ss:$24 sps:$4 sm:$0xff]  }
  0x6d   :  { %805 = vmatpush1.bf16.msra.mxu0 %v474_v45  ;;  %879 = vmatprep.subr.bf16.mxu1 %v291_v48  ;;  %v94_v45 = vld [vmem:[%s12955_s23 + $0x20] sm:$0xff] }
  0x6e   :  { %806 = vmatprep.subr.bf16.mxu0 %v481_v47  ;;  %v332_v47 = vunpack.c.l.s8.bf16 %v140_v44  ;;  %v238_v48 = vunpack.c.l.s8.bf16 %v94_v45  ;;  %v244_v57 = vunpack.c.h.s8.bf16 %v94_v45 }
  0x70   :  { %880 = vmatpush1.bf16.msra.mxu1 %v290_v54  ;;  %v147_v54 = vld [vmem:[%s12955_s23 + $0x1c8] sm:$0xff] }
  0x71   :  { %807 = vmatpush1.bf16.msra.mxu0 %v480_v53  ;;  %881 = vmatprep.subr.bf16.mxu1 %v297_v56  ;;  %v8550_v53 = vld [vmem:[%s12956_s28 + $0x44] ss:$24 sps:$4 sm:$0xff]   ;;  %v338_v56 = vunpack.c.h.s8.bf16 %v140_v44  ;;  %v345_v60 = vunpack.c.l.s8.bf16 %v147_v54  ;;  %v375_v44 = vunpack.c.h.s8.bf16 %v159_v30 }
  0x72   :  { %808 = vmatprep.subr.bf16.mxu0 %v487_v55  ;;  %v101_v55 = vld [vmem:[%s12955_s23 + $0x58] sm:$0xff] }
  0x74   :  { %882 = vmatpush1.bf16.msra.mxu1 %v296_v62  ;;  %v146_v62 = vld [vmem:[%s12955_s23 + $0x1c0] sm:$0xff] }
  0x75   :  { %809 = vmatpush1.bf16.msra.mxu0 %v486_v61  ;;  %883 = vmatprep.subr.bf16.mxu1 %v303_v0  ;;  %v251_v61 = vunpack.c.l.s8.bf16 %v101_v55  ;;  %v8571_v0 = vld [vmem:[%s12956_s28 + $0x40] ss:$24 sps:$4 sm:$0xff]   ;;  %v344_v1 = vunpack.c.l.s8.bf16 %v146_v62  ;;  %v350_v12 = vunpack.c.h.s8.bf16 %v146_v62 }
  0x76   :  { %810 = vmatprep.subr.bf16.mxu0 %v493_v63  ;;  %v100_v63 = vld [vmem:[%s12955_s23 + $0x50] sm:$0xff] }
  0x77   :  { %v250_v4 = vunpack.c.l.s8.bf16 %v100_v63 }
  0x78   :  { %884 = vmatpush1.bf16.msra.mxu1 %v302_v6  ;;  %v257_v6 = vunpack.c.h.s8.bf16 %v101_v55 }
  0x79   :  { %811 = vmatpush1.bf16.msra.mxu0 %v492_v5  ;;  %885 = vmatprep.subr.bf16.mxu1 %v309_v8  ;;  %v351_v5 = vunpack.c.h.s8.bf16 %v147_v54  ;;  %v153_v8 = vld [vmem:[%s12955_s23 + $0x1f8] sm:$0xff] }
  0x7a   :  { %812 = vmatprep.subr.bf16.mxu0 %v499_v7  ;;  %v8576_v7 = vld [vmem:[%s12956_s28 + $0x74] ss:$24 sps:$4 sm:$0xff]  }
  0x7c   :  { %886 = vmatpush1.bf16.msra.mxu1 %v308_v14  ;;  %v357_v14 = vunpack.c.l.s8.bf16 %v153_v8 }
  0x7d   :  { %813 = vmatpush1.bf16.msra.mxu0 %v498_v13  ;;  %887 = vmatprep.subr.bf16.mxu1 %v315_v16  ;;  %v256_v13 = vunpack.c.h.s8.bf16 %v100_v63  ;;  %v152_v16 = vld [vmem:[%s12955_s23 + $0x1f0] sm:$0xff] }
  0x7e   :  { %814 = vmatprep.subr.bf16.mxu0 %v505_v15  ;;  %v263_v15 = vunpack.c.l.s8.bf16 %v107_v9 }
  0x80   :  { %888 = vmatpush1.bf16.msra.mxu1 %v314_v22  ;;  %v262_v22 = vunpack.c.l.s8.bf16 %v106_v17 }
  0x81   :  { %815 = vmatpush1.bf16.msra.mxu0 %v504_v21  ;;  %889 = vmatprep.subr.bf16.mxu1 %v321_v25  ;;  %v356_v21 = vunpack.c.l.s8.bf16 %v152_v16  ;;  %v269_v25 = vunpack.c.h.s8.bf16 %v107_v9  ;;  %v124_v9 = vld [vmem:[%s12955_s23 + $0x110] sm:$0xff] }
  0x82   :  { %816 = vmatprep.subr.bf16.mxu0 %v511_v23  ;;  %v363_v23 = vunpack.c.h.s8.bf16 %v153_v8  ;;  %v170_v8 = vld [vmem:[%s12955_s23 + $0x280] sm:$0xff] }
  0x84   :  { %890 = vmatpush1.bf16.msra.mxu1 %v320_v32  ;;  %v362_v32 = vunpack.c.h.s8.bf16 %v152_v16  ;;  %v177_v16 = vld [vmem:[%s12955_s23 + $0x2b8] sm:$0xff] }
  0x85   :  { %817 = vmatpush1.bf16.msra.mxu0 %v510_v31  ;;  %891 = vmatprep.subr.bf16.mxu1 %v327_v34  ;;  %v113_v31 = vld [vmem:[%s12955_s23 + $0xb8] sm:$0xff]  ;;  %v369_v34 = vunpack.c.l.s8.bf16 %v159_v30  ;;  %v176_v30 = vld [vmem:[%s12955_s23 + $0x2b0] sm:$0xff] }
  0x86   :  { %818 = vmatprep.subr.bf16.mxu0 %v517_v33  ;;  %v268_v33 = vunpack.c.h.s8.bf16 %v106_v17  ;;  %v275_v35 = vunpack.c.l.s8.bf16 %v113_v31  ;;  %v281_v45 = vunpack.c.h.s8.bf16 %v113_v31  ;;  %v131_v17 = vld [vmem:[%s12955_s23 + $0x148] sm:$0xff]  ;;  %v130_v31 = vld [vmem:[%s12955_s23 + $0x140] sm:$0xff] }
  0x88   :  { %892 = vmatpush1.bf16.msra.mxu1 %v326_v39  ;;  %v8623_v39 = vld [vmem:[%s12956_s28 + $0xa0] ss:$24 sps:$4 sm:$0xff]  }
  0x89   :  { %819 = vmatpush1.bf16.msra.mxu0 %v516_v38  ;;  %934 = vmatprep.subr.bf16.mxu1 %v333_v40  ;;  %v112_v38 = vld [vmem:[%s12955_s23 + $0xb0] sm:$0xff]  ;;  %v368_v40 = vunpack.c.l.s8.bf16 %v158_v37 }
  0x8a   :  { %1080 = vmatprep.subr.bf16.mxu0 %v239_v41  ;;  %v274_v41 = vunpack.c.l.s8.bf16 %v112_v38 }
  0x8b   :  { %894 = vmatmul.mubr.bf16.vlgmr.msra.gmra.mrb[16].mxu1 %v8358_v42 }
  0x8c   :  { %821 = vmatmul.mubr.bf16.vlgmr.msra.gmra.mrb[0].mxu0 %v8545_v46  ;;  %935 = vmatpush1.bf16.msra.mxu1 %v332_v47  ;;  %v165_v47 = vld [vmem:[%s12955_s23 + $0x258] sm:$0xff] }
  0x8d   :  { %1081 = vmatpush1.bf16.msra.mxu0 %v238_v48  ;;  %936 = vmatprep.subr.bf16.mxu1 %v339_v49  ;;  %v119_v48 = vld [vmem:[%s12955_s23 + $0xe8] sm:$0xff]  ;;  %v374_v49 = vunpack.c.h.s8.bf16 %v158_v37  ;;  %v381_v54 = vunpack.c.l.s8.bf16 %v165_v47  ;;  %v387_v62 = vunpack.c.h.s8.bf16 %v165_v47  ;;  %v182_v47 = vld [vmem:[%s12955_s23 + $0x2e0] sm:$0xff] }
  0x8e   :  { %1082 = vmatprep.subr.bf16.mxu0 %v245_v52  ;;  %830 = vmatprep.mubr.bf16.mxu0 %v8550_v53  ;;  %v280_v52 = vunpack.c.h.s8.bf16 %v112_v38  ;;  %v287_v55 = vunpack.c.l.s8.bf16 %v119_v48  ;;  %v293_v63 = vunpack.c.h.s8.bf16 %v119_v48  ;;  %v183_v37 = vld [vmem:[%s12955_s23 + $0x2e8] sm:$0xff]  ;;  %v137_v38 = vld [vmem:[%s12955_s23 + $0x178] sm:$0xff]  ;;  %v136_v48 = vld [vmem:[%s12955_s23 + $0x170] sm:$0xff] }
  0x8f   :  { %903 = vmatprep.mubr.bf16.mxu1 %v8374_v50 }
  0x90   :  { %937 = vmatpush1.bf16.msra.mxu1 %v338_v56  ;;  %v164_v56 = vld [vmem:[%s12955_s23 + $0x250] sm:$0xff] }
  0x91   :  { %1083 = vmatpush1.bf16.msra.mxu0 %v244_v57  ;;  %938 = vmatprep.subr.bf16.mxu1 %v345_v60  ;;  %v118_v57 = vld [vmem:[%s12955_s23 + $0xe0] sm:$0xff]  ;;  %v380_v60 = vunpack.c.l.s8.bf16 %v164_v56 }
  0x92   :  { %1084 = vmatprep.subr.bf16.mxu0 %v251_v61  ;;  %v286_v61 = vunpack.c.l.s8.bf16 %v118_v57 }
  0x93   :  { %904 = vmatmul.mubr.bf16.gmra.mrb[20].mxu1 %v8394_v58 }
  0x94   :  { %831 = vmatmul.mubr.bf16.gmra.mrb[4].mxu0 %v8571_v0  ;;  %939 = vmatpush1.bf16.msra.mxu1 %v344_v1  ;;  %v171_v1 = vld [vmem:[%s12955_s23 + $0x288] sm:$0xff] }
  0x95   :  { %1085 = vmatpush1.bf16.msra.mxu0 %v250_v4  ;;  %940 = vmatprep.subr.bf16.mxu1 %v351_v5  ;;  %v125_v4 = vld [vmem:[%s12955_s23 + $0x118] sm:$0xff]  ;;  %v393_v5 = vunpack.c.l.s8.bf16 %v171_v1 }
  0x96   :  { %1086 = vmatprep.subr.bf16.mxu0 %v257_v6  ;;  %840 = vmatprep.mubr.bf16.mxu0 %v8576_v7  ;;  %v299_v6 = vunpack.c.l.s8.bf16 %v125_v4 }
  0x97   :  { %913 = vmatprep.mubr.bf16.mxu1 %v8410_v2 }
  0x98   :  { %941 = vmatpush1.bf16.msra.mxu1 %v350_v12  ;;  %v392_v12 = vunpack.c.l.s8.bf16 %v170_v8 }
  0x99   :  { %1087 = vmatpush1.bf16.msra.mxu0 %v256_v13  ;;  %942 = vmatprep.subr.bf16.mxu1 %v357_v14  ;;  %v298_v13 = vunpack.c.l.s8.bf16 %v124_v9  ;;  %v399_v14 = vunpack.c.h.s8.bf16 %v171_v1  ;;  %v188_v1 = vld [vmem:[%s12955_s23 + $0x310] sm:$0xff] }
  0x9a   :  { %1088 = vmatprep.subr.bf16.mxu0 %v263_v15  ;;  %v305_v15 = vunpack.c.h.s8.bf16 %v125_v4  ;;  %v142_v4 = vld [vmem:[%s12955_s23 + $0x1a0] sm:$0xff] }
  0x9b   :  { %914 = vmatmul.mubr.bf16.gmra.mrb[24].mxu1 %v8430_v10 }
  0x9c   :  { %841 = vmatmul.mubr.bf16.gmra.mrb[8].mxu0 %v8597_v20  ;;  %943 = vmatpush1.bf16.msra.mxu1 %v356_v21  ;;  %v398_v21 = vunpack.c.h.s8.bf16 %v170_v8  ;;  %v195_v8 = vld [vmem:[%s12955_s23 + $0x348] sm:$0xff] }
  0x9d   :  { %1089 = vmatpush1.bf16.msra.mxu0 %v262_v22  ;;  %944 = vmatprep.subr.bf16.mxu1 %v363_v23  ;;  %v304_v22 = vunpack.c.h.s8.bf16 %v124_v9  ;;  %v405_v23 = vunpack.c.l.s8.bf16 %v177_v16  ;;  %v149_v9 = vld [vmem:[%s12955_s23 + $0x1d8] sm:$0xff] }
  0x9e   :  { %1090 = vmatprep.subr.bf16.mxu0 %v269_v25  ;;  %850 = vmatprep.mubr.bf16.mxu0 %v8602_v26  ;;  %v311_v25 = vunpack.c.l.s8.bf16 %v131_v17 }
  0x9f   :  { %923 = vmatprep.mubr.bf16.mxu1 %v8446_v18 }
  0xa0   :  { %945 = vmatpush1.bf16.msra.mxu1 %v362_v32  ;;  %v404_v32 = vunpack.c.l.s8.bf16 %v176_v30 }
  0xa1   :  { %1091 = vmatpush1.bf16.msra.mxu0 %v268_v33  ;;  %946 = vmatprep.subr.bf16.mxu1 %v369_v34  ;;  %v310_v33 = vunpack.c.l.s8.bf16 %v130_v31  ;;  %v411_v34 = vunpack.c.h.s8.bf16 %v177_v16  ;;  %v194_v16 = vld [vmem:[%s12955_s23 + $0x340] sm:$0xff] }
  0xa2   :  { %1092 = vmatprep.subr.bf16.mxu0 %v275_v35  ;;  %v317_v35 = vunpack.c.h.s8.bf16 %v131_v17  ;;  %v148_v17 = vld [vmem:[%s12955_s23 + $0x1d0] sm:$0xff] }
  0xa3   :  { %924 = vmatmul.mubr.bf16.gmra.mrb[28].mxu1 %v8466_v28 }
  0xa4   :  { %851 = vmatmul.mubr.bf16.gmra.mrb[12].mxu0 %v8623_v39  ;;  %947 = vmatpush1.bf16.msra.mxu1 %v368_v40  ;;  %v410_v40 = vunpack.c.h.s8.bf16 %v176_v30 }
  0xa5   :  { %1093 = vmatpush1.bf16.msra.mxu0 %v274_v41  ;;  %948 = vmatprep.subr.bf16.mxu1 %v375_v44  ;;  %v316_v41 = vunpack.c.h.s8.bf16 %v130_v31  ;;  %v417_v44 = vunpack.c.l.s8.bf16 %v183_v37 }
  0xa6   :  { %1094 = vmatprep.subr.bf16.mxu0 %v281_v45  ;;  %966 = vmatprep.mubr.bf16.mxu1 %v8273_v27  ;;  %v386_v27 = vunpack.c.h.s8.bf16 %v164_v56  ;;  %v323_v45 = vunpack.c.l.s8.bf16 %v137_v38  ;;  %v189_v56 = vld [vmem:[%s12955_s23 + $0x318] sm:$0xff] }
  0xa7   :  { %1112 = vmatprep.mubr.bf16.mxu0 %v8268_v24  ;;  %v292_v24 = vunpack.c.h.s8.bf16 %v118_v57  ;;  %v143_v57 = vld [vmem:[%s12955_s23 + $0x1a8] sm:$0xff] }
  0xa8   :  { %949 = vmatpush1.bf16.msra.mxu1 %v374_v49  ;;  %v416_v49 = vunpack.c.l.s8.bf16 %v182_v47 }
  0xa9   :  { %1095 = vmatpush1.bf16.msra.mxu0 %v280_v52  ;;  %950 = vmatprep.subr.bf16.mxu1 %v381_v54  ;;  %v322_v52 = vunpack.c.l.s8.bf16 %v136_v48  ;;  %v423_v54 = vunpack.c.h.s8.bf16 %v183_v37  ;;  %v207_v37 = vld [vmem:[%s12955_s23 + $0x3a8] sm:$0xff] }
  0xaa   :  { %1096 = vmatprep.subr.bf16.mxu0 %v287_v55  ;;  %v329_v55 = vunpack.c.h.s8.bf16 %v137_v38  ;;  %v161_v38 = vld [vmem:[%s12955_s23 + $0x238] sm:$0xff] }
  0xac   :  { %951 = vmatpush1.bf16.msra.mxu1 %v380_v60  ;;  %v422_v60 = vunpack.c.h.s8.bf16 %v182_v47  ;;  %v471_v47 = vunpack.c.h.s8.bf16 %v207_v37 }
  0xad   :  { %1097 = vmatpush1.bf16.msra.mxu0 %v286_v61  ;;  %952 = vmatprep.subr.bf16.mxu1 %v387_v62  ;;  %v328_v61 = vunpack.c.h.s8.bf16 %v136_v48  ;;  %v429_v62 = vunpack.c.l.s8.bf16 %v189_v56  ;;  %v377_v48 = vunpack.c.h.s8.bf16 %v161_v38 }
  0xae   :  { %1098 = vmatprep.subr.bf16.mxu0 %v293_v63  ;;  %v335_v63 = vunpack.c.l.s8.bf16 %v143_v57 }
  0xb0   :  { %953 = vmatpush1.bf16.msra.mxu1 %v386_v27  ;;  %v428_v27 = vunpack.c.l.s8.bf16 %v188_v1 }
  0xb1   :  { %1099 = vmatpush1.bf16.msra.mxu0 %v292_v24  ;;  %954 = vmatprep.subr.bf16.mxu1 %v393_v5  ;;  %v334_v24 = vunpack.c.l.s8.bf16 %v142_v4  ;;  %v435_v5 = vunpack.c.h.s8.bf16 %v189_v56  ;;  %v212_v56 = vld [vmem:[%s12955_s23 + $0x3d0] sm:$0xff] }
  0xb2   :  { %1100 = vmatprep.subr.bf16.mxu0 %v299_v6  ;;  %v341_v6 = vunpack.c.h.s8.bf16 %v143_v57  ;;  %v166_v57 = vld [vmem:[%s12955_s23 + $0x260] sm:$0xff] }
  0xb4   :  { %955 = vmatpush1.bf16.msra.mxu1 %v392_v12  ;;  %v434_v12 = vunpack.c.h.s8.bf16 %v188_v1  ;;  %v482_v1 = vunpack.c.h.s8.bf16 %v212_v56 }
  0xb5   :  { %1101 = vmatpush1.bf16.msra.mxu0 %v298_v13  ;;  %956 = vmatprep.subr.bf16.mxu1 %v399_v14  ;;  %v340_v13 = vunpack.c.h.s8.bf16 %v142_v4  ;;  %v441_v14 = vunpack.c.l.s8.bf16 %v195_v8  ;;  %v388_v4 = vunpack.c.h.s8.bf16 %v166_v57 }
  0xb6   :  { %1102 = vmatprep.subr.bf16.mxu0 %v305_v15  ;;  %v347_v15 = vunpack.c.l.s8.bf16 %v149_v9 }
  0xb8   :  { %957 = vmatpush1.bf16.msra.mxu1 %v398_v21  ;;  %v447_v21 = vunpack.c.h.s8.bf16 %v195_v8 }
  0xb9   :  { %1103 = vmatpush1.bf16.msra.mxu0 %v304_v22  ;;  %958 = vmatprep.subr.bf16.mxu1 %v405_v23  ;;  %v353_v22 = vunpack.c.h.s8.bf16 %v149_v9  ;;  %v201_v23 = vld [vmem:[%s12955_s23 + $0x378] sm:$0xff] }
  0xba   :  { %1104 = vmatprep.subr.bf16.mxu0 %v311_v25  ;;  %v155_v25 = vld [vmem:[%s12955_s23 + $0x208] sm:$0xff]  ;;  %v453_v30 = vunpack.c.l.s8.bf16 %v201_v23 }
  0xbb   :  { %v359_v31 = vunpack.c.l.s8.bf16 %v155_v25 }
  0xbc   :  { %959 = vmatpush1.bf16.msra.mxu1 %v404_v32  ;;  %v200_v32 = vld [vmem:[%s12955_s23 + $0x370] sm:$0xff] }
  0xbd   :  { %1105 = vmatpush1.bf16.msra.mxu0 %v310_v33  ;;  %960 = vmatprep.subr.bf16.mxu1 %v411_v34  ;;  %v154_v33 = vld [vmem:[%s12955_s23 + $0x200] sm:$0xff]  ;;  %v459_v34 = vunpack.c.h.s8.bf16 %v201_v23 }
  0xbe   :  { %1106 = vmatprep.subr.bf16.mxu0 %v317_v35  ;;  %v365_v35 = vunpack.c.h.s8.bf16 %v155_v25 }
  0xc0   :  { %961 = vmatpush1.bf16.msra.mxu1 %v410_v40  ;;  %v465_v40 = vunpack.c.l.s8.bf16 %v207_v37 }
  0xc1   :  { %1107 = vmatpush1.bf16.msra.mxu0 %v316_v41  ;;  %962 = vmatprep.subr.bf16.mxu1 %v417_v44  ;;  %v371_v41 = vunpack.c.l.s8.bf16 %v161_v38  ;;  %v206_v44 = vld [vmem:[%s12955_s23 + $0x3a0] sm:$0xff] }
  0xc2   :  { %1108 = vmatprep.subr.bf16.mxu0 %v323_v45  ;;  %v160_v45 = vld [vmem:[%s12955_s23 + $0x230] sm:$0xff] }
  0xc4   :  { %963 = vmatpush1.bf16.msra.mxu1 %v416_v49  ;;  %v213_v49 = vld [vmem:[%s12955_s23 + $0x3d8] sm:$0xff] }
  0xc5   :  { %1109 = vmatpush1.bf16.msra.mxu0 %v322_v52  ;;  %964 = vmatprep.subr.bf16.mxu1 %v423_v54  ;;  %v167_v52 = vld [vmem:[%s12955_s23 + $0x268] sm:$0xff]  ;;  %v477_v54 = vunpack.c.l.s8.bf16 %v213_v49 }
  0xc6   :  { %1110 = vmatprep.subr.bf16.mxu0 %v329_v55  ;;  %v383_v55 = vunpack.c.l.s8.bf16 %v167_v52 }
  0xc8   :  { %965 = vmatpush1.bf16.msra.mxu1 %v422_v60  ;;  %v382_v60 = vunpack.c.l.s8.bf16 %v166_v57 }
  0xc9   :  { %1111 = vmatpush1.bf16.msra.mxu0 %v328_v61  ;;  %1007 = vmatprep.subr.bf16.mxu1 %v429_v62  ;;  %v483_v61 = vunpack.c.h.s8.bf16 %v213_v49  ;;  %v389_v62 = vunpack.c.h.s8.bf16 %v167_v52 }
  0xca   :  { %1153 = vmatprep.subr.bf16.mxu0 %v335_v63  ;;  %v219_v63 = vld [vmem:[%s12955_s23 + $0x408] sm:$0xff] }
  0xcb   :  { %967 = vmatmul.mubr.bf16.vlgmr.msra.gmra.mrb[16].mxu1 %v8363_v43  ;;  %v346_v43 = vunpack.c.l.s8.bf16 %v148_v17 }
  0xcc   :  { %1113 = vmatmul.mubr.bf16.vlgmr.msra.gmra.mrb[16].mxu0 %v8358_v42  ;;  %1008 = vmatpush1.bf16.msra.mxu1 %v428_v27  ;;  %v440_v42 = vunpack.c.l.s8.bf16 %v194_v16  ;;  %v489_v27 = vunpack.c.l.s8.bf16 %v219_v63 }
  0xcd   :  { %1154 = vmatpush1.bf16.msra.mxu0 %v334_v24  ;;  %1009 = vmatprep.subr.bf16.mxu1 %v435_v5  ;;  %v218_v5 = vld [vmem:[%s12955_s23 + $0x400] sm:$0xff] }
  0xce   :  { %1155 = vmatprep.subr.bf16.mxu0 %v341_v6  ;;  %976 = vmatprep.mubr.bf16.mxu1 %v8379_v51  ;;  %v352_v51 = vunpack.c.h.s8.bf16 %v148_v17  ;;  %v172_v6 = vld [vmem:[%s12955_s23 + $0x290] sm:$0xff]  ;;  %v488_v8 = vunpack.c.l.s8.bf16 %v218_v5 }
  0xcf   :  { %1122 = vmatprep.mubr.bf16.mxu0 %v8374_v50  ;;  %v446_v50 = vunpack.c.h.s8.bf16 %v194_v16  ;;  %v394_v9 = vunpack.c.l.s8.bf16 %v172_v6  ;;  %v494_v16 = vunpack.c.h.s8.bf16 %v218_v5  ;;  %v400_v17 = vunpack.c.h.s8.bf16 %v172_v6  ;;  %v202_v6 = vld [vmem:[%s12955_s23 + $0x380] sm:$0xff] }
  0xd0   :  { %1010 = vmatpush1.bf16.msra.mxu1 %v434_v12  ;;  %v495_v12 = vunpack.c.h.s8.bf16 %v219_v63  ;;  %v203_v63 = vld [vmem:[%s12955_s23 + $0x388] sm:$0xff] }
  0xd1   :  { %1156 = vmatpush1.bf16.msra.mxu0 %v340_v13  ;;  %1011 = vmatprep.subr.bf16.mxu1 %v441_v14  ;;  %v225_v14 = vld [vmem:[%s12955_s23 + $0x438] sm:$0xff]  ;;  %v455_v5 = vunpack.c.l.s8.bf16 %v203_v63 }
  0xd2   :  { %1157 = vmatprep.subr.bf16.mxu0 %v347_v15  ;;  %v179_v15 = vld [vmem:[%s12955_s23 + $0x2c8] sm:$0xff] }
  0xd3   :  { %977 = vmatmul.mubr.bf16.gmra.mrb[20].mxu1 %v8399_v59  ;;  %v358_v59 = vunpack.c.l.s8.bf16 %v154_v33 }
  0xd4   :  { %1123 = vmatmul.mubr.bf16.gmra.mrb[20].mxu0 %v8394_v58  ;;  %1012 = vmatpush1.bf16.msra.mxu1 %v440_v42  ;;  %v452_v58 = vunpack.c.l.s8.bf16 %v200_v32  ;;  %v501_v42 = vunpack.c.l.s8.bf16 %v225_v14 }
  0xd5   :  { %1158 = vmatpush1.bf16.msra.mxu0 %v346_v43  ;;  %1013 = vmatprep.subr.bf16.mxu1 %v447_v21  ;;  %v407_v43 = vunpack.c.l.s8.bf16 %v179_v15  ;;  %v224_v21 = vld [vmem:[%s12955_s23 + $0x430] sm:$0xff] }
  0xd6   :  { %1159 = vmatprep.subr.bf16.mxu0 %v353_v22  ;;  %986 = vmatprep.mubr.bf16.mxu1 %v8415_v3  ;;  %v364_v3 = vunpack.c.h.s8.bf16 %v154_v33  ;;  %v178_v22 = vld [vmem:[%s12955_s23 + $0x2c0] sm:$0xff]  ;;  %v500_v23 = vunpack.c.l.s8.bf16 %v224_v21 }
  0xd7   :  { %1132 = vmatprep.mubr.bf16.mxu0 %v8410_v2  ;;  %v458_v2 = vunpack.c.h.s8.bf16 %v200_v32  ;;  %v406_v25 = vunpack.c.l.s8.bf16 %v178_v22  ;;  %v506_v32 = vunpack.c.h.s8.bf16 %v224_v21  ;;  %v412_v33 = vunpack.c.h.s8.bf16 %v178_v22 }
  0xd8   :  { %1014 = vmatpush1.bf16.msra.mxu1 %v446_v50  ;;  %v507_v50 = vunpack.c.h.s8.bf16 %v225_v14  ;;  %v8112_v14 = vld [vmem:[%s12956_s28 + $0x68] ss:$24 sps:$4 sm:$0xff]  }
  0xd9   :  { %1160 = vmatpush1.bf16.msra.mxu0 %v352_v51  ;;  %1015 = vmatprep.subr.bf16.mxu1 %v453_v30  ;;  %v413_v51 = vunpack.c.h.s8.bf16 %v179_v15  ;;  %v231_v30 = vld [vmem:[%s12955_s23 + $0x468] sm:$0xff] }
  0xda   :  { %1161 = vmatprep.subr.bf16.mxu0 %v359_v31  ;;  %v185_v31 = vld [vmem:[%s12955_s23 + $0x2f8] sm:$0xff] }
  0xdb   :  { %987 = vmatmul.mubr.bf16.gmra.mrb[24].mxu1 %v8435_v11  ;;  %v370_v11 = vunpack.c.l.s8.bf16 %v160_v45 }
  0xdc   :  { %1133 = vmatmul.mubr.bf16.gmra.mrb[24].mxu0 %v8430_v10  ;;  %1016 = vmatpush1.bf16.msra.mxu1 %v452_v58  ;;  %v464_v10 = vunpack.c.l.s8.bf16 %v206_v44  ;;  %v513_v58 = vunpack.c.l.s8.bf16 %v231_v30 }
  0xdd   :  { %1162 = vmatpush1.bf16.msra.mxu0 %v358_v59  ;;  %1017 = vmatprep.subr.bf16.mxu1 %v459_v34  ;;  %v419_v59 = vunpack.c.l.s8.bf16 %v185_v31  ;;  %v230_v34 = vld [vmem:[%s12955_s23 + $0x460] sm:$0xff] }
  0xde   :  { %1163 = vmatprep.subr.bf16.mxu0 %v365_v35  ;;  %996 = vmatprep.mubr.bf16.mxu1 %v8451_v19  ;;  %v376_v19 = vunpack.c.h.s8.bf16 %v160_v45  ;;  %v184_v35 = vld [vmem:[%s12955_s23 + $0x2f0] sm:$0xff]  ;;  %v512_v37 = vunpack.c.l.s8.bf16 %v230_v34 }
  0xdf   :  { %1142 = vmatprep.mubr.bf16.mxu0 %v8446_v18  ;;  %v470_v18 = vunpack.c.h.s8.bf16 %v206_v44  ;;  %v418_v38 = vunpack.c.l.s8.bf16 %v184_v35  ;;  %v518_v44 = vunpack.c.h.s8.bf16 %v230_v34  ;;  %v424_v45 = vunpack.c.h.s8.bf16 %v184_v35  ;;  %v1543_v34 = vld [vmem:[%s12957_s30 + $0x60] sm:$0xff] }
  0xe0   :  { %1018 = vmatpush1.bf16.msra.mxu1 %v458_v2  ;;  %v519_v2 = vunpack.c.h.s8.bf16 %v231_v30 }
  0xe1   :  { %1164 = vmatpush1.bf16.msra.mxu0 %v364_v3  ;;  %1019 = vmatprep.subr.bf16.mxu1 %v465_v40  ;;  %v425_v3 = vunpack.c.h.s8.bf16 %v185_v31  ;;  %v191_v40 = vld [vmem:[%s12955_s23 + $0x328] sm:$0xff] }
  0xe2   :  { %1165 = vmatprep.subr.bf16.mxu0 %v371_v41  ;;  %v1532_v41 = vld [vmem:[%s12957_s30 + $0x8] sm:$0xff]  ;;  %v437_v52 = vunpack.c.h.s8.bf16 %v191_v40 }
  0xe3   :  { %997 = vmatmul.mubr.bf16.gmra.mrb[28].mxu1 %v8471_v29  ;;  %v476_v29 = vunpack.c.l.s8.bf16 %v212_v56 }
  0xe4   :  { %1143 = vmatmul.mubr.bf16.gmra.mrb[28].mxu0 %v8466_v28  ;;  %1020 = vmatpush1.bf16.msra.mxu1 %v464_v10  ;;  %v8107_v28 = vld [vmem:[%s12956_s28 + $0xc] ss:$24 sps:$4 sm:$0xff]   ;;  %v431_v10 = vunpack.c.l.s8.bf16 %v191_v40 }
  0xe5   :  { %1166 = vmatpush1.bf16.msra.mxu0 %v370_v11  ;;  %1021 = vmatprep.subr.bf16.mxu1 %v471_v47  ;;  %v190_v11 = vld [vmem:[%s12955_s23 + $0x320] sm:$0xff]  ;;  %v1628_v47 = vunpack.c.l.s8.bf16 %v1532_v41 }
  0xe6   :  { %1167 = vmatprep.subr.bf16.mxu0 %v377_v48  ;;  %1039 = vmatprep.mubr.bf16.mxu1 %v8482_v36  ;;  %v173_v36 = vld [vmem:[%s12955_s23 + $0x298] sm:$0xff]  ;;  %v1531_v48 = vld [vmem:[%s12957_s30] sm:$0xff]  ;;  %v430_v49 = vunpack.c.l.s8.bf16 %v190_v11  ;;  %v436_v56 = vunpack.c.h.s8.bf16 %v190_v11 }
  0xe7   :  { %1185 = vmatprep.mubr.bf16.mxu0 %v8107_v28  ;;  %v395_v24 = vunpack.c.l.s8.bf16 %v173_v36  ;;  %v401_v13 = vunpack.c.h.s8.bf16 %v173_v36  ;;  %v196_v28 = vld [vmem:[%s12955_s23 + $0x350] sm:$0xff] }
  0xe8   :  { %1022 = vmatpush1.bf16.msra.mxu1 %v470_v18  ;;  %v197_v18 = vld [vmem:[%s12955_s23 + $0x358] sm:$0xff] }
  0xe9   :  { %1168 = vmatpush1.bf16.msra.mxu0 %v376_v19  ;;  %1023 = vmatprep.subr.bf16.mxu1 %v477_v54  ;;  %v1627_v19 = vunpack.c.l.s8.bf16 %v1531_v48  ;;  %v8108_v54 = vld [vmem:[%s12956_s28 + $0x8] ss:$24 sps:$4 sm:$0xff]   ;;  %v443_v57 = vunpack.c.l.s8.bf16 %v197_v18 }
  0xea   :  { %1169 = vmatprep.subr.bf16.mxu0 %v383_v55  ;;  %v1632_v55 = vunpack.c.h.s8.bf16 %v1532_v41 }
  0xec   :  { %1024 = vmatpush1.bf16.msra.mxu1 %v476_v29  ;;  %v1631_v29 = vunpack.c.h.s8.bf16 %v1531_v48  ;;  %v221_v48 = vld [vmem:[%s12955_s23 + $0x418] sm:$0xff] }
  0xed   :  { %1170 = vmatpush1.bf16.msra.mxu0 %v382_v60  ;;  %1025 = vmatprep.subr.bf16.mxu1 %v483_v61  ;;  %v1536_v60 = vld [vmem:[%s12957_s30 + $0x28] sm:$0xff]  ;;  %v1535_v61 = vld [vmem:[%s12957_s30 + $0x20] sm:$0xff] }
  0xee   :  { %1171 = vmatprep.subr.bf16.mxu0 %v389_v62  ;;  %v449_v62 = vunpack.c.h.s8.bf16 %v197_v18  ;;  %v1636_v36 = vunpack.c.l.s8.bf16 %v1536_v60  ;;  %v1547_v18 = vld [vmem:[%s12957_s30 + $0x80] sm:$0xff] }
  0xf0   :  { %1026 = vmatpush1.bf16.msra.mxu1 %v482_v1  ;;  %v8110_v1 = vld [vmem:[%s12956_s28 + $0x38] ss:$24 sps:$4 sm:$0xff]  }
  0xf1   :  { %1172 = vmatpush1.bf16.msra.mxu0 %v388_v4  ;;  %1027 = vmatprep.subr.bf16.mxu1 %v489_v27  ;;  %v1635_v4 = vunpack.c.l.s8.bf16 %v1535_v61  ;;  %v448_v27 = vunpack.c.h.s8.bf16 %v196_v28 }
  0xf2   :  { %1173 = vmatprep.subr.bf16.mxu0 %v395_v24  ;;  %v1640_v24 = vunpack.c.h.s8.bf16 %v1536_v60 }
  0xf4   :  { %1028 = vmatpush1.bf16.msra.mxu1 %v488_v8  ;;  %v454_v8 = vunpack.c.l.s8.bf16 %v202_v6 }
  0xf5   :  { %1174 = vmatpush1.bf16.msra.mxu0 %v394_v9  ;;  %1029 = vmatprep.subr.bf16.mxu1 %v495_v12  ;;  %v461_v9 = vunpack.c.h.s8.bf16 %v203_v63  ;;  %v209_v12 = vld [vmem:[%s12955_s23 + $0x3b8] sm:$0xff]  ;;  %v227_v63 = vld [vmem:[%s12955_s23 + $0x448] sm:$0xff] }
  0xf6   :  { %1175 = vmatprep.subr.bf16.mxu0 %v401_v13  ;;  %v1639_v13 = vunpack.c.h.s8.bf16 %v1535_v61  ;;  %v473_v30 = vunpack.c.h.s8.bf16 %v209_v12  ;;  %v497_v61 = vunpack.c.h.s8.bf16 %v221_v48 }
  0xf8   :  { %1030 = vmatpush1.bf16.msra.mxu1 %v494_v16  ;;  %v1539_v16 = vld [vmem:[%s12957_s30 + $0x40] sm:$0xff] }
  0xf9   :  { %1176 = vmatpush1.bf16.msra.mxu0 %v400_v17  ;;  %1031 = vmatprep.subr.bf16.mxu1 %v501_v42  ;;  %v460_v17 = vunpack.c.h.s8.bf16 %v202_v6  ;;  %v467_v42 = vunpack.c.l.s8.bf16 %v209_v12  ;;  %v1643_v22 = vunpack.c.l.s8.bf16 %v1539_v16 }
  0xfa   :  { %1177 = vmatprep.subr.bf16.mxu0 %v407_v43  ;;  %v8113_v43 = vld [vmem:[%s12956_s28 + $0x9c] ss:$24 sps:$4 sm:$0xff]  }
  0xfc   :  { %1032 = vmatpush1.bf16.msra.mxu1 %v500_v23 }
  0xfd   :  { %1178 = vmatpush1.bf16.msra.mxu0 %v406_v25  ;;  %1033 = vmatprep.subr.bf16.mxu1 %v507_v50  ;;  %v1544_v50 = vld [vmem:[%s12957_s30 + $0x68] sm:$0xff] }
  0xfe   :  { %1179 = vmatprep.subr.bf16.mxu0 %v413_v51  ;;  %v1656_v41 = vunpack.c.h.s8.bf16 %v1544_v50 }
 0x100   :  { %1034 = vmatpush1.bf16.msra.mxu1 %v506_v32  ;;  %v215_v32 = vld [vmem:[%s12955_s23 + $0x3e8] sm:$0xff] }
 0x101   :  { %1180 = vmatpush1.bf16.msra.mxu0 %v412_v33  ;;  %1035 = vmatprep.subr.bf16.mxu1 %v513_v58  ;;  %v1647_v33 = vunpack.c.h.s8.bf16 %v1539_v16  ;;  %v8114_v58 = vld [vmem:[%s12956_s28 + $0x98] ss:$24 sps:$4 sm:$0xff]   ;;  %v485_v11 = vunpack.c.h.s8.bf16 %v215_v32 }
 0x102   :  { %1181 = vmatprep.subr.bf16.mxu0 %v419_v59  ;;  %v1652_v59 = vunpack.c.l.s8.bf16 %v1544_v50  ;;  %v233_v16 = vld [vmem:[%s12955_s23 + $0x478] sm:$0xff] }
 0x104   :  { %1036 = vmatpush1.bf16.msra.mxu1 %v512_v37  ;;  %v8115_v37 = vld [vmem:[%s12956_s28 + $0x14] ss:$24 sps:$4 sm:$0xff]  }
 0x105   :  { %1182 = vmatpush1.bf16.msra.mxu0 %v418_v38  ;;  %1037 = vmatprep.subr.bf16.mxu1 %v519_v2  ;;  %v479_v38 = vunpack.c.l.s8.bf16 %v215_v32  ;;  %v1560_v32 = vld [vmem:[%s12957_s30 + $0xe8] sm:$0xff] }
 0x106   :  { %1183 = vmatprep.subr.bf16.mxu0 %v425_v3  ;;  %v1651_v3 = vunpack.c.l.s8.bf16 %v1543_v34 }
 0x108   :  { %1038 = vmatpush1.bf16.msra.mxu1 %v518_v44 }
 0x109   :  { %1184 = vmatpush1.bf16.msra.mxu0 %v424_v45  ;;  %1819 = vmatprep.subr.bf16.mxu1 %v1628_v47 }
 0x10a   :  { %1226 = vmatprep.subr.bf16.mxu0 %v431_v10  ;;  %v1548_v10 = vld [vmem:[%s12957_s30 + $0x88] sm:$0xff] }
 0x10b   :  { %1040 = vmatmul.mubr.bf16.vlgmr.msra.gmra.mrb[16].mxu1 %v8545_v46  ;;  %v8109_v46 = vld [vmem:[%s12956_s28 + $0x3c] ss:$24 sps:$4 sm:$0xff]  }
 0x10c   :  { %1186 = vmatmul.mubr.bf16.vlgmr.msra.gmra.mrb[16].mxu0 %v8108_v54  ;;  %1049 = vmatprep.mubr.bf16.mxu1 %v8550_v53  ;;  %v442_v53 = vunpack.c.l.s8.bf16 %v196_v28  ;;  %v491_v54 = vunpack.c.l.s8.bf16 %v221_v48  ;;  %v1538_v48 = vld [vmem:[%s12957_s30 + $0x38] sm:$0xff] }
 0x10d   :  { %1227 = vmatpush1.bf16.msra.mxu0 %v430_v49  ;;  %1195 = vmatprep.mubr.bf16.mxu0 %v8109_v46  ;;  %v1655_v49 = vunpack.c.h.s8.bf16 %v1543_v34  ;;  %v1664_v46 = vunpack.c.h.s8.bf16 %v1548_v10  ;;  %v1684_v34 = vunpack.c.l.s8.bf16 %v1560_v32 }
 0x10e   :  { %1228 = vmatprep.subr.bf16.mxu0 %v437_v52  ;;  %1820 = vmatpush1.bf16.msra.mxu1 %v1627_v19  ;;  %v1660_v52 = vunpack.c.l.s8.bf16 %v1548_v10  ;;  %v8959_v10 = vld [vmem:[%s12957_s30 + $0x108] sm:$0xff] }
 0x10f   :  { %1821 = vmatprep.subr.bf16.mxu1 %v1632_v55  ;;  %v220_v55 = vld [vmem:[%s12955_s23 + $0x410] sm:$0xff] }
 0x111   :  { %1229 = vmatpush1.bf16.msra.mxu0 %v436_v56 }
 0x112   :  { %1230 = vmatprep.subr.bf16.mxu0 %v443_v57  ;;  %1822 = vmatpush1.bf16.msra.mxu1 %v1631_v29  ;;  %v1659_v57 = vunpack.c.l.s8.bf16 %v1547_v18  ;;  %v490_v29 = vunpack.c.l.s8.bf16 %v220_v55 }
 0x113   :  { %1050 = vmatmul.mubr.bf16.gmra.mrb[20].mxu1 %v8571_v0  ;;  %v8111_v0 = vld [vmem:[%s12956_s28 + $0x6c] ss:$24 sps:$4 sm:$0xff]   ;;  %1823 = vmatprep.subr.bf16.mxu1 %v1636_v36  ;;  %v1663_v36 = vunpack.c.h.s8.bf16 %v1547_v18  ;;  %v1692_v18 = vunpack.c.l.s8.bf16 %v8959_v10 }
 0x114   :  { %1196 = vmatmul.mubr.bf16.gmra.mrb[20].mxu0 %v8110_v1  ;;  %1059 = vmatprep.mubr.bf16.mxu1 %v8576_v7  ;;  %v1540_v7 = vld [vmem:[%s12957_s30 + $0x48] sm:$0xff] }
 0x115   :  { %1231 = vmatpush1.bf16.msra.mxu0 %v442_v53  ;;  %1205 = vmatprep.mubr.bf16.mxu0 %v8111_v0  ;;  %v1644_v15 = vunpack.c.l.s8.bf16 %v1540_v7  ;;  %v1648_v31 = vunpack.c.h.s8.bf16 %v1540_v7  ;;  %v1552_v53 = vld [vmem:[%s12957_s30 + $0xa8] sm:$0xff] }
 0x116   :  { %1232 = vmatprep.subr.bf16.mxu0 %v449_v62  ;;  %1824 = vmatpush1.bf16.msra.mxu1 %v1635_v4  ;;  %v1668_v1 = vunpack.c.l.s8.bf16 %v1552_v53  ;;  %v1551_v4 = vld [vmem:[%s12957_s30 + $0xa0] sm:$0xff]  ;;  %v1672_v7 = vunpack.c.h.s8.bf16 %v1552_v53  ;;  %v1301_v53 = vlaneseq }
 0x117   :  { %1825 = vmatprep.subr.bf16.mxu1 %v1640_v24  ;;  %v503_v24 = vunpack.c.l.s8.bf16 %v227_v63  ;;  %v1667_v0 = vunpack.c.l.s8.bf16 %v1551_v4 }
 0x119   :  { %1233 = vmatpush1.bf16.msra.mxu0 %v448_v27  ;;  %v496_v27 = vunpack.c.h.s8.bf16 %v220_v55  ;;  %v1638_v55 = vunpack.c.l.s8.bf16 %v1538_v48 }
 0x11a   :  { %1234 = vmatprep.subr.bf16.mxu0 %v455_v5  ;;  %1826 = vmatpush1.bf16.msra.mxu1 %v1639_v13  ;;  %v226_v5 = vld [vmem:[%s12955_s23 + $0x440] sm:$0xff]  ;;  %v1556_v13 = vld [vmem:[%s12957_s30 + $0xc8] sm:$0xff] }
 0x11b   :  { %1060 = vmatmul.mubr.bf16.gmra.mrb[24].mxu1 %v8597_v20  ;;  %v208_v20 = vld [vmem:[%s12955_s23 + $0x3b0] sm:$0xff]  ;;  %1827 = vmatprep.subr.bf16.mxu1 %v1644_v15 }
 0x11c   :  { %1206 = vmatmul.mubr.bf16.gmra.mrb[24].mxu0 %v8112_v14  ;;  %1069 = vmatprep.mubr.bf16.mxu1 %v8602_v26  ;;  %v466_v26 = vunpack.c.l.s8.bf16 %v208_v20  ;;  %v472_v35 = vunpack.c.h.s8.bf16 %v208_v20  ;;  %v509_v14 = vunpack.c.h.s8.bf16 %v227_v63  ;;  %v1555_v20 = vld [vmem:[%s12957_s30 + $0xc0] sm:$0xff] }
 0x11d   :  { %1235 = vmatpush1.bf16.msra.mxu0 %v454_v8  ;;  %1215 = vmatprep.mubr.bf16.mxu0 %v8113_v43  ;;  %v508_v43 = vunpack.c.h.s8.bf16 %v226_v5  ;;  %v1675_v50 = vunpack.c.l.s8.bf16 %v1555_v20  ;;  %v8118_v63 = vld [vmem:[%s12956_s28 + $0x40] ss:$24 sps:$4 sm:$0xff]  }
 0x11e   :  { %1236 = vmatprep.subr.bf16.mxu0 %v461_v9  ;;  %v8857_v21 = vpop.f32.mrb[0].mxu1  ;;  %1828 = vmatpush1.bf16.msra.mxu1 %v1643_v22  ;;  %v502_v9 = vunpack.c.l.s8.bf16 %v226_v5  ;;  %v515_v22 = vunpack.c.l.s8.bf16 %v233_v16 }
 0x11f   :  { %v8859_v23 = vpop.f32.mrb[1].mxu1  ;;  %1829 = vmatprep.subr.bf16.mxu1 %v1648_v31 }
 0x120   :  { %v8861_v25 = vpop.f32.mrb[2].mxu1 }
 0x121   :  { %1237 = vmatpush1.bf16.msra.mxu0 %v460_v17  ;;  %v8866_v51 = vpop.f32.mrb[3].mxu1  ;;  %v1671_v17 = vunpack.c.h.s8.bf16 %v1551_v4 }
 0x122   :  { %1238 = vmatprep.subr.bf16.mxu0 %v467_v42  ;;  %1830 = vmatpush1.bf16.msra.mxu1 %v1647_v33  ;;  %v1676_v42 = vunpack.c.l.s8.bf16 %v1556_v13  ;;  %v521_v33 = vunpack.c.h.s8.bf16 %v233_v16  ;;  %v8120_v16 = vld [vmem:[%s12956_s28 + $0x70] ss:$24 sps:$4 sm:$0xff]  }
 0x123   :  { %1070 = vmatmul.mubr.bf16.gmra.mrb[28].mxu1 %v8623_v39  ;;  %v214_v39 = vld [vmem:[%s12955_s23 + $0x3e0] sm:$0xff]  ;;  %1831 = vmatprep.subr.bf16.mxu1 %v1652_v59  ;;  %v1679_v59 = vunpack.c.h.s8.bf16 %v1555_v20 }
 0x124   :  { %1216 = vmatmul.mubr.bf16.gmra.mrb[28].mxu0 %v8114_v58  ;;  %v478_v44 = vunpack.c.l.s8.bf16 %v214_v39  ;;  %v484_v19 = vunpack.c.h.s8.bf16 %v214_v39  ;;  %v1534_v58 = vld [vmem:[%s12957_s30 + $0x18] sm:$0xff]  ;;  %v1533_v39 = vld [vmem:[%s12957_s30 + $0x10] sm:$0xff] }
 0x125   :  { %1239 = vmatpush1.bf16.msra.mxu0 %v466_v26  ;;  %1258 = vmatprep.mubr.bf16.mxu0 %v8115_v37  ;;  %v232_v26 = vld [vmem:[%s12955_s23 + $0x470] sm:$0xff]  ;;  %v8121_v20 = vld [vmem:[%s12956_s28 + $0xa4] ss:$24 sps:$4 sm:$0xff]  }
 0x126   :  { %1240 = vmatprep.subr.bf16.mxu0 %v473_v30  ;;  %v8884_v2 = vpop.f32.mrb[4].mxu1  ;;  %1832 = vmatpush1.bf16.msra.mxu1 %v1651_v3  ;;  %v1680_v30 = vunpack.c.h.s8.bf16 %v1556_v13  ;;  %v514_v31 = vunpack.c.l.s8.bf16 %v232_v26  ;;  %v520_v37 = vunpack.c.h.s8.bf16 %v232_v26  ;;  %v1545_v26 = vld [vmem:[%s12957_s30 + $0x70] sm:$0xff] }
 0x127   :  { %v8886_v40 = vpop.f32.mrb[5].mxu1  ;;  %1833 = vmatprep.subr.bf16.mxu1 %v1656_v41  ;;  %v1688_v41 = vunpack.c.h.s8.bf16 %v1560_v32 }
 0x128   :  { %v8888_v45 = vpop.f32.mrb[6].mxu1 }
 0x129   :  { %1241 = vmatpush1.bf16.msra.mxu0 %v472_v35  ;;  %v8893_v47 = vpop.f32.mrb[7].mxu1  ;;  %v1559_v35 = vld [vmem:[%s12957_s30 + $0xe0] sm:$0xff] }
 0x12a   :  { %1242 = vmatprep.subr.bf16.mxu0 %v479_v38  ;;  %1834 = vmatpush1.bf16.msra.mxu1 %v1655_v49  ;;  %v1630_v38 = vunpack.c.l.s8.bf16 %v1534_v58  ;;  %v1683_v3 = vunpack.c.l.s8.bf16 %v1559_v35  ;;  %v1687_v49 = vunpack.c.h.s8.bf16 %v1559_v35  ;;  %v1653_v35 = vunpack.c.l.s8.bf16 %v1545_v26 }
 0x12b   :  { %1835 = vmatprep.subr.bf16.mxu1 %v1660_v52  ;;  %v8116_v52 = vld [vmem:[%s12956_s28 + $0x10] ss:$24 sps:$4 sm:$0xff]  }
 0x12d   :  { %1243 = vmatpush1.bf16.msra.mxu0 %v478_v44  ;;  %v1629_v44 = vunpack.c.l.s8.bf16 %v1533_v39 }
 0x12e   :  { %1244 = vmatprep.subr.bf16.mxu0 %v485_v11  ;;  %v8904_v56 = vpop.f32.mrb[8].mxu1  ;;  %1836 = vmatpush1.bf16.msra.mxu1 %v1659_v57  ;;  %v1634_v11 = vunpack.c.h.s8.bf16 %v1534_v58  ;;  %v1537_v57 = vld [vmem:[%s12957_s30 + $0x30] sm:$0xff] }
 0x12f   :  { %v8906_v28 = vpop.f32.mrb[9].mxu1  ;;  %1837 = vmatprep.subr.bf16.mxu1 %v1664_v46  ;;  %v1637_v46 = vunpack.c.l.s8.bf16 %v1537_v57 }
 0x130   :  { %v8908_v60 = vpop.f32.mrb[10].mxu1 }
 0x131   :  { %1245 = vmatpush1.bf16.msra.mxu0 %v484_v19  ;;  %v8913_v62 = vpop.f32.mrb[11].mxu1  ;;  %v1633_v19 = vunpack.c.h.s8.bf16 %v1533_v39 }
 0x132   :  { %1246 = vmatprep.subr.bf16.mxu0 %v491_v54  ;;  %1838 = vmatpush1.bf16.msra.mxu1 %v1663_v36  ;;  %v8117_v54 = vld [vmem:[%s12956_s28 + $0x44] ss:$24 sps:$4 sm:$0xff]   ;;  %v1641_v36 = vunpack.c.h.s8.bf16 %v1537_v57 }
 0x133   :  { %1839 = vmatprep.subr.bf16.mxu1 %v1668_v1  ;;  %v8119_v1 = vld [vmem:[%s12956_s28 + $0x74] ss:$24 sps:$4 sm:$0xff]  }
 0x135   :  { %1247 = vmatpush1.bf16.msra.mxu0 %v490_v29  ;;  %v1642_v29 = vunpack.c.h.s8.bf16 %v1538_v48  ;;  %v8122_v48 = vld [vmem:[%s12956_s28 + $0xa0] ss:$24 sps:$4 sm:$0xff]  }
 0x136   :  { %1248 = vmatprep.subr.bf16.mxu0 %v497_v61  ;;  %v8924_v6 = vpop.f32.mrb[12].mxu1  ;;  %1840 = vmatpush1.bf16.msra.mxu1 %v1667_v0  ;;  %v1542_v61 = vld [vmem:[%s12957_s30 + $0x58] sm:$0xff] }
 0x137   :  { %v8926_v8 = vpop.f32.mrb[13].mxu1  ;;  %1841 = vmatprep.subr.bf16.mxu1 %v1672_v7  ;;  %v1646_v4 = vunpack.c.l.s8.bf16 %v1542_v61  ;;  %v1650_v7 = vunpack.c.h.s8.bf16 %v1542_v61 }
 0x138   :  { %v8928_v12 = vpop.f32.mrb[14].mxu1 }
 0x139   :  { %1249 = vmatpush1.bf16.msra.mxu0 %v496_v27  ;;  %v8933_v15 = vpop.f32.mrb[15].mxu1  ;;  %v1541_v27 = vld [vmem:[%s12957_s30 + $0x50] sm:$0xff] }
 0x13a   :  { %1250 = vmatprep.subr.bf16.mxu0 %v503_v24  ;;  %1842 = vmatpush1.bf16.msra.mxu1 %v1671_v17  ;;  %v8986_v24 = vshrl.u32 %v1301_v53, 7  ;;  %v1645_v5 = vunpack.c.l.s8.bf16 %v1541_v27  ;;  %v9008_v17 = vld [vmem:[%s12962_s26] sm:$0x3f] }
 0x13b   :  { %1843 = vmatprep.subr.bf16.mxu1 %v1676_v42  ;;  %v1649_v42 = vunpack.c.h.s8.bf16 %v1541_v27 }
 0x13c   :  { %12958 = vst [vmem:[#allocation2_spill] sm:$0xff] %v8986_v24  ;;  %v8989_v0 = vsub.s32 0, %v8986_v24  ;;  %v8997_v13 = vsub.s32 1, %v8986_v24 }
 0x13d   :  { %1251 = vmatpush1.bf16.msra.mxu0 %v502_v9  ;;  %v8994_v9 = vld [vmem:[%s12960_s0] sm:$0x3f] }
 0x13e   :  { %1252 = vmatprep.subr.bf16.mxu0 %v509_v14  ;;  %1844 = vmatpush1.bf16.msra.mxu1 %v1675_v50  ;;  %12959 = vst [vmem:[#allocation3_spill] sm:$0xff] %v8989_v0  ;;  %12961 = vst [vmem:[#allocation4_spill] sm:$0xff] %v8997_v13  ;;  %v1546_v14 = vld [vmem:[%s12957_s30 + $0x78] sm:$0xff]  ;;  %v9027_v32 = vrot.slane %v9008_v17, %v8989_v0 }
 0x13f   :  { %1845 = vmatprep.subr.bf16.mxu1 %v1680_v30  ;;  %v9022_v30 = vrot.slane %v8994_v9, %v8997_v13 }
 0x141   :  { %1253 = vmatpush1.bf16.msra.mxu0 %v508_v43  ;;  %v9015_v43 = vrot.slane %v8994_v9, %v8989_v0 }
 0x142   :  { %1254 = vmatprep.subr.bf16.mxu0 %v515_v22  ;;  %1846 = vmatpush1.bf16.msra.mxu1 %v1679_v59  ;;  %v1654_v22 = vunpack.c.l.s8.bf16 %v1546_v14  ;;  %v9032_v59 = vrot.slane %v9008_v17, %v8997_v13 }
 0x143   :  { %1847 = vmatprep.subr.bf16.mxu1 %v1684_v34 }
 0x145   :  { %1255 = vmatpush1.bf16.msra.mxu0 %v514_v31 }
 0x146   :  { %1256 = vmatprep.subr.bf16.mxu0 %v521_v33  ;;  %1848 = vmatpush1.bf16.msra.mxu1 %v1683_v3 }
 0x147   :  { %1849 = vmatprep.subr.bf16.mxu1 %v1688_v41 }
 0x149   :  { %1257 = vmatpush1.bf16.msra.mxu0 %v520_v37 }
 0x14a   :  { %2038 = vmatprep.subr.bf16.mxu0 %v1630_v38  ;;  %1850 = vmatpush1.bf16.msra.mxu1 %v1687_v49 }
 0x14b   :  { %1892 = vmatprep.subr.bf16.mxu1 %v1692_v18 }
 0x14c   :  { %1259 = vmatmul.mubr.bf16.vlgmr.msra.gmra.mrb[16].mxu0 %v8116_v52  ;;  %v1657_v52 = vunpack.c.h.s8.bf16 %v1545_v26 }
 0x14d   :  { %2039 = vmatpush1.bf16.msra.mxu0 %v1629_v44  ;;  %1268 = vmatprep.mubr.bf16.mxu0 %v8117_v54 }
 0x14e   :  { %2040 = vmatprep.subr.bf16.mxu0 %v1634_v11 }
 0x151   :  { %2041 = vmatpush1.bf16.msra.mxu0 %v1633_v19  ;;  %v1549_v19 = vld [vmem:[%s12957_s30 + $0x90] sm:$0xff] }
 0x152   :  { %2042 = vmatprep.subr.bf16.mxu0 %v1638_v55  ;;  %v1661_v61 = vunpack.c.l.s8.bf16 %v1549_v19 }
 0x154   :  { %1269 = vmatmul.mubr.bf16.gmra.mrb[20].mxu0 %v8118_v63 }
 0x155   :  { %2043 = vmatpush1.bf16.msra.mxu0 %v1637_v46  ;;  %1278 = vmatprep.mubr.bf16.mxu0 %v8119_v1 }
 0x156   :  { %2044 = vmatprep.subr.bf16.mxu0 %v1642_v29 }
 0x159   :  { %2045 = vmatpush1.bf16.msra.mxu0 %v1641_v36 }
 0x15a   :  { %2046 = vmatprep.subr.bf16.mxu0 %v1646_v4 }
 0x15c   :  { %1279 = vmatmul.mubr.bf16.gmra.mrb[24].mxu0 %v8120_v16 }
 0x15d   :  { %2047 = vmatpush1.bf16.msra.mxu0 %v1645_v5  ;;  %1288 = vmatprep.mubr.bf16.mxu0 %v8121_v20 }
 0x15e   :  { %2048 = vmatprep.subr.bf16.mxu0 %v1650_v7 }
 0x15f   :  { %v822_v50 = vpop.f32.mrb[0].mxu0 }
 0x160   :  { %v7618_v31 = vadd.f32 %v822_v50, %v8857_v21  ;;  %v824_v33 = vpop.f32.mrb[1].mxu0  ;;  %v1658_v21 = vunpack.c.h.s8.bf16 %v1546_v14 }
 0x161   :  { %v7619_v58 = vadd.f32 %v824_v33, %v8859_v23  ;;  %v826_v34 = vpop.f32.mrb[2].mxu0  ;;  %2049 = vmatpush1.bf16.msra.mxu0 %v1649_v42  ;;  %v1550_v23 = vld [vmem:[%s12957_s30 + $0x98] sm:$0xff] }
 0x162   :  { %v1331_v37 = vmul.f32 %v7618_v31, %v9015_v43  ;;  %v7620_v38 = vadd.f32 %v826_v34, %v8861_v25  ;;  %v828_v39 = vpop.f32.mrb[3].mxu0  ;;  %2050 = vmatprep.subr.bf16.mxu0 %v1654_v22  ;;  %v1662_v18 = vunpack.c.l.s8.bf16 %v1550_v23  ;;  %v1666_v4 = vunpack.c.h.s8.bf16 %v1550_v23 }
 0x163   :  { %v1332_v3 = vmul.f32 %v7619_v58, %v9022_v30  ;;  %v7621_v41 = vadd.f32 %v828_v39, %v8866_v51 }
 0x164   :  { %v1411_v44 = vadd.f32 %v9027_v32, %v1331_v37  ;;  %v1337_v11 = vmul.f32 %v7620_v38, %v9015_v43  ;;  %1289 = vmatmul.mubr.bf16.gmra.mrb[28].mxu0 %v8122_v48  ;;  %v1563_v38 = vld [vmem:[%s12957_s30 + $0x100] sm:$0xff]  ;;  %v1558_v48 = vld [vmem:[%s12957_s30 + $0xd8] sm:$0xff] }
 0x165   :  { %v1412_v25 = vadd.f32 %v9032_v59, %v1332_v3  ;;  %v1338_v49 = vmul.f32 %v7621_v41, %v9022_v30  ;;  %2051 = vmatpush1.bf16.msra.mxu0 %v1653_v35 }
 0x166   :  { %8011 = vtanh.f32 %v1411_v44  ;;  %v1417_v51 = vadd.f32 %v9027_v32, %v1337_v11  ;;  %2052 = vmatprep.subr.bf16.mxu0 %v1658_v21 }
 0x167   :  { %8013 = vtanh.f32 %v1412_v25  ;;  %v1418_v54 = vadd.f32 %v9032_v59, %v1338_v49  ;;  %v832_v55 = vpop.f32.mrb[4].mxu0 }
 0x168   :  { %8015 = vtanh.f32 %v1417_v51  ;;  %v7622_v57 = vadd.f32 %v832_v55, %v8884_v2  ;;  %v834_v46 = vpop.f32.mrb[5].mxu0  ;;  %v1554_v2 = vld [vmem:[%s12957_s30 + $0xb8] sm:$0xff]  ;;  %v1678_v55 = vunpack.c.l.s8.bf16 %v1558_v48 }
 0x169   :  { %8017 = vtanh.f32 %v1418_v54  ;;  %v7623_v29 = vadd.f32 %v834_v46, %v8886_v40  ;;  %v836_v53 = vpop.f32.mrb[6].mxu0  ;;  %2053 = vmatpush1.bf16.msra.mxu0 %v1657_v52  ;;  %v1670_v20 = vunpack.c.l.s8.bf16 %v1554_v2  ;;  %v1674_v11 = vunpack.c.h.s8.bf16 %v1554_v2  ;;  %v1568_v46 = vld [vmem:[%s12957_s30 + $0x128] sm:$0xff] }
 0x16a   :  { %v1343_v63 = vmul.f32 %v7622_v57, %v9015_v43  ;;  %v7624_v36 = vadd.f32 %v836_v53, %v8888_v45  ;;  %v838_v1 = vpop.f32.mrb[7].mxu0  ;;  %2054 = vmatprep.subr.bf16.mxu0 %v1662_v18  ;;  %v1665_v45 = vunpack.c.h.s8.bf16 %v1549_v19  ;;  %v1557_v57 = vld [vmem:[%s12957_s30 + $0xd0] sm:$0xff]  ;;  %v1700_v2 = vunpack.c.l.s8.bf16 %v1568_v46 }
 0x16b   :  { %v1344_v27 = vmul.f32 %v7623_v29, %v9022_v30  ;;  %v7625_v5 = vadd.f32 %v838_v1, %v8893_v47  ;;  %v1553_v47 = vld [vmem:[%s12957_s30 + $0xb0] sm:$0xff] }
 0x16c   :  { %v1423_v40 = vadd.f32 %v9027_v32, %v1343_v63  ;;  %v1349_v7 = vmul.f32 %v7624_v36, %v9015_v43  ;;  %v1669_v37 = vunpack.c.l.s8.bf16 %v1553_v47  ;;  %v1673_v19 = vunpack.c.h.s8.bf16 %v1553_v47 }
 0x16d   :  { %v1424_v14 = vadd.f32 %v9032_v59, %v1344_v27  ;;  %v1350_v16 = vmul.f32 %v7625_v5, %v9022_v30  ;;  %2055 = vmatpush1.bf16.msra.mxu0 %v1661_v61  ;;  %v1695_v36 = vunpack.c.h.s8.bf16 %v1563_v38  ;;  %v1677_v5 = vunpack.c.l.s8.bf16 %v1557_v57 }
 0x16e   :  { %8019 = vtanh.f32 %v1423_v40  ;;  %v1429_v42 = vadd.f32 %v9027_v32, %v1349_v7  ;;  %2056 = vmatprep.subr.bf16.mxu0 %v1666_v4  ;;  %v1567_v40 = vld [vmem:[%s12957_s30 + $0x120] sm:$0xff] }
 0x16f   :  { %8021 = vtanh.f32 %v1424_v14  ;;  %v1430_v22 = vadd.f32 %v9032_v59, %v1350_v16  ;;  %v842_v26 = vpop.f32.mrb[8].mxu0 }
 0x170   :  { %v8012_v50 = vpop.eup %8011  ;;  %8023 = vtanh.f32 %v1429_v42  ;;  %v7626_v31 = vadd.f32 %v842_v26, %v8904_v56  ;;  %v844_v33 = vpop.f32.mrb[9].mxu0 }
 0x171   :  { %v8014_v58 = vpop.eup %8013  ;;  %8025 = vtanh.f32 %v1430_v22  ;;  %v7627_v34 = vadd.f32 %v844_v33, %v8906_v28  ;;  %v846_v35 = vpop.f32.mrb[10].mxu0  ;;  %2057 = vmatpush1.bf16.msra.mxu0 %v1665_v45  ;;  %v1682_v45 = vunpack.c.h.s8.bf16 %v1558_v48  ;;  %v1562_v22 = vld [vmem:[%s12957_s30 + $0xf8] sm:$0xff] }
 0x172   :  { %v8016_v39 = vpop.eup %8015  ;;  %v1355_v21 = vmul.f32 %v7626_v31, %v9015_v43  ;;  %v7628_v3 = vadd.f32 %v846_v35, %v8908_v60  ;;  %v848_v41 = vpop.f32.mrb[11].mxu0  ;;  %2058 = vmatprep.subr.bf16.mxu0 %v1670_v20  ;;  %v1691_v60 = vunpack.c.l.s8.bf16 %v1563_v38  ;;  %v1572_v38 = vld [vmem:[%s12957_s30 + $0x148] sm:$0xff]  ;;  %v1566_v48 = vld [vmem:[%s12957_s30 + $0x118] sm:$0xff] }
 0x173   :  { %v8018_v56 = vpop.eup %8017  ;;  %v1356_v23 = vmul.f32 %v7627_v34, %v9022_v30  ;;  %v7629_v44 = vadd.f32 %v848_v41, %v8913_v62  ;;  %v9080_v28 = vpack.c.bf16 %v8016_v39, %v8012_v50  ;;  %v1696_v62 = vunpack.c.h.s8.bf16 %v8959_v10 }
 0x174   :  { %v1435_v25 = vadd.f32 %v9027_v32, %v1355_v21  ;;  %v1361_v49 = vmul.f32 %v7628_v3, %v9015_v43  ;;  %v1508_v52 = vpack.c.bf16 %v8018_v56, %v8014_v58  ;;  %v1704_v34 = vunpack.c.h.s8.bf16 %v1568_v46  ;;  %v1571_v56 = vld [vmem:[%s12957_s30 + $0x140] sm:$0xff] }
 0x175   :  { %v1436_v51 = vadd.f32 %v9032_v59, %v1356_v23  ;;  %v1362_v18 = vmul.f32 %v7629_v44, %v9022_v30  ;;  %2059 = vmatpush1.bf16.msra.mxu0 %v1669_v37  ;;  %v1686_v37 = vunpack.c.l.s8.bf16 %v1562_v22  ;;  %v1708_v41 = vunpack.c.l.s8.bf16 %v1572_v38  ;;  %v1575_v46 = vld [vmem:[%s12957_s30 + $0x160] sm:$0xff] }
 0x176   :  { %8027 = vtanh.f32 %v1435_v25  ;;  %v1441_v54 = vadd.f32 %v9027_v32, %v1361_v49  ;;  %1851 = vmatprep.mubr.bf16.mxu1 %v1508_v52  ;;  %2070 = vmatprep.mubr.bf16.mxu0 %v1508_v52  ;;  %v1690_v44 = vunpack.c.h.s8.bf16 %v1562_v22  ;;  %v1707_v49 = vunpack.c.l.s8.bf16 %v1571_v56 }
 0x177   :  { %8029 = vtanh.f32 %v1436_v51  ;;  %v1442_v29 = vadd.f32 %v9032_v59, %v1362_v18  ;;  %v852_v53 = vpop.f32.mrb[12].mxu0  ;;  %1852 = vmatmul.mubr.bf16.vlgmr.msra.gmra.mrb[32].mxu1 %v9080_v28  ;;  %2060 = vmatprep.subr.bf16.mxu0 %v1674_v11  ;;  %v1694_v51 = vunpack.c.l.s8.bf16 %v1566_v48  ;;  %v1565_v18 = vld [vmem:[%s12957_s30 + $0x110] sm:$0xff] }
 0x178   :  { %v8020_v10 = vpop.eup %8019  ;;  %8031 = vtanh.f32 %v1441_v54  ;;  %v7630_v61 = vadd.f32 %v852_v53, %v8924_v6  ;;  %v854_v63 = vpop.f32.mrb[13].mxu0  ;;  %1893 = vmatpush1.bf16.msra.mxu1 %v1691_v60  ;;  %v1712_v60 = vunpack.c.h.s8.bf16 %v1572_v38  ;;  %v1576_v54 = vld [vmem:[%s12957_s30 + $0x168] sm:$0xff]  ;;  %v1698_v53 = vunpack.c.h.s8.bf16 %v1566_v48 }
 0x179   :  { %v8022_v1 = vpop.eup %8021  ;;  %8033 = vtanh.f32 %v1442_v29  ;;  %v7631_v4 = vadd.f32 %v854_v63, %v8926_v8  ;;  %v856_v27 = vpop.f32.mrb[14].mxu0  ;;  %2061 = vmatpush1.bf16.msra.mxu0 %v1673_v19  ;;  %1894 = vmatprep.subr.bf16.mxu1 %v1696_v62  ;;  %v1711_v62 = vunpack.c.h.s8.bf16 %v1571_v56  ;;  %v1570_v63 = vld [vmem:[%s12957_s30 + $0x138] sm:$0xff] }
 0x17a   :  { %v8024_v7 = vpop.eup %8023  ;;  %v1367_v14 = vmul.f32 %v7630_v61, %v9015_v43  ;;  %v7632_v6 = vadd.f32 %v856_v27, %v8928_v12  ;;  %v858_v16 = vpop.f32.mrb[15].mxu0  ;;  %2062 = vmatprep.subr.bf16.mxu0 %v1678_v55  ;;  %v1699_v12 = vunpack.c.l.s8.bf16 %v1567_v40  ;;  %v1697_v27 = vunpack.c.h.s8.bf16 %v1565_v18 }
 0x17b   :  { %v8026_v42 = vpop.eup %8025  ;;  %v1368_v8 = vmul.f32 %v7631_v4, %v9022_v30  ;;  %v7633_v20 = vadd.f32 %v858_v16, %v8933_v15  ;;  %v9108_v47 = vpack.c.bf16 %v8024_v7, %v8020_v10  ;;  %v1681_v15 = vunpack.c.h.s8.bf16 %v1557_v57 }
 0x17c   :  { %v1447_v26 = vadd.f32 %v9027_v32, %v1367_v14  ;;  %v1373_v50 = vmul.f32 %v7632_v6, %v9015_v43  ;;  %v9115_v31 = vpack.c.bf16 %v8026_v42, %v8022_v1  ;;  %1895 = vmatpush1.bf16.msra.mxu1 %v1695_v36  ;;  %v1561_v43 = vld [vmem:[%s12957_s30 + $0xf0] sm:$0xff]  ;;  %v1693_v57 = vunpack.c.l.s8.bf16 %v1565_v18  ;;  %v1579_v6 = vld [vmem:[%s12957_s30 + $0x180] sm:$0xff]  ;;  %v1574_v42 = vld [vmem:[%s12957_s30 + $0x158] sm:$0xff] }
 0x17d   :  { %v1448_v33 = vadd.f32 %v9032_v59, %v1368_v8  ;;  %v1374_v58 = vmul.f32 %v7633_v20, %v9022_v30  ;;  %2063 = vmatpush1.bf16.msra.mxu0 %v1677_v5  ;;  %1896 = vmatprep.subr.bf16.mxu1 %v1700_v2  ;;  %v1685_v3 = vunpack.c.l.s8.bf16 %v1561_v43  ;;  %v1689_v52 = vunpack.c.h.s8.bf16 %v1561_v43  ;;  %v1591_v18 = vld [vmem:[%s12957_s30 + $0x1e0] sm:$0xff] }
 0x17e   :  { %8035 = vtanh.f32 %v1447_v26  ;;  %v1453_v35 = vadd.f32 %v9027_v32, %v1373_v50  ;;  %1861 = vmatprep.mubr.bf16.mxu1 %v9115_v31  ;;  %2064 = vmatprep.subr.bf16.mxu0 %v1682_v45  ;;  %v1703_v32 = vunpack.c.h.s8.bf16 %v1567_v40  ;;  %v1716_v36 = vunpack.c.l.s8.bf16 %v1576_v54  ;;  %v1569_v40 = vld [vmem:[%s12957_s30 + $0x130] sm:$0xff] }
 0x17f   :  { %8037 = vtanh.f32 %v1448_v33  ;;  %v1454_v30 = vadd.f32 %v9032_v59, %v1374_v58  ;;  %1862 = vmatmul.mubr.bf16.gmra.mrb[36].mxu1 %v9108_v47  ;;  %v1715_v4 = vunpack.c.l.s8.bf16 %v1575_v46  ;;  %v1720_v5 = vunpack.c.h.s8.bf16 %v1576_v54  ;;  %v1573_v50 = vld [vmem:[%s12957_s30 + $0x150] sm:$0xff]  ;;  %v1583_v33 = vld [vmem:[%s12957_s30 + $0x1a0] sm:$0xff] }
 0x180   :  { %v8028_v39 = vpop.eup %8027  ;;  %8039 = vtanh.f32 %v1453_v35  ;;  %1897 = vmatpush1.bf16.msra.mxu1 %v1699_v12  ;;  %v1702_v2 = vunpack.c.l.s8.bf16 %v1570_v63  ;;  %v1719_v7 = vunpack.c.h.s8.bf16 %v1575_v46  ;;  %v1701_v14 = vunpack.c.l.s8.bf16 %v1569_v40 }
 0x181   :  { %v8030_v21 = vpop.eup %8029  ;;  %8041 = vtanh.f32 %v1454_v30  ;;  %2065 = vmatpush1.bf16.msra.mxu0 %v1681_v15  ;;  %1898 = vmatprep.subr.bf16.mxu1 %v1704_v34  ;;  %v1706_v16 = vunpack.c.h.s8.bf16 %v1570_v63  ;;  %v1723_v8 = vunpack.c.l.s8.bf16 %v1579_v6  ;;  %v1705_v20 = vunpack.c.h.s8.bf16 %v1569_v40  ;;  %v1578_v34 = vld [vmem:[%s12957_s30 + $0x178] sm:$0xff]  ;;  %v1577_v30 = vld [vmem:[%s12957_s30 + $0x170] sm:$0xff] }
 0x182   :  { %v8032_v23 = vpop.eup %8031  ;;  %2066 = vmatprep.subr.bf16.mxu0 %v1686_v37  ;;  %v1710_v26 = vunpack.c.l.s8.bf16 %v1574_v42  ;;  %v1727_v12 = vunpack.c.h.s8.bf16 %v1579_v6  ;;  %v1714_v58 = vunpack.c.h.s8.bf16 %v1574_v42  ;;  %v1731_v35 = vunpack.c.l.s8.bf16 %v1583_v33  ;;  %v1593_v6 = vld [vmem:[%s12957_s30 + $0x1f0] sm:$0xff]  ;;  %v9230_v42 = vld [vmem:[%s12957_s30 + $0x218] sm:$0xff] }
 0x183   :  { %v8034_v59 = vpop.eup %8033  ;;  %v9132_v11 = vpack.c.bf16 %v8032_v23, %v8028_v39  ;;  %v1713_v37 = vunpack.c.h.s8.bf16 %v1573_v50  ;;  %v1718_v38 = vunpack.c.l.s8.bf16 %v1578_v34  ;;  %v1588_v39 = vld [vmem:[%s12957_s30 + $0x1c8] sm:$0xff]  ;;  %v1722_v56 = vunpack.c.h.s8.bf16 %v1578_v34  ;;  %v1582_v23 = vld [vmem:[%s12957_s30 + $0x198] sm:$0xff] }
 0x184   :  { %v1520_v25 = vpack.c.bf16 %v8034_v59, %v8030_v21  ;;  %1899 = vmatpush1.bf16.msra.mxu1 %v1703_v32  ;;  %v1735_v32 = vunpack.c.h.s8.bf16 %v1583_v33  ;;  %v1717_v21 = vunpack.c.l.s8.bf16 %v1577_v30  ;;  %v1721_v59 = vunpack.c.h.s8.bf16 %v1577_v30 }
 0x185   :  { %2067 = vmatpush1.bf16.msra.mxu0 %v1685_v3  ;;  %1900 = vmatprep.subr.bf16.mxu1 %v1708_v41  ;;  %v1740_v3 = vunpack.c.l.s8.bf16 %v1588_v39  ;;  %v1587_v41 = vld [vmem:[%s12957_s30 + $0x1c0] sm:$0xff]  ;;  %v1726_v48 = vunpack.c.l.s8.bf16 %v1582_v23  ;;  %v1747_v54 = vunpack.c.l.s8.bf16 %v1591_v18 }
 0x186   :  { %1871 = vmatprep.mubr.bf16.mxu1 %v1520_v25  ;;  %2068 = vmatprep.subr.bf16.mxu0 %v1690_v44  ;;  %v1739_v44 = vunpack.c.l.s8.bf16 %v1587_v41 }
 0x187   :  { %1872 = vmatmul.mubr.bf16.gmra.mrb[40].mxu1 %v9132_v11 }
 0x188   :  { %v8036_v19 = vpop.eup %8035  ;;  %1901 = vmatpush1.bf16.msra.mxu1 %v1707_v49  ;;  %v1592_v49 = vld [vmem:[%s12957_s30 + $0x1e8] sm:$0xff] }
 0x189   :  { %v8038_v55 = vpop.eup %8037  ;;  %2069 = vmatpush1.bf16.msra.mxu0 %v1689_v52  ;;  %1902 = vmatprep.subr.bf16.mxu1 %v1712_v60  ;;  %v1743_v52 = vunpack.c.h.s8.bf16 %v1587_v41 }
 0x18a   :  { %v8040_v29 = vpop.eup %8039  ;;  %2111 = vmatprep.subr.bf16.mxu0 %v1694_v51  ;;  %v1748_v51 = vunpack.c.l.s8.bf16 %v1592_v49 }
 0x18b   :  { %v8042_v10 = vpop.eup %8041  ;;  %v9147_v61 = vpack.c.bf16 %v8040_v29, %v8036_v19  ;;  %v1730_v19 = vunpack.c.h.s8.bf16 %v1582_v23  ;;  %v1585_v29 = vld [vmem:[%s12957_s30 + $0x1b0] sm:$0xff] }
 0x18c   :  { %2071 = vmatmul.mubr.bf16.vlgmr.msra.gmra.mrb[32].mxu0 %v9080_v28  ;;  %v1526_v1 = vpack.c.bf16 %v8042_v10, %v8038_v55  ;;  %1903 = vmatpush1.bf16.msra.mxu1 %v1711_v62  ;;  %v1580_v28 = vld [vmem:[%s12957_s30 + $0x188] sm:$0xff]  ;;  %v1586_v62 = vld [vmem:[%s12957_s30 + $0x1b8] sm:$0xff]  ;;  %v1751_v10 = vunpack.c.h.s8.bf16 %v1591_v18 }
 0x18d   :  { %2080 = vmatprep.mubr.bf16.mxu0 %v9115_v31  ;;  %2112 = vmatpush1.bf16.msra.mxu0 %v1693_v57  ;;  %v1724_v45 = vunpack.c.l.s8.bf16 %v1580_v28  ;;  %v1728_v22 = vunpack.c.h.s8.bf16 %v1580_v28  ;;  %v1584_v31 = vld [vmem:[%s12957_s30 + $0x1a8] sm:$0xff]  ;;  %v1752_v57 = vunpack.c.h.s8.bf16 %v1592_v49  ;;  %v1734_v46 = vunpack.c.l.s8.bf16 %v1586_v62  ;;  %v1594_v28 = vld [vmem:[%s12957_s30 + $0x1f8] sm:$0xff] }
 0x18e   :  { %1881 = vmatprep.mubr.bf16.mxu1 %v1526_v1  ;;  %2113 = vmatprep.subr.bf16.mxu0 %v1698_v53  ;;  %v1732_v15 = vunpack.c.l.s8.bf16 %v1584_v31  ;;  %v1736_v43 = vunpack.c.h.s8.bf16 %v1584_v31  ;;  %v9212_v53 = vld [vmem:[%s12957_s30 + $0x208] sm:$0xff] }
 0x18f   :  { %1882 = vmatmul.mubr.bf16.gmra.mrb[44].mxu1 %v9147_v61  ;;  %1904 = vmatprep.subr.bf16.mxu1 %v1716_v36  ;;  %v1756_v63 = vunpack.c.l.s8.bf16 %v9212_v53  ;;  %v1738_v36 = vunpack.c.h.s8.bf16 %v1586_v62 }
 0x190   :  { %1905 = vmatpush1.bf16.msra.mxu1 %v1715_v4  ;;  %v1737_v4 = vunpack.c.h.s8.bf16 %v1585_v29 }
 0x191   :  { %2114 = vmatpush1.bf16.msra.mxu0 %v1697_v27  ;;  %1906 = vmatprep.subr.bf16.mxu1 %v1720_v5  ;;  %v1589_v5 = vld [vmem:[%s12957_s30 + $0x1d0] sm:$0xff] }
 0x192   :  { %2115 = vmatprep.subr.bf16.mxu0 %v1702_v2  ;;  %v1741_v2 = vunpack.c.l.s8.bf16 %v1589_v5 }
 0x194   :  { %2081 = vmatmul.mubr.bf16.gmra.mrb[36].mxu0 %v9108_v47  ;;  %1907 = vmatpush1.bf16.msra.mxu1 %v1719_v7  ;;  %v1709_v47 = vunpack.c.l.s8.bf16 %v1573_v50  ;;  %v1745_v7 = vunpack.c.h.s8.bf16 %v1589_v5 }
 0x195   :  { %2090 = vmatprep.mubr.bf16.mxu0 %v1520_v25  ;;  %2116 = vmatpush1.bf16.msra.mxu0 %v1701_v14  ;;  %v1581_v25 = vld [vmem:[%s12957_s30 + $0x190] sm:$0xff]  ;;  %v1750_v14 = vunpack.c.l.s8.bf16 %v1594_v28 }
 0x196   :  { %2117 = vmatprep.subr.bf16.mxu0 %v1706_v16  ;;  %1908 = vmatprep.subr.bf16.mxu1 %v1724_v45  ;;  %v1725_v60 = vunpack.c.l.s8.bf16 %v1581_v25  ;;  %v1729_v55 = vunpack.c.h.s8.bf16 %v1581_v25  ;;  %v1749_v16 = vunpack.c.l.s8.bf16 %v1593_v6  ;;  %v1754_v45 = vunpack.c.h.s8.bf16 %v1594_v28 }
 0x197   :  { %v1762_v28 = vunpack.c.h.s8.bf16 %v9230_v42 }
 0x198   :  { %1909 = vmatpush1.bf16.msra.mxu1 %v1723_v8  ;;  %v1753_v8 = vunpack.c.h.s8.bf16 %v1593_v6  ;;  %v9294_v6 = vld [vmem:[%s12957_s30 + $0x220] sm:$0xff] }
 0x199   :  { %2118 = vmatpush1.bf16.msra.mxu0 %v1705_v20  ;;  %1910 = vmatprep.subr.bf16.mxu1 %v1728_v22  ;;  %v1758_v20 = vunpack.c.l.s8.bf16 %v9230_v42  ;;  %v9234_v22 = vsub.s32 2, %v8986_v24 }
 0x19a   :  { %2119 = vmatprep.subr.bf16.mxu0 %v1710_v26  ;;  %v9237_v26 = vsub.s32 3, %v8986_v24 }
 0x19b   :  { %v9241_v50 = vrot.slane %v8994_v9, %v9234_v22 }
 0x19c   :  { %2091 = vmatmul.mubr.bf16.gmra.mrb[40].mxu0 %v9132_v11  ;;  %1911 = vmatpush1.bf16.msra.mxu1 %v1727_v12  ;;  %v1744_v11 = vunpack.c.h.s8.bf16 %v1588_v39  ;;  %v9245_v31 = vrot.slane %v8994_v9, %v9237_v26  ;;  %v9249_v12 = vrot.slane %v9008_v17, %v9234_v22  ;;  %v9253_v33 = vrot.slane %v9008_v17, %v9237_v26 }
 0x19d   :  { %2100 = vmatprep.mubr.bf16.mxu0 %v1526_v1  ;;  %2120 = vmatpush1.bf16.msra.mxu0 %v1709_v47  ;;  %v1590_v1 = vld [vmem:[%s12957_s30 + $0x1d8] sm:$0xff] }
 0x19e   :  { %2121 = vmatprep.subr.bf16.mxu0 %v1714_v58  ;;  %1912 = vmatprep.subr.bf16.mxu1 %v1732_v15  ;;  %v1742_v27 = vunpack.c.l.s8.bf16 %v1590_v1  ;;  %v1746_v40 = vunpack.c.h.s8.bf16 %v1590_v1 }
 0x1a0   :  { %1913 = vmatpush1.bf16.msra.mxu1 %v1731_v35 }
 0x1a1   :  { %2122 = vmatpush1.bf16.msra.mxu0 %v1713_v37  ;;  %1914 = vmatprep.subr.bf16.mxu1 %v1736_v43 }
 0x1a2   :  { %2123 = vmatprep.subr.bf16.mxu0 %v1718_v38 }
 0x1a4   :  { %2101 = vmatmul.mubr.bf16.gmra.mrb[44].mxu0 %v9147_v61  ;;  %1915 = vmatpush1.bf16.msra.mxu1 %v1735_v32  ;;  %v1733_v61 = vunpack.c.l.s8.bf16 %v1585_v29 }
 0x1a5   :  { %2124 = vmatpush1.bf16.msra.mxu0 %v1717_v21  ;;  %1916 = vmatprep.subr.bf16.mxu1 %v1740_v3 }
 0x1a6   :  { %2125 = vmatprep.subr.bf16.mxu0 %v1722_v56 }
 0x1a8   :  { %1917 = vmatpush1.bf16.msra.mxu1 %v1739_v44 }
 0x1a9   :  { %2126 = vmatpush1.bf16.msra.mxu0 %v1721_v59  ;;  %1918 = vmatprep.subr.bf16.mxu1 %v1744_v11 }
 0x1aa   :  { %2127 = vmatprep.subr.bf16.mxu0 %v1726_v48 }
 0x1ac   :  { %1919 = vmatpush1.bf16.msra.mxu1 %v1743_v52 }
 0x1ad   :  { %2128 = vmatpush1.bf16.msra.mxu0 %v1725_v60  ;;  %1920 = vmatprep.subr.bf16.mxu1 %v1748_v51  ;;  %v1595_v60 = vld [vmem:[%s12957_s30 + $0x200] sm:$0xff] }
 0x1ae   :  { %2129 = vmatprep.subr.bf16.mxu0 %v1730_v19  ;;  %v1597_v19 = vld [vmem:[%s12957_s30 + $0x210] sm:$0xff] }
 0x1b0   :  { %1921 = vmatpush1.bf16.msra.mxu1 %v1747_v54 }
 0x1b1   :  { %2130 = vmatpush1.bf16.msra.mxu0 %v1729_v55  ;;  %1922 = vmatprep.subr.bf16.mxu1 %v1752_v57 }
 0x1b2   :  { %2131 = vmatprep.subr.bf16.mxu0 %v1734_v46 }
 0x1b4   :  { %1923 = vmatpush1.bf16.msra.mxu1 %v1751_v10 }
 0x1b5   :  { %2132 = vmatpush1.bf16.msra.mxu0 %v1733_v61  ;;  %1965 = vmatprep.subr.bf16.mxu1 %v1756_v63  ;;  %v1755_v61 = vunpack.c.l.s8.bf16 %v1595_v60 }
 0x1b6   :  { %2133 = vmatprep.subr.bf16.mxu0 %v1738_v36 }
 0x1b9   :  { %2134 = vmatpush1.bf16.msra.mxu0 %v1737_v4 }
 0x1ba   :  { %2135 = vmatprep.subr.bf16.mxu0 %v1742_v27  ;;  %v1757_v27 = vunpack.c.l.s8.bf16 %v1597_v19 }
 0x1bd   :  { %2136 = vmatpush1.bf16.msra.mxu0 %v1741_v2 }
 0x1be   :  { %2137 = vmatprep.subr.bf16.mxu0 %v1746_v40  ;;  %v1760_v40 = vunpack.c.h.s8.bf16 %v9212_v53  ;;  %v1602_v53 = vld [vmem:[%s12957_s30 + $0x238] sm:$0xff] }
 0x1c1   :  { %2138 = vmatpush1.bf16.msra.mxu0 %v1745_v7  ;;  %v9288_v7 = vld [vmem:[%s12957_s30 + $0x228] sm:$0xff] }
 0x1c2   :  { %2139 = vmatprep.subr.bf16.mxu0 %v1750_v14 }
 0x1c5   :  { %2140 = vmatpush1.bf16.msra.mxu0 %v1749_v16 }
 0x1c6   :  { %2141 = vmatprep.subr.bf16.mxu0 %v1754_v45  ;;  %v9303_v45 = vld [vmem:[%s12957_s30 + $0x230] sm:$0xff] }
 0x1c9   :  { %2142 = vmatpush1.bf16.msra.mxu0 %v1753_v8  ;;  %v1759_v8 = vunpack.c.h.s8.bf16 %v1595_v60 }
 0x1ca   :  { %2184 = vmatprep.subr.bf16.mxu0 %v1758_v20  ;;  %v1761_v20 = vunpack.c.h.s8.bf16 %v1597_v19  ;;  %v1605_v19 = vld [vmem:[%s12957_s30 + $0x250] sm:$0xff] }
 0x1de   :  { %v1041_v47 = vpop.f32.mrb[16].mxu1 }
 0x1df   :  { %v1333_v58 = vmul.f32 %v9241_v50, %v1041_v47  ;;  %v1043_v15 = vpop.f32.mrb[17].mxu1 }
 0x1e0   :  { %v1334_v34 = vmul.f32 %v9245_v31, %v1043_v15  ;;  %v1045_v35 = vpop.f32.mrb[18].mxu1  ;;  %v1764_v15 = vunpack.c.l.s8.bf16 %v9288_v7 }
 0x1e1   :  { %v1413_v37 = vadd.f32 %v9249_v12, %v1333_v58  ;;  %v1339_v9 = vmul.f32 %v9241_v50, %v1045_v35  ;;  %v1047_v43 = vpop.f32.mrb[19].mxu1 }
 0x1e2   :  { %v1414_v38 = vadd.f32 %v9253_v33, %v1334_v34  ;;  %v1340_v30 = vmul.f32 %v9245_v31, %v1047_v43  ;;  %v1766_v34 = vunpack.c.l.s8.bf16 %v1602_v53 }
 0x1e3   :  { %8043 = vtanh.f32 %v1413_v37  ;;  %v1419_v39 = vadd.f32 %v9249_v12, %v1339_v9 }
 0x1e4   :  { %8045 = vtanh.f32 %v1414_v38  ;;  %v1420_v17 = vadd.f32 %v9253_v33, %v1340_v30 }
 0x1e5   :  { %8047 = vtanh.f32 %v1419_v39 }
 0x1e6   :  { %8049 = vtanh.f32 %v1420_v17  ;;  %v1051_v32 = vpop.f32.mrb[20].mxu1  ;;  %v1763_v17 = vunpack.c.l.s8.bf16 %v9294_v6 }
 0x1e7   :  { %v1345_v21 = vmul.f32 %v9241_v50, %v1051_v32  ;;  %v1053_v3 = vpop.f32.mrb[21].mxu1 }
 0x1e8   :  { %v1346_v41 = vmul.f32 %v9245_v31, %v1053_v3  ;;  %v1055_v56 = vpop.f32.mrb[22].mxu1 }
 0x1e9   :  { %v1425_v23 = vadd.f32 %v9249_v12, %v1345_v21  ;;  %v1351_v44 = vmul.f32 %v9241_v50, %v1055_v56  ;;  %v1057_v59 = vpop.f32.mrb[23].mxu1  ;;  %v1765_v56 = vunpack.c.l.s8.bf16 %v9303_v45 }
 0x1ea   :  { %v1426_v11 = vadd.f32 %v9253_v33, %v1346_v41  ;;  %v1352_v48 = vmul.f32 %v9245_v31, %v1057_v59  ;;  %v1768_v59 = vunpack.c.h.s8.bf16 %v9288_v7  ;;  %v1609_v7 = vld [vmem:[%s12957_s30 + $0x270] sm:$0xff] }
 0x1eb   :  { %8051 = vtanh.f32 %v1425_v23  ;;  %v1431_v25 = vadd.f32 %v9249_v12, %v1351_v44 }
 0x1ec   :  { %8053 = vtanh.f32 %v1426_v11  ;;  %v1432_v49 = vadd.f32 %v9253_v33, %v1352_v48  ;;  %v1770_v11 = vunpack.c.h.s8.bf16 %v1602_v53 }
 0x1ed   :  { %v8044_v52 = vpop.eup %8043  ;;  %8055 = vtanh.f32 %v1431_v25  ;;  %v1606_v25 = vld [vmem:[%s12957_s30 + $0x258] sm:$0xff] }
 0x1ee   :  { %v8046_v51 = vpop.eup %8045  ;;  %8057 = vtanh.f32 %v1432_v49  ;;  %v1061_v18 = vpop.f32.mrb[24].mxu1 }
 0x1ef   :  { %v8048_v62 = vpop.eup %8047  ;;  %v1357_v54 = vmul.f32 %v9241_v50, %v1061_v18  ;;  %v1063_v55 = vpop.f32.mrb[25].mxu1  ;;  %v1603_v18 = vld [vmem:[%s12957_s30 + $0x240] sm:$0xff] }
 0x1f0   :  { %v8050_v57 = vpop.eup %8049  ;;  %v1358_v46 = vmul.f32 %v9245_v31, %v1063_v55  ;;  %v1065_v29 = vpop.f32.mrb[26].mxu1  ;;  %v1509_v10 = vpack.c.bf16 %v8048_v62, %v8044_v52  ;;  %v1769_v52 = vunpack.c.h.s8.bf16 %v9303_v45 }
 0x1f1   :  { %v1437_v63 = vadd.f32 %v9249_v12, %v1357_v54  ;;  %v1363_v36 = vmul.f32 %v9241_v50, %v1065_v29  ;;  %v1067_v1 = vpop.f32.mrb[27].mxu1  ;;  %v1510_v4 = vpack.c.bf16 %v8050_v57, %v8046_v51  ;;  %v1773_v29 = vunpack.c.l.s8.bf16 %v1605_v19 }
 0x1f2   :  { %v1438_v5 = vadd.f32 %v9253_v33, %v1358_v46  ;;  %v1364_v2 = vmul.f32 %v9245_v31, %v1067_v1  ;;  %v1771_v46 = vunpack.c.l.s8.bf16 %v1603_v18 }
 0x1f3   :  { %8059 = vtanh.f32 %v1437_v63  ;;  %v1443_v14 = vadd.f32 %v9249_v12, %v1363_v36  ;;  %1924 = vmatprep.mubr.bf16.mxu1 %v1510_v4  ;;  %2143 = vmatprep.mubr.bf16.mxu0 %v1510_v4  ;;  %v1608_v63 = vld [vmem:[%s12957_s30 + $0x268] sm:$0xff]  ;;  %v1610_v36 = vld [vmem:[%s12957_s30 + $0x278] sm:$0xff]  ;;  %v1775_v4 = vunpack.c.h.s8.bf16 %v1603_v18 }
 0x1f4   :  { %8061 = vtanh.f32 %v1438_v5  ;;  %v1444_v16 = vadd.f32 %v9253_v33, %v1364_v2  ;;  %1925 = vmatmul.mubr.bf16.vlgmr.msra.gmra.mrb[32].mxu1 %v1509_v10  ;;  %2144 = vmatmul.mubr.bf16.vlgmr.msra.gmra.mrb[32].mxu0 %v1509_v10  ;;  %v1780_v2 = vunpack.c.l.s8.bf16 %v1608_v63 }
 0x1f5   :  { %v8052_v42 = vpop.eup %8051  ;;  %8063 = vtanh.f32 %v1443_v14  ;;  %1966 = vmatpush1.bf16.msra.mxu1 %v1755_v61  ;;  %2185 = vmatpush1.bf16.msra.mxu0 %v1757_v27  ;;  %v1778_v61 = vunpack.c.h.s8.bf16 %v1606_v25  ;;  %v1777_v27 = vunpack.c.h.s8.bf16 %v1605_v19 }
 0x1f6   :  { %v8054_v47 = vpop.eup %8053  ;;  %8065 = vtanh.f32 %v1444_v16  ;;  %v1071_v58 = vpop.f32.mrb[28].mxu1  ;;  %1967 = vmatprep.subr.bf16.mxu1 %v1760_v40  ;;  %2186 = vmatprep.subr.bf16.mxu0 %v1762_v28  ;;  %v1607_v40 = vld [vmem:[%s12957_s30 + $0x260] sm:$0xff]  ;;  %v1782_v28 = vunpack.c.l.s8.bf16 %v1610_v36 }
 0x1f7   :  { %v8056_v35 = vpop.eup %8055  ;;  %v1369_v37 = vmul.f32 %v9241_v50, %v1071_v58  ;;  %v1073_v9 = vpop.f32.mrb[29].mxu1  ;;  %v1779_v45 = vunpack.c.l.s8.bf16 %v1607_v40  ;;  %v1614_v58 = vld [vmem:[%s12957_s30 + $0x298] sm:$0xff] }
 0x1f8   :  { %v8058_v43 = vpop.eup %8057  ;;  %v1370_v38 = vmul.f32 %v9245_v31, %v1073_v9  ;;  %v1075_v30 = vpop.f32.mrb[30].mxu1  ;;  %v1515_v39 = vpack.c.bf16 %v8056_v35, %v8052_v42  ;;  %v1781_v42 = vunpack.c.l.s8.bf16 %v1609_v7  ;;  %v1790_v9 = vunpack.c.l.s8.bf16 %v1614_v58 }
 0x1f9   :  { %v1449_v32 = vadd.f32 %v9249_v12, %v1369_v37  ;;  %v1375_v21 = vmul.f32 %v9241_v50, %v1075_v30  ;;  %1968 = vmatpush1.bf16.msra.mxu1 %v1759_v8  ;;  %v1077_v3 = vpop.f32.mrb[31].mxu1  ;;  %2187 = vmatpush1.bf16.msra.mxu0 %v1761_v20  ;;  %v1516_v41 = vpack.c.bf16 %v8058_v43, %v8054_v47  ;;  %v1604_v50 = vld [vmem:[%s12957_s30 + $0x248] sm:$0xff]  ;;  %v1784_v8 = vunpack.c.h.s8.bf16 %v1608_v63  ;;  %v1611_v37 = vld [vmem:[%s12957_s30 + $0x280] sm:$0xff]  ;;  %v1613_v43 = vld [vmem:[%s12957_s30 + $0x290] sm:$0xff] }
 0x1fa   :  { %v1450_v23 = vadd.f32 %v9253_v33, %v1370_v38  ;;  %v1376_v44 = vmul.f32 %v9245_v31, %v1077_v3  ;;  %1969 = vmatprep.subr.bf16.mxu1 %v1764_v15  ;;  %2188 = vmatprep.subr.bf16.mxu0 %v1766_v34  ;;  %v1772_v51 = vunpack.c.l.s8.bf16 %v1604_v50  ;;  %v1776_v10 = vunpack.c.h.s8.bf16 %v1604_v50  ;;  %v1612_v47 = vld [vmem:[%s12957_s30 + $0x288] sm:$0xff] }
 0x1fb   :  { %8067 = vtanh.f32 %v1449_v32  ;;  %v1455_v48 = vadd.f32 %v9249_v12, %v1375_v21  ;;  %1934 = vmatprep.mubr.bf16.mxu1 %v1516_v41  ;;  %2153 = vmatprep.mubr.bf16.mxu0 %v1516_v41  ;;  %v1767_v12 = vunpack.c.h.s8.bf16 %v9294_v6  ;;  %v1786_v20 = vunpack.c.h.s8.bf16 %v1610_v36  ;;  %v1616_v32 = vld [vmem:[%s12957_s30 + $0x2a8] sm:$0xff]  ;;  %v1618_v21 = vld [vmem:[%s12957_s30 + $0x2b8] sm:$0xff] }
 0x1fc   :  { %8069 = vtanh.f32 %v1450_v23  ;;  %v1456_v31 = vadd.f32 %v9253_v33, %v1376_v44  ;;  %1935 = vmatmul.mubr.bf16.gmra.mrb[36].mxu1 %v1515_v39  ;;  %2154 = vmatmul.mubr.bf16.gmra.mrb[36].mxu0 %v1515_v39  ;;  %v1774_v33 = vunpack.c.l.s8.bf16 %v1606_v25  ;;  %v1783_v15 = vunpack.c.h.s8.bf16 %v1607_v40  ;;  %v1615_v23 = vld [vmem:[%s12957_s30 + $0x2a0] sm:$0xff] }
 0x1fd   :  { %v8060_v49 = vpop.eup %8059  ;;  %8071 = vtanh.f32 %v1455_v48  ;;  %1970 = vmatpush1.bf16.msra.mxu1 %v1763_v17  ;;  %2189 = vmatpush1.bf16.msra.mxu0 %v1765_v56  ;;  %v1785_v34 = vunpack.c.h.s8.bf16 %v1609_v7  ;;  %v1788_v35 = vunpack.c.l.s8.bf16 %v1612_v47  ;;  %v1787_v38 = vunpack.c.l.s8.bf16 %v1611_v37 }
 0x1fe   :  { %v8062_v60 = vpop.eup %8061  ;;  %8073 = vtanh.f32 %v1456_v31  ;;  %1971 = vmatprep.subr.bf16.mxu1 %v1768_v59  ;;  %2190 = vmatprep.subr.bf16.mxu0 %v1770_v11  ;;  %v1789_v30 = vunpack.c.l.s8.bf16 %v1613_v43  ;;  %v1792_v39 = vunpack.c.h.s8.bf16 %v1612_v47  ;;  %v1794_v17 = vunpack.c.h.s8.bf16 %v1614_v58  ;;  %v1617_v59 = vld [vmem:[%s12957_s30 + $0x2b0] sm:$0xff] }
 0x1ff   :  { %v8064_v62 = vpop.eup %8063  ;;  %v1791_v3 = vunpack.c.h.s8.bf16 %v1611_v37  ;;  %v1793_v41 = vunpack.c.h.s8.bf16 %v1613_v43  ;;  %v1796_v56 = vunpack.c.l.s8.bf16 %v1616_v32  ;;  %v1798_v44 = vunpack.c.l.s8.bf16 %v1618_v21  ;;  %v1625_v37 = vld [vmem:[%s12957_s30 + $0x2f0] sm:$0xff] }
 0x200   :  { %v8066_v54 = vpop.eup %8065  ;;  %v1521_v55 = vpack.c.bf16 %v8064_v62, %v8060_v49  ;;  %v9368_v11 = vsub.s32 4, %v8986_v24  ;;  %v9371_v48 = vsub.s32 5, %v8986_v24  ;;  %v1795_v50 = vunpack.c.l.s8.bf16 %v1615_v23 }
 0x201   :  { %1972 = vmatpush1.bf16.msra.mxu1 %v1767_v12  ;;  %2191 = vmatpush1.bf16.msra.mxu0 %v1769_v52  ;;  %v1522_v57 = vpack.c.bf16 %v8066_v54, %v8062_v60  ;;  %v1797_v25 = vunpack.c.l.s8.bf16 %v1617_v59  ;;  %v1800_v31 = vunpack.c.h.s8.bf16 %v1616_v32  ;;  %v1802_v49 = vunpack.c.h.s8.bf16 %v1618_v21  ;;  %v8123_v12 = vld [vmem:[%s12960_s0] sm:$0x3f]  ;;  %v1620_v60 = vld [vmem:[%s12957_s30 + $0x2c8] sm:$0xff] }
 0x202   :  { %1973 = vmatprep.subr.bf16.mxu1 %v1772_v51  ;;  %2192 = vmatprep.subr.bf16.mxu0 %v1774_v33  ;;  %12963 = vst [vmem:[#allocation5_spill] sm:$0xff] %v9368_v11  ;;  %12964 = vst [vmem:[#allocation6_spill] sm:$0xff] %v9371_v48  ;;  %v9377_v52 = vrot.slane %v8123_v12, %v9368_v11  ;;  %v1622_v51 = vld [vmem:[%s12957_s30 + $0x2d8] sm:$0xff]  ;;  %v9386_v18 = vrot.slane %v8123_v12, %v9371_v48  ;;  %v8124_v33 = vld [vmem:[%s12962_s26] sm:$0x3f]  ;;  %v1799_v62 = vunpack.c.h.s8.bf16 %v1615_v23 }
 0x203   :  { %1944 = vmatprep.mubr.bf16.mxu1 %v1522_v57  ;;  %2163 = vmatprep.mubr.bf16.mxu0 %v1522_v57  ;;  %v9392_v19 = vrot.slane %v8124_v33, %v9368_v11  ;;  %v1801_v54 = vunpack.c.h.s8.bf16 %v1617_v59  ;;  %v9395_v57 = vrot.slane %v8124_v33, %v9371_v48  ;;  %v1817_v12 = vunpack.c.h.s8.bf16 %v1625_v37 }
 0x204   :  { %1945 = vmatmul.mubr.bf16.gmra.mrb[40].mxu1 %v1521_v55  ;;  %2164 = vmatmul.mubr.bf16.gmra.mrb[40].mxu0 %v1521_v55 }
 0x205   :  { %v8068_v1 = vpop.eup %8067  ;;  %1974 = vmatpush1.bf16.msra.mxu1 %v1771_v46  ;;  %2193 = vmatpush1.bf16.msra.mxu0 %v1773_v29  ;;  %v1804_v46 = vunpack.c.l.s8.bf16 %v1620_v60  ;;  %v1619_v29 = vld [vmem:[%s12957_s30 + $0x2c0] sm:$0xff] }
 0x206   :  { %v8070_v5 = vpop.eup %8069  ;;  %1975 = vmatprep.subr.bf16.mxu1 %v1776_v10  ;;  %2194 = vmatprep.subr.bf16.mxu0 %v1778_v61  ;;  %v1806_v10 = vunpack.c.l.s8.bf16 %v1622_v51  ;;  %v1621_v61 = vld [vmem:[%s12957_s30 + $0x2d0] sm:$0xff]  ;;  %v1803_v40 = vunpack.c.l.s8.bf16 %v1619_v29 }
 0x207   :  { %v8072_v14 = vpop.eup %8071  ;;  %v1809_v47 = vunpack.c.h.s8.bf16 %v1621_v61 }
 0x208   :  { %v8074_v6 = vpop.eup %8073  ;;  %v1527_v53 = vpack.c.bf16 %v8072_v14, %v8068_v1 }
 0x209   :  { %1976 = vmatpush1.bf16.msra.mxu1 %v1775_v4  ;;  %2195 = vmatpush1.bf16.msra.mxu0 %v1777_v27  ;;  %v1528_v16 = vpack.c.bf16 %v8074_v6, %v8070_v5  ;;  %v1808_v6 = vunpack.c.h.s8.bf16 %v1620_v60 }
 0x20a   :  { %1977 = vmatprep.subr.bf16.mxu1 %v1780_v2  ;;  %2196 = vmatprep.subr.bf16.mxu0 %v1782_v28  ;;  %v1805_v28 = vunpack.c.l.s8.bf16 %v1621_v61 }
 0x20b   :  { %1954 = vmatprep.mubr.bf16.mxu1 %v1528_v16  ;;  %2173 = vmatprep.mubr.bf16.mxu0 %v1528_v16 }
 0x20c   :  { %1955 = vmatmul.mubr.bf16.gmra.mrb[44].mxu1 %v1527_v53  ;;  %2174 = vmatmul.mubr.bf16.gmra.mrb[44].mxu0 %v1527_v53  ;;  %v1810_v53 = vunpack.c.h.s8.bf16 %v1622_v51 }
 0x20d   :  { %1978 = vmatpush1.bf16.msra.mxu1 %v1779_v45  ;;  %2197 = vmatpush1.bf16.msra.mxu0 %v1781_v42  ;;  %v1624_v45 = vld [vmem:[%s12957_s30 + $0x2e8] sm:$0xff]  ;;  %v1626_v42 = vld [vmem:[%s12957_s30 + $0x2f8] sm:$0xff] }
 0x20e   :  { %1979 = vmatprep.subr.bf16.mxu1 %v1784_v8  ;;  %2198 = vmatprep.subr.bf16.mxu0 %v1786_v20  ;;  %v1807_v20 = vunpack.c.h.s8.bf16 %v1619_v29  ;;  %v1816_v23 = vunpack.c.h.s8.bf16 %v1624_v45 }
 0x211   :  { %1980 = vmatpush1.bf16.msra.mxu1 %v1783_v15  ;;  %2199 = vmatpush1.bf16.msra.mxu0 %v1785_v34  ;;  %v1812_v15 = vunpack.c.l.s8.bf16 %v1624_v45  ;;  %v1623_v34 = vld [vmem:[%s12957_s30 + $0x2e0] sm:$0xff] }
 0x212   :  { %1981 = vmatprep.subr.bf16.mxu1 %v1788_v35  ;;  %2200 = vmatprep.subr.bf16.mxu0 %v1790_v9  ;;  %v1814_v35 = vunpack.c.l.s8.bf16 %v1626_v42  ;;  %v1811_v21 = vunpack.c.l.s8.bf16 %v1623_v34 }
 0x215   :  { %1982 = vmatpush1.bf16.msra.mxu1 %v1787_v38  ;;  %2201 = vmatpush1.bf16.msra.mxu0 %v1789_v30 }
 0x216   :  { %1983 = vmatprep.subr.bf16.mxu1 %v1792_v39  ;;  %2202 = vmatprep.subr.bf16.mxu0 %v1794_v17 }
 0x219   :  { %1984 = vmatpush1.bf16.msra.mxu1 %v1791_v3  ;;  %2203 = vmatpush1.bf16.msra.mxu0 %v1793_v41  ;;  %v1813_v3 = vunpack.c.l.s8.bf16 %v1625_v37 }
 0x21a   :  { %1985 = vmatprep.subr.bf16.mxu1 %v1796_v56  ;;  %2204 = vmatprep.subr.bf16.mxu0 %v1798_v44  ;;  %v1818_v44 = vunpack.c.h.s8.bf16 %v1626_v42 }
 0x21d   :  { %1986 = vmatpush1.bf16.msra.mxu1 %v1795_v50  ;;  %2205 = vmatpush1.bf16.msra.mxu0 %v1797_v25  ;;  %v2414_v50 = vld [vmem:[%s12895_s6 + $0x8] sm:$0xff] }
 0x21e   :  { %1987 = vmatprep.subr.bf16.mxu1 %v1800_v31  ;;  %2206 = vmatprep.subr.bf16.mxu0 %v1802_v49  ;;  %v1815_v49 = vunpack.c.h.s8.bf16 %v1623_v34  ;;  %v2446_v33 = vunpack.c.l.s8.bf16 %v2414_v50 }
 0x21f   :  { %v1260_v55 = vpop.f32.mrb[16].mxu0 }
 0x220   :  { %v1335_v63 = vmul.f32 %v9377_v52, %v1260_v55  ;;  %v1262_v36 = vpop.f32.mrb[17].mxu0 }
 0x221   :  { %v1336_v1 = vmul.f32 %v9386_v18, %v1262_v36  ;;  %v1264_v4 = vpop.f32.mrb[18].mxu0  ;;  %1988 = vmatpush1.bf16.msra.mxu1 %v1799_v62  ;;  %2207 = vmatpush1.bf16.msra.mxu0 %v1801_v54  ;;  %v2413_v62 = vld [vmem:[%s12895_s6] sm:$0xff] }
 0x222   :  { %v1415_v27 = vadd.f32 %v9392_v19, %v1335_v63  ;;  %v1341_v5 = vmul.f32 %v9377_v52, %v1264_v4  ;;  %v1266_v2 = vpop.f32.mrb[19].mxu0  ;;  %1989 = vmatprep.subr.bf16.mxu1 %v1804_v46  ;;  %2208 = vmatprep.subr.bf16.mxu0 %v1806_v10 }
 0x223   :  { %v1416_v7 = vadd.f32 %v9395_v57, %v1336_v1  ;;  %v1342_v14 = vmul.f32 %v9386_v18, %v1266_v2 }
 0x224   :  { %8075 = vtanh.f32 %v1415_v27  ;;  %v1421_v16 = vadd.f32 %v9392_v19, %v1341_v5  ;;  %v2445_v5 = vunpack.c.l.s8.bf16 %v2413_v62 }
 0x225   :  { %8077 = vtanh.f32 %v1416_v7  ;;  %v1422_v8 = vadd.f32 %v9395_v57, %v1342_v14  ;;  %1990 = vmatpush1.bf16.msra.mxu1 %v1803_v40  ;;  %2209 = vmatpush1.bf16.msra.mxu0 %v1805_v28  ;;  %v2448_v28 = vunpack.c.h.s8.bf16 %v2414_v50  ;;  %v2416_v14 = vld [vmem:[%s12895_s6 + $0x18] sm:$0xff] }
 0x226   :  { %8079 = vtanh.f32 %v1421_v16  ;;  %1991 = vmatprep.subr.bf16.mxu1 %v1808_v6  ;;  %2210 = vmatprep.subr.bf16.mxu0 %v1810_v53  ;;  %v2447_v16 = vunpack.c.h.s8.bf16 %v2413_v62 }
 0x227   :  { %8081 = vtanh.f32 %v1422_v8  ;;  %v1270_v58 = vpop.f32.mrb[20].mxu0  ;;  %v2450_v8 = vunpack.c.l.s8.bf16 %v2416_v14 }
 0x228   :  { %v1347_v9 = vmul.f32 %v9377_v52, %v1270_v58  ;;  %v1272_v43 = vpop.f32.mrb[21].mxu0 }
 0x229   :  { %v1348_v38 = vmul.f32 %v9386_v18, %v1272_v43  ;;  %v1274_v30 = vpop.f32.mrb[22].mxu0  ;;  %1992 = vmatpush1.bf16.msra.mxu1 %v1807_v20  ;;  %2211 = vmatpush1.bf16.msra.mxu0 %v1809_v47  ;;  %v2415_v20 = vld [vmem:[%s12895_s6 + $0x10] sm:$0xff] }
 0x22a   :  { %v1427_v39 = vadd.f32 %v9392_v19, %v1347_v9  ;;  %v1353_v17 = vmul.f32 %v9377_v52, %v1274_v30  ;;  %v1276_v32 = vpop.f32.mrb[23].mxu0  ;;  %1993 = vmatprep.subr.bf16.mxu1 %v1812_v15  ;;  %2212 = vmatprep.subr.bf16.mxu0 %v1814_v35 }
 0x22b   :  { %v1428_v41 = vadd.f32 %v9395_v57, %v1348_v38  ;;  %v1354_v56 = vmul.f32 %v9386_v18, %v1276_v32 }
 0x22c   :  { %8083 = vtanh.f32 %v1427_v39  ;;  %v1433_v59 = vadd.f32 %v9392_v19, %v1353_v17  ;;  %v2449_v17 = vunpack.c.l.s8.bf16 %v2415_v20 }
 0x22d   :  { %8085 = vtanh.f32 %v1428_v41  ;;  %v1434_v25 = vadd.f32 %v9395_v57, %v1354_v56  ;;  %1994 = vmatpush1.bf16.msra.mxu1 %v1811_v21  ;;  %2213 = vmatpush1.bf16.msra.mxu0 %v1813_v3  ;;  %v2452_v3 = vunpack.c.h.s8.bf16 %v2416_v14  ;;  %v2418_v56 = vld [vmem:[%s12895_s6 + $0x28] sm:$0xff] }
 0x22e   :  { %v8076_v31 = vpop.eup %8075  ;;  %8087 = vtanh.f32 %v1433_v59  ;;  %1995 = vmatprep.subr.bf16.mxu1 %v1816_v23  ;;  %2214 = vmatprep.subr.bf16.mxu0 %v1818_v44  ;;  %v2454_v59 = vunpack.c.l.s8.bf16 %v2418_v56 }
 0x22f   :  { %v8078_v60 = vpop.eup %8077  ;;  %8089 = vtanh.f32 %v1434_v25  ;;  %v1280_v51 = vpop.f32.mrb[24].mxu0 }
 0x230   :  { %v8080_v54 = vpop.eup %8079  ;;  %v1359_v55 = vmul.f32 %v9377_v52, %v1280_v51  ;;  %v1282_v46 = vpop.f32.mrb[25].mxu0 }
 0x231   :  { %v8082_v29 = vpop.eup %8081  ;;  %v1360_v10 = vmul.f32 %v9386_v18, %v1282_v46  ;;  %v1284_v61 = vpop.f32.mrb[26].mxu0  ;;  %v1511_v63 = vpack.c.bf16 %v8080_v54, %v8076_v31  ;;  %1996 = vmatpush1.bf16.msra.mxu1 %v1815_v49  ;;  %2215 = vmatpush1.bf16.msra.mxu0 %v1817_v12  ;;  %v2456_v12 = vunpack.c.h.s8.bf16 %v2418_v56 }
 0x232   :  { %v1439_v36 = vadd.f32 %v9392_v19, %v1359_v55  ;;  %v1365_v1 = vmul.f32 %v9377_v52, %v1284_v61  ;;  %v1286_v4 = vpop.f32.mrb[27].mxu0  ;;  %v1512_v27 = vpack.c.bf16 %v8082_v29, %v8078_v60  ;;  %2589 = vmatprep.subr.bf16.mxu1 %v2446_v33  ;;  %v2420_v60 = vld [vmem:[%s12895_s6 + $0x38] sm:$0xff]  ;;  %v2419_v55 = vld [vmem:[%s12895_s6 + $0x30] sm:$0xff] }
 0x233   :  { %v1440_v2 = vadd.f32 %v9395_v57, %v1360_v10  ;;  %v1366_v40 = vmul.f32 %v9386_v18, %v1286_v4  ;;  %v2458_v54 = vunpack.c.l.s8.bf16 %v2420_v60  ;;  %v2422_v4 = vld [vmem:[%s12895_s6 + $0x48] sm:$0xff] }
 0x234   :  { %8091 = vtanh.f32 %v1439_v36  ;;  %v1445_v7 = vadd.f32 %v9392_v19, %v1365_v1  ;;  %1997 = vmatprep.mubr.bf16.mxu1 %v1512_v27  ;;  %2216 = vmatprep.mubr.bf16.mxu0 %v1512_v27  ;;  %v7961_v36 = vld [vmem:[%s12894_s1 + $0x4] ss:$16 sps:$4 sm:$0xff]   ;;  %v2460_v1 = vunpack.c.h.s8.bf16 %v2420_v60  ;;  %v2459_v27 = vunpack.c.h.s8.bf16 %v2419_v55  ;;  %v7967_v60 = vld [vmem:[%s12894_s1 + $0x40] ss:$16 sps:$4 sm:$0xff]  }
 0x235   :  { %8093 = vtanh.f32 %v1440_v2  ;;  %v1446_v6 = vadd.f32 %v9395_v57, %v1366_v40  ;;  %1998 = vmatmul.mubr.bf16.vlgmr.msra.gmra.mrb[32].mxu1 %v1511_v63  ;;  %2217 = vmatmul.mubr.bf16.vlgmr.msra.gmra.mrb[32].mxu0 %v1511_v63  ;;  %v2457_v63 = vunpack.c.l.s8.bf16 %v2419_v55  ;;  %v2421_v2 = vld [vmem:[%s12895_s6 + $0x40] sm:$0xff] }
 0x236   :  { %v8084_v53 = vpop.eup %8083  ;;  %8095 = vtanh.f32 %v1445_v7  ;;  %2590 = vmatpush1.bf16.msra.mxu1 %v2445_v5  ;;  %v2462_v5 = vunpack.c.l.s8.bf16 %v2422_v4  ;;  %v2461_v40 = vunpack.c.l.s8.bf16 %v2421_v2  ;;  %v2424_v7 = vld [vmem:[%s12895_s6 + $0x58] sm:$0xff]  ;;  %v2463_v14 = vunpack.c.h.s8.bf16 %v2421_v2 }
 0x237   :  { %v8086_v45 = vpop.eup %8085  ;;  %8097 = vtanh.f32 %v1446_v6  ;;  %v1290_v42 = vpop.f32.mrb[28].mxu0  ;;  %2591 = vmatprep.subr.bf16.mxu1 %v2448_v28  ;;  %v2464_v28 = vunpack.c.h.s8.bf16 %v2422_v4  ;;  %v2466_v6 = vunpack.c.l.s8.bf16 %v2424_v7 }
 0x238   :  { %v8088_v47 = vpop.eup %8087  ;;  %v1371_v58 = vmul.f32 %v9377_v52, %v1290_v42  ;;  %v1292_v15 = vpop.f32.mrb[29].mxu0  ;;  %v2426_v42 = vld [vmem:[%s12895_s6 + $0x68] sm:$0xff] }
 0x239   :  { %v8090_v34 = vpop.eup %8089  ;;  %v1372_v35 = vmul.f32 %v9386_v18, %v1292_v15  ;;  %v1294_v37 = vpop.f32.mrb[30].mxu0  ;;  %v1517_v9 = vpack.c.bf16 %v8088_v47, %v8084_v53  ;;  %v2423_v53 = vld [vmem:[%s12895_s6 + $0x50] sm:$0xff]  ;;  %v2425_v47 = vld [vmem:[%s12895_s6 + $0x60] sm:$0xff]  ;;  %v2472_v15 = vunpack.c.h.s8.bf16 %v2426_v42 }
 0x23a   :  { %v1451_v43 = vadd.f32 %v9392_v19, %v1371_v58  ;;  %v1377_v38 = vmul.f32 %v9377_v52, %v1294_v37  ;;  %2592 = vmatpush1.bf16.msra.mxu1 %v2447_v16  ;;  %v1296_v30 = vpop.f32.mrb[31].mxu0  ;;  %v1518_v39 = vpack.c.bf16 %v8090_v34, %v8086_v45  ;;  %v2465_v16 = vunpack.c.l.s8.bf16 %v2423_v53  ;;  %v2428_v34 = vld [vmem:[%s12895_s6 + $0x78] sm:$0xff] }
 0x23b   :  { %v1452_v32 = vadd.f32 %v9395_v57, %v1372_v35  ;;  %v1378_v21 = vmul.f32 %v9386_v18, %v1296_v30  ;;  %2593 = vmatprep.subr.bf16.mxu1 %v2450_v8  ;;  %v2451_v18 = vunpack.c.h.s8.bf16 %v2415_v20  ;;  %v2468_v45 = vunpack.c.h.s8.bf16 %v2424_v7  ;;  %v2430_v30 = vld [vmem:[%s12895_s6 + $0x88] sm:$0xff] }
 0x23c   :  { %8099 = vtanh.f32 %v1451_v43  ;;  %v1457_v41 = vadd.f32 %v9392_v19, %v1377_v38  ;;  %2007 = vmatprep.mubr.bf16.mxu1 %v1518_v39  ;;  %2226 = vmatprep.mubr.bf16.mxu0 %v1518_v39  ;;  %v2417_v19 = vld [vmem:[%s12895_s6 + $0x20] sm:$0xff]  ;;  %v2467_v8 = vunpack.c.h.s8.bf16 %v2423_v53  ;;  %v2470_v20 = vunpack.c.l.s8.bf16 %v2426_v42 }
 0x23d   :  { %8101 = vtanh.f32 %v1452_v32  ;;  %v1458_v52 = vadd.f32 %v9395_v57, %v1378_v21  ;;  %2008 = vmatmul.mubr.bf16.gmra.mrb[36].mxu1 %v1517_v9  ;;  %2227 = vmatmul.mubr.bf16.gmra.mrb[36].mxu0 %v1517_v9  ;;  %v2453_v57 = vunpack.c.l.s8.bf16 %v2417_v19  ;;  %v2455_v33 = vunpack.c.h.s8.bf16 %v2417_v19  ;;  %v2427_v9 = vld [vmem:[%s12895_s6 + $0x70] sm:$0xff]  ;;  %v2429_v32 = vld [vmem:[%s12895_s6 + $0x80] sm:$0xff] }
 0x23e   :  { %v8092_v23 = vpop.eup %8091  ;;  %8103 = vtanh.f32 %v1457_v41  ;;  %2594 = vmatpush1.bf16.msra.mxu1 %v2449_v17  ;;  %v2469_v58 = vunpack.c.l.s8.bf16 %v2425_v47  ;;  %v2471_v35 = vunpack.c.h.s8.bf16 %v2425_v47  ;;  %v2474_v37 = vunpack.c.l.s8.bf16 %v2428_v34  ;;  %v7959_v21 = vld [vmem:[%s12894_s1] ss:$16 sps:$4 sm:$0xff]   ;;  %v7962_v41 = vld [vmem:[%s12894_s1 + $0x24] ss:$16 sps:$4 sm:$0xff]  }
 0x23f   :  { %v8094_v44 = vpop.eup %8093  ;;  %8105 = vtanh.f32 %v1458_v52  ;;  %2595 = vmatprep.subr.bf16.mxu1 %v2452_v3  ;;  %v2473_v43 = vunpack.c.l.s8.bf16 %v2427_v9  ;;  %v2476_v38 = vunpack.c.h.s8.bf16 %v2428_v34  ;;  %v2475_v39 = vunpack.c.h.s8.bf16 %v2427_v9  ;;  %v2432_v52 = vld [vmem:[%s12895_s6 + $0x98] sm:$0xff] }
 0x240   :  { %v8096_v50 = vpop.eup %8095  ;;  %v2478_v17 = vunpack.c.l.s8.bf16 %v2430_v30  ;;  %v2477_v3 = vunpack.c.l.s8.bf16 %v2429_v32  ;;  %v2480_v56 = vunpack.c.h.s8.bf16 %v2430_v30 }
 0x241   :  { %v8098_v25 = vpop.eup %8097  ;;  %v1523_v31 = vpack.c.bf16 %v8096_v50, %v8092_v23  ;;  %v2479_v23 = vunpack.c.h.s8.bf16 %v2429_v32  ;;  %v7965_v50 = vld [vmem:[%s12894_s1 + $0x44] ss:$16 sps:$4 sm:$0xff]   ;;  %v7974_v32 = vld [vmem:[%s12894_s1 + $0x2c] ss:$16 sps:$4 sm:$0xff]  }
 0x242   :  { %2596 = vmatpush1.bf16.msra.mxu1 %v2451_v18  ;;  %v1524_v49 = vpack.c.bf16 %v8098_v25, %v8094_v44  ;;  %v2482_v18 = vunpack.c.l.s8.bf16 %v2432_v52  ;;  %v2431_v44 = vld [vmem:[%s12895_s6 + $0x90] sm:$0xff]  ;;  %v2484_v25 = vunpack.c.h.s8.bf16 %v2432_v52  ;;  %v7977_v52 = vld [vmem:[%s12894_s1 + $0x4c] ss:$16 sps:$4 sm:$0xff]  }
 0x243   :  { %2597 = vmatprep.subr.bf16.mxu1 %v2454_v59  ;;  %v7964_v59 = vld [vmem:[%s12894_s1 + $0x20] ss:$16 sps:$4 sm:$0xff]   ;;  %v2481_v19 = vunpack.c.l.s8.bf16 %v2431_v44 }
 0x244   :  { %2017 = vmatprep.mubr.bf16.mxu1 %v1524_v49  ;;  %2236 = vmatprep.mubr.bf16.mxu0 %v1524_v49  ;;  %v2483_v49 = vunpack.c.h.s8.bf16 %v2431_v44 }
 0x245   :  { %2018 = vmatmul.mubr.bf16.gmra.mrb[40].mxu1 %v1523_v31  ;;  %2237 = vmatmul.mubr.bf16.gmra.mrb[40].mxu0 %v1523_v31  ;;  %v2434_v31 = vld [vmem:[%s12895_s6 + $0xa8] sm:$0xff] }
 0x246   :  { %v8100_v51 = vpop.eup %8099  ;;  %2598 = vmatpush1.bf16.msra.mxu1 %v2453_v57  ;;  %v2486_v57 = vunpack.c.l.s8.bf16 %v2434_v31 }
 0x247   :  { %v8102_v62 = vpop.eup %8101  ;;  %2599 = vmatprep.subr.bf16.mxu1 %v2456_v12  ;;  %v2433_v12 = vld [vmem:[%s12895_s6 + $0xa0] sm:$0xff] }
 0x248   :  { %v8104_v46 = vpop.eup %8103  ;;  %v2487_v55 = vunpack.c.h.s8.bf16 %v2433_v12 }
 0x249   :  { %v8106_v29 = vpop.eup %8105  ;;  %v1529_v10 = vpack.c.bf16 %v8104_v46, %v8100_v51  ;;  %v2485_v51 = vunpack.c.l.s8.bf16 %v2433_v12 }
 0x24a   :  { %2600 = vmatpush1.bf16.msra.mxu1 %v2455_v33  ;;  %v1530_v61 = vpack.c.bf16 %v8106_v29, %v8102_v62  ;;  %v7968_v33 = vld [vmem:[%s12894_s1 + $0x64] ss:$16 sps:$4 sm:$0xff]   ;;  %v2488_v62 = vunpack.c.h.s8.bf16 %v2434_v31 }
 0x24b   :  { %2601 = vmatprep.subr.bf16.mxu1 %v2458_v54  ;;  %v2436_v54 = vld [vmem:[%s12895_s6 + $0xb8] sm:$0xff]  ;;  %v2435_v29 = vld [vmem:[%s12895_s6 + $0xb0] sm:$0xff]  ;;  %v2969_v31 = vld [vmem:[%s12898_s8] sm:$0xff] }
 0x24c   :  { %2027 = vmatprep.mubr.bf16.mxu1 %v1530_v61  ;;  %2246 = vmatprep.mubr.bf16.mxu0 %v1530_v61  ;;  %v2490_v46 = vunpack.c.l.s8.bf16 %v2436_v54  ;;  %v2489_v61 = vunpack.c.l.s8.bf16 %v2435_v29  ;;  %v2491_v4 = vunpack.c.h.s8.bf16 %v2435_v29  ;;  %v2985_v12 = vunpack.c.l.s8.bf16 %v2969_v31 }
 0x24d   :  { %2028 = vmatmul.mubr.bf16.gmra.mrb[44].mxu1 %v1529_v10  ;;  %2247 = vmatmul.mubr.bf16.gmra.mrb[44].mxu0 %v1529_v10  ;;  %v7970_v10 = vld [vmem:[%s12894_s1 + $0x60] ss:$16 sps:$4 sm:$0xff]  }
 0x24e   :  { %2602 = vmatpush1.bf16.msra.mxu1 %v2457_v63  ;;  %2621 = vmatprep.mubr.bf16.mxu1 %v7961_v36  ;;  %v7973_v63 = vld [vmem:[%s12894_s1 + $0xc] ss:$16 sps:$4 sm:$0xff]   ;;  %v2492_v36 = vunpack.c.h.s8.bf16 %v2436_v54  ;;  %v2971_v54 = vld [vmem:[%s12898_s8 + $0x10] sm:$0xff] }
 0x24f   :  { %2603 = vmatprep.subr.bf16.mxu1 %v2460_v1  ;;  %v2438_v1 = vld [vmem:[%s12895_s6 + $0xc8] sm:$0xff] }
 0x252   :  { %2604 = vmatpush1.bf16.msra.mxu1 %v2459_v27  ;;  %v2494_v27 = vunpack.c.l.s8.bf16 %v2438_v1 }
 0x253   :  { %2605 = vmatprep.subr.bf16.mxu1 %v2462_v5  ;;  %v2437_v5 = vld [vmem:[%s12895_s6 + $0xc0] sm:$0xff] }
 0x254   :  { %v2493_v2 = vunpack.c.l.s8.bf16 %v2437_v5  ;;  %v2495_v7 = vunpack.c.h.s8.bf16 %v2437_v5 }
 0x256   :  { %2606 = vmatpush1.bf16.msra.mxu1 %v2461_v40  ;;  %v2496_v40 = vunpack.c.h.s8.bf16 %v2438_v1 }
 0x257   :  { %2607 = vmatprep.subr.bf16.mxu1 %v2464_v28  ;;  %v2440_v28 = vld [vmem:[%s12895_s6 + $0xd8] sm:$0xff] }
 0x25a   :  { %2608 = vmatpush1.bf16.msra.mxu1 %v2463_v14  ;;  %v2498_v14 = vunpack.c.l.s8.bf16 %v2440_v28 }
 0x25b   :  { %2609 = vmatprep.subr.bf16.mxu1 %v2466_v6  ;;  %v2439_v6 = vld [vmem:[%s12895_s6 + $0xd0] sm:$0xff] }
 0x25c   :  { %v2497_v53 = vunpack.c.l.s8.bf16 %v2439_v6  ;;  %v2499_v42 = vunpack.c.h.s8.bf16 %v2439_v6 }
 0x25e   :  { %2610 = vmatpush1.bf16.msra.mxu1 %v2465_v16  ;;  %v2500_v16 = vunpack.c.h.s8.bf16 %v2440_v28 }
 0x25f   :  { %2611 = vmatprep.subr.bf16.mxu1 %v2468_v45  ;;  %v2442_v45 = vld [vmem:[%s12895_s6 + $0xe8] sm:$0xff] }
 0x262   :  { %2612 = vmatpush1.bf16.msra.mxu1 %v2467_v8  ;;  %v2502_v8 = vunpack.c.l.s8.bf16 %v2442_v45 }
 0x263   :  { %2613 = vmatprep.subr.bf16.mxu1 %v2470_v20  ;;  %v2441_v20 = vld [vmem:[%s12895_s6 + $0xe0] sm:$0xff] }
 0x264   :  { %v2501_v47 = vunpack.c.l.s8.bf16 %v2441_v20  ;;  %v2503_v34 = vunpack.c.h.s8.bf16 %v2441_v20 }
 0x266   :  { %2614 = vmatpush1.bf16.msra.mxu1 %v2469_v58  ;;  %v2504_v58 = vunpack.c.h.s8.bf16 %v2442_v45 }
 0x267   :  { %2615 = vmatprep.subr.bf16.mxu1 %v2472_v15  ;;  %v2444_v15 = vld [vmem:[%s12895_s6 + $0xf8] sm:$0xff] }
 0x26a   :  { %2616 = vmatpush1.bf16.msra.mxu1 %v2471_v35  ;;  %v2506_v35 = vunpack.c.l.s8.bf16 %v2444_v15 }
 0x26b   :  { %2617 = vmatprep.subr.bf16.mxu1 %v2474_v37  ;;  %v2443_v37 = vld [vmem:[%s12895_s6 + $0xf0] sm:$0xff] }
 0x26c   :  { %v2505_v9 = vunpack.c.l.s8.bf16 %v2443_v37  ;;  %v2507_v30 = vunpack.c.h.s8.bf16 %v2443_v37 }
 0x26e   :  { %2618 = vmatpush1.bf16.msra.mxu1 %v2473_v43  ;;  %v2508_v43 = vunpack.c.h.s8.bf16 %v2444_v15 }
 0x26f   :  { %2619 = vmatprep.subr.bf16.mxu1 %v2476_v38  ;;  %v2823_v38 = vld [vmem:[%s12897_s7] sm:$0xff] }
 0x272   :  { %2620 = vmatpush1.bf16.msra.mxu1 %v2475_v39  ;;  %v2825_v39 = vunpack.c.l.s8.bf16 %v2823_v38 }
 0x273   :  { %2662 = vmatprep.subr.bf16.mxu1 %v2478_v17  ;;  %v7971_v17 = vld [vmem:[%s12894_s1 + $0x8] ss:$16 sps:$4 sm:$0xff]  }
 0x275   :  { %2622 = vmatmul.mubr.bf16.vlgmr.msra.gmra.mrb[48].mxu1 %v7959_v21  ;;  %v2826_v21 = vunpack.c.h.s8.bf16 %v2823_v38  ;;  %v2257_v38 = vld [vmem:[%s12960_s0 + $0x6] sm:$0xf] }
 0x276   :  { %2663 = vmatpush1.bf16.msra.mxu1 %v2477_v3  ;;  %2631 = vmatprep.mubr.bf16.mxu1 %v7962_v41  ;;  %v2824_v3 = vld [vmem:[%s12897_s7 + $0x8] sm:$0xff] }
 0x277   :  { %2664 = vmatprep.subr.bf16.mxu1 %v2480_v56  ;;  %v2827_v41 = vunpack.c.l.s8.bf16 %v2824_v3  ;;  %v7976_v56 = vld [vmem:[%s12894_s1 + $0x28] ss:$16 sps:$4 sm:$0xff]  }
 0x27a   :  { %2665 = vmatpush1.bf16.msra.mxu1 %v2479_v23  ;;  %v2828_v23 = vunpack.c.h.s8.bf16 %v2824_v3 }
 0x27b   :  { %2666 = vmatprep.subr.bf16.mxu1 %v2482_v18  ;;  %v2970_v18 = vld [vmem:[%s12898_s8 + $0x8] sm:$0xff] }
 0x27c   :  { %v2986_v44 = vunpack.c.l.s8.bf16 %v2970_v18 }
 0x27d   :  { %2632 = vmatmul.mubr.bf16.gmra.mrb[52].mxu1 %v7964_v59  ;;  %v7979_v59 = vld [vmem:[%s12894_s1 + $0x48] ss:$16 sps:$4 sm:$0xff]  }
 0x27e   :  { %2667 = vmatpush1.bf16.msra.mxu1 %v2481_v19  ;;  %2641 = vmatprep.mubr.bf16.mxu1 %v7965_v50  ;;  %v7980_v19 = vld [vmem:[%s12894_s1 + $0x6c] ss:$16 sps:$4 sm:$0xff]   ;;  %v7982_v50 = vld [vmem:[%s12894_s1 + $0x68] ss:$16 sps:$4 sm:$0xff]  }
 0x27f   :  { %2668 = vmatprep.subr.bf16.mxu1 %v2484_v25  ;;  %v7983_v25 = vld [vmem:[%s12896_s2] sm:$0xff]  }
 0x282   :  { %2669 = vmatpush1.bf16.msra.mxu1 %v2483_v49  ;;  %v7984_v49 = vld [vmem:[%s12896_s2 + $0x8] sm:$0xff]  }
 0x283   :  { %2670 = vmatprep.subr.bf16.mxu1 %v2486_v57  ;;  %v7985_v57 = vld [vmem:[%s12896_s2 + $0x10] sm:$0xff]  }
 0x285   :  { %2642 = vmatmul.mubr.bf16.gmra.mrb[56].mxu1 %v7967_v60  ;;  %v2988_v60 = vunpack.c.h.s8.bf16 %v2970_v18 }
 0x286   :  { %2671 = vmatpush1.bf16.msra.mxu1 %v2485_v51  ;;  %2651 = vmatprep.mubr.bf16.mxu1 %v7968_v33  ;;  %v2972_v51 = vld [vmem:[%s12898_s8 + $0x18] sm:$0xff]  ;;  %v2987_v33 = vunpack.c.h.s8.bf16 %v2969_v31 }
 0x287   :  { %2672 = vmatprep.subr.bf16.mxu1 %v2488_v62  ;;  %v2990_v62 = vunpack.c.l.s8.bf16 %v2972_v51  ;;  %v2992_v29 = vunpack.c.h.s8.bf16 %v2972_v51 }
 0x28a   :  { %2673 = vmatpush1.bf16.msra.mxu1 %v2487_v55  ;;  %v7986_v55 = vld [vmem:[%s12896_s2 + $0x18] sm:$0xff]  }
 0x28b   :  { %2674 = vmatprep.subr.bf16.mxu1 %v2490_v46  ;;  %v2989_v46 = vunpack.c.l.s8.bf16 %v2971_v54 }
 0x28d   :  { %2652 = vmatmul.mubr.bf16.gmra.mrb[60].mxu1 %v7970_v10  ;;  %v2974_v10 = vld [vmem:[%s12898_s8 + $0x28] sm:$0xff] }
 0x28e   :  { %2675 = vmatpush1.bf16.msra.mxu1 %v2489_v61  ;;  %2694 = vmatprep.mubr.bf16.mxu1 %v7973_v63  ;;  %v2991_v61 = vunpack.c.h.s8.bf16 %v2971_v54  ;;  %v2994_v63 = vunpack.c.l.s8.bf16 %v2974_v10 }
 0x28f   :  { %2676 = vmatprep.subr.bf16.mxu1 %v2492_v36  ;;  %v2973_v36 = vld [vmem:[%s12898_s8 + $0x20] sm:$0xff] }
 0x290   :  { %v2993_v1 = vunpack.c.l.s8.bf16 %v2973_v36  ;;  %v2995_v5 = vunpack.c.h.s8.bf16 %v2973_v36  ;;  %v3119_v36 = vld [vmem:[%s12899_s9 + $0x8] sm:$0xff] }
 0x292   :  { %2677 = vmatpush1.bf16.msra.mxu1 %v2491_v4  ;;  %v2996_v4 = vunpack.c.h.s8.bf16 %v2974_v10 }
 0x293   :  { %2678 = vmatprep.subr.bf16.mxu1 %v2494_v27  ;;  %v2976_v27 = vld [vmem:[%s12898_s8 + $0x38] sm:$0xff] }
 0x296   :  { %2679 = vmatpush1.bf16.msra.mxu1 %v2493_v2  ;;  %v2998_v2 = vunpack.c.l.s8.bf16 %v2976_v27 }
 0x297   :  { %2680 = vmatprep.subr.bf16.mxu1 %v2496_v40  ;;  %v2975_v40 = vld [vmem:[%s12898_s8 + $0x30] sm:$0xff] }
 0x298   :  { %v2997_v28 = vunpack.c.l.s8.bf16 %v2975_v40  ;;  %v2999_v6 = vunpack.c.h.s8.bf16 %v2975_v40 }
 0x29a   :  { %2681 = vmatpush1.bf16.msra.mxu1 %v2495_v7  ;;  %v3000_v7 = vunpack.c.h.s8.bf16 %v2976_v27 }
 0x29b   :  { %2682 = vmatprep.subr.bf16.mxu1 %v2498_v14  ;;  %v2978_v14 = vld [vmem:[%s12898_s8 + $0x48] sm:$0xff] }
 0x29e   :  { %2683 = vmatpush1.bf16.msra.mxu1 %v2497_v53  ;;  %v3002_v53 = vunpack.c.l.s8.bf16 %v2978_v14 }
 0x29f   :  { %2684 = vmatprep.subr.bf16.mxu1 %v2500_v16  ;;  %v2977_v16 = vld [vmem:[%s12898_s8 + $0x40] sm:$0xff] }
 0x2a0   :  { %v3001_v45 = vunpack.c.l.s8.bf16 %v2977_v16  ;;  %v3003_v20 = vunpack.c.h.s8.bf16 %v2977_v16 }
 0x2a2   :  { %2685 = vmatpush1.bf16.msra.mxu1 %v2499_v42  ;;  %v3004_v42 = vunpack.c.h.s8.bf16 %v2978_v14 }
 0x2a3   :  { %2686 = vmatprep.subr.bf16.mxu1 %v2502_v8  ;;  %v2980_v8 = vld [vmem:[%s12898_s8 + $0x58] sm:$0xff] }
 0x2a6   :  { %2687 = vmatpush1.bf16.msra.mxu1 %v2501_v47  ;;  %v3006_v47 = vunpack.c.l.s8.bf16 %v2980_v8 }
 0x2a7   :  { %2688 = vmatprep.subr.bf16.mxu1 %v2504_v58  ;;  %v2979_v58 = vld [vmem:[%s12898_s8 + $0x50] sm:$0xff] }
 0x2a8   :  { %v3005_v15 = vunpack.c.l.s8.bf16 %v2979_v58  ;;  %v3007_v37 = vunpack.c.h.s8.bf16 %v2979_v58 }
 0x2aa   :  { %2689 = vmatpush1.bf16.msra.mxu1 %v2503_v34  ;;  %v3008_v34 = vunpack.c.h.s8.bf16 %v2980_v8 }
 0x2ab   :  { %2690 = vmatprep.subr.bf16.mxu1 %v2506_v35  ;;  %v2982_v35 = vld [vmem:[%s12898_s8 + $0x68] sm:$0xff] }
 0x2ac   :  { %v3012_v3 = vunpack.c.h.s8.bf16 %v2982_v35 }
 0x2ae   :  { %2691 = vmatpush1.bf16.msra.mxu1 %v2505_v9  ;;  %v3010_v9 = vunpack.c.l.s8.bf16 %v2982_v35 }
 0x2af   :  { %2692 = vmatprep.subr.bf16.mxu1 %v2508_v43  ;;  %v2981_v43 = vld [vmem:[%s12898_s8 + $0x60] sm:$0xff] }
 0x2b2   :  { %2693 = vmatpush1.bf16.msra.mxu1 %v2507_v30  ;;  %v3009_v30 = vunpack.c.l.s8.bf16 %v2981_v43 }
 0x2b3   :  { %7586 = vmatprep.subr.bf16.mxu1 %v2825_v39 }
 0x2b5   :  { %2695 = vmatmul.mubr.bf16.vlgmr.msra.gmra.mrb[48].mxu1 %v7971_v17  ;;  %v9662_v17 = vrot.slane %v2257_v38, %v9234_v22 }
 0x2b6   :  { %7587 = vmatpush3.bf16.msra.mxu1 %v2825_v39  ;;  %2704 = vmatprep.mubr.bf16.mxu1 %v7974_v32  ;;  %v2311_v39 = vld [vmem:[%s12962_s26 + $0x6] sm:$0xf]  ;;  %v9665_v32 = vrot.slane %v2257_v38, %v9237_v26 }
 0x2b7   :  { %7588 = vmatprep.subr.bf16.mxu1 %v2826_v21 }
 0x2ba   :  { %7589 = vmatpush3.bf16.msra.mxu1 %v2826_v21  ;;  %v9668_v21 = vrot.slane %v2311_v39, %v9234_v22 }
 0x2bb   :  { %7590 = vmatprep.subr.bf16.mxu1 %v2827_v41 }
 0x2bd   :  { %2705 = vmatmul.mubr.bf16.gmra.mrb[52].mxu1 %v7976_v56 }
 0x2be   :  { %2714 = vmatprep.mubr.bf16.mxu1 %v7977_v52  ;;  %7591 = vmatpush3.bf16.msra.mxu1 %v2827_v41  ;;  %v9673_v52 = vrot.slane %v2311_v39, %v9237_v26 }
 0x2bf   :  { %7592 = vmatprep.subr.bf16.mxu1 %v2828_v23 }
 0x2c2   :  { %7593 = vmatpush3.bf16.msra.mxu1 %v2828_v23  ;;  %v3011_v23 = vunpack.c.h.s8.bf16 %v2981_v43 }
 0x2c3   :  { %3017 = vmatprep.subr.bf16.mxu1 %v2986_v44 }
 0x2c5   :  { %2715 = vmatmul.mubr.bf16.gmra.mrb[56].mxu1 %v7979_v59 }
 0x2c6   :  { %2724 = vmatprep.mubr.bf16.mxu1 %v7980_v19 }
 0x2cd   :  { %2725 = vmatmul.mubr.bf16.gmra.mrb[60].mxu1 %v7982_v50 }
 0x2ce   :  { %7594 = vmatprep.mubr.msk.bf16.mxu1 %vm2849_vm0, %v7983_v25 }
 0x2d5   :  { %7595 = vmatmul.mubr.msk.bf16.vlgmr.msra.gmra.mrb[64].mxu1 %vm2849_vm0, %v7984_v49 }
 0x2d6   :  { %7598 = vmatprep.mubr.msk.bf16.mxu1 %vm2849_vm0, %v7985_v57  ;;  %3018 = vmatpush1.bf16.msra.mxu1 %v2985_v12 }
 0x2d7   :  { %3019 = vmatprep.subr.bf16.mxu1 %v2988_v60 }
 0x2da   :  { %3020 = vmatpush1.bf16.msra.mxu1 %v2987_v33  ;;  %v2984_v33 = vld [vmem:[%s12898_s8 + $0x78] sm:$0xff] }
 0x2db   :  { %3021 = vmatprep.subr.bf16.mxu1 %v2990_v62  ;;  %v2983_v62 = vld [vmem:[%s12898_s8 + $0x70] sm:$0xff] }
 0x2dc   :  { %v3015_v14 = vunpack.c.h.s8.bf16 %v2983_v62 }
 0x2dd   :  { %7599 = vmatmul.mubr.msk.bf16.gmra.mrb[68].mxu1 %vm2849_vm0, %v7986_v55 }
 0x2de   :  { %3022 = vmatpush1.bf16.msra.mxu1 %v2989_v46  ;;  %v3014_v46 = vunpack.c.l.s8.bf16 %v2984_v33 }
 0x2df   :  { %3023 = vmatprep.subr.bf16.mxu1 %v2992_v29  ;;  %v3013_v29 = vunpack.c.l.s8.bf16 %v2983_v62 }
 0x2e2   :  { %3024 = vmatpush1.bf16.msra.mxu1 %v2991_v61 }
 0x2e3   :  { %3025 = vmatprep.subr.bf16.mxu1 %v2994_v63  ;;  %v3016_v63 = vunpack.c.h.s8.bf16 %v2984_v33 }
 0x2e6   :  { %3026 = vmatpush1.bf16.msra.mxu1 %v2993_v1 }
 0x2e7   :  { %3027 = vmatprep.subr.bf16.mxu1 %v2996_v4 }
 0x2ea   :  { %3028 = vmatpush1.bf16.msra.mxu1 %v2995_v5  ;;  %v3127_v5 = vunpack.c.l.s8.bf16 %v3119_v36 }
 0x2eb   :  { %3029 = vmatprep.subr.bf16.mxu1 %v2998_v2  ;;  %v3118_v2 = vld [vmem:[%s12899_s9] sm:$0xff] }
 0x2ec   :  { %3142 = vmatprep.subr.bf16.mxu0 %v3127_v5 }
 0x2ee   :  { %3030 = vmatpush1.bf16.msra.mxu1 %v2997_v28 }
 0x2ef   :  { %3031 = vmatprep.subr.bf16.mxu1 %v3000_v7 }
 0x2f2   :  { %3032 = vmatpush1.bf16.msra.mxu1 %v2999_v6  ;;  %v3126_v6 = vunpack.c.l.s8.bf16 %v3118_v2 }
 0x2f3   :  { %3033 = vmatprep.subr.bf16.mxu1 %v3002_v53 }
 0x2f4   :  { %3143 = vmatpush1.bf16.msra.mxu0 %v3126_v6 }
 0x2f6   :  { %3034 = vmatpush1.bf16.msra.mxu1 %v3001_v45 }
 0x2f7   :  { %3035 = vmatprep.subr.bf16.mxu1 %v3004_v42 }
 0x2fa   :  { %3036 = vmatpush1.bf16.msra.mxu1 %v3003_v20 }
 0x2fb   :  { %3037 = vmatprep.subr.bf16.mxu1 %v3006_v47 }
 0x2fe   :  { %3038 = vmatpush1.bf16.msra.mxu1 %v3005_v15  ;;  %v3129_v15 = vunpack.c.h.s8.bf16 %v3119_v36 }
 0x2ff   :  { %3039 = vmatprep.subr.bf16.mxu1 %v3008_v34  ;;  %v3128_v34 = vunpack.c.h.s8.bf16 %v3118_v2 }
 0x300   :  { %3144 = vmatprep.subr.bf16.mxu0 %v3129_v15 }
 0x301   :  { %3145 = vmatpush1.bf16.msra.mxu0 %v3128_v34 }
 0x302   :  { %3040 = vmatpush1.bf16.msra.mxu1 %v3007_v37 }
 0x303   :  { %3041 = vmatprep.subr.bf16.mxu1 %v3010_v9  ;;  %v3121_v9 = vld [vmem:[%s12899_s9 + $0x18] sm:$0xff] }
 0x304   :  { %v3131_v39 = vunpack.c.l.s8.bf16 %v3121_v9 }
 0x306   :  { %3042 = vmatpush1.bf16.msra.mxu1 %v3009_v30  ;;  %3146 = vmatprep.subr.bf16.mxu0 %v3131_v39 }
 0x307   :  { %3043 = vmatprep.subr.bf16.mxu1 %v3012_v3  ;;  %v3120_v3 = vld [vmem:[%s12899_s9 + $0x10] sm:$0xff] }
 0x308   :  { %v9670_v41 = vpop.f32.mrb[32].mxu1  ;;  %v2218_v56 = vpop.f32.mrb[32].mxu0 }
 0x309   :  { %v2281_v18 = vmul.f32 %v9662_v17, %v2218_v56  ;;  %v9676_v44 = vpop.f32.mrb[33].mxu1  ;;  %v2220_v59 = vpop.f32.mrb[33].mxu0 }
 0x30a   :  { %v2282_v19 = vmul.f32 %v9665_v32, %v2220_v59  ;;  %v9679_v50 = vpop.f32.mrb[34].mxu1  ;;  %v2222_v25 = vpop.f32.mrb[34].mxu0  ;;  %3044 = vmatpush1.bf16.msra.mxu1 %v3011_v23  ;;  %v3130_v59 = vunpack.c.l.s8.bf16 %v3120_v3 }
 0x30b   :  { %v9682_v31 = vadd.f32 %v9668_v21, %v2281_v18  ;;  %v2285_v49 = vmul.f32 %v9662_v17, %v2222_v25  ;;  %v9685_v57 = vpop.f32.mrb[35].mxu1  ;;  %v2224_v12 = vpop.f32.mrb[35].mxu0  ;;  %3045 = vmatprep.subr.bf16.mxu1 %v3014_v46 }
 0x30c   :  { %v9688_v60 = vadd.f32 %v9673_v52, %v2282_v19  ;;  %v2286_v51 = vmul.f32 %v9665_v32, %v2224_v12  ;;  %3147 = vmatpush1.bf16.msra.mxu0 %v3130_v59  ;;  %v3124_v59 = vld [vmem:[%s12899_s9 + $0x30] sm:$0xff] }
 0x30d   :  { %12965 = vst [vmem:[#allocation7_spill] sm:$0xff] %v9682_v31  ;;  %v9698_v54 = vadd.f32 %v9668_v21, %v2285_v49 }
 0x30e   :  { %12966 = vst [vmem:[#allocation8_spill] sm:$0xff] %v9688_v60  ;;  %v9701_v55 = vadd.f32 %v9673_v52, %v2286_v51  ;;  %3046 = vmatpush1.bf16.msra.mxu1 %v3013_v29  ;;  %v3133_v29 = vunpack.c.h.s8.bf16 %v3121_v9 }
 0x30f   :  { %12967 = vst [vmem:[#allocation9_spill] sm:$0xff] %v9698_v54  ;;  %3047 = vmatprep.subr.bf16.mxu1 %v3016_v63 }
 0x310   :  { %12968 = vst [vmem:[#allocation10_spill] sm:$0xff] %v9701_v55  ;;  %v9703_v10 = vpop.f32.mrb[36].mxu1  ;;  %v2228_v61 = vpop.f32.mrb[36].mxu0  ;;  %3148 = vmatprep.subr.bf16.mxu0 %v3133_v29  ;;  %v2735_v29 = vld [vmem:[%s12960_s0 + $0xa] sm:$0x3] }
 0x311   :  { %v2289_v1 = vmul.f32 %v9662_v17, %v2228_v61  ;;  %v9709_v4 = vpop.f32.mrb[37].mxu1  ;;  %v2230_v27 = vpop.f32.mrb[37].mxu0  ;;  %v3132_v61 = vunpack.c.h.s8.bf16 %v3120_v3 }
 0x312   :  { %v2290_v40 = vmul.f32 %v9665_v32, %v2230_v27  ;;  %v9715_v28 = vpop.f32.mrb[38].mxu1  ;;  %v2232_v7 = vpop.f32.mrb[38].mxu0  ;;  %3048 = vmatpush1.bf16.msra.mxu1 %v3015_v14 }
 0x313   :  { %v9718_v53 = vadd.f32 %v9668_v21, %v2289_v1  ;;  %v2293_v16 = vmul.f32 %v9662_v17, %v2232_v7  ;;  %v9721_v45 = vpop.f32.mrb[39].mxu1  ;;  %v2234_v42 = vpop.f32.mrb[39].mxu0  ;;  %v3123_v1 = vld [vmem:[%s12899_s9 + $0x28] sm:$0xff]  ;;  %v3122_v7 = vld [vmem:[%s12899_s9 + $0x20] sm:$0xff]  ;;  %3149 = vmatpush1.bf16.msra.mxu0 %v3132_v61 }
 0x314   :  { %v9724_v8 = vadd.f32 %v9673_v52, %v2290_v40  ;;  %v2294_v20 = vmul.f32 %v9665_v32, %v2234_v42  ;;  %v3135_v40 = vunpack.c.l.s8.bf16 %v3123_v1  ;;  %v3134_v42 = vunpack.c.l.s8.bf16 %v3122_v7  ;;  %v2763_v61 = vld [vmem:[%s12962_s26 + $0xa] sm:$0x3] }
 0x315   :  { %12969 = vst [vmem:[#allocation11_spill] sm:$0xff] %v9718_v53  ;;  %v9728_v47 = vadd.f32 %v9668_v21, %v2293_v16  ;;  %v3137_v3 = vunpack.c.h.s8.bf16 %v3123_v1  ;;  %v9816_v1 = vrot.slane %v2735_v29, %v8997_v13 }
 0x316   :  { %12970 = vst [vmem:[#allocation12_spill] sm:$0xff] %v9724_v8  ;;  %v9731_v58 = vadd.f32 %v9673_v52, %v2294_v20  ;;  %3150 = vmatprep.subr.bf16.mxu0 %v3135_v40  ;;  %v9822_v40 = vrot.slane %v2763_v61, %v8997_v13 }
 0x317   :  { %12971 = vst [vmem:[#allocation13_spill] sm:$0xff] %v9728_v47  ;;  %3151 = vmatpush1.bf16.msra.mxu0 %v3134_v42 }
 0x318   :  { %12972 = vst [vmem:[#allocation14_spill] sm:$0xff] %v9731_v58  ;;  %v9733_v35 = vpop.f32.mrb[40].mxu1  ;;  %v2238_v37 = vpop.f32.mrb[40].mxu0  ;;  %3152 = vmatprep.subr.bf16.mxu0 %v3137_v3 }
 0x319   :  { %v2297_v43 = vmul.f32 %v9662_v17, %v2238_v37  ;;  %v9739_v38 = vpop.f32.mrb[41].mxu1  ;;  %v2240_v30 = vpop.f32.mrb[41].mxu0 }
 0x31a   :  { %v2298_v56 = vmul.f32 %v9665_v32, %v2240_v30  ;;  %v9745_v23 = vpop.f32.mrb[42].mxu1  ;;  %v2242_v18 = vpop.f32.mrb[42].mxu0 }
 0x31b   :  { %v9748_v19 = vadd.f32 %v9668_v21, %v2297_v43  ;;  %v2301_v25 = vmul.f32 %v9662_v17, %v2242_v18  ;;  %v9751_v49 = vpop.f32.mrb[43].mxu1  ;;  %v2244_v12 = vpop.f32.mrb[43].mxu0 }
 0x31c   :  { %v9754_v51 = vadd.f32 %v9673_v52, %v2298_v56  ;;  %v2302_v33 = vmul.f32 %v9665_v32, %v2244_v12  ;;  %v3136_v56 = vunpack.c.h.s8.bf16 %v3122_v7 }
 0x31d   :  { %12973 = vst [vmem:[#allocation15_spill] sm:$0xff] %v9748_v19  ;;  %v9758_v62 = vadd.f32 %v9668_v21, %v2301_v25  ;;  %v9802_v25 = vld [vmem:[%s12900_s10 + $0x8] sm:$0xff] }
 0x31e   :  { %12974 = vst [vmem:[#allocation16_spill] sm:$0xff] %v9754_v51  ;;  %v9761_v46 = vadd.f32 %v9673_v52, %v2302_v33  ;;  %3153 = vmatpush1.bf16.msra.mxu0 %v3136_v56  ;;  %v3360_v12 = vunpack.c.l.s8.bf16 %v9802_v25  ;;  %v12915_v33 = vmov 0  }
 0x31f   :  { %12975 = vst [vmem:[#allocation17_spill] sm:$0xff] %v9758_v62  ;;  %3174 = vmatprep.mubr.bf16.mxu0 %v12915_v33 }
 0x320   :  { %12976 = vst [vmem:[#allocation18_spill] sm:$0xff] %v9761_v46  ;;  %v9763_v63 = vpop.f32.mrb[44].mxu1  ;;  %v2248_v36 = vpop.f32.mrb[44].mxu0 }
 0x321   :  { %v2305_v27 = vmul.f32 %v9662_v17, %v2248_v36  ;;  %v9769_v5 = vpop.f32.mrb[45].mxu1  ;;  %v2250_v2 = vpop.f32.mrb[45].mxu0  ;;  %v9813_v36 = vrot.slane %v2735_v29, %v8989_v0 }
 0x322   :  { %v2306_v14 = vmul.f32 %v9665_v32, %v2250_v2  ;;  %v9775_v6 = vpop.f32.mrb[46].mxu1  ;;  %v2252_v16 = vpop.f32.mrb[46].mxu0 }
 0x323   :  { %v9778_v20 = vadd.f32 %v9668_v21, %v2305_v27  ;;  %v2309_v15 = vmul.f32 %v9662_v17, %v2252_v16  ;;  %v9781_v34 = vpop.f32.mrb[47].mxu1  ;;  %v2254_v37 = vpop.f32.mrb[47].mxu0  ;;  %v3125_v17 = vld [vmem:[%s12899_s9 + $0x38] sm:$0xff]  ;;  %v9819_v27 = vrot.slane %v2763_v61, %v8989_v0 }
 0x324   :  { %v9784_v9 = vadd.f32 %v9673_v52, %v2306_v14  ;;  %v2310_v43 = vmul.f32 %v9665_v32, %v2254_v37  ;;  %v3139_v18 = vunpack.c.l.s8.bf16 %v3125_v17  ;;  %v3138_v32 = vunpack.c.l.s8.bf16 %v3124_v59 }
 0x325   :  { %12977 = vst [vmem:[#allocation19_spill] sm:$0xff] %v9778_v20  ;;  %v9788_v30 = vadd.f32 %v9668_v21, %v2309_v15  ;;  %v3141_v21 = vunpack.c.h.s8.bf16 %v3125_v17 }
 0x326   :  { %12978 = vst [vmem:[#allocation20_spill] sm:$0xff] %v9784_v9  ;;  %v9791_v39 = vadd.f32 %v9673_v52, %v2310_v43  ;;  %3154 = vmatprep.subr.bf16.mxu0 %v3139_v18  ;;  %v3140_v52 = vunpack.c.h.s8.bf16 %v3124_v59 }
 0x327   :  { %12979 = vst [vmem:[#allocation21_spill] sm:$0xff] %v9788_v30  ;;  %3155 = vmatpush1.bf16.msra.mxu0 %v3138_v32 }
 0x328   :  { %12980 = vst [vmem:[#allocation22_spill] sm:$0xff] %v9791_v39  ;;  %3156 = vmatprep.subr.bf16.mxu0 %v3141_v21 }
 0x32b   :  { %3157 = vmatpush1.bf16.msra.mxu0 %v3140_v52 }
 0x32c   :  { %3503 = vmatprep.subr.bf16.mxu0 %v3360_v12 }
 0x388   :  { %v2696_v2 = vpop.f32.mrb[48].mxu1 }
 0x389   :  { %v2747_v7 = vmul.f32 %v9813_v36, %v2696_v2  ;;  %v2698_v14 = vpop.f32.mrb[49].mxu1 }
 0x38a   :  { %v2748_v16 = vmul.f32 %v9816_v1, %v2698_v14  ;;  %v2700_v42 = vpop.f32.mrb[50].mxu1 }
 0x38b   :  { %v2775_v15 = vadd.f32 %v9819_v27, %v2747_v7  ;;  %v2749_v37 = vmul.f32 %v9813_v36, %v2700_v42  ;;  %v2702_v43 = vpop.f32.mrb[51].mxu1 }
 0x38c   :  { %v2776_v3 = vadd.f32 %v9822_v40, %v2748_v16  ;;  %v2750_v56 = vmul.f32 %v9816_v1, %v2702_v43 }
 0x38d   :  { %v2777_v17 = vadd.f32 %v9819_v27, %v2749_v37  ;;  %v2791_v59 = vmax.f32 %v2775_v15, 0.0 }
 0x38e   :  { %v2778_v18 = vadd.f32 %v9822_v40, %v2750_v56  ;;  %v2792_v21 = vmax.f32 %v2776_v3, 0.0 }
 0x38f   :  { %v2793_v32 = vmax.f32 %v2777_v17, 0.0 }
 0x390   :  { %v2794_v52 = vmax.f32 %v2778_v18, 0.0  ;;  %v2706_v12 = vpop.f32.mrb[52].mxu1 }
 0x391   :  { %v2807_v29 = vpack.c.bf16 %v2793_v32, %v2791_v59  ;;  %v2751_v61 = vmul.f32 %v9813_v36, %v2706_v12  ;;  %v2708_v2 = vpop.f32.mrb[53].mxu1 }
 0x392   :  { %v2752_v7 = vmul.f32 %v9816_v1, %v2708_v2  ;;  %v2710_v14 = vpop.f32.mrb[54].mxu1  ;;  %v2808_v42 = vpack.c.bf16 %v2794_v52, %v2792_v21 }
 0x393   :  { %v2779_v16 = vadd.f32 %v9819_v27, %v2751_v61  ;;  %v2753_v43 = vmul.f32 %v9813_v36, %v2710_v14  ;;  %v2712_v37 = vpop.f32.mrb[55].mxu1 }
 0x394   :  { %v2780_v56 = vadd.f32 %v9822_v40, %v2752_v7  ;;  %v2754_v15 = vmul.f32 %v9816_v1, %v2712_v37  ;;  %3049 = vmatprep.mubr.bf16.mxu1 %v2808_v42 }
 0x395   :  { %v2781_v3 = vadd.f32 %v9819_v27, %v2753_v43  ;;  %3050 = vmatmul.mubr.bf16.vlgmr.msra.gmra.mrb[72].mxu1 %v2807_v29  ;;  %v2795_v18 = vmax.f32 %v2779_v16, 0.0 }
 0x396   :  { %v2782_v17 = vadd.f32 %v9822_v40, %v2754_v15  ;;  %v2796_v32 = vmax.f32 %v2780_v56, 0.0 }
 0x397   :  { %v2797_v59 = vmax.f32 %v2781_v3, 0.0 }
 0x398   :  { %v2798_v12 = vmax.f32 %v2782_v17, 0.0  ;;  %v2716_v21 = vpop.f32.mrb[56].mxu1 }
 0x399   :  { %v2755_v52 = vmul.f32 %v9813_v36, %v2716_v21  ;;  %v2718_v61 = vpop.f32.mrb[57].mxu1  ;;  %v2809_v2 = vpack.c.bf16 %v2797_v59, %v2795_v18 }
 0x39a   :  { %v2756_v14 = vmul.f32 %v9816_v1, %v2718_v61  ;;  %v2720_v7 = vpop.f32.mrb[58].mxu1  ;;  %v2810_v33 = vpack.c.bf16 %v2798_v12, %v2796_v32 }
 0x39b   :  { %v2783_v42 = vadd.f32 %v9819_v27, %v2755_v52  ;;  %v2757_v43 = vmul.f32 %v9813_v36, %v2720_v7  ;;  %v2722_v29 = vpop.f32.mrb[59].mxu1 }
 0x39c   :  { %v2784_v37 = vadd.f32 %v9822_v40, %v2756_v14  ;;  %v2758_v16 = vmul.f32 %v9816_v1, %v2722_v29  ;;  %3059 = vmatprep.mubr.bf16.mxu1 %v2810_v33 }
 0x39d   :  { %v2785_v56 = vadd.f32 %v9819_v27, %v2757_v43  ;;  %3060 = vmatmul.mubr.bf16.gmra.mrb[76].mxu1 %v2809_v2  ;;  %v2799_v3 = vmax.f32 %v2783_v42, 0.0 }
 0x39e   :  { %v2786_v15 = vadd.f32 %v9822_v40, %v2758_v16  ;;  %v2800_v18 = vmax.f32 %v2784_v37, 0.0 }
 0x39f   :  { %v2801_v17 = vmax.f32 %v2785_v56, 0.0  ;;  %v7518_v56 = vld [vmem:[%s12960_s0 + $0xc] ss:$0 sm:$0xff] }
 0x3a0   :  { %v2802_v59 = vmax.f32 %v2786_v15, 0.0  ;;  %v2726_v32 = vpop.f32.mrb[60].mxu1 }
 0x3a1   :  { %v2759_v12 = vmul.f32 %v9813_v36, %v2726_v32  ;;  %v2728_v21 = vpop.f32.mrb[61].mxu1  ;;  %v2811_v52 = vpack.c.bf16 %v2801_v17, %v2799_v3 }
 0x3a2   :  { %v2760_v61 = vmul.f32 %v9816_v1, %v2728_v21  ;;  %v2730_v14 = vpop.f32.mrb[62].mxu1  ;;  %v2812_v7 = vpack.c.bf16 %v2802_v59, %v2800_v18  ;;  %v7519_v59 = vld [vmem:[%s12962_s26 + $0xc] ss:$0 sm:$0xff] }
 0x3a3   :  { %v2787_v33 = vadd.f32 %v9819_v27, %v2759_v12  ;;  %v2761_v43 = vmul.f32 %v9813_v36, %v2730_v14  ;;  %v2732_v2 = vpop.f32.mrb[63].mxu1 }
 0x3a4   :  { %v2788_v29 = vadd.f32 %v9822_v40, %v2760_v61  ;;  %v2762_v42 = vmul.f32 %v9816_v1, %v2732_v2  ;;  %3069 = vmatprep.mubr.bf16.mxu1 %v2812_v7 }
 0x3a5   :  { %v2789_v37 = vadd.f32 %v9819_v27, %v2761_v43  ;;  %3070 = vmatmul.mubr.bf16.gmra.mrb[80].mxu1 %v2811_v52  ;;  %v2803_v15 = vmax.f32 %v2787_v33, 0.0 }
 0x3a6   :  { %v2790_v16 = vadd.f32 %v9822_v40, %v2762_v42  ;;  %v2804_v17 = vmax.f32 %v2788_v29, 0.0  ;;  %v3327_v29 = vld [vmem:[%s12900_s10] sm:$0xff] }
 0x3a7   :  { %v2805_v3 = vmax.f32 %v2789_v37, 0.0 }
 0x3a8   :  { %v2806_v18 = vmax.f32 %v2790_v16, 0.0  ;;  %v7596_v36 = vpop.f32.mrb[64].mxu1 }
 0x3a9   :  { %v2936_v1 = vmul.f32 %v7596_v36, %v7518_v56  ;;  %v2896_v32 = vpop.f32.mrb[65].mxu1  ;;  %v2813_v12 = vpack.c.bf16 %v2805_v3, %v2803_v15  ;;  %v3359_v36 = vunpack.c.l.s8.bf16 %v3327_v29 }
 0x3aa   :  { %v2934_v27 = vmul.f32 %v7518_v56, %v2896_v32  ;;  %v7597_v21 = vpop.f32.mrb[66].mxu1  ;;  %v2814_v52 = vpack.c.bf16 %v2806_v18, %v2804_v17 }
 0x3ab   :  { %v2951_v40 = vadd.f32 %v7519_v59, %v2936_v1  ;;  %v2937_v61 = vmul.f32 %v7597_v21, %v7518_v56  ;;  %v2899_v14 = vpop.f32.mrb[67].mxu1 }
 0x3ac   :  { %v2949_v7 = vadd.f32 %v7519_v59, %v2934_v27  ;;  %v2935_v43 = vmul.f32 %v7518_v56, %v2899_v14  ;;  %3079 = vmatprep.mubr.bf16.mxu1 %v2814_v52  ;;  %v3362_v27 = vunpack.c.h.s8.bf16 %v9802_v25 }
 0x3ad   :  { %v2952_v33 = vadd.f32 %v7519_v59, %v2937_v61  ;;  %3080 = vmatmul.mubr.bf16.gmra.mrb[84].mxu1 %v2813_v12  ;;  %v2959_v42 = vmax.f32 %v2951_v40, 0.0  ;;  %v3330_v40 = vld [vmem:[%s12900_s10 + $0x18] sm:$0xff] }
 0x3ae   :  { %v2950_v2 = vadd.f32 %v7519_v59, %v2935_v43  ;;  %v2957_v16 = vmax.f32 %v2949_v7, 0.0 }
 0x3af   :  { %v2960_v37 = vmax.f32 %v2952_v33, 0.0 }
 0x3b0   :  { %v2958_v15 = vmax.f32 %v2950_v2, 0.0  ;;  %v7600_v3 = vpop.f32.mrb[68].mxu1  ;;  %v3361_v2 = vunpack.c.h.s8.bf16 %v3327_v29  ;;  %v3332_v29 = vld [vmem:[%s12900_s10 + $0x28] sm:$0xff] }
 0x3b1   :  { %v2940_v17 = vmul.f32 %v7600_v3, %v7518_v56  ;;  %v2912_v18 = vpop.f32.mrb[69].mxu1  ;;  %v2966_v1 = vpack.c.bf16 %v2960_v37, %v2959_v42  ;;  %v12981_v42 = vmov 0  }
 0x3b2   :  { %v2965_v32 = vpack.c.bf16 %v2958_v15, %v2957_v16  ;;  %v2938_v21 = vmul.f32 %v7518_v56, %v2912_v18  ;;  %v7601_v52 = vpop.f32.mrb[70].mxu1  ;;  %v3364_v16 = vunpack.c.l.s8.bf16 %v3330_v40  ;;  %v3329_v15 = vld [vmem:[%s12900_s10 + $0x10] sm:$0xff] }
 0x3b3   :  { %v2955_v12 = vadd.f32 %v7519_v59, %v2940_v17  ;;  %v2941_v61 = vmul.f32 %v7601_v52, %v7518_v56  ;;  %v2915_v14 = vpop.f32.mrb[71].mxu1  ;;  %v3331_v52 = vld [vmem:[%s12900_s10 + $0x20] sm:$0xff] }
 0x3b4   :  { %3175 = vmatmul.mubr.bf16.vlgmr.msra.gmra.mrb[48].mxu0 %v2965_v32  ;;  %v2953_v7 = vadd.f32 %v7519_v59, %v2938_v21  ;;  %v2939_v43 = vmul.f32 %v7518_v56, %v2915_v14  ;;  %v3363_v32 = vunpack.c.l.s8.bf16 %v3329_v15  ;;  %v3366_v56 = vunpack.c.h.s8.bf16 %v3330_v40  ;;  %v3334_v14 = vld [vmem:[%s12900_s10 + $0x38] sm:$0xff] }
 0x3b5   :  { %3504 = vmatpush1.bf16.msra.mxu0 %v3359_v36  ;;  %v2963_v33 = vmax.f32 %v2955_v12, 0.0  ;;  %v2956_v3 = vadd.f32 %v7519_v59, %v2941_v61  ;;  %3184 = vmatprep.mubr.bf16.mxu0 %v12981_v42  ;;  %v3367_v12 = vunpack.c.l.s8.bf16 %v3331_v52  ;;  %v3370_v61 = vunpack.c.h.s8.bf16 %v3332_v29 }
 0x3b6   :  { %3505 = vmatprep.subr.bf16.mxu0 %v3362_v27  ;;  %v2961_v25 = vmax.f32 %v2953_v7, 0.0  ;;  %v2954_v37 = vadd.f32 %v7519_v59, %v2939_v43  ;;  %v3365_v59 = vunpack.c.h.s8.bf16 %v3329_v15  ;;  %v3368_v27 = vunpack.c.l.s8.bf16 %v3332_v29  ;;  %v3333_v7 = vld [vmem:[%s12900_s10 + $0x30] sm:$0xff]  ;;  %v3335_v15 = vld [vmem:[%s12900_s10 + $0x40] sm:$0xff] }
 0x3b7   :  { %v2964_v17 = vmax.f32 %v2956_v3, 0.0  ;;  %v3372_v40 = vunpack.c.l.s8.bf16 %v3334_v14  ;;  %v3371_v43 = vunpack.c.l.s8.bf16 %v3333_v7  ;;  %v3336_v3 = vld [vmem:[%s12900_s10 + $0x48] sm:$0xff] }
 0x3b8   :  { %v2962_v18 = vmax.f32 %v2954_v37, 0.0  ;;  %v3729_v37 = vld [vmem:[%s12902_s11] sm:$0xff]  ;;  %v3378_v29 = vunpack.c.h.s8.bf16 %v3336_v3 }
 0x3b9   :  { %3506 = vmatpush1.bf16.msra.mxu0 %v3361_v2  ;;  %v2968_v21 = vpack.c.bf16 %v2964_v17, %v2963_v33  ;;  %v7989_v33 = vld [vmem:[%s12901_s3 + $0x4] ss:$16 sps:$4 sm:$0xff]   ;;  %v3374_v2 = vunpack.c.h.s8.bf16 %v3334_v14 }
 0x3ba   :  { %3507 = vmatprep.subr.bf16.mxu0 %v3364_v16  ;;  %v2967_v36 = vpack.c.bf16 %v2962_v18, %v2961_v25  ;;  %v3730_v25 = vld [vmem:[%s12902_s11 + $0x8] sm:$0xff]  ;;  %v3376_v16 = vunpack.c.l.s8.bf16 %v3336_v3  ;;  %v3793_v18 = vunpack.c.l.s8.bf16 %v3729_v37 }
 0x3bb   :  { %v3794_v17 = vunpack.c.l.s8.bf16 %v3730_v25 }
 0x3bc   :  { %3185 = vmatmul.mubr.bf16.gmra.mrb[52].mxu0 %v2966_v1  ;;  %v3369_v1 = vunpack.c.h.s8.bf16 %v3331_v52  ;;  %v3338_v52 = vld [vmem:[%s12900_s10 + $0x58] sm:$0xff] }
 0x3bd   :  { %3508 = vmatpush1.bf16.msra.mxu0 %v3363_v32  ;;  %3194 = vmatprep.mubr.bf16.mxu0 %v12981_v42  ;;  %v3802_v32 = vunpack.c.h.s8.bf16 %v3730_v25  ;;  %v3380_v14 = vunpack.c.l.s8.bf16 %v3338_v52  ;;  %v3340_v25 = vld [vmem:[%s12900_s10 + $0x68] sm:$0xff] }
 0x3be   :  { %3509 = vmatprep.subr.bf16.mxu0 %v3366_v56  ;;  %3921 = vmatprep.subr.bf16.mxu1 %v3794_v17  ;;  %v3375_v56 = vunpack.c.l.s8.bf16 %v3335_v15  ;;  %v3339_v17 = vld [vmem:[%s12900_s10 + $0x60] sm:$0xff] }
 0x3bf   :  { %3922 = vmatpush1.bf16.msra.mxu1 %v3793_v18  ;;  %v3383_v18 = vunpack.c.l.s8.bf16 %v3339_v17 }
 0x3c0   :  { %3923 = vmatprep.subr.bf16.mxu1 %v3802_v32  ;;  %v3386_v32 = vunpack.c.h.s8.bf16 %v3340_v25 }
 0x3c1   :  { %3510 = vmatpush1.bf16.msra.mxu0 %v3365_v59 }
 0x3c2   :  { %3511 = vmatprep.subr.bf16.mxu0 %v3368_v27  ;;  %v3737_v27 = vld [vmem:[%s12902_s11 + $0x40] sm:$0xff] }
 0x3c4   :  { %3195 = vmatmul.mubr.bf16.gmra.mrb[56].mxu0 %v2967_v36  ;;  %v3801_v36 = vunpack.c.h.s8.bf16 %v3729_v37 }
 0x3c5   :  { %3512 = vmatpush1.bf16.msra.mxu0 %v3367_v12  ;;  %3204 = vmatprep.mubr.bf16.mxu0 %v12981_v42  ;;  %v3373_v42 = vunpack.c.h.s8.bf16 %v3333_v7  ;;  %v3377_v12 = vunpack.c.h.s8.bf16 %v3335_v15  ;;  %v3746_v7 = vld [vmem:[%s12902_s11 + $0x88] sm:$0xff]  ;;  %v3384_v15 = vunpack.c.l.s8.bf16 %v3340_v25 }
 0x3c6   :  { %3513 = vmatprep.subr.bf16.mxu0 %v3370_v61  ;;  %3924 = vmatpush1.bf16.msra.mxu1 %v3801_v36  ;;  %v3809_v61 = vunpack.c.l.s8.bf16 %v3737_v27  ;;  %v3826_v3 = vunpack.c.l.s8.bf16 %v3746_v7 }
 0x3c9   :  { %3514 = vmatpush1.bf16.msra.mxu0 %v3369_v1  ;;  %v3337_v1 = vld [vmem:[%s12900_s10 + $0x50] sm:$0xff] }
 0x3ca   :  { %3515 = vmatprep.subr.bf16.mxu0 %v3372_v40  ;;  %v3381_v37 = vunpack.c.h.s8.bf16 %v3337_v1 }
 0x3cc   :  { %3205 = vmatmul.mubr.bf16.gmra.mrb[60].mxu0 %v2968_v21  ;;  %v3738_v21 = vld [vmem:[%s12902_s11 + $0x48] sm:$0xff] }
 0x3cd   :  { %3516 = vmatpush1.bf16.msra.mxu0 %v3371_v43  ;;  %3535 = vmatprep.mubr.bf16.mxu0 %v7989_v33  ;;  %v3810_v59 = vunpack.c.l.s8.bf16 %v3738_v21  ;;  %v3818_v40 = vunpack.c.h.s8.bf16 %v3738_v21  ;;  %v3379_v43 = vunpack.c.l.s8.bf16 %v3337_v1  ;;  %v3817_v33 = vunpack.c.h.s8.bf16 %v3737_v27  ;;  %v3342_v21 = vld [vmem:[%s12900_s10 + $0x78] sm:$0xff] }
 0x3ce   :  { %3517 = vmatprep.subr.bf16.mxu0 %v3374_v2  ;;  %v3382_v2 = vunpack.c.h.s8.bf16 %v3338_v52  ;;  %v3388_v36 = vunpack.c.l.s8.bf16 %v3342_v21 }
 0x3cf   :  { %3925 = vmatprep.subr.bf16.mxu1 %v3810_v59  ;;  %v3834_v59 = vunpack.c.h.s8.bf16 %v3746_v7 }
 0x3d0   :  { %3926 = vmatpush1.bf16.msra.mxu1 %v3809_v61  ;;  %v3344_v61 = vld [vmem:[%s12900_s10 + $0x88] sm:$0xff] }
 0x3d1   :  { %3518 = vmatpush1.bf16.msra.mxu0 %v3373_v42  ;;  %3927 = vmatprep.subr.bf16.mxu1 %v3818_v40  ;;  %v3745_v42 = vld [vmem:[%s12902_s11 + $0x80] sm:$0xff] }
 0x3d2   :  { %3519 = vmatprep.subr.bf16.mxu0 %v3376_v16  ;;  %v3825_v16 = vunpack.c.l.s8.bf16 %v3745_v42  ;;  %v3833_v52 = vunpack.c.h.s8.bf16 %v3745_v42  ;;  %v3753_v40 = vld [vmem:[%s12902_s11 + $0xc0] sm:$0xff] }
 0x3d4   :  { %3928 = vmatpush1.bf16.msra.mxu1 %v3817_v33  ;;  %v3392_v33 = vunpack.c.l.s8.bf16 %v3344_v61 }
 0x3d5   :  { %3520 = vmatpush1.bf16.msra.mxu0 %v3375_v56  ;;  %3929 = vmatprep.subr.bf16.mxu1 %v3826_v3  ;;  %v3385_v56 = vunpack.c.h.s8.bf16 %v3339_v17  ;;  %v7987_v3 = vld [vmem:[%s12901_s3] ss:$16 sps:$4 sm:$0xff]   ;;  %v3346_v17 = vld [vmem:[%s12900_s10 + $0x98] sm:$0xff] }
 0x3d6   :  { %3521 = vmatprep.subr.bf16.mxu0 %v3378_v29  ;;  %v3341_v29 = vld [vmem:[%s12900_s10 + $0x70] sm:$0xff] }
 0x3d7   :  { %v3387_v27 = vunpack.c.l.s8.bf16 %v3341_v29  ;;  %v3389_v7 = vunpack.c.h.s8.bf16 %v3341_v29  ;;  %v3396_v29 = vunpack.c.l.s8.bf16 %v3346_v17 }
 0x3d8   :  { %3930 = vmatpush1.bf16.msra.mxu1 %v3825_v16  ;;  %v3849_v16 = vunpack.c.h.s8.bf16 %v3753_v40 }
 0x3d9   :  { %3522 = vmatpush1.bf16.msra.mxu0 %v3377_v12  ;;  %v3390_v12 = vunpack.c.h.s8.bf16 %v3342_v21  ;;  %3931 = vmatprep.subr.bf16.mxu1 %v3834_v59  ;;  %v3761_v21 = vld [vmem:[%s12902_s11 + $0x100] sm:$0xff]  ;;  %v3345_v59 = vld [vmem:[%s12900_s10 + $0x90] sm:$0xff] }
 0x3da   :  { %3523 = vmatprep.subr.bf16.mxu0 %v3380_v14  ;;  %v3754_v14 = vld [vmem:[%s12902_s11 + $0xc8] sm:$0xff] }
 0x3db   :  { %v3842_v1 = vunpack.c.l.s8.bf16 %v3754_v14  ;;  %v3850_v42 = vunpack.c.h.s8.bf16 %v3754_v14  ;;  %v3865_v14 = vunpack.c.h.s8.bf16 %v3761_v21 }
 0x3dc   :  { %3932 = vmatpush1.bf16.msra.mxu1 %v3833_v52 }
 0x3dd   :  { %3524 = vmatpush1.bf16.msra.mxu0 %v3379_v43  ;;  %v3841_v43 = vunpack.c.l.s8.bf16 %v3753_v40  ;;  %3933 = vmatprep.subr.bf16.mxu1 %v3842_v1  ;;  %v3398_v1 = vunpack.c.h.s8.bf16 %v3346_v17  ;;  %v3348_v40 = vld [vmem:[%s12900_s10 + $0xa8] sm:$0xff]  ;;  %v7996_v17 = vld [vmem:[%s12901_s3 + $0x64] ss:$16 sps:$4 sm:$0xff]  }
 0x3de   :  { %3525 = vmatprep.subr.bf16.mxu0 %v3382_v2  ;;  %v3343_v2 = vld [vmem:[%s12900_s10 + $0x80] sm:$0xff] }
 0x3df   :  { %v3391_v25 = vunpack.c.l.s8.bf16 %v3343_v2 }
 0x3e0   :  { %3934 = vmatpush1.bf16.msra.mxu1 %v3841_v43 }
 0x3e1   :  { %3526 = vmatpush1.bf16.msra.mxu0 %v3381_v37  ;;  %v7990_v37 = vld [vmem:[%s12901_s3 + $0x24] ss:$16 sps:$4 sm:$0xff]   ;;  %3935 = vmatprep.subr.bf16.mxu1 %v3850_v42  ;;  %v3400_v42 = vunpack.c.l.s8.bf16 %v3348_v40 }
 0x3e2   :  { %3527 = vmatprep.subr.bf16.mxu0 %v3384_v15  ;;  %v3394_v15 = vunpack.c.h.s8.bf16 %v3344_v61  ;;  %v7993_v61 = vld [vmem:[%s12901_s3 + $0x44] ss:$16 sps:$4 sm:$0xff]  }
 0x3e4   :  { %3936 = vmatpush1.bf16.msra.mxu1 %v3849_v16 }
 0x3e5   :  { %3528 = vmatpush1.bf16.msra.mxu0 %v3383_v18  ;;  %v3762_v18 = vld [vmem:[%s12902_s11 + $0x108] sm:$0xff] }
 0x3e6   :  { %3529 = vmatprep.subr.bf16.mxu0 %v3386_v32  ;;  %v3858_v32 = vunpack.c.l.s8.bf16 %v3762_v18  ;;  %v3866_v52 = vunpack.c.h.s8.bf16 %v3762_v18 }
 0x3e8   :  { %3937 = vmatprep.subr.bf16.mxu1 %v3858_v32  ;;  %v3402_v32 = vunpack.c.h.s8.bf16 %v3348_v40  ;;  %v8001_v40 = vld [vmem:[%s12901_s3 + $0xc] ss:$16 sps:$4 sm:$0xff]  }
 0x3e9   :  { %3530 = vmatpush1.bf16.msra.mxu0 %v3385_v56  ;;  %v3393_v56 = vunpack.c.h.s8.bf16 %v3343_v2  ;;  %v3397_v2 = vunpack.c.h.s8.bf16 %v3345_v59 }
 0x3ea   :  { %3531 = vmatprep.subr.bf16.mxu0 %v3388_v36  ;;  %v3857_v36 = vunpack.c.l.s8.bf16 %v3761_v21  ;;  %v3350_v21 = vld [vmem:[%s12900_s10 + $0xb8] sm:$0xff] }
 0x3ec   :  { %3938 = vmatpush1.bf16.msra.mxu1 %v3857_v36 }
 0x3ed   :  { %3532 = vmatpush1.bf16.msra.mxu0 %v3387_v27  ;;  %v7992_v27 = vld [vmem:[%s12901_s3 + $0x20] ss:$16 sps:$4 sm:$0xff]   ;;  %3939 = vmatprep.subr.bf16.mxu1 %v3866_v52  ;;  %v3404_v52 = vunpack.c.l.s8.bf16 %v3350_v21 }
 0x3ee   :  { %3533 = vmatprep.subr.bf16.mxu0 %v3390_v12  ;;  %v3395_v12 = vunpack.c.l.s8.bf16 %v3345_v59 }
 0x3f0   :  { %3940 = vmatpush1.bf16.msra.mxu1 %v3865_v14 }
 0x3f1   :  { %3534 = vmatpush1.bf16.msra.mxu0 %v3389_v7  ;;  %v3770_v7 = vld [vmem:[%s12902_s11 + $0x148] sm:$0xff] }
 0x3f2   :  { %3576 = vmatprep.subr.bf16.mxu0 %v3392_v33  ;;  %v3874_v43 = vunpack.c.l.s8.bf16 %v3770_v7  ;;  %v3769_v33 = vld [vmem:[%s12902_s11 + $0x140] sm:$0xff]  ;;  %v3882_v16 = vunpack.c.h.s8.bf16 %v3770_v7 }
 0x3f3   :  { %v3881_v18 = vunpack.c.h.s8.bf16 %v3769_v33 }
 0x3f4   :  { %3536 = vmatmul.mubr.bf16.vlgmr.msra.gmra.mrb[64].mxu0 %v7987_v3  ;;  %v3873_v3 = vunpack.c.l.s8.bf16 %v3769_v33  ;;  %3941 = vmatprep.subr.bf16.mxu1 %v3874_v43  ;;  %v3406_v43 = vunpack.c.h.s8.bf16 %v3350_v21  ;;  %v3352_v33 = vld [vmem:[%s12900_s10 + $0xc8] sm:$0xff] }
 0x3f5   :  { %3577 = vmatpush1.bf16.msra.mxu0 %v3391_v25  ;;  %3545 = vmatprep.mubr.bf16.mxu0 %v7990_v37  ;;  %v3347_v25 = vld [vmem:[%s12900_s10 + $0xa0] sm:$0xff]  ;;  %v3410_v21 = vunpack.c.h.s8.bf16 %v3352_v33 }
 0x3f6   :  { %3578 = vmatprep.subr.bf16.mxu0 %v3394_v15  ;;  %3942 = vmatpush1.bf16.msra.mxu1 %v3873_v3  ;;  %v7995_v37 = vld [vmem:[%s12901_s3 + $0x40] ss:$16 sps:$4 sm:$0xff]   ;;  %v3399_v15 = vunpack.c.l.s8.bf16 %v3347_v25  ;;  %v3401_v59 = vunpack.c.h.s8.bf16 %v3347_v25 }
 0x3f7   :  { %3943 = vmatprep.subr.bf16.mxu1 %v3882_v16  ;;  %v3408_v16 = vunpack.c.l.s8.bf16 %v3352_v33 }
 0x3f9   :  { %3579 = vmatpush1.bf16.msra.mxu0 %v3393_v56  ;;  %v3778_v56 = vld [vmem:[%s12902_s11 + $0x188] sm:$0xff] }
 0x3fa   :  { %3580 = vmatprep.subr.bf16.mxu0 %v3396_v29  ;;  %3944 = vmatpush1.bf16.msra.mxu1 %v3881_v18  ;;  %v3890_v36 = vunpack.c.l.s8.bf16 %v3778_v56  ;;  %v3777_v29 = vld [vmem:[%s12902_s11 + $0x180] sm:$0xff]  ;;  %v3898_v14 = vunpack.c.h.s8.bf16 %v3778_v56  ;;  %v3354_v56 = vld [vmem:[%s12900_s10 + $0xd8] sm:$0xff] }
 0x3fb   :  { %v3897_v7 = vunpack.c.h.s8.bf16 %v3777_v29 }
 0x3fc   :  { %3546 = vmatmul.mubr.bf16.gmra.mrb[68].mxu0 %v7992_v27  ;;  %v3889_v27 = vunpack.c.l.s8.bf16 %v3777_v29  ;;  %3945 = vmatprep.subr.bf16.mxu1 %v3890_v36  ;;  %v10022_v36 = vld [vmem:[%s12902_s11 + $0x18] sm:$0xff] }
 0x3fd   :  { %3581 = vmatpush1.bf16.msra.mxu0 %v3395_v12  ;;  %3555 = vmatprep.mubr.bf16.mxu0 %v7993_v61  ;;  %v3349_v12 = vld [vmem:[%s12900_s10 + $0xb0] sm:$0xff]  ;;  %v3796_v29 = vunpack.c.l.s8.bf16 %v10022_v36 }
 0x3fe   :  { %3582 = vmatprep.subr.bf16.mxu0 %v3398_v1  ;;  %3946 = vmatpush1.bf16.msra.mxu1 %v3889_v27  ;;  %v7998_v61 = vld [vmem:[%s12901_s3 + $0x60] ss:$16 sps:$4 sm:$0xff]   ;;  %v3403_v1 = vunpack.c.l.s8.bf16 %v3349_v12  ;;  %v3405_v25 = vunpack.c.h.s8.bf16 %v3349_v12  ;;  %v3412_v27 = vunpack.c.l.s8.bf16 %v3354_v56 }
 0x3ff   :  { %3947 = vmatprep.subr.bf16.mxu1 %v3898_v14  ;;  %v3356_v14 = vld [vmem:[%s12900_s10 + $0xe8] sm:$0xff] }
 0x400   :  { %v3418_v33 = vunpack.c.h.s8.bf16 %v3356_v14 }
 0x401   :  { %3583 = vmatpush1.bf16.msra.mxu0 %v3397_v2  ;;  %v3786_v2 = vld [vmem:[%s12902_s11 + $0x1c8] sm:$0xff] }
 0x402   :  { %3584 = vmatprep.subr.bf16.mxu0 %v3400_v42  ;;  %3948 = vmatpush1.bf16.msra.mxu1 %v3897_v7  ;;  %v3906_v3 = vunpack.c.l.s8.bf16 %v3786_v2  ;;  %v3785_v42 = vld [vmem:[%s12902_s11 + $0x1c0] sm:$0xff] }
 0x403   :  { %v3355_v7 = vld [vmem:[%s12900_s10 + $0xe0] sm:$0xff] }
 0x404   :  { %3556 = vmatmul.mubr.bf16.gmra.mrb[72].mxu0 %v7995_v37  ;;  %v3905_v37 = vunpack.c.l.s8.bf16 %v3785_v42  ;;  %3949 = vmatprep.subr.bf16.mxu1 %v3906_v3  ;;  %v3417_v3 = vunpack.c.h.s8.bf16 %v3355_v7 }
 0x405   :  { %3585 = vmatpush1.bf16.msra.mxu0 %v3399_v15  ;;  %3565 = vmatprep.mubr.bf16.mxu0 %v7996_v17  ;;  %v3351_v15 = vld [vmem:[%s12900_s10 + $0xc0] sm:$0xff]  ;;  %v3914_v17 = vunpack.c.h.s8.bf16 %v3786_v2  ;;  %v3358_v2 = vld [vmem:[%s12900_s10 + $0xf8] sm:$0xff] }
 0x406   :  { %3586 = vmatprep.subr.bf16.mxu0 %v3402_v32  ;;  %3950 = vmatpush1.bf16.msra.mxu1 %v3905_v37  ;;  %v3407_v18 = vunpack.c.l.s8.bf16 %v3351_v15  ;;  %v3913_v32 = vunpack.c.h.s8.bf16 %v3785_v42  ;;  %v3420_v42 = vunpack.c.l.s8.bf16 %v3358_v2 }
 0x407   :  { %3951 = vmatprep.subr.bf16.mxu1 %v3914_v17 }
 0x409   :  { %3587 = vmatpush1.bf16.msra.mxu0 %v3401_v59  ;;  %v3409_v59 = vunpack.c.h.s8.bf16 %v3351_v15  ;;  %v3734_v15 = vld [vmem:[%s12902_s11 + $0x28] sm:$0xff] }
 0x40a   :  { %3588 = vmatprep.subr.bf16.mxu0 %v3404_v52  ;;  %3952 = vmatpush1.bf16.msra.mxu1 %v3913_v32  ;;  %v3353_v52 = vld [vmem:[%s12900_s10 + $0xd0] sm:$0xff]  ;;  %v3733_v32 = vld [vmem:[%s12902_s11 + $0x20] sm:$0xff] }
 0x40b   :  { %3994 = vmatprep.subr.bf16.mxu1 %v3796_v29  ;;  %v3411_v12 = vunpack.c.l.s8.bf16 %v3353_v52  ;;  %v3797_v29 = vunpack.c.l.s8.bf16 %v3733_v32 }
 0x40c   :  { %3566 = vmatmul.mubr.bf16.gmra.mrb[76].mxu0 %v7998_v61  ;;  %v3414_v61 = vunpack.c.h.s8.bf16 %v3354_v56  ;;  %v8002_v56 = vld [vmem:[%s12901_s3 + $0x2c] ss:$16 sps:$4 sm:$0xff]  }
 0x40d   :  { %3589 = vmatpush1.bf16.msra.mxu0 %v3403_v1  ;;  %3608 = vmatprep.mubr.bf16.mxu0 %v8001_v40  ;;  %v3413_v1 = vunpack.c.h.s8.bf16 %v3353_v52  ;;  %v3416_v40 = vunpack.c.l.s8.bf16 %v3356_v14  ;;  %v3805_v52 = vunpack.c.h.s8.bf16 %v3733_v32  ;;  %v8004_v14 = vld [vmem:[%s12901_s3 + $0x28] ss:$16 sps:$4 sm:$0xff]   ;;  %v3757_v32 = vld [vmem:[%s12902_s11 + $0xe0] sm:$0xff] }
 0x40e   :  { %3590 = vmatprep.subr.bf16.mxu0 %v3406_v43  ;;  %v3415_v43 = vunpack.c.l.s8.bf16 %v3355_v7 }
 0x411   :  { %3591 = vmatpush1.bf16.msra.mxu0 %v3405_v25  ;;  %v3357_v25 = vld [vmem:[%s12900_s10 + $0xf0] sm:$0xff] }
 0x412   :  { %3592 = vmatprep.subr.bf16.mxu0 %v3408_v16  ;;  %v3419_v37 = vunpack.c.l.s8.bf16 %v3357_v25  ;;  %v3422_v16 = vunpack.c.h.s8.bf16 %v3358_v2  ;;  %v3421_v17 = vunpack.c.h.s8.bf16 %v3357_v25  ;;  %v8008_v25 = vld [vmem:[%s12901_s3 + $0x6c] ss:$16 sps:$4 sm:$0xff]  }
 0x415   :  { %3593 = vmatpush1.bf16.msra.mxu0 %v3407_v18  ;;  %v3798_v18 = vunpack.c.l.s8.bf16 %v3734_v15 }
 0x416   :  { %3594 = vmatprep.subr.bf16.mxu0 %v3410_v21  ;;  %v7999_v21 = vld [vmem:[%s12901_s3 + $0x8] ss:$16 sps:$4 sm:$0xff]  }
 0x419   :  { %3595 = vmatpush1.bf16.msra.mxu0 %v3409_v59  ;;  %v3806_v59 = vunpack.c.h.s8.bf16 %v3734_v15  ;;  %v3758_v15 = vld [vmem:[%s12902_s11 + $0xe8] sm:$0xff] }
 0x41a   :  { %3596 = vmatprep.subr.bf16.mxu0 %v3412_v27  ;;  %v3742_v27 = vld [vmem:[%s12902_s11 + $0x68] sm:$0xff] }
 0x41b   :  { %v3822_v7 = vunpack.c.h.s8.bf16 %v3742_v27 }
 0x41d   :  { %3597 = vmatpush1.bf16.msra.mxu0 %v3411_v12  ;;  %v3814_v12 = vunpack.c.l.s8.bf16 %v3742_v27  ;;  %v3853_v27 = vunpack.c.h.s8.bf16 %v3757_v32 }
 0x41e   :  { %3598 = vmatprep.subr.bf16.mxu0 %v3414_v61  ;;  %v3741_v61 = vld [vmem:[%s12902_s11 + $0x60] sm:$0xff] }
 0x421   :  { %3599 = vmatpush1.bf16.msra.mxu0 %v3413_v1  ;;  %v8005_v1 = vld [vmem:[%s12901_s3 + $0x4c] ss:$16 sps:$4 sm:$0xff]  }
 0x422   :  { %3600 = vmatprep.subr.bf16.mxu0 %v3416_v40  ;;  %v3813_v40 = vunpack.c.l.s8.bf16 %v3741_v61 }
 0x425   :  { %3601 = vmatpush1.bf16.msra.mxu0 %v3415_v43  ;;  %v3750_v43 = vld [vmem:[%s12902_s11 + $0xa8] sm:$0xff] }
 0x426   :  { %3602 = vmatprep.subr.bf16.mxu0 %v3418_v33  ;;  %v3821_v33 = vunpack.c.h.s8.bf16 %v3741_v61  ;;  %v3830_v2 = vunpack.c.l.s8.bf16 %v3750_v43 }
 0x429   :  { %3603 = vmatpush1.bf16.msra.mxu0 %v3417_v3  ;;  %v3749_v3 = vld [vmem:[%s12902_s11 + $0xa0] sm:$0xff] }
 0x42a   :  { %3604 = vmatprep.subr.bf16.mxu0 %v3420_v42  ;;  %v8007_v42 = vld [vmem:[%s12901_s3 + $0x48] ss:$16 sps:$4 sm:$0xff]  }
 0x42d   :  { %3605 = vmatpush1.bf16.msra.mxu0 %v3419_v37  ;;  %v3829_v37 = vunpack.c.l.s8.bf16 %v3749_v3 }
 0x42e   :  { %3606 = vmatprep.subr.bf16.mxu0 %v3422_v16  ;;  %v3838_v16 = vunpack.c.h.s8.bf16 %v3750_v43  ;;  %v3773_v43 = vld [vmem:[%s12902_s11 + $0x160] sm:$0xff] }
 0x431   :  { %3607 = vmatpush1.bf16.msra.mxu0 %v3421_v17  ;;  %v3837_v17 = vunpack.c.h.s8.bf16 %v3749_v3  ;;  %v3782_v3 = vld [vmem:[%s12902_s11 + $0x1a8] sm:$0xff] }
 0x432   :  { %4067 = vmatprep.subr.bf16.mxu0 %v3798_v18  ;;  %v3846_v18 = vunpack.c.l.s8.bf16 %v3758_v15 }
 0x434   :  { %3609 = vmatmul.mubr.bf16.vlgmr.msra.gmra.mrb[64].mxu0 %v7999_v21  ;;  %v8010_v21 = vld [vmem:[%s12901_s3 + $0x68] ss:$16 sps:$4 sm:$0xff]  }
 0x435   :  { %3618 = vmatprep.mubr.bf16.mxu0 %v8002_v56  ;;  %4068 = vmatpush1.bf16.msra.mxu0 %v3797_v29  ;;  %v3845_v56 = vunpack.c.l.s8.bf16 %v3757_v32  ;;  %v3854_v29 = vunpack.c.h.s8.bf16 %v3758_v15  ;;  %v3902_v15 = vunpack.c.h.s8.bf16 %v3782_v3 }
 0x436   :  { %4069 = vmatprep.subr.bf16.mxu0 %v3806_v59  ;;  %v3766_v59 = vld [vmem:[%s12902_s11 + $0x128] sm:$0xff] }
 0x439   :  { %4070 = vmatpush1.bf16.msra.mxu0 %v3805_v52  ;;  %v3862_v52 = vunpack.c.l.s8.bf16 %v3766_v59 }
 0x43a   :  { %4071 = vmatprep.subr.bf16.mxu0 %v3814_v12  ;;  %v3765_v12 = vld [vmem:[%s12902_s11 + $0x120] sm:$0xff] }
 0x43b   :  { %v3861_v61 = vunpack.c.l.s8.bf16 %v3765_v12 }
 0x43c   :  { %3619 = vmatmul.mubr.bf16.gmra.mrb[68].mxu0 %v8004_v14  ;;  %v3870_v14 = vunpack.c.h.s8.bf16 %v3766_v59 }
 0x43d   :  { %3628 = vmatprep.mubr.bf16.mxu0 %v8005_v1  ;;  %4072 = vmatpush1.bf16.msra.mxu0 %v3813_v40  ;;  %v3774_v1 = vld [vmem:[%s12902_s11 + $0x168] sm:$0xff]  ;;  %v3869_v40 = vunpack.c.h.s8.bf16 %v3765_v12 }
 0x43e   :  { %4073 = vmatprep.subr.bf16.mxu0 %v3822_v7  ;;  %v3878_v7 = vunpack.c.l.s8.bf16 %v3774_v1 }
 0x441   :  { %4074 = vmatpush1.bf16.msra.mxu0 %v3821_v33  ;;  %v3877_v33 = vunpack.c.l.s8.bf16 %v3773_v43 }
 0x442   :  { %4075 = vmatprep.subr.bf16.mxu0 %v3830_v2  ;;  %v3886_v2 = vunpack.c.h.s8.bf16 %v3774_v1 }
 0x444   :  { %3629 = vmatmul.mubr.bf16.gmra.mrb[72].mxu0 %v8007_v42  ;;  %v3885_v42 = vunpack.c.h.s8.bf16 %v3773_v43 }
 0x445   :  { %3638 = vmatprep.mubr.bf16.mxu0 %v8008_v25  ;;  %4076 = vmatpush1.bf16.msra.mxu0 %v3829_v37  ;;  %v3894_v25 = vunpack.c.l.s8.bf16 %v3782_v3  ;;  %v3781_v37 = vld [vmem:[%s12902_s11 + $0x1a0] sm:$0xff] }
 0x446   :  { %4077 = vmatprep.subr.bf16.mxu0 %v3838_v16  ;;  %v3893_v16 = vunpack.c.l.s8.bf16 %v3781_v37 }
 0x449   :  { %4078 = vmatpush1.bf16.msra.mxu0 %v3837_v17  ;;  %v3790_v17 = vld [vmem:[%s12902_s11 + $0x1e8] sm:$0xff] }
 0x44a   :  { %4079 = vmatprep.subr.bf16.mxu0 %v3846_v18  ;;  %v3901_v18 = vunpack.c.h.s8.bf16 %v3781_v37  ;;  %v3910_v32 = vunpack.c.l.s8.bf16 %v3790_v17 }
 0x44c   :  { %3639 = vmatmul.mubr.bf16.gmra.mrb[76].mxu0 %v8010_v21  ;;  %v3789_v21 = vld [vmem:[%s12902_s11 + $0x1e0] sm:$0xff] }
 0x44d   :  { %4080 = vmatpush1.bf16.msra.mxu0 %v3845_v56  ;;  %v3909_v59 = vunpack.c.l.s8.bf16 %v3789_v21 }
 0x44e   :  { %4081 = vmatprep.subr.bf16.mxu0 %v3854_v29 }
 0x451   :  { %4082 = vmatpush1.bf16.msra.mxu0 %v3853_v27 }
 0x452   :  { %4083 = vmatprep.subr.bf16.mxu0 %v3862_v52  ;;  %v3918_v52 = vunpack.c.h.s8.bf16 %v3790_v17  ;;  %v3215_v17 = vld [vmem:[%s12960_s0 + $0xf] sm:$0x3] }
 0x455   :  { %4084 = vmatpush1.bf16.msra.mxu0 %v3861_v61  ;;  %v10112_v61 = vld [vmem:[%s12903_s12 + $0x8] sm:$0xff] }
 0x456   :  { %4085 = vmatprep.subr.bf16.mxu0 %v3870_v14  ;;  %v3917_v14 = vunpack.c.h.s8.bf16 %v3789_v21  ;;  %v4384_v1 = vunpack.c.l.s8.bf16 %v10112_v61 }
 0x459   :  { %4086 = vmatpush1.bf16.msra.mxu0 %v3869_v40 }
 0x45a   :  { %4087 = vmatprep.subr.bf16.mxu0 %v3878_v7 }
 0x45d   :  { %4088 = vmatpush1.bf16.msra.mxu0 %v3877_v33 }
 0x45e   :  { %4089 = vmatprep.subr.bf16.mxu0 %v3886_v2 }
 0x461   :  { %4090 = vmatpush1.bf16.msra.mxu0 %v3885_v42 }
 0x462   :  { %4091 = vmatprep.subr.bf16.mxu0 %v3894_v25 }
 0x465   :  { %4092 = vmatpush1.bf16.msra.mxu0 %v3893_v16  ;;  %v3090_v16 = vld [vmem:[%s12960_s0 + $0xd] sm:$0x3] }
 0x466   :  { %4093 = vmatprep.subr.bf16.mxu0 %v3902_v15  ;;  %v10138_v21 = vrot.slane %v3090_v16, %v8989_v0 }
 0x468   :  { %v3051_v56 = vpop.f32.mrb[72].mxu1 }
 0x469   :  { %v3053_v29 = vpop.f32.mrb[73].mxu1  ;;  %4094 = vmatpush1.bf16.msra.mxu0 %v3901_v18  ;;  %v3102_v48 = vmul.f32 %v10138_v21, %v3051_v56 }
 0x46a   :  { %v3055_v27 = vpop.f32.mrb[74].mxu1  ;;  %4095 = vmatprep.subr.bf16.mxu0 %v3910_v32 }
 0x46b   :  { %v3057_v12 = vpop.f32.mrb[75].mxu1 }
 0x46d   :  { %4096 = vmatpush1.bf16.msra.mxu0 %v3909_v59  ;;  %v10141_v59 = vrot.slane %v3215_v17, %v8989_v0 }
 0x46e   :  { %4097 = vmatprep.subr.bf16.mxu0 %v3918_v52  ;;  %v10144_v52 = vrot.slane %v3090_v16, %v8997_v13 }
 0x470   :  { %v3061_v40 = vpop.f32.mrb[76].mxu1  ;;  %v3103_v9 = vmul.f32 %v10144_v52, %v3053_v29 }
 0x471   :  { %v3063_v7 = vpop.f32.mrb[77].mxu1  ;;  %4098 = vmatpush1.bf16.msra.mxu0 %v3917_v14  ;;  %v3259_v14 = vld [vmem:[%s12962_s26 + $0xd] sm:$0x3] }
 0x472   :  { %v3065_v43 = vpop.f32.mrb[78].mxu1  ;;  %4511 = vmatprep.subr.bf16.mxu0 %v4384_v1  ;;  %v10150_v1 = vrot.slane %v3215_v17, %v8997_v13  ;;  %v10155_v39 = vrot.slane %v3259_v14, %v8989_v0  ;;  %v10160_v20 = vrot.slane %v3259_v14, %v8997_v13  ;;  %v3104_v17 = vmul.f32 %v10138_v21, %v3055_v27 }
 0x473   :  { %v3067_v33 = vpop.f32.mrb[79].mxu1  ;;  %v3106_v14 = vmul.f32 %v10138_v21, %v3061_v40  ;;  %v3107_v53 = vmul.f32 %v10144_v52, %v3063_v7 }
 0x478   :  { %v10115_v2 = vpop.f32.mrb[80].mxu1 }
 0x479   :  { %v10117_v3 = vpop.f32.mrb[81].mxu1 }
 0x47a   :  { %v10119_v42 = vpop.f32.mrb[82].mxu1 }
 0x47b   :  { %v10121_v25 = vpop.f32.mrb[83].mxu1 }
 0x480   :  { %v10123_v37 = vpop.f32.mrb[84].mxu1 }
 0x481   :  { %v10128_v15 = vpop.f32.mrb[85].mxu1 }
 0x482   :  { %v10133_v18 = vpop.f32.mrb[86].mxu1 }
 0x483   :  { %v10135_v32 = vpop.f32.mrb[87].mxu1 }
 0x487   :  { %v3176_v24 = vpop.f32.mrb[48].mxu0 }
 0x488   :  { %v3227_v11 = vmul.f32 %v10141_v59, %v3176_v24  ;;  %v3178_v30 = vpop.f32.mrb[49].mxu0  ;;  %v3105_v24 = vmul.f32 %v10144_v52, %v3057_v12 }
 0x489   :  { %v3228_v16 = vmul.f32 %v10150_v1, %v3178_v30  ;;  %v3180_v46 = vpop.f32.mrb[50].mxu0  ;;  %v10170_v30 = vld [vmem:[%s12902_s11 + $0x10] sm:$0xff] }
 0x48a   :  { %v3243_v62 = vadd.f32 %v3227_v11, %v3102_v48  ;;  %v3229_v51 = vmul.f32 %v10141_v59, %v3180_v46  ;;  %v3182_v56 = vpop.f32.mrb[51].mxu0  ;;  %v10175_v11 = vld [vmem:[%s12903_s12] sm:$0xff] }
 0x48b   :  { %v3244_v19 = vadd.f32 %v3228_v16, %v3103_v9  ;;  %v3230_v58 = vmul.f32 %v10150_v1, %v3182_v56 }
 0x48c   :  { %v3271_v47 = vadd.f32 %v10155_v39, %v3243_v62  ;;  %v3245_v29 = vadd.f32 %v3229_v51, %v3104_v17  ;;  %v3795_v51 = vunpack.c.l.s8.bf16 %v10170_v30  ;;  %v4383_v62 = vunpack.c.l.s8.bf16 %v10175_v11 }
 0x48d   :  { %v3272_v48 = vadd.f32 %v10160_v20, %v3244_v19  ;;  %v3246_v46 = vadd.f32 %v3230_v58, %v3105_v24 }
 0x48e   :  { %v3273_v9 = vadd.f32 %v10155_v39, %v3245_v29  ;;  %v3287_v16 = vmax.f32 %v3271_v47, 0.0  ;;  %v3109_v47 = vmul.f32 %v10144_v52, %v3067_v33  ;;  %v3804_v33 = vunpack.c.h.s8.bf16 %v10022_v36 }
 0x48f   :  { %v3274_v27 = vadd.f32 %v10160_v20, %v3246_v46  ;;  %v3186_v12 = vpop.f32.mrb[52].mxu0  ;;  %v3288_v19 = vmax.f32 %v3272_v48, 0.0  ;;  %v3108_v46 = vmul.f32 %v10138_v21, %v3065_v43  ;;  %v10202_v43 = vld [vmem:[%s12902_s11 + $0x50] sm:$0xff] }
 0x490   :  { %v3289_v17 = vmax.f32 %v3273_v9, 0.0  ;;  %v3231_v56 = vmul.f32 %v10141_v59, %v3186_v12  ;;  %v3188_v8 = vpop.f32.mrb[53].mxu0  ;;  %v3811_v36 = vunpack.c.l.s8.bf16 %v10202_v43 }
 0x491   :  { %v3290_v58 = vmax.f32 %v3274_v27, 0.0  ;;  %v3232_v24 = vmul.f32 %v10150_v1, %v3188_v8  ;;  %v3190_v29 = vpop.f32.mrb[54].mxu0  ;;  %v10197_v8 = vld [vmem:[%s12902_s11 + $0x58] sm:$0xff] }
 0x492   :  { %v10187_v55 = vpack.c.bf16 %v3289_v17, %v3287_v16  ;;  %v3247_v54 = vadd.f32 %v3231_v56, %v3106_v14  ;;  %v3233_v60 = vmul.f32 %v10141_v59, %v3190_v29  ;;  %v3192_v40 = vpop.f32.mrb[55].mxu0  ;;  %v4392_v14 = vunpack.c.h.s8.bf16 %v10112_v61 }
 0x493   :  { %v10191_v9 = vpack.c.bf16 %v3290_v58, %v3288_v19  ;;  %v3248_v12 = vadd.f32 %v3232_v24, %v3107_v53  ;;  %v3234_v7 = vmul.f32 %v10150_v1, %v3192_v40  ;;  %v10210_v53 = vld [vmem:[%s12903_s12 + $0x48] sm:$0xff]  ;;  %v3110_v61 = vmul.f32 %v10138_v21, %v10115_v2  ;;  %v10232_v2 = vld [vmem:[%s12903_s12 + $0x40] sm:$0xff] }
 0x494   :  { %v3275_v48 = vadd.f32 %v10155_v39, %v3247_v54  ;;  %v3249_v27 = vadd.f32 %v3233_v60, %v3108_v46  ;;  %v3803_v60 = vunpack.c.h.s8.bf16 %v10170_v30  ;;  %v3812_v54 = vunpack.c.l.s8.bf16 %v10197_v8 }
 0x495   :  { %v3276_v16 = vadd.f32 %v10160_v20, %v3248_v12  ;;  %v3250_v17 = vadd.f32 %v3234_v7, %v3109_v47  ;;  %3953 = vmatprep.mubr.bf16.mxu1 %v10191_v9  ;;  %4099 = vmatprep.mubr.bf16.mxu0 %v10191_v9  ;;  %v4391_v24 = vunpack.c.h.s8.bf16 %v10175_v11  ;;  %v4400_v29 = vunpack.c.l.s8.bf16 %v10210_v53 }
 0x496   :  { %v3277_v56 = vadd.f32 %v10155_v39, %v3249_v27  ;;  %3954 = vmatmul.mubr.bf16.vlgmr.msra.gmra.mrb[88].mxu1 %v10187_v55  ;;  %4100 = vmatmul.mubr.bf16.vlgmr.msra.gmra.mrb[80].mxu0 %v10187_v55  ;;  %v3111_v46 = vmul.f32 %v10144_v52, %v10117_v3  ;;  %v3291_v30 = vmax.f32 %v3275_v48, 0.0  ;;  %v3112_v11 = vmul.f32 %v10138_v21, %v10119_v42  ;;  %v10248_v42 = vld [vmem:[%s12902_s11 + $0x98] sm:$0xff] }
 0x497   :  { %v3278_v19 = vadd.f32 %v10160_v20, %v3250_v17  ;;  %3995 = vmatpush1.bf16.msra.mxu1 %v3795_v51  ;;  %v3196_v58 = vpop.f32.mrb[56].mxu0  ;;  %4512 = vmatpush1.bf16.msra.mxu0 %v4383_v62  ;;  %v3292_v51 = vmax.f32 %v3276_v16, 0.0  ;;  %v3113_v48 = vmul.f32 %v10144_v52, %v10121_v25  ;;  %v10253_v25 = vld [vmem:[%s12902_s11 + $0x90] sm:$0xff]  ;;  %v4399_v16 = vunpack.c.l.s8.bf16 %v10232_v2 }
 0x498   :  { %v3293_v40 = vmax.f32 %v3277_v56, 0.0  ;;  %v3235_v47 = vmul.f32 %v10141_v59, %v3196_v58  ;;  %v3198_v12 = vpop.f32.mrb[57].mxu0  ;;  %3996 = vmatprep.subr.bf16.mxu1 %v3804_v33  ;;  %4513 = vmatprep.subr.bf16.mxu0 %v4392_v14 }
 0x499   :  { %v3294_v62 = vmax.f32 %v3278_v19, 0.0  ;;  %v3236_v7 = vmul.f32 %v10150_v1, %v3198_v12  ;;  %v3200_v3 = vpop.f32.mrb[58].mxu0 }
 0x49a   :  { %v10239_v27 = vpack.c.bf16 %v3293_v40, %v3291_v30  ;;  %v3251_v33 = vadd.f32 %v3235_v47, %v3110_v61  ;;  %v3237_v14 = vmul.f32 %v10141_v59, %v3200_v3  ;;  %v3202_v17 = vpop.f32.mrb[59].mxu0  ;;  %v10262_v30 = vld [vmem:[%s12903_s12 + $0x88] sm:$0xff] }
 0x49b   :  { %v10242_v56 = vpack.c.bf16 %v3294_v62, %v3292_v51  ;;  %v3252_v58 = vadd.f32 %v3236_v7, %v3111_v46  ;;  %v3238_v31 = vmul.f32 %v10150_v1, %v3202_v17  ;;  %3997 = vmatpush1.bf16.msra.mxu1 %v3803_v60  ;;  %4514 = vmatpush1.bf16.msra.mxu0 %v4391_v24  ;;  %v3820_v46 = vunpack.c.h.s8.bf16 %v10197_v8 }
 0x49c   :  { %v3279_v61 = vadd.f32 %v10155_v39, %v3251_v33  ;;  %v3253_v19 = vadd.f32 %v3237_v14, %v3112_v11  ;;  %3998 = vmatprep.subr.bf16.mxu1 %v3812_v54  ;;  %4515 = vmatprep.subr.bf16.mxu0 %v4400_v29  ;;  %v4408_v60 = vunpack.c.h.s8.bf16 %v10210_v53  ;;  %v3819_v8 = vunpack.c.h.s8.bf16 %v10202_v43 }
 0x49d   :  { %v3280_v40 = vadd.f32 %v10160_v20, %v3252_v58  ;;  %v3254_v47 = vadd.f32 %v3238_v31, %v3113_v48  ;;  %3963 = vmatprep.mubr.bf16.mxu1 %v10242_v56  ;;  %4109 = vmatprep.mubr.bf16.mxu0 %v10242_v56  ;;  %v3828_v53 = vunpack.c.l.s8.bf16 %v10248_v42  ;;  %v3827_v54 = vunpack.c.l.s8.bf16 %v10253_v25 }
 0x49e   :  { %v3281_v24 = vadd.f32 %v10155_v39, %v3253_v19  ;;  %3964 = vmatmul.mubr.bf16.gmra.mrb[92].mxu1 %v10239_v27  ;;  %4110 = vmatmul.mubr.bf16.gmra.mrb[84].mxu0 %v10239_v27  ;;  %v3114_v29 = vmul.f32 %v10138_v21, %v10123_v37  ;;  %v4407_v11 = vunpack.c.h.s8.bf16 %v10232_v2  ;;  %v4416_v51 = vunpack.c.l.s8.bf16 %v10262_v30  ;;  %v4335_v37 = vld [vmem:[%s12903_s12 + $0x80] sm:$0xff] }
 0x49f   :  { %v3282_v31 = vadd.f32 %v10160_v20, %v3254_v47  ;;  %3999 = vmatpush1.bf16.msra.mxu1 %v3811_v36  ;;  %v3206_v12 = vpop.f32.mrb[60].mxu0  ;;  %4516 = vmatpush1.bf16.msra.mxu0 %v4399_v16  ;;  %v3115_v62 = vmul.f32 %v10144_v52, %v10128_v15  ;;  %v3295_v43 = vmax.f32 %v3279_v61, 0.0  ;;  %v3116_v36 = vmul.f32 %v10138_v21, %v10133_v18 }
 0x4a0   :  { %v3297_v7 = vmax.f32 %v3281_v24, 0.0  ;;  %v3239_v3 = vmul.f32 %v10141_v59, %v3206_v12  ;;  %v3208_v48 = vpop.f32.mrb[61].mxu0  ;;  %4000 = vmatprep.subr.bf16.mxu1 %v3820_v46  ;;  %4517 = vmatprep.subr.bf16.mxu0 %v4408_v60  ;;  %v3296_v2 = vmax.f32 %v3280_v40, 0.0  ;;  %v3117_v15 = vmul.f32 %v10144_v52, %v10135_v32 }
 0x4a1   :  { %v3298_v33 = vmax.f32 %v3282_v31, 0.0  ;;  %v3240_v14 = vmul.f32 %v10150_v1, %v3208_v48  ;;  %v3210_v17 = vpop.f32.mrb[62].mxu0  ;;  %v4415_v18 = vunpack.c.l.s8.bf16 %v4335_v37  ;;  %v3836_v32 = vunpack.c.h.s8.bf16 %v10248_v42 }
 0x4a2   :  { %v10289_v58 = vpack.c.bf16 %v3297_v7, %v3295_v43  ;;  %v3255_v16 = vadd.f32 %v3239_v3, %v3114_v29  ;;  %v3241_v61 = vmul.f32 %v10141_v59, %v3210_v17  ;;  %v3212_v19 = vpop.f32.mrb[63].mxu0  ;;  %v4424_v52 = vunpack.c.h.s8.bf16 %v10262_v30  ;;  %v3763_v17 = vld [vmem:[%s12902_s11 + $0x110] sm:$0xff] }
 0x4a3   :  { %v10292_v46 = vpack.c.bf16 %v3298_v33, %v3296_v2  ;;  %v3256_v60 = vadd.f32 %v3240_v14, %v3115_v62  ;;  %v3242_v47 = vmul.f32 %v10150_v1, %v3212_v19  ;;  %4001 = vmatpush1.bf16.msra.mxu1 %v3819_v8  ;;  %4518 = vmatpush1.bf16.msra.mxu0 %v4407_v11  ;;  %v3756_v1 = vld [vmem:[%s12902_s11 + $0xd8] sm:$0xff]  ;;  %v4344_v8 = vld [vmem:[%s12903_s12 + $0xc8] sm:$0xff]  ;;  %v4423_v29 = vunpack.c.h.s8.bf16 %v4335_v37 }
 0x4a4   :  { %v3283_v21 = vadd.f32 %v10155_v39, %v3255_v16  ;;  %v3257_v40 = vadd.f32 %v3241_v61, %v3116_v36  ;;  %4002 = vmatprep.subr.bf16.mxu1 %v3828_v53  ;;  %4519 = vmatprep.subr.bf16.mxu0 %v4416_v51  ;;  %v3835_v53 = vunpack.c.h.s8.bf16 %v10253_v25  ;;  %v3844_v11 = vunpack.c.l.s8.bf16 %v3756_v1  ;;  %v3755_v51 = vld [vmem:[%s12902_s11 + $0xd0] sm:$0xff]  ;;  %v3764_v37 = vld [vmem:[%s12902_s11 + $0x118] sm:$0xff]  ;;  %v4352_v2 = vld [vmem:[%s12903_s12 + $0x108] sm:$0xff] }
 0x4a5   :  { %v3284_v59 = vadd.f32 %v10160_v20, %v3256_v60  ;;  %v3258_v24 = vadd.f32 %v3242_v47, %v3117_v15  ;;  %3973 = vmatprep.mubr.bf16.mxu1 %v10292_v46  ;;  %4119 = vmatprep.mubr.bf16.mxu0 %v10292_v46  ;;  %v3843_v7 = vunpack.c.l.s8.bf16 %v3755_v51  ;;  %v3852_v3 = vunpack.c.h.s8.bf16 %v3756_v1  ;;  %v4351_v61 = vld [vmem:[%s12903_s12 + $0x100] sm:$0xff] }
 0x4a6   :  { %v3285_v42 = vadd.f32 %v10155_v39, %v3257_v40  ;;  %3974 = vmatmul.mubr.bf16.gmra.mrb[96].mxu1 %v10289_v58  ;;  %4120 = vmatmul.mubr.bf16.gmra.mrb[88].mxu0 %v10289_v58  ;;  %v3299_v31 = vmax.f32 %v3283_v21, 0.0  ;;  %v4432_v39 = vunpack.c.l.s8.bf16 %v4344_v8  ;;  %v4440_v36 = vunpack.c.h.s8.bf16 %v4344_v8  ;;  %v4360_v40 = vld [vmem:[%s12903_s12 + $0x148] sm:$0xff]  ;;  %v4359_v8 = vld [vmem:[%s12903_s12 + $0x140] sm:$0xff] }
 0x4a7   :  { %v3286_v30 = vadd.f32 %v10160_v20, %v3258_v24  ;;  %4003 = vmatpush1.bf16.msra.mxu1 %v3827_v54  ;;  %4520 = vmatpush1.bf16.msra.mxu0 %v4415_v18  ;;  %v3300_v62 = vmax.f32 %v3284_v59, 0.0  ;;  %v4343_v20 = vld [vmem:[%s12903_s12 + $0xc0] sm:$0xff]  ;;  %v3851_v33 = vunpack.c.h.s8.bf16 %v3755_v51  ;;  %v3860_v14 = vunpack.c.l.s8.bf16 %v3764_v37  ;;  %v3772_v18 = vld [vmem:[%s12902_s11 + $0x158] sm:$0xff]  ;;  %v3771_v59 = vld [vmem:[%s12902_s11 + $0x150] sm:$0xff] }
 0x4a8   :  { %v3301_v12 = vmax.f32 %v3285_v42, 0.0  ;;  %4004 = vmatprep.subr.bf16.mxu1 %v3836_v32  ;;  %4521 = vmatprep.subr.bf16.mxu0 %v4424_v52  ;;  %v4431_v48 = vunpack.c.l.s8.bf16 %v4343_v20  ;;  %v4439_v15 = vunpack.c.h.s8.bf16 %v4343_v20  ;;  %v4448_v16 = vunpack.c.l.s8.bf16 %v4352_v2  ;;  %v4367_v20 = vld [vmem:[%s12903_s12 + $0x180] sm:$0xff] }
 0x4a9   :  { %v3302_v43 = vmax.f32 %v3286_v30, 0.0  ;;  %v3859_v19 = vunpack.c.l.s8.bf16 %v3763_v17  ;;  %v3868_v60 = vunpack.c.h.s8.bf16 %v3764_v37  ;;  %v4447_v47 = vunpack.c.l.s8.bf16 %v4351_v61  ;;  %v3788_v37 = vld [vmem:[%s12902_s11 + $0x1d8] sm:$0xff] }
 0x4aa   :  { %v10318_v54 = vpack.c.bf16 %v3301_v12, %v3299_v31  ;;  %v4456_v21 = vunpack.c.h.s8.bf16 %v4352_v2  ;;  %v3867_v32 = vunpack.c.h.s8.bf16 %v3763_v17  ;;  %v3876_v52 = vunpack.c.l.s8.bf16 %v3772_v18  ;;  %v4368_v12 = vld [vmem:[%s12903_s12 + $0x188] sm:$0xff]  ;;  %v3787_v17 = vld [vmem:[%s12902_s11 + $0x1d0] sm:$0xff] }
 0x4ab   :  { %v10320_v25 = vpack.c.bf16 %v3302_v43, %v3300_v62  ;;  %4005 = vmatpush1.bf16.msra.mxu1 %v3835_v53  ;;  %4522 = vmatpush1.bf16.msra.mxu0 %v4423_v29  ;;  %v4455_v24 = vunpack.c.h.s8.bf16 %v4351_v61  ;;  %v4464_v1 = vunpack.c.l.s8.bf16 %v4360_v40  ;;  %v3875_v42 = vunpack.c.l.s8.bf16 %v3771_v59  ;;  %v3780_v29 = vld [vmem:[%s12902_s11 + $0x198] sm:$0xff]  ;;  %v4376_v2 = vld [vmem:[%s12903_s12 + $0x1c8] sm:$0xff]  ;;  %v4375_v61 = vld [vmem:[%s12903_s12 + $0x1c0] sm:$0xff] }
 0x4ac   :  { %4006 = vmatprep.subr.bf16.mxu1 %v3844_v11  ;;  %4523 = vmatprep.subr.bf16.mxu0 %v4432_v39  ;;  %v3884_v30 = vunpack.c.h.s8.bf16 %v3772_v18  ;;  %v4463_v53 = vunpack.c.l.s8.bf16 %v4359_v8  ;;  %v4472_v31 = vunpack.c.h.s8.bf16 %v4360_v40  ;;  %v3883_v11 = vunpack.c.h.s8.bf16 %v3771_v59  ;;  %v3779_v39 = vld [vmem:[%s12902_s11 + $0x190] sm:$0xff]  ;;  %v3736_v18 = vld [vmem:[%s12902_s11 + $0x38] sm:$0xff]  ;;  %v10381_v40 = vld [vmem:[%s12903_s12 + $0x28] sm:$0xff] }
 0x4ad   :  { %3983 = vmatprep.mubr.bf16.mxu1 %v10320_v25  ;;  %4129 = vmatprep.mubr.bf16.mxu0 %v10320_v25  ;;  %v3892_v51 = vunpack.c.l.s8.bf16 %v3780_v29  ;;  %v4471_v62 = vunpack.c.h.s8.bf16 %v4359_v8  ;;  %v4480_v43 = vunpack.c.l.s8.bf16 %v4368_v12  ;;  %v3735_v59 = vld [vmem:[%s12902_s11 + $0x30] sm:$0xff] }
 0x4ae   :  { %3984 = vmatmul.mubr.bf16.gmra.mrb[100].mxu1 %v10318_v54  ;;  %4130 = vmatmul.mubr.bf16.gmra.mrb[92].mxu0 %v10318_v54  ;;  %v3799_v8 = vunpack.c.l.s8.bf16 %v3735_v59 }
 0x4af   :  { %4007 = vmatpush1.bf16.msra.mxu1 %v3843_v7  ;;  %4026 = vmatprep.mubr.bf16.mxu1 %v10191_v9  ;;  %v3891_v7 = vunpack.c.l.s8.bf16 %v3779_v39 }
 0x4b0   :  { %4008 = vmatprep.subr.bf16.mxu1 %v3852_v3  ;;  %4524 = vmatpush1.bf16.msra.mxu0 %v4431_v48  ;;  %v3900_v3 = vunpack.c.h.s8.bf16 %v3780_v29  ;;  %v4479_v48 = vunpack.c.l.s8.bf16 %v4367_v20 }
 0x4b1   :  { %4525 = vmatprep.subr.bf16.mxu0 %v4440_v36  ;;  %v4488_v36 = vunpack.c.h.s8.bf16 %v4368_v12 }
 0x4b3   :  { %4009 = vmatpush1.bf16.msra.mxu1 %v3851_v33  ;;  %v3899_v33 = vunpack.c.h.s8.bf16 %v3779_v39 }
 0x4b4   :  { %4010 = vmatprep.subr.bf16.mxu1 %v3860_v14  ;;  %4526 = vmatpush1.bf16.msra.mxu0 %v4439_v15  ;;  %v3908_v14 = vunpack.c.l.s8.bf16 %v3788_v37  ;;  %v4487_v15 = vunpack.c.h.s8.bf16 %v4367_v20 }
 0x4b5   :  { %4527 = vmatprep.subr.bf16.mxu0 %v4448_v16  ;;  %v4496_v16 = vunpack.c.l.s8.bf16 %v4376_v2 }
 0x4b7   :  { %4011 = vmatpush1.bf16.msra.mxu1 %v3859_v19  ;;  %v3907_v19 = vunpack.c.l.s8.bf16 %v3787_v17 }
 0x4b8   :  { %4012 = vmatprep.subr.bf16.mxu1 %v3868_v60  ;;  %4528 = vmatpush1.bf16.msra.mxu0 %v4447_v47  ;;  %v3916_v60 = vunpack.c.h.s8.bf16 %v3788_v37  ;;  %v4495_v47 = vunpack.c.l.s8.bf16 %v4375_v61 }
 0x4b9   :  { %4529 = vmatprep.subr.bf16.mxu0 %v4456_v21  ;;  %v4504_v21 = vunpack.c.h.s8.bf16 %v4376_v2 }
 0x4bb   :  { %4013 = vmatpush1.bf16.msra.mxu1 %v3867_v32  ;;  %v3915_v32 = vunpack.c.h.s8.bf16 %v3787_v17 }
 0x4bc   :  { %4014 = vmatprep.subr.bf16.mxu1 %v3876_v52  ;;  %4530 = vmatpush1.bf16.msra.mxu0 %v4455_v24  ;;  %v3800_v52 = vunpack.c.l.s8.bf16 %v3736_v18  ;;  %v4503_v24 = vunpack.c.h.s8.bf16 %v4375_v61 }
 0x4bd   :  { %4531 = vmatprep.subr.bf16.mxu0 %v4464_v1  ;;  %v4388_v1 = vunpack.c.l.s8.bf16 %v10381_v40 }
 0x4bf   :  { %4015 = vmatpush1.bf16.msra.mxu1 %v3875_v42  ;;  %v3808_v42 = vunpack.c.h.s8.bf16 %v3736_v18 }
 0x4c0   :  { %4016 = vmatprep.subr.bf16.mxu1 %v3884_v30  ;;  %4532 = vmatpush1.bf16.msra.mxu0 %v4463_v53  ;;  %v3744_v30 = vld [vmem:[%s12902_s11 + $0x78] sm:$0xff]  ;;  %v3807_v53 = vunpack.c.h.s8.bf16 %v3735_v59 }
 0x4c1   :  { %4533 = vmatprep.subr.bf16.mxu0 %v4472_v31  ;;  %v3816_v29 = vunpack.c.l.s8.bf16 %v3744_v30  ;;  %v3743_v31 = vld [vmem:[%s12902_s11 + $0x70] sm:$0xff] }
 0x4c2   :  { %v3815_v12 = vunpack.c.l.s8.bf16 %v3743_v31  ;;  %v3823_v39 = vunpack.c.h.s8.bf16 %v3743_v31 }
 0x4c3   :  { %4017 = vmatpush1.bf16.msra.mxu1 %v3883_v11  ;;  %v3824_v11 = vunpack.c.h.s8.bf16 %v3744_v30 }
 0x4c4   :  { %4018 = vmatprep.subr.bf16.mxu1 %v3892_v51  ;;  %4534 = vmatpush1.bf16.msra.mxu0 %v4471_v62  ;;  %v3752_v51 = vld [vmem:[%s12902_s11 + $0xb8] sm:$0xff] }
 0x4c5   :  { %4535 = vmatprep.subr.bf16.mxu0 %v4480_v43  ;;  %v3832_v62 = vunpack.c.l.s8.bf16 %v3752_v51  ;;  %v3751_v43 = vld [vmem:[%s12902_s11 + $0xb0] sm:$0xff] }
 0x4c6   :  { %v3831_v20 = vunpack.c.l.s8.bf16 %v3751_v43 }
 0x4c7   :  { %4019 = vmatpush1.bf16.msra.mxu1 %v3891_v7  ;;  %v3840_v7 = vunpack.c.h.s8.bf16 %v3752_v51 }
 0x4c8   :  { %4020 = vmatprep.subr.bf16.mxu1 %v3900_v3  ;;  %4536 = vmatpush1.bf16.msra.mxu0 %v4479_v48  ;;  %v3760_v3 = vld [vmem:[%s12902_s11 + $0xf8] sm:$0xff]  ;;  %v3839_v48 = vunpack.c.h.s8.bf16 %v3751_v43 }
 0x4c9   :  { %4537 = vmatprep.subr.bf16.mxu0 %v4488_v36  ;;  %v3848_v37 = vunpack.c.l.s8.bf16 %v3760_v3  ;;  %v3759_v36 = vld [vmem:[%s12902_s11 + $0xf0] sm:$0xff] }
 0x4ca   :  { %v3847_v2 = vunpack.c.l.s8.bf16 %v3759_v36  ;;  %v3855_v17 = vunpack.c.h.s8.bf16 %v3759_v36 }
 0x4cb   :  { %4021 = vmatpush1.bf16.msra.mxu1 %v3899_v33  ;;  %v3856_v33 = vunpack.c.h.s8.bf16 %v3760_v3  ;;  %v3791_v3 = vld [vmem:[%s12902_s11 + $0x1f0] sm:$0xff] }
 0x4cc   :  { %4022 = vmatprep.subr.bf16.mxu1 %v3908_v14  ;;  %4538 = vmatpush1.bf16.msra.mxu0 %v4487_v15  ;;  %v3768_v14 = vld [vmem:[%s12902_s11 + $0x138] sm:$0xff] }
 0x4cd   :  { %4539 = vmatprep.subr.bf16.mxu0 %v4496_v16  ;;  %v3864_v15 = vunpack.c.l.s8.bf16 %v3768_v14  ;;  %v3767_v16 = vld [vmem:[%s12902_s11 + $0x130] sm:$0xff] }
 0x4ce   :  { %v3863_v61 = vunpack.c.l.s8.bf16 %v3767_v16 }
 0x4cf   :  { %4023 = vmatpush1.bf16.msra.mxu1 %v3907_v19  ;;  %v3872_v19 = vunpack.c.h.s8.bf16 %v3768_v14 }
 0x4d0   :  { %4024 = vmatprep.subr.bf16.mxu1 %v3916_v60  ;;  %4540 = vmatpush1.bf16.msra.mxu0 %v4495_v47  ;;  %v3776_v60 = vld [vmem:[%s12902_s11 + $0x178] sm:$0xff]  ;;  %v3871_v47 = vunpack.c.h.s8.bf16 %v3767_v16 }
 0x4d1   :  { %4541 = vmatprep.subr.bf16.mxu0 %v4504_v21  ;;  %v3880_v18 = vunpack.c.l.s8.bf16 %v3776_v60 }
 0x4d3   :  { %4025 = vmatpush1.bf16.msra.mxu1 %v3915_v32  ;;  %v3888_v32 = vunpack.c.h.s8.bf16 %v3776_v60  ;;  %v4322_v60 = vld [vmem:[%s12903_s12 + $0x18] sm:$0xff] }
 0x4d4   :  { %4140 = vmatprep.subr.bf16.mxu1 %v3800_v52  ;;  %4542 = vmatpush1.bf16.msra.mxu0 %v4503_v24  ;;  %v3784_v52 = vld [vmem:[%s12902_s11 + $0x1b8] sm:$0xff] }
 0x4d5   :  { %4657 = vmatprep.subr.bf16.mxu0 %v4388_v1  ;;  %v3896_v24 = vunpack.c.l.s8.bf16 %v3784_v52  ;;  %v3783_v1 = vld [vmem:[%s12902_s11 + $0x1b0] sm:$0xff] }
 0x4d6   :  { %4027 = vmatmul.mubr.bf16.vlgmr.msra.gmra.mrb[104].mxu1 %v10187_v55  ;;  %v3895_v30 = vunpack.c.l.s8.bf16 %v3783_v1 }
 0x4d7   :  { %4036 = vmatprep.mubr.bf16.mxu1 %v10242_v56  ;;  %4141 = vmatpush1.bf16.msra.mxu1 %v3799_v8  ;;  %v3649_v8 = vld [vmem:[%s12960_s0 + $0x11] sm:$0x3] }
 0x4d8   :  { %4142 = vmatprep.subr.bf16.mxu1 %v3808_v42  ;;  %v3677_v42 = vld [vmem:[%s12962_s26 + $0xf] sm:$0x3]  ;;  %v10441_v31 = vrot.slane %v3649_v8, %v8997_v13 }
 0x4db   :  { %4143 = vmatpush1.bf16.msra.mxu1 %v3807_v53  ;;  %v10438_v53 = vrot.slane %v3649_v8, %v8989_v0 }
 0x4dc   :  { %4144 = vmatprep.subr.bf16.mxu1 %v3816_v29  ;;  %v3904_v29 = vunpack.c.h.s8.bf16 %v3784_v52 }
 0x4de   :  { %4037 = vmatmul.mubr.bf16.gmra.mrb[108].mxu1 %v10239_v27 }
 0x4df   :  { %4046 = vmatprep.mubr.bf16.mxu1 %v10292_v46  ;;  %4145 = vmatpush1.bf16.msra.mxu1 %v3815_v12  ;;  %v3792_v12 = vld [vmem:[%s12902_s11 + $0x1f8] sm:$0xff] }
 0x4e0   :  { %4146 = vmatprep.subr.bf16.mxu1 %v3824_v11  ;;  %v10447_v11 = vrot.slane %v3677_v42, %v8989_v0 }
 0x4e3   :  { %4147 = vmatpush1.bf16.msra.mxu1 %v3823_v39  ;;  %v10450_v39 = vrot.slane %v3677_v42, %v8997_v13  ;;  %v4386_v42 = vunpack.c.l.s8.bf16 %v4322_v60 }
 0x4e4   :  { %4148 = vmatprep.subr.bf16.mxu1 %v3832_v62  ;;  %v3903_v62 = vunpack.c.h.s8.bf16 %v3783_v1 }
 0x4e6   :  { %4047 = vmatmul.mubr.bf16.gmra.mrb[112].mxu1 %v10289_v58 }
 0x4e7   :  { %4056 = vmatprep.mubr.bf16.mxu1 %v10320_v25  ;;  %4149 = vmatpush1.bf16.msra.mxu1 %v3831_v20 }
 0x4e8   :  { %4150 = vmatprep.subr.bf16.mxu1 %v3840_v7  ;;  %v3912_v7 = vunpack.c.l.s8.bf16 %v3792_v12 }
 0x4eb   :  { %4151 = vmatpush1.bf16.msra.mxu1 %v3839_v48 }
 0x4ec   :  { %4152 = vmatprep.subr.bf16.mxu1 %v3848_v37 }
 0x4ee   :  { %4057 = vmatmul.mubr.bf16.gmra.mrb[116].mxu1 %v10318_v54 }
 0x4ef   :  { %4153 = vmatpush1.bf16.msra.mxu1 %v3847_v2  ;;  %4172 = vmatprep.mubr.bf16.mxu1 %v10191_v9  ;;  %v3775_v9 = vld [vmem:[%s12902_s11 + $0x170] sm:$0xff] }
 0x4f0   :  { %4154 = vmatprep.subr.bf16.mxu1 %v3856_v33  ;;  %v3879_v21 = vunpack.c.l.s8.bf16 %v3775_v9  ;;  %v3887_v59 = vunpack.c.h.s8.bf16 %v3775_v9  ;;  %v4323_v9 = vld [vmem:[%s12903_s12 + $0x20] sm:$0xff] }
 0x4f3   :  { %4155 = vmatpush1.bf16.msra.mxu1 %v3855_v17 }
 0x4f4   :  { %4156 = vmatprep.subr.bf16.mxu1 %v3864_v15  ;;  %v3911_v15 = vunpack.c.l.s8.bf16 %v3791_v3 }
 0x4f7   :  { %4157 = vmatpush1.bf16.msra.mxu1 %v3863_v61  ;;  %v3920_v61 = vunpack.c.h.s8.bf16 %v3792_v12 }
 0x4f8   :  { %4158 = vmatprep.subr.bf16.mxu1 %v3872_v19 }
 0x4fb   :  { %4159 = vmatpush1.bf16.msra.mxu1 %v3871_v47 }
 0x4fc   :  { %4160 = vmatprep.subr.bf16.mxu1 %v3880_v18 }
 0x4ff   :  { %4161 = vmatpush1.bf16.msra.mxu1 %v3879_v21 }
 0x500   :  { %4162 = vmatprep.subr.bf16.mxu1 %v3888_v32 }
 0x503   :  { %4163 = vmatpush1.bf16.msra.mxu1 %v3887_v59  ;;  %v3919_v59 = vunpack.c.h.s8.bf16 %v3791_v3  ;;  %v4396_v3 = vunpack.c.h.s8.bf16 %v10381_v40 }
 0x504   :  { %4164 = vmatprep.subr.bf16.mxu1 %v3896_v24 }
 0x507   :  { %v3610_v51 = vpop.f32.mrb[64].mxu0  ;;  %4165 = vmatpush1.bf16.msra.mxu1 %v3895_v30  ;;  %v4321_v30 = vld [vmem:[%s12903_s12 + $0x10] sm:$0xff] }
 0x508   :  { %v3661_v43 = vmul.f32 %v10438_v53, %v3610_v51  ;;  %v3612_v20 = vpop.f32.mrb[65].mxu0  ;;  %4166 = vmatprep.subr.bf16.mxu1 %v3904_v29 }
 0x509   :  { %v3662_v48 = vmul.f32 %v10441_v31, %v3612_v20  ;;  %v3614_v37 = vpop.f32.mrb[66].mxu0 }
 0x50a   :  { %v3689_v36 = vadd.f32 %v10447_v11, %v3661_v43  ;;  %v3663_v2 = vmul.f32 %v10438_v53, %v3614_v37  ;;  %v3616_v33 = vpop.f32.mrb[67].mxu0 }
 0x50b   :  { %v3690_v14 = vadd.f32 %v10450_v39, %v3662_v48  ;;  %v3664_v17 = vmul.f32 %v10441_v31, %v3616_v33  ;;  %4167 = vmatpush1.bf16.msra.mxu1 %v3903_v62  ;;  %v4387_v62 = vunpack.c.l.s8.bf16 %v4323_v9 }
 0x50c   :  { %v3691_v16 = vadd.f32 %v10447_v11, %v3663_v2  ;;  %4168 = vmatprep.subr.bf16.mxu1 %v3912_v7  ;;  %v3705_v47 = vmax.f32 %v3689_v36, 0.0  ;;  %v4385_v36 = vunpack.c.l.s8.bf16 %v4321_v30  ;;  %v4332_v2 = vld [vmem:[%s12903_s12 + $0x68] sm:$0xff] }
 0x50d   :  { %v3692_v19 = vadd.f32 %v10450_v39, %v3664_v17  ;;  %v3706_v21 = vmax.f32 %v3690_v14, 0.0  ;;  %v4394_v14 = vunpack.c.h.s8.bf16 %v4322_v60  ;;  %v4395_v17 = vunpack.c.h.s8.bf16 %v4323_v9 }
 0x50e   :  { %v3707_v18 = vmax.f32 %v3691_v16, 0.0  ;;  %v4393_v9 = vunpack.c.h.s8.bf16 %v4321_v30 }
 0x50f   :  { %v3708_v32 = vmax.f32 %v3692_v19, 0.0  ;;  %v3620_v52 = vpop.f32.mrb[68].mxu0  ;;  %4169 = vmatpush1.bf16.msra.mxu1 %v3911_v15  ;;  %v4330_v15 = vld [vmem:[%s12903_s12 + $0x58] sm:$0xff]  ;;  %v4404_v19 = vunpack.c.l.s8.bf16 %v4332_v2 }
 0x510   :  { %v10469_v24 = vpack.c.bf16 %v3707_v18, %v3705_v47  ;;  %v3665_v1 = vmul.f32 %v10438_v53, %v3620_v52  ;;  %v3622_v8 = vpop.f32.mrb[69].mxu0  ;;  %4170 = vmatprep.subr.bf16.mxu1 %v3920_v61  ;;  %v4331_v47 = vld [vmem:[%s12903_s12 + $0x60] sm:$0xff] }
 0x511   :  { %v10475_v29 = vpack.c.bf16 %v3708_v32, %v3706_v21  ;;  %v3666_v12 = vmul.f32 %v10441_v31, %v3622_v8  ;;  %v3624_v51 = vpop.f32.mrb[70].mxu0 }
 0x512   :  { %v3693_v43 = vadd.f32 %v10447_v11, %v3665_v1  ;;  %v3667_v20 = vmul.f32 %v10438_v53, %v3624_v51  ;;  %v3626_v7 = vpop.f32.mrb[71].mxu0  ;;  %v4329_v1 = vld [vmem:[%s12903_s12 + $0x50] sm:$0xff] }
 0x513   :  { %v3694_v48 = vadd.f32 %v10450_v39, %v3666_v12  ;;  %v3668_v37 = vmul.f32 %v10441_v31, %v3626_v7  ;;  %4171 = vmatpush1.bf16.msra.mxu1 %v3919_v59  ;;  %4543 = vmatprep.mubr.bf16.mxu0 %v10475_v29 }
 0x514   :  { %v3695_v33 = vadd.f32 %v10447_v11, %v3667_v20  ;;  %4544 = vmatmul.mubr.bf16.vlgmr.msra.gmra.mrb[96].mxu0 %v10469_v24  ;;  %4584 = vmatprep.subr.bf16.mxu1 %v4386_v42  ;;  %v3709_v16 = vmax.f32 %v3693_v43, 0.0  ;;  %v4412_v43 = vunpack.c.h.s8.bf16 %v4332_v2 }
 0x515   :  { %v3696_v40 = vadd.f32 %v10450_v39, %v3668_v37  ;;  %4658 = vmatpush1.bf16.msra.mxu0 %v4387_v62  ;;  %v3710_v18 = vmax.f32 %v3694_v48, 0.0  ;;  %v4340_v48 = vld [vmem:[%s12903_s12 + $0xa8] sm:$0xff] }
 0x516   :  { %v3711_v61 = vmax.f32 %v3695_v33, 0.0  ;;  %4173 = vmatmul.mubr.bf16.vlgmr.msra.gmra.mrb[120].mxu1 %v10187_v55  ;;  %4659 = vmatprep.subr.bf16.mxu0 %v4396_v3  ;;  %v4402_v55 = vunpack.c.l.s8.bf16 %v4330_v15  ;;  %v4401_v3 = vunpack.c.l.s8.bf16 %v4329_v1  ;;  %v4411_v33 = vunpack.c.h.s8.bf16 %v4331_v47 }
 0x517   :  { %v3712_v60 = vmax.f32 %v3696_v40, 0.0  ;;  %v3630_v21 = vpop.f32.mrb[72].mxu0  ;;  %4182 = vmatprep.mubr.bf16.mxu1 %v10242_v56  ;;  %4585 = vmatpush1.bf16.msra.mxu1 %v4385_v36  ;;  %v4403_v56 = vunpack.c.l.s8.bf16 %v4331_v47  ;;  %v4410_v36 = vunpack.c.h.s8.bf16 %v4330_v15  ;;  %v4409_v47 = vunpack.c.h.s8.bf16 %v4329_v1 }
 0x518   :  { %v10498_v32 = vpack.c.bf16 %v3711_v61, %v3709_v16  ;;  %v3669_v52 = vmul.f32 %v10438_v53, %v3630_v21  ;;  %v3632_v59 = vpop.f32.mrb[73].mxu0  ;;  %4586 = vmatprep.subr.bf16.mxu1 %v4394_v14  ;;  %v4338_v14 = vld [vmem:[%s12903_s12 + $0x98] sm:$0xff]  ;;  %v4420_v16 = vunpack.c.l.s8.bf16 %v4340_v48  ;;  %v4339_v61 = vld [vmem:[%s12903_s12 + $0xa0] sm:$0xff] }
 0x519   :  { %v10504_v8 = vpack.c.bf16 %v3712_v60, %v3710_v18  ;;  %v3670_v42 = vmul.f32 %v10441_v31, %v3632_v59  ;;  %4660 = vmatpush1.bf16.msra.mxu0 %v4395_v17  ;;  %v3634_v12 = vpop.f32.mrb[74].mxu0 }
 0x51a   :  { %v3697_v30 = vadd.f32 %v10447_v11, %v3669_v52  ;;  %v3671_v51 = vmul.f32 %v10438_v53, %v3634_v12  ;;  %v3636_v62 = vpop.f32.mrb[75].mxu0  ;;  %4661 = vmatprep.subr.bf16.mxu0 %v4404_v19  ;;  %v4337_v52 = vld [vmem:[%s12903_s12 + $0x90] sm:$0xff] }
 0x51b   :  { %v3698_v20 = vadd.f32 %v10450_v39, %v3670_v42  ;;  %v3672_v7 = vmul.f32 %v10441_v31, %v3636_v62  ;;  %4553 = vmatprep.mubr.bf16.mxu0 %v10504_v8  ;;  %4587 = vmatpush1.bf16.msra.mxu1 %v4393_v9 }
 0x51c   :  { %v3699_v37 = vadd.f32 %v10447_v11, %v3671_v51  ;;  %4554 = vmatmul.mubr.bf16.gmra.mrb[100].mxu0 %v10498_v32  ;;  %4588 = vmatprep.subr.bf16.mxu1 %v4402_v55  ;;  %v3713_v40 = vmax.f32 %v3697_v30, 0.0  ;;  %v4428_v30 = vunpack.c.h.s8.bf16 %v4340_v48  ;;  %v4427_v48 = vunpack.c.h.s8.bf16 %v4339_v61 }
 0x51d   :  { %v3700_v2 = vadd.f32 %v10450_v39, %v3672_v7  ;;  %4662 = vmatpush1.bf16.msra.mxu0 %v4403_v56  ;;  %v3714_v19 = vmax.f32 %v3698_v20, 0.0  ;;  %v4348_v20 = vld [vmem:[%s12903_s12 + $0xe8] sm:$0xff] }
 0x51e   :  { %v3715_v17 = vmax.f32 %v3699_v37, 0.0  ;;  %4183 = vmatmul.mubr.bf16.gmra.mrb[124].mxu1 %v10239_v27  ;;  %4663 = vmatprep.subr.bf16.mxu0 %v4412_v43  ;;  %v4418_v27 = vunpack.c.l.s8.bf16 %v4338_v14  ;;  %v4417_v43 = vunpack.c.l.s8.bf16 %v4337_v52 }
 0x51f   :  { %v3716_v15 = vmax.f32 %v3700_v2, 0.0  ;;  %v3640_v18 = vpop.f32.mrb[76].mxu0  ;;  %4192 = vmatprep.mubr.bf16.mxu1 %v10292_v46  ;;  %4589 = vmatpush1.bf16.msra.mxu1 %v4401_v3  ;;  %v4419_v46 = vunpack.c.l.s8.bf16 %v4339_v61  ;;  %v4436_v2 = vunpack.c.l.s8.bf16 %v4348_v20 }
 0x520   :  { %v10526_v60 = vpack.c.bf16 %v3715_v17, %v3713_v40  ;;  %v3673_v21 = vmul.f32 %v10438_v53, %v3640_v18  ;;  %v3642_v9 = vpop.f32.mrb[77].mxu0  ;;  %4590 = vmatprep.subr.bf16.mxu1 %v4410_v36 }
 0x521   :  { %v10532_v59 = vpack.c.bf16 %v3716_v15, %v3714_v19  ;;  %v3674_v55 = vmul.f32 %v10441_v31, %v3642_v9  ;;  %4664 = vmatpush1.bf16.msra.mxu0 %v4411_v33  ;;  %v3644_v42 = vpop.f32.mrb[78].mxu0  ;;  %v4444_v19 = vunpack.c.h.s8.bf16 %v4348_v20  ;;  %v4356_v15 = vld [vmem:[%s12903_s12 + $0x128] sm:$0xff] }
 0x522   :  { %v3701_v1 = vadd.f32 %v10447_v11, %v3673_v21  ;;  %v3675_v12 = vmul.f32 %v10438_v53, %v3644_v42  ;;  %v3646_v56 = vpop.f32.mrb[79].mxu0  ;;  %4665 = vmatprep.subr.bf16.mxu0 %v4420_v16  ;;  %v4426_v53 = vunpack.c.h.s8.bf16 %v4338_v14  ;;  %v4354_v21 = vld [vmem:[%s12903_s12 + $0x118] sm:$0xff]  ;;  %v4452_v9 = vunpack.c.l.s8.bf16 %v4356_v15  ;;  %v4353_v42 = vld [vmem:[%s12903_s12 + $0x110] sm:$0xff] }
 0x523   :  { %v3702_v51 = vadd.f32 %v10450_v39, %v3674_v55  ;;  %v3676_v62 = vmul.f32 %v10441_v31, %v3646_v56  ;;  %4563 = vmatprep.mubr.bf16.mxu0 %v10532_v59  ;;  %4591 = vmatpush1.bf16.msra.mxu1 %v4409_v47  ;;  %v4346_v31 = vld [vmem:[%s12903_s12 + $0xd8] sm:$0xff]  ;;  %v4450_v55 = vunpack.c.l.s8.bf16 %v4354_v21  ;;  %v4458_v56 = vunpack.c.h.s8.bf16 %v4354_v21 }
 0x524   :  { %v3703_v7 = vadd.f32 %v10447_v11, %v3675_v12  ;;  %4564 = vmatmul.mubr.bf16.gmra.mrb[104].mxu0 %v10526_v60  ;;  %4592 = vmatprep.subr.bf16.mxu1 %v4418_v27  ;;  %v3717_v37 = vmax.f32 %v3701_v1, 0.0  ;;  %v4347_v11 = vld [vmem:[%s12903_s12 + $0xe0] sm:$0xff]  ;;  %v4434_v17 = vunpack.c.l.s8.bf16 %v4346_v31  ;;  %v4442_v18 = vunpack.c.h.s8.bf16 %v4346_v31  ;;  %v4364_v12 = vld [vmem:[%s12903_s12 + $0x168] sm:$0xff]  ;;  %v4378_v21 = vld [vmem:[%s12903_s12 + $0x1d8] sm:$0xff] }
 0x525   :  { %v3704_v3 = vadd.f32 %v10450_v39, %v3676_v62  ;;  %4666 = vmatpush1.bf16.msra.mxu0 %v4419_v46  ;;  %v3718_v33 = vmax.f32 %v3702_v51, 0.0  ;;  %v4425_v39 = vunpack.c.h.s8.bf16 %v4337_v52  ;;  %v4435_v61 = vunpack.c.l.s8.bf16 %v4347_v11  ;;  %v4355_v27 = vld [vmem:[%s12903_s12 + $0x120] sm:$0xff]  ;;  %v4362_v51 = vld [vmem:[%s12903_s12 + $0x158] sm:$0xff] }
 0x526   :  { %v3719_v36 = vmax.f32 %v3703_v7, 0.0  ;;  %4193 = vmatmul.mubr.bf16.gmra.mrb[128].mxu1 %v10289_v58  ;;  %4667 = vmatprep.subr.bf16.mxu0 %v4428_v30  ;;  %v4345_v58 = vld [vmem:[%s12903_s12 + $0xd0] sm:$0xff]  ;;  %v4443_v47 = vunpack.c.h.s8.bf16 %v4347_v11  ;;  %v4451_v46 = vunpack.c.l.s8.bf16 %v4355_v27  ;;  %v4449_v1 = vunpack.c.l.s8.bf16 %v4353_v42  ;;  %v4370_v11 = vld [vmem:[%s12903_s12 + $0x198] sm:$0xff] }
 0x527   :  { %v3720_v14 = vmax.f32 %v3704_v3, 0.0  ;;  %4202 = vmatprep.mubr.bf16.mxu1 %v10320_v25  ;;  %4593 = vmatpush1.bf16.msra.mxu1 %v4417_v43  ;;  %v4433_v25 = vunpack.c.l.s8.bf16 %v4345_v58  ;;  %v4441_v52 = vunpack.c.h.s8.bf16 %v4345_v58  ;;  %v4459_v30 = vunpack.c.h.s8.bf16 %v4355_v27  ;;  %v4363_v43 = vld [vmem:[%s12903_s12 + $0x160] sm:$0xff]  ;;  %v4369_v58 = vld [vmem:[%s12903_s12 + $0x190] sm:$0xff] }
 0x528   :  { %v10554_v40 = vpack.c.bf16 %v3719_v36, %v3717_v37  ;;  %4594 = vmatprep.subr.bf16.mxu1 %v4426_v53  ;;  %v4468_v62 = vunpack.c.l.s8.bf16 %v4364_v12  ;;  %v4457_v20 = vunpack.c.h.s8.bf16 %v4353_v42  ;;  %v4466_v7 = vunpack.c.l.s8.bf16 %v4362_v51  ;;  %v4361_v53 = vld [vmem:[%s12903_s12 + $0x150] sm:$0xff]  ;;  %v4372_v37 = vld [vmem:[%s12903_s12 + $0x1a8] sm:$0xff]  ;;  %v4379_v27 = vld [vmem:[%s12903_s12 + $0x1e0] sm:$0xff] }
 0x529   :  { %v10559_v16 = vpack.c.bf16 %v3720_v14, %v3718_v33  ;;  %4668 = vmatpush1.bf16.msra.mxu0 %v4427_v48  ;;  %v4467_v3 = vunpack.c.l.s8.bf16 %v4363_v43  ;;  %v4476_v48 = vunpack.c.h.s8.bf16 %v4364_v12  ;;  %v4465_v31 = vunpack.c.l.s8.bf16 %v4361_v53  ;;  %v4371_v14 = vld [vmem:[%s12903_s12 + $0x1a0] sm:$0xff]  ;;  %v4377_v42 = vld [vmem:[%s12903_s12 + $0x1d0] sm:$0xff]  ;;  %v5050_v12 = vld [vmem:[%s12904_s13 + $0x8] sm:$0xff] }
 0x52a   :  { %4669 = vmatprep.subr.bf16.mxu0 %v4436_v2  ;;  %v4474_v36 = vunpack.c.h.s8.bf16 %v4362_v51  ;;  %v4475_v2 = vunpack.c.h.s8.bf16 %v4363_v43  ;;  %v4484_v33 = vunpack.c.l.s8.bf16 %v4372_v37  ;;  %v4326_v51 = vld [vmem:[%s12903_s12 + $0x38] sm:$0xff]  ;;  %v5049_v43 = vld [vmem:[%s12904_s13] sm:$0xff] }
 0x52b   :  { %4573 = vmatprep.mubr.bf16.mxu0 %v10559_v16  ;;  %4595 = vmatpush1.bf16.msra.mxu1 %v4425_v39  ;;  %v4473_v39 = vunpack.c.h.s8.bf16 %v4361_v53  ;;  %v4325_v53 = vld [vmem:[%s12903_s12 + $0x30] sm:$0xff] }
 0x52c   :  { %4574 = vmatmul.mubr.bf16.gmra.mrb[108].mxu0 %v10554_v40  ;;  %4596 = vmatprep.subr.bf16.mxu1 %v4434_v17  ;;  %v4482_v17 = vunpack.c.l.s8.bf16 %v4370_v11 }
 0x52d   :  { %4670 = vmatpush1.bf16.msra.mxu0 %v4435_v61  ;;  %4689 = vmatprep.mubr.bf16.mxu0 %v10475_v29  ;;  %v4483_v61 = vunpack.c.l.s8.bf16 %v4371_v14 }
 0x52e   :  { %4203 = vmatmul.mubr.bf16.gmra.mrb[132].mxu1 %v10318_v54  ;;  %4671 = vmatprep.subr.bf16.mxu0 %v4444_v19  ;;  %v4460_v54 = vunpack.c.h.s8.bf16 %v4356_v15  ;;  %v4492_v19 = vunpack.c.h.s8.bf16 %v4372_v37  ;;  %v4380_v15 = vld [vmem:[%s12903_s12 + $0x1e8] sm:$0xff] }
 0x52f   :  { %4597 = vmatpush1.bf16.msra.mxu1 %v4433_v25  ;;  %4616 = vmatprep.mubr.bf16.mxu1 %v10475_v29  ;;  %v4481_v25 = vunpack.c.l.s8.bf16 %v4369_v58  ;;  %v5054_v37 = vld [vmem:[%s12904_s13 + $0x28] sm:$0xff] }
 0x530   :  { %4598 = vmatprep.subr.bf16.mxu1 %v4442_v18  ;;  %v4490_v18 = vunpack.c.h.s8.bf16 %v4370_v11  ;;  %v4334_v11 = vld [vmem:[%s12903_s12 + $0x78] sm:$0xff] }
 0x531   :  { %4672 = vmatpush1.bf16.msra.mxu0 %v4443_v47  ;;  %v4491_v47 = vunpack.c.h.s8.bf16 %v4371_v14  ;;  %v5053_v14 = vld [vmem:[%s12904_s13 + $0x20] sm:$0xff] }
 0x532   :  { %4673 = vmatprep.subr.bf16.mxu0 %v4452_v9  ;;  %v4500_v9 = vunpack.c.l.s8.bf16 %v4380_v15 }
 0x533   :  { %4599 = vmatpush1.bf16.msra.mxu1 %v4441_v52  ;;  %v4489_v52 = vunpack.c.h.s8.bf16 %v4369_v58  ;;  %v4333_v58 = vld [vmem:[%s12903_s12 + $0x70] sm:$0xff] }
 0x534   :  { %4600 = vmatprep.subr.bf16.mxu1 %v4450_v55  ;;  %v4498_v55 = vunpack.c.l.s8.bf16 %v4378_v21 }
 0x535   :  { %4674 = vmatpush1.bf16.msra.mxu0 %v4451_v46  ;;  %v4499_v46 = vunpack.c.l.s8.bf16 %v4379_v27 }
 0x536   :  { %4675 = vmatprep.subr.bf16.mxu0 %v4460_v54  ;;  %v4508_v54 = vunpack.c.h.s8.bf16 %v4380_v15  ;;  %v5058_v15 = vld [vmem:[%s12904_s13 + $0x48] sm:$0xff] }
 0x537   :  { %4601 = vmatpush1.bf16.msra.mxu1 %v4449_v1  ;;  %v4497_v1 = vunpack.c.l.s8.bf16 %v4377_v42 }
 0x538   :  { %4602 = vmatprep.subr.bf16.mxu1 %v4458_v56  ;;  %v4506_v56 = vunpack.c.h.s8.bf16 %v4378_v21  ;;  %v4342_v21 = vld [vmem:[%s12903_s12 + $0xb8] sm:$0xff] }
 0x539   :  { %4676 = vmatpush1.bf16.msra.mxu0 %v4459_v30  ;;  %v4507_v30 = vunpack.c.h.s8.bf16 %v4379_v27  ;;  %v5057_v27 = vld [vmem:[%s12904_s13 + $0x40] sm:$0xff] }
 0x53a   :  { %4677 = vmatprep.subr.bf16.mxu0 %v4468_v62  ;;  %v5114_v62 = vunpack.c.l.s8.bf16 %v5050_v12 }
 0x53b   :  { %4603 = vmatpush1.bf16.msra.mxu1 %v4457_v20  ;;  %v4505_v20 = vunpack.c.h.s8.bf16 %v4377_v42  ;;  %v4341_v42 = vld [vmem:[%s12903_s12 + $0xb0] sm:$0xff] }
 0x53c   :  { %4604 = vmatprep.subr.bf16.mxu1 %v4466_v7  ;;  %v4390_v7 = vunpack.c.l.s8.bf16 %v4326_v51 }
 0x53d   :  { %4678 = vmatpush1.bf16.msra.mxu0 %v4467_v3  ;;  %v5113_v3 = vunpack.c.l.s8.bf16 %v5049_v43 }
 0x53e   :  { %4679 = vmatprep.subr.bf16.mxu0 %v4476_v48  ;;  %v5118_v48 = vunpack.c.h.s8.bf16 %v5050_v12  ;;  %v10661_v12 = vld [vmem:[%s12960_s0 + $0x13] sm:$0xff] }
 0x53f   :  { %4605 = vmatpush1.bf16.msra.mxu1 %v4465_v31  ;;  %v4389_v31 = vunpack.c.l.s8.bf16 %v4325_v53 }
 0x540   :  { %4606 = vmatprep.subr.bf16.mxu1 %v4474_v36  ;;  %v4398_v36 = vunpack.c.h.s8.bf16 %v4326_v51  ;;  %v5133_v51 = vunpack.c.h.s8.bf16 %v5057_v27 }
 0x541   :  { %4680 = vmatpush1.bf16.msra.mxu0 %v4475_v2  ;;  %v5117_v2 = vunpack.c.h.s8.bf16 %v5049_v43  ;;  %v10674_v43 = vrot.slane %v10661_v12, %v8989_v0 }
 0x542   :  { %4681 = vmatprep.subr.bf16.mxu0 %v4484_v33  ;;  %v5122_v33 = vunpack.c.l.s8.bf16 %v5054_v37 }
 0x543   :  { %4607 = vmatpush1.bf16.msra.mxu1 %v4473_v39  ;;  %v4397_v39 = vunpack.c.h.s8.bf16 %v4325_v53  ;;  %v10683_v53 = vld [vmem:[%s12962_s26 + $0x11] sm:$0xf] }
 0x544   :  { %4608 = vmatprep.subr.bf16.mxu1 %v4482_v17  ;;  %v4406_v17 = vunpack.c.l.s8.bf16 %v4334_v11 }
 0x545   :  { %4682 = vmatpush1.bf16.msra.mxu0 %v4483_v61  ;;  %v5121_v61 = vunpack.c.l.s8.bf16 %v5053_v14 }
 0x546   :  { %4683 = vmatprep.subr.bf16.mxu0 %v4492_v19  ;;  %v5126_v19 = vunpack.c.h.s8.bf16 %v5054_v37  ;;  %v4349_v37 = vld [vmem:[%s12903_s12 + $0xf0] sm:$0xff] }
 0x547   :  { %4609 = vmatpush1.bf16.msra.mxu1 %v4481_v25  ;;  %v4405_v25 = vunpack.c.l.s8.bf16 %v4333_v58 }
 0x548   :  { %4610 = vmatprep.subr.bf16.mxu1 %v4490_v18  ;;  %v4414_v18 = vunpack.c.h.s8.bf16 %v4334_v11 }
 0x549   :  { %4684 = vmatpush1.bf16.msra.mxu0 %v4491_v47  ;;  %v5125_v47 = vunpack.c.h.s8.bf16 %v5053_v14  ;;  %v10697_v14 = vrot.slane %v10683_v53, %v8989_v0 }
 0x54a   :  { %4685 = vmatprep.subr.bf16.mxu0 %v4500_v9  ;;  %v5130_v9 = vunpack.c.l.s8.bf16 %v5058_v15 }
 0x54b   :  { %4611 = vmatpush1.bf16.msra.mxu1 %v4489_v52  ;;  %v4413_v52 = vunpack.c.h.s8.bf16 %v4333_v58 }
 0x54c   :  { %4612 = vmatprep.subr.bf16.mxu1 %v4498_v55  ;;  %v4422_v55 = vunpack.c.l.s8.bf16 %v4342_v21 }
 0x54d   :  { %4686 = vmatpush1.bf16.msra.mxu0 %v4499_v46  ;;  %v5129_v46 = vunpack.c.l.s8.bf16 %v5057_v27 }
 0x54e   :  { %4687 = vmatprep.subr.bf16.mxu0 %v4508_v54  ;;  %v5134_v54 = vunpack.c.h.s8.bf16 %v5058_v15 }
 0x54f   :  { %4613 = vmatpush1.bf16.msra.mxu1 %v4497_v1  ;;  %v4421_v1 = vunpack.c.l.s8.bf16 %v4341_v42 }
 0x550   :  { %4614 = vmatprep.subr.bf16.mxu1 %v4506_v56  ;;  %v5062_v56 = vld [vmem:[%s12904_s13 + $0x68] sm:$0xff] }
 0x551   :  { %4688 = vmatpush1.bf16.msra.mxu0 %v4507_v30  ;;  %v4430_v30 = vunpack.c.h.s8.bf16 %v4342_v21  ;;  %v5142_v58 = vunpack.c.h.s8.bf16 %v5062_v56 }
 0x552   :  { %5241 = vmatprep.subr.bf16.mxu0 %v5114_v62  ;;  %v4350_v62 = vld [vmem:[%s12903_s12 + $0xf8] sm:$0xff] }
 0x553   :  { %4615 = vmatpush1.bf16.msra.mxu1 %v4505_v20  ;;  %v5138_v20 = vunpack.c.l.s8.bf16 %v5062_v56 }
 0x554   :  { %4690 = vmatmul.mubr.bf16.vlgmr.msra.gmra.mrb[112].mxu0 %v10469_v24  ;;  %4730 = vmatprep.subr.bf16.mxu1 %v4390_v7  ;;  %v5061_v7 = vld [vmem:[%s12904_s13 + $0x60] sm:$0xff] }
 0x555   :  { %4699 = vmatprep.mubr.bf16.mxu0 %v10504_v8  ;;  %5242 = vmatpush1.bf16.msra.mxu0 %v5113_v3  ;;  %v10687_v3 = vrot.slane %v10661_v12, %v8997_v13  ;;  %v5137_v11 = vunpack.c.l.s8.bf16 %v5061_v7 }
 0x556   :  { %4617 = vmatmul.mubr.bf16.vlgmr.msra.gmra.mrb[136].mxu1 %v10469_v24  ;;  %5243 = vmatprep.subr.bf16.mxu0 %v5118_v48  ;;  %v4429_v48 = vunpack.c.h.s8.bf16 %v4341_v42  ;;  %v5141_v42 = vunpack.c.h.s8.bf16 %v5061_v7 }
 0x557   :  { %4626 = vmatprep.mubr.bf16.mxu1 %v10504_v8  ;;  %4731 = vmatpush1.bf16.msra.mxu1 %v4389_v31  ;;  %v4438_v31 = vunpack.c.l.s8.bf16 %v4350_v62 }
 0x558   :  { %4732 = vmatprep.subr.bf16.mxu1 %v4398_v36 }
 0x559   :  { %5244 = vmatpush1.bf16.msra.mxu0 %v5117_v2 }
 0x55a   :  { %5245 = vmatprep.subr.bf16.mxu0 %v5122_v33 }
 0x55b   :  { %4733 = vmatpush1.bf16.msra.mxu1 %v4397_v39 }
 0x55c   :  { %4700 = vmatmul.mubr.bf16.gmra.mrb[116].mxu0 %v10498_v32  ;;  %4734 = vmatprep.subr.bf16.mxu1 %v4406_v17 }
 0x55d   :  { %4709 = vmatprep.mubr.bf16.mxu0 %v10532_v59  ;;  %5246 = vmatpush1.bf16.msra.mxu0 %v5121_v61 }
 0x55e   :  { %4627 = vmatmul.mubr.bf16.gmra.mrb[140].mxu1 %v10498_v32  ;;  %5247 = vmatprep.subr.bf16.mxu0 %v5126_v19  ;;  %v10704_v19 = vrot.slane %v10683_v53, %v8997_v13 }
 0x55f   :  { %4636 = vmatprep.mubr.bf16.mxu1 %v10532_v59  ;;  %4735 = vmatpush1.bf16.msra.mxu1 %v4405_v25 }
 0x560   :  { %4736 = vmatprep.subr.bf16.mxu1 %v4414_v18  ;;  %v4437_v18 = vunpack.c.l.s8.bf16 %v4349_v37 }
 0x561   :  { %5248 = vmatpush1.bf16.msra.mxu0 %v5125_v47  ;;  %v5066_v47 = vld [vmem:[%s12904_s13 + $0x88] sm:$0xff] }
 0x562   :  { %5249 = vmatprep.subr.bf16.mxu0 %v5130_v9  ;;  %v5146_v56 = vunpack.c.l.s8.bf16 %v5066_v47 }
 0x563   :  { %4737 = vmatpush1.bf16.msra.mxu1 %v4413_v52  ;;  %v4446_v52 = vunpack.c.h.s8.bf16 %v4350_v62 }
 0x564   :  { %4710 = vmatmul.mubr.bf16.gmra.mrb[120].mxu0 %v10526_v60  ;;  %4738 = vmatprep.subr.bf16.mxu1 %v4422_v55 }
 0x565   :  { %4719 = vmatprep.mubr.bf16.mxu0 %v10559_v16  ;;  %5250 = vmatpush1.bf16.msra.mxu0 %v5129_v46  ;;  %v4358_v46 = vld [vmem:[%s12903_s12 + $0x138] sm:$0xff] }
 0x566   :  { %4637 = vmatmul.mubr.bf16.gmra.mrb[144].mxu1 %v10526_v60  ;;  %5251 = vmatprep.subr.bf16.mxu0 %v5134_v54 }
 0x567   :  { %4646 = vmatprep.mubr.bf16.mxu1 %v10559_v16  ;;  %4739 = vmatpush1.bf16.msra.mxu1 %v4421_v1 }
 0x568   :  { %4740 = vmatprep.subr.bf16.mxu1 %v4430_v30  ;;  %v5065_v30 = vld [vmem:[%s12904_s13 + $0x80] sm:$0xff] }
 0x569   :  { %5252 = vmatpush1.bf16.msra.mxu0 %v5133_v51  ;;  %v3955_v36 = vpop.f32.mrb[88].mxu1  ;;  %v10692_v2 = vpop.f32.mrb[80].mxu0 }
 0x56a   :  { %v4255_v33 = vmul.f32 %v10674_v43, %v3955_v36  ;;  %v3957_v39 = vpop.f32.mrb[89].mxu1  ;;  %v10699_v17 = vpop.f32.mrb[81].mxu0  ;;  %5253 = vmatprep.subr.bf16.mxu0 %v5138_v20  ;;  %v4445_v20 = vunpack.c.h.s8.bf16 %v4349_v37  ;;  %v5150_v37 = vunpack.c.h.s8.bf16 %v5066_v47  ;;  %v4462_v47 = vunpack.c.h.s8.bf16 %v4358_v46 }
 0x56b   :  { %v4256_v61 = vmul.f32 %v10687_v3, %v3957_v39  ;;  %4741 = vmatpush1.bf16.msra.mxu1 %v4429_v48  ;;  %v3959_v25 = vpop.f32.mrb[90].mxu1  ;;  %v10706_v15 = vpop.f32.mrb[82].mxu0  ;;  %v4454_v48 = vunpack.c.l.s8.bf16 %v4358_v46 }
 0x56c   :  { %4720 = vmatmul.mubr.bf16.gmra.mrb[124].mxu0 %v10554_v40  ;;  %v4263_v21 = vmul.f32 %v10674_v43, %v3959_v25  ;;  %v3961_v9 = vpop.f32.mrb[91].mxu1  ;;  %v10713_v27 = vpop.f32.mrb[83].mxu0  ;;  %4742 = vmatprep.subr.bf16.mxu1 %v4438_v31  ;;  %v4931_v54 = vadd.f32 %v10697_v14, %v4255_v33  ;;  %v4357_v31 = vld [vmem:[%s12903_s12 + $0x130] sm:$0xff]  ;;  %v5145_v33 = vunpack.c.l.s8.bf16 %v5065_v30 }
 0x56d   :  { %5254 = vmatpush1.bf16.msra.mxu0 %v5137_v11  ;;  %v4264_v55 = vmul.f32 %v10687_v3, %v3961_v9  ;;  %v4932_v51 = vadd.f32 %v10704_v19, %v4256_v61  ;;  %v4453_v9 = vunpack.c.l.s8.bf16 %v4357_v31 }
 0x56e   :  { %v4935_v1 = vadd.f32 %v10697_v14, %v4263_v21  ;;  %4647 = vmatmul.mubr.bf16.gmra.mrb[148].mxu1 %v10554_v40  ;;  %5255 = vmatprep.subr.bf16.mxu0 %v5142_v58 }
 0x56f   :  { %v4936_v62 = vadd.f32 %v10704_v19, %v4264_v55  ;;  %4743 = vmatpush1.bf16.msra.mxu1 %v4437_v18  ;;  %4762 = vmatprep.mubr.bf16.mxu1 %v10475_v29 }
 0x570   :  { %v10728_v7 = vpack.c.bf16 %v4935_v1, %v4931_v54  ;;  %4744 = vmatprep.subr.bf16.mxu1 %v4446_v52  ;;  %v5070_v52 = vld [vmem:[%s12904_s13 + $0xa8] sm:$0xff] }
 0x571   :  { %5256 = vmatpush1.bf16.msra.mxu0 %v5141_v42  ;;  %v3965_v36 = vpop.f32.mrb[92].mxu1  ;;  %v10733_v11 = vpop.f32.mrb[84].mxu0  ;;  %v10735_v39 = vpack.c.bf16 %v4936_v62, %v4932_v51  ;;  %v4366_v51 = vld [vmem:[%s12903_s12 + $0x178] sm:$0xff] }
 0x572   :  { %12982 = vst [vmem:[#allocation23_spill] sm:$0xff] %v10733_v11  ;;  %v4271_v58 = vmul.f32 %v10674_v43, %v3965_v36  ;;  %v3967_v61 = vpop.f32.mrb[93].mxu1  ;;  %v10738_v29 = vpop.f32.mrb[85].mxu0  ;;  %5257 = vmatprep.subr.bf16.mxu0 %v5146_v56  ;;  %v5149_v56 = vunpack.c.h.s8.bf16 %v5065_v30  ;;  %v5154_v36 = vunpack.c.l.s8.bf16 %v5070_v52  ;;  %v4461_v30 = vunpack.c.h.s8.bf16 %v4357_v31 }
 0x573   :  { %12983 = vst [vmem:[#allocation24_spill] sm:$0xff] %v10738_v29  ;;  %v4272_v25 = vmul.f32 %v10687_v3, %v3967_v61  ;;  %4745 = vmatpush1.bf16.msra.mxu1 %v4445_v20  ;;  %v3969_v18 = vpop.f32.mrb[94].mxu1  ;;  %v10741_v21 = vpop.f32.mrb[86].mxu0  ;;  %5273 = vmatprep.mubr.bf16.mxu0 %v10735_v39  ;;  %v5069_v61 = vld [vmem:[%s12904_s13 + $0xa0] sm:$0xff]  ;;  %v5158_v31 = vunpack.c.h.s8.bf16 %v5070_v52 }
 0x574   :  { %12984 = vst [vmem:[#allocation25_spill] sm:$0xff] %v10741_v21  ;;  %v4279_v55 = vmul.f32 %v10674_v43, %v3969_v18  ;;  %v3971_v42 = vpop.f32.mrb[95].mxu1  ;;  %v10748_v54 = vpop.f32.mrb[87].mxu0  ;;  %4746 = vmatprep.subr.bf16.mxu1 %v4454_v48  ;;  %v4939_v62 = vadd.f32 %v10697_v14, %v4271_v58  ;;  %v4365_v58 = vld [vmem:[%s12903_s12 + $0x170] sm:$0xff] }
 0x575   :  { %12985 = vst [vmem:[#allocation26_spill] sm:$0xff] %v10748_v54  ;;  %5258 = vmatpush1.bf16.msra.mxu0 %v5145_v33  ;;  %v4280_v1 = vmul.f32 %v10687_v3, %v3971_v42  ;;  %v4940_v46 = vadd.f32 %v10704_v19, %v4272_v25  ;;  %v4470_v33 = vunpack.c.l.s8.bf16 %v4366_v51  ;;  %v5153_v42 = vunpack.c.l.s8.bf16 %v5069_v61 }
 0x576   :  { %v4943_v20 = vadd.f32 %v10697_v14, %v4279_v55  ;;  %5259 = vmatprep.subr.bf16.mxu0 %v5150_v37 }
 0x577   :  { %v4944_v48 = vadd.f32 %v10704_v19, %v4280_v1  ;;  %4747 = vmatpush1.bf16.msra.mxu1 %v4453_v9 }
 0x578   :  { %4748 = vmatprep.subr.bf16.mxu1 %v4462_v47  ;;  %v10764_v18 = vpack.c.bf16 %v4943_v20, %v4939_v62  ;;  %v5074_v20 = vld [vmem:[%s12904_s13 + $0xc8] sm:$0xff] }
 0x579   :  { %5260 = vmatpush1.bf16.msra.mxu0 %v5149_v56  ;;  %v3975_v37 = vpop.f32.mrb[96].mxu1  ;;  %v10766_v55 = vpop.f32.mrb[88].mxu0  ;;  %v10768_v54 = vpack.c.bf16 %v4944_v48, %v4940_v46  ;;  %v4469_v56 = vunpack.c.l.s8.bf16 %v4365_v58 }
 0x57a   :  { %12986 = vst [vmem:[#allocation27_spill] sm:$0xff] %v10766_v55  ;;  %v4287_v25 = vmul.f32 %v10674_v43, %v3975_v37  ;;  %v3977_v1 = vpop.f32.mrb[97].mxu1  ;;  %v10771_v9 = vpop.f32.mrb[89].mxu0  ;;  %5261 = vmatprep.subr.bf16.mxu0 %v5154_v36  ;;  %v5157_v36 = vunpack.c.h.s8.bf16 %v5069_v61  ;;  %v5162_v55 = vunpack.c.l.s8.bf16 %v5074_v20  ;;  %v4477_v61 = vunpack.c.h.s8.bf16 %v4365_v58 }
 0x57b   :  { %12987 = vst [vmem:[#allocation28_spill] sm:$0xff] %v10771_v9  ;;  %v4288_v47 = vmul.f32 %v10687_v3, %v3977_v1  ;;  %4749 = vmatpush1.bf16.msra.mxu1 %v4461_v30  ;;  %v3979_v21 = vpop.f32.mrb[98].mxu1  ;;  %v10774_v62 = vpop.f32.mrb[90].mxu0  ;;  %v4478_v9 = vunpack.c.h.s8.bf16 %v4366_v51  ;;  %v4374_v30 = vld [vmem:[%s12903_s12 + $0x1b8] sm:$0xff]  ;;  %v5166_v58 = vunpack.c.h.s8.bf16 %v5074_v20 }
 0x57c   :  { %12988 = vst [vmem:[#allocation29_spill] sm:$0xff] %v10774_v62  ;;  %v4295_v46 = vmul.f32 %v10674_v43, %v3979_v21  ;;  %v3981_v48 = vpop.f32.mrb[99].mxu1  ;;  %v10780_v37 = vpop.f32.mrb[91].mxu0  ;;  %4750 = vmatprep.subr.bf16.mxu1 %v4470_v33  ;;  %v4947_v1 = vadd.f32 %v10697_v14, %v4287_v25  ;;  %v5073_v21 = vld [vmem:[%s12904_s13 + $0xc0] sm:$0xff]  ;;  %v4373_v25 = vld [vmem:[%s12903_s12 + $0x1b0] sm:$0xff] }
 0x57d   :  { %12989 = vst [vmem:[#allocation30_spill] sm:$0xff] %v10780_v37  ;;  %5262 = vmatpush1.bf16.msra.mxu0 %v5153_v42  ;;  %v4296_v52 = vmul.f32 %v10687_v3, %v3981_v48  ;;  %v4948_v51 = vadd.f32 %v10704_v19, %v4288_v47  ;;  %v4486_v42 = vunpack.c.l.s8.bf16 %v4374_v30  ;;  %v5161_v37 = vunpack.c.l.s8.bf16 %v5073_v21 }
 0x57e   :  { %v4951_v62 = vadd.f32 %v10697_v14, %v4295_v46  ;;  %5263 = vmatprep.subr.bf16.mxu0 %v5158_v31  ;;  %v5165_v20 = vunpack.c.h.s8.bf16 %v5073_v21  ;;  %v4381_v21 = vld [vmem:[%s12903_s12 + $0x1f0] sm:$0xff] }
 0x57f   :  { %v4952_v33 = vadd.f32 %v10704_v19, %v4296_v52  ;;  %4751 = vmatpush1.bf16.msra.mxu1 %v4469_v56 }
 0x580   :  { %4752 = vmatprep.subr.bf16.mxu1 %v4478_v9  ;;  %v10796_v48 = vpack.c.bf16 %v4951_v62, %v4947_v1  ;;  %v5078_v1 = vld [vmem:[%s12904_s13 + $0xe8] sm:$0xff] }
 0x581   :  { %5264 = vmatpush1.bf16.msra.mxu0 %v5157_v36  ;;  %v3985_v31 = vpop.f32.mrb[100].mxu1  ;;  %v10798_v46 = vpop.f32.mrb[92].mxu0  ;;  %v10800_v29 = vpack.c.bf16 %v4952_v33, %v4948_v51  ;;  %v4485_v36 = vunpack.c.l.s8.bf16 %v4373_v25 }
 0x582   :  { %12990 = vst [vmem:[#allocation31_spill] sm:$0xff] %v10798_v46  ;;  %v4303_v47 = vmul.f32 %v10674_v43, %v3985_v31  ;;  %v3987_v52 = vpop.f32.mrb[101].mxu1  ;;  %v10803_v56 = vpop.f32.mrb[93].mxu0  ;;  %5265 = vmatprep.subr.bf16.mxu0 %v5162_v55  ;;  %v5170_v46 = vunpack.c.l.s8.bf16 %v5078_v1 }
 0x583   :  { %12991 = vst [vmem:[#allocation32_spill] sm:$0xff] %v10803_v56  ;;  %v4304_v9 = vmul.f32 %v10687_v3, %v3987_v52  ;;  %4753 = vmatpush1.bf16.msra.mxu1 %v4477_v61  ;;  %v3989_v11 = vpop.f32.mrb[102].mxu1  ;;  %v10806_v62 = vpop.f32.mrb[94].mxu0  ;;  %v4494_v56 = vunpack.c.h.s8.bf16 %v4374_v30  ;;  %v4382_v61 = vld [vmem:[%s12903_s12 + $0x1f8] sm:$0xff] }
 0x584   :  { %12992 = vst [vmem:[#allocation33_spill] sm:$0xff] %v10806_v62  ;;  %v4311_v51 = vmul.f32 %v10674_v43, %v3989_v11  ;;  %v3991_v33 = vpop.f32.mrb[103].mxu1  ;;  %v10812_v31 = vpop.f32.mrb[95].mxu0  ;;  %4754 = vmatprep.subr.bf16.mxu1 %v4486_v42  ;;  %v4955_v52 = vadd.f32 %v10697_v14, %v4303_v47  ;;  %v5077_v43 = vld [vmem:[%s12904_s13 + $0xe0] sm:$0xff]  ;;  %v4502_v30 = vunpack.c.l.s8.bf16 %v4382_v61 }
 0x585   :  { %12993 = vst [vmem:[#allocation34_spill] sm:$0xff] %v10812_v31  ;;  %5266 = vmatpush1.bf16.msra.mxu0 %v5161_v37  ;;  %v4312_v55 = vmul.f32 %v10687_v3, %v3991_v33  ;;  %v4956_v11 = vadd.f32 %v10704_v19, %v4304_v9  ;;  %v4493_v3 = vunpack.c.h.s8.bf16 %v4373_v25  ;;  %v4501_v9 = vunpack.c.l.s8.bf16 %v4381_v21  ;;  %v5051_v33 = vld [vmem:[%s12904_s13 + $0x10] sm:$0xff] }
 0x586   :  { %v4959_v62 = vadd.f32 %v10697_v14, %v4311_v51  ;;  %5267 = vmatprep.subr.bf16.mxu0 %v5166_v58  ;;  %v5169_v14 = vunpack.c.l.s8.bf16 %v5077_v43  ;;  %v5174_v58 = vunpack.c.h.s8.bf16 %v5078_v1  ;;  %v4510_v25 = vunpack.c.h.s8.bf16 %v4382_v61 }
 0x587   :  { %v4960_v37 = vadd.f32 %v10704_v19, %v4312_v55  ;;  %4755 = vmatpush1.bf16.msra.mxu1 %v4485_v36  ;;  %v5082_v19 = vld [vmem:[%s12904_s13 + $0x108] sm:$0xff]  ;;  %v4509_v1 = vunpack.c.h.s8.bf16 %v4381_v21  ;;  %v5115_v61 = vunpack.c.l.s8.bf16 %v5051_v33  ;;  %v5119_v21 = vunpack.c.h.s8.bf16 %v5051_v33  ;;  %v5059_v33 = vld [vmem:[%s12904_s13 + $0x50] sm:$0xff] }
 0x588   :  { %4756 = vmatprep.subr.bf16.mxu1 %v4494_v56  ;;  %v10828_v42 = vpack.c.bf16 %v4959_v62, %v4955_v52  ;;  %v5173_v56 = vunpack.c.h.s8.bf16 %v5077_v43  ;;  %v5052_v62 = vld [vmem:[%s12904_s13 + $0x18] sm:$0xff]  ;;  %v5178_v36 = vunpack.c.l.s8.bf16 %v5082_v19  ;;  %v5086_v52 = vld [vmem:[%s12904_s13 + $0x128] sm:$0xff] }
 0x589   :  { %5268 = vmatpush1.bf16.msra.mxu0 %v5165_v20  ;;  %v10830_v47 = vpack.c.bf16 %v4960_v37, %v4956_v11  ;;  %v5116_v51 = vunpack.c.l.s8.bf16 %v5052_v62  ;;  %v5182_v20 = vunpack.c.h.s8.bf16 %v5082_v19  ;;  %v5120_v43 = vunpack.c.h.s8.bf16 %v5052_v62  ;;  %v5056_v37 = vld [vmem:[%s12904_s13 + $0x38] sm:$0xff] }
 0x58a   :  { %5269 = vmatprep.subr.bf16.mxu0 %v5170_v46  ;;  %v5081_v46 = vld [vmem:[%s12904_s13 + $0x100] sm:$0xff]  ;;  %v5060_v62 = vld [vmem:[%s12904_s13 + $0x58] sm:$0xff] }
 0x58b   :  { %4757 = vmatpush1.bf16.msra.mxu1 %v4493_v3  ;;  %v5177_v55 = vunpack.c.l.s8.bf16 %v5081_v46  ;;  %v5181_v11 = vunpack.c.h.s8.bf16 %v5081_v46  ;;  %v5186_v3 = vunpack.c.l.s8.bf16 %v5086_v52  ;;  %v5089_v46 = vld [vmem:[%s12904_s13 + $0x140] sm:$0xff] }
 0x58c   :  { %4758 = vmatprep.subr.bf16.mxu1 %v4502_v30  ;;  %v5085_v30 = vld [vmem:[%s12904_s13 + $0x120] sm:$0xff] }
 0x58d   :  { %5270 = vmatpush1.bf16.msra.mxu0 %v5169_v14  ;;  %v5124_v14 = vunpack.c.l.s8.bf16 %v5056_v37 }
 0x58e   :  { %5271 = vmatprep.subr.bf16.mxu0 %v5174_v58  ;;  %v5055_v58 = vld [vmem:[%s12904_s13 + $0x30] sm:$0xff] }
 0x58f   :  { %4759 = vmatpush1.bf16.msra.mxu1 %v4501_v9  ;;  %v5185_v9 = vunpack.c.l.s8.bf16 %v5085_v30  ;;  %v5123_v19 = vunpack.c.l.s8.bf16 %v5055_v58 }
 0x590   :  { %4760 = vmatprep.subr.bf16.mxu1 %v4510_v25  ;;  %v5090_v25 = vld [vmem:[%s12904_s13 + $0x148] sm:$0xff] }
 0x591   :  { %5272 = vmatpush1.bf16.msra.mxu0 %v5173_v56  ;;  %v5189_v56 = vunpack.c.h.s8.bf16 %v5085_v30  ;;  %v10895_v30 = vrot.slane %v10661_v12, %v9237_v26 }
 0x592   :  { %5314 = vmatprep.subr.bf16.mxu0 %v5178_v36  ;;  %v5194_v36 = vunpack.c.l.s8.bf16 %v5090_v25 }
 0x593   :  { %4761 = vmatpush1.bf16.msra.mxu1 %v4509_v1  ;;  %v5127_v1 = vunpack.c.h.s8.bf16 %v5055_v58 }
 0x594   :  { %5274 = vmatmul.mubr.bf16.vlgmr.msra.gmra.mrb[128].mxu0 %v10728_v7  ;;  %5387 = vmatprep.subr.bf16.mxu1 %v5116_v51  ;;  %v5132_v51 = vunpack.c.l.s8.bf16 %v5060_v62 }
 0x595   :  { %5283 = vmatprep.mubr.bf16.mxu0 %v10768_v54  ;;  %5315 = vmatpush1.bf16.msra.mxu0 %v5177_v55  ;;  %v5193_v55 = vunpack.c.l.s8.bf16 %v5089_v46 }
 0x596   :  { %4763 = vmatmul.mubr.bf16.vlgmr.msra.gmra.mrb[152].mxu1 %v10469_v24  ;;  %5316 = vmatprep.subr.bf16.mxu0 %v5182_v20  ;;  %v5190_v24 = vunpack.c.h.s8.bf16 %v5086_v52  ;;  %v5131_v20 = vunpack.c.l.s8.bf16 %v5059_v33  ;;  %v5197_v52 = vunpack.c.h.s8.bf16 %v5089_v46 }
 0x597   :  { %4772 = vmatprep.mubr.bf16.mxu1 %v10504_v8  ;;  %5388 = vmatpush1.bf16.msra.mxu1 %v5115_v61  ;;  %v5128_v8 = vunpack.c.h.s8.bf16 %v5056_v37  ;;  %v5094_v61 = vld [vmem:[%s12904_s13 + $0x168] sm:$0xff] }
 0x598   :  { %5389 = vmatprep.subr.bf16.mxu1 %v5120_v43  ;;  %v5064_v43 = vld [vmem:[%s12904_s13 + $0x78] sm:$0xff]  ;;  %v5202_v37 = vunpack.c.l.s8.bf16 %v5094_v61 }
 0x599   :  { %5317 = vmatpush1.bf16.msra.mxu0 %v5181_v11  ;;  %v10887_v11 = vrot.slane %v10661_v12, %v9234_v22  ;;  %v5206_v12 = vunpack.c.h.s8.bf16 %v5094_v61 }
 0x59a   :  { %5318 = vmatprep.subr.bf16.mxu0 %v5186_v3  ;;  %v5093_v3 = vld [vmem:[%s12904_s13 + $0x160] sm:$0xff] }
 0x59b   :  { %5390 = vmatpush1.bf16.msra.mxu1 %v5119_v21  ;;  %v5135_v21 = vunpack.c.h.s8.bf16 %v5059_v33 }
 0x59c   :  { %5284 = vmatmul.mubr.bf16.gmra.mrb[132].mxu0 %v10764_v18  ;;  %5391 = vmatprep.subr.bf16.mxu1 %v5124_v14  ;;  %v5063_v14 = vld [vmem:[%s12904_s13 + $0x70] sm:$0xff] }
 0x59d   :  { %5293 = vmatprep.mubr.bf16.mxu0 %v10800_v29  ;;  %5319 = vmatpush1.bf16.msra.mxu0 %v5185_v9  ;;  %v5201_v9 = vunpack.c.l.s8.bf16 %v5093_v3 }
 0x59e   :  { %4773 = vmatmul.mubr.bf16.gmra.mrb[156].mxu1 %v10498_v32  ;;  %5320 = vmatprep.subr.bf16.mxu0 %v5190_v24  ;;  %v5198_v32 = vunpack.c.h.s8.bf16 %v5090_v25 }
 0x59f   :  { %4782 = vmatprep.mubr.bf16.mxu1 %v10532_v59  ;;  %5392 = vmatpush1.bf16.msra.mxu1 %v5123_v19  ;;  %v5136_v59 = vunpack.c.h.s8.bf16 %v5060_v62  ;;  %v5139_v62 = vunpack.c.l.s8.bf16 %v5063_v14 }
 0x5a0   :  { %5393 = vmatprep.subr.bf16.mxu1 %v5128_v8  ;;  %v10908_v8 = vrot.slane %v10683_v53, %v9237_v26 }
 0x5a1   :  { %5321 = vmatpush1.bf16.msra.mxu0 %v5189_v56 }
 0x5a2   :  { %5322 = vmatprep.subr.bf16.mxu0 %v5194_v36  ;;  %v5098_v36 = vld [vmem:[%s12904_s13 + $0x188] sm:$0xff] }
 0x5a3   :  { %5394 = vmatpush1.bf16.msra.mxu1 %v5127_v1  ;;  %v5210_v61 = vunpack.c.l.s8.bf16 %v5098_v36 }
 0x5a4   :  { %5294 = vmatmul.mubr.bf16.gmra.mrb[136].mxu0 %v10796_v48  ;;  %5395 = vmatprep.subr.bf16.mxu1 %v5132_v51  ;;  %v5144_v51 = vunpack.c.h.s8.bf16 %v5064_v43 }
 0x5a5   :  { %5303 = vmatprep.mubr.bf16.mxu0 %v10830_v47  ;;  %5323 = vmatpush1.bf16.msra.mxu0 %v5193_v55  ;;  %v5205_v55 = vunpack.c.h.s8.bf16 %v5093_v3 }
 0x5a6   :  { %4783 = vmatmul.mubr.bf16.gmra.mrb[160].mxu1 %v10526_v60  ;;  %5324 = vmatprep.subr.bf16.mxu0 %v5198_v32  ;;  %v5140_v60 = vunpack.c.l.s8.bf16 %v5064_v43 }
 0x5a7   :  { %4792 = vmatprep.mubr.bf16.mxu1 %v10559_v16  ;;  %5396 = vmatpush1.bf16.msra.mxu1 %v5131_v20  ;;  %v10903_v16 = vrot.slane %v10683_v53, %v9234_v22  ;;  %v5068_v53 = vld [vmem:[%s12904_s13 + $0x98] sm:$0xff] }
 0x5a8   :  { %5397 = vmatprep.subr.bf16.mxu1 %v5136_v59  ;;  %v5097_v59 = vld [vmem:[%s12904_s13 + $0x180] sm:$0xff] }
 0x5a9   :  { %5325 = vmatpush1.bf16.msra.mxu0 %v5197_v52  ;;  %v4028_v58 = vpop.f32.mrb[104].mxu1 }
 0x5aa   :  { %v4257_v24 = vmul.f32 %v10887_v11, %v4028_v58  ;;  %v4030_v19 = vpop.f32.mrb[105].mxu1  ;;  %5326 = vmatprep.subr.bf16.mxu0 %v5202_v37  ;;  %v5143_v37 = vunpack.c.h.s8.bf16 %v5063_v14 }
 0x5ab   :  { %v4258_v25 = vmul.f32 %v10895_v30, %v4030_v19  ;;  %v4032_v56 = vpop.f32.mrb[106].mxu1  ;;  %5398 = vmatpush1.bf16.msra.mxu1 %v5135_v21  ;;  %v5148_v21 = vunpack.c.l.s8.bf16 %v5068_v53 }
 0x5ac   :  { %v4265_v46 = vmul.f32 %v10887_v11, %v4032_v56  ;;  %5304 = vmatmul.mubr.bf16.gmra.mrb[140].mxu0 %v10828_v42  ;;  %v4034_v1 = vpop.f32.mrb[107].mxu1  ;;  %5399 = vmatprep.subr.bf16.mxu1 %v5140_v60  ;;  %v4933_v32 = vadd.f32 %v10903_v16, %v4257_v24  ;;  %v5102_v56 = vld [vmem:[%s12904_s13 + $0x1a8] sm:$0xff] }
 0x5ad   :  { %v4266_v33 = vmul.f32 %v10895_v30, %v4034_v1  ;;  %5327 = vmatpush1.bf16.msra.mxu0 %v5201_v9  ;;  %v4934_v52 = vadd.f32 %v10908_v8, %v4258_v25  ;;  %v5209_v9 = vunpack.c.l.s8.bf16 %v5097_v59  ;;  %v5152_v1 = vunpack.c.h.s8.bf16 %v5068_v53 }
 0x5ae   :  { %v4937_v20 = vadd.f32 %v10903_v16, %v4265_v46  ;;  %4793 = vmatmul.mubr.bf16.gmra.mrb[164].mxu1 %v10554_v40  ;;  %5328 = vmatprep.subr.bf16.mxu0 %v5206_v12  ;;  %v5067_v40 = vld [vmem:[%s12904_s13 + $0x90] sm:$0xff]  ;;  %v5214_v12 = vunpack.c.h.s8.bf16 %v5098_v36  ;;  %v5213_v36 = vunpack.c.h.s8.bf16 %v5097_v59 }
 0x5af   :  { %v4938_v43 = vadd.f32 %v10908_v8, %v4266_v33  ;;  %5400 = vmatpush1.bf16.msra.mxu1 %v5139_v62  ;;  %5419 = vmatprep.mubr.bf16.mxu1 %v10735_v39  ;;  %v5147_v25 = vunpack.c.l.s8.bf16 %v5067_v40  ;;  %v5072_v33 = vld [vmem:[%s12904_s13 + $0xb8] sm:$0xff]  ;;  %v5151_v59 = vunpack.c.h.s8.bf16 %v5067_v40 }
 0x5b0   :  { %v10928_v3 = vpack.c.bf16 %v4937_v20, %v4933_v32  ;;  %5401 = vmatprep.subr.bf16.mxu1 %v5144_v51  ;;  %v5218_v20 = vunpack.c.l.s8.bf16 %v5102_v56 }
 0x5b1   :  { %5329 = vmatpush1.bf16.msra.mxu0 %v5205_v55  ;;  %v4038_v60 = vpop.f32.mrb[108].mxu1  ;;  %v10933_v58 = vpack.c.bf16 %v4938_v43, %v4934_v52  ;;  %v5156_v43 = vunpack.c.l.s8.bf16 %v5072_v33 }
 0x5b2   :  { %v4273_v24 = vmul.f32 %v10887_v11, %v4038_v60  ;;  %v4040_v19 = vpop.f32.mrb[109].mxu1  ;;  %5330 = vmatprep.subr.bf16.mxu0 %v5210_v61  ;;  %v5101_v61 = vld [vmem:[%s12904_s13 + $0x1a0] sm:$0xff] }
 0x5b3   :  { %v4274_v39 = vmul.f32 %v10895_v30, %v4040_v19  ;;  %v4042_v14 = vpop.f32.mrb[110].mxu1  ;;  %5346 = vmatprep.mubr.bf16.mxu0 %v10933_v58  ;;  %5402 = vmatpush1.bf16.msra.mxu1 %v5143_v37  ;;  %v5071_v37 = vld [vmem:[%s12904_s13 + $0xb0] sm:$0xff] }
 0x5b4   :  { %v4281_v62 = vmul.f32 %v10887_v11, %v4042_v14  ;;  %v4044_v46 = vpop.f32.mrb[111].mxu1  ;;  %5403 = vmatprep.subr.bf16.mxu1 %v5148_v21  ;;  %v4941_v55 = vadd.f32 %v10903_v16, %v4273_v24 }
 0x5b5   :  { %v4282_v51 = vmul.f32 %v10895_v30, %v4044_v46  ;;  %5331 = vmatpush1.bf16.msra.mxu0 %v5209_v9  ;;  %v4942_v53 = vadd.f32 %v10908_v8, %v4274_v39  ;;  %v5217_v9 = vunpack.c.l.s8.bf16 %v5101_v61  ;;  %v5222_v39 = vunpack.c.h.s8.bf16 %v5102_v56  ;;  %v5076_v56 = vld [vmem:[%s12904_s13 + $0xd8] sm:$0xff] }
 0x5b6   :  { %v4945_v32 = vadd.f32 %v10903_v16, %v4281_v62  ;;  %5332 = vmatprep.subr.bf16.mxu0 %v5214_v12  ;;  %v5106_v62 = vld [vmem:[%s12904_s13 + $0x1c8] sm:$0xff] }
 0x5b7   :  { %v4946_v52 = vadd.f32 %v10908_v8, %v4282_v51  ;;  %5404 = vmatpush1.bf16.msra.mxu1 %v5147_v25  ;;  %v5155_v25 = vunpack.c.l.s8.bf16 %v5071_v37  ;;  %v5160_v51 = vunpack.c.h.s8.bf16 %v5072_v33 }
 0x5b8   :  { %5405 = vmatprep.subr.bf16.mxu1 %v5152_v1  ;;  %v10956_v21 = vpack.c.bf16 %v4945_v32, %v4941_v55  ;;  %v5221_v55 = vunpack.c.h.s8.bf16 %v5101_v61  ;;  %v5159_v61 = vunpack.c.h.s8.bf16 %v5071_v37 }
 0x5b9   :  { %5333 = vmatpush1.bf16.msra.mxu0 %v5213_v36  ;;  %v4048_v60 = vpop.f32.mrb[112].mxu1  ;;  %v10958_v24 = vpack.c.bf16 %v4946_v52, %v4942_v53  ;;  %v5226_v53 = vunpack.c.l.s8.bf16 %v5106_v62  ;;  %v5105_v52 = vld [vmem:[%s12904_s13 + $0x1c0] sm:$0xff] }
 0x5ba   :  { %v4289_v19 = vmul.f32 %v10887_v11, %v4048_v60  ;;  %v4050_v12 = vpop.f32.mrb[113].mxu1  ;;  %5334 = vmatprep.subr.bf16.mxu0 %v5218_v20  ;;  %v5075_v60 = vld [vmem:[%s12904_s13 + $0xd0] sm:$0xff] }
 0x5bb   :  { %v4290_v40 = vmul.f32 %v10895_v30, %v4050_v12  ;;  %v4052_v14 = vpop.f32.mrb[114].mxu1  ;;  %5406 = vmatpush1.bf16.msra.mxu1 %v5151_v59  ;;  %v5225_v12 = vunpack.c.l.s8.bf16 %v5105_v52 }
 0x5bc   :  { %v4297_v46 = vmul.f32 %v10887_v11, %v4052_v14  ;;  %v4054_v1 = vpop.f32.mrb[115].mxu1  ;;  %5407 = vmatprep.subr.bf16.mxu1 %v5156_v43  ;;  %v4949_v32 = vadd.f32 %v10903_v16, %v4289_v19  ;;  %v5164_v43 = vunpack.c.l.s8.bf16 %v5076_v56 }
 0x5bd   :  { %v4298_v36 = vmul.f32 %v10895_v30, %v4054_v1  ;;  %5335 = vmatpush1.bf16.msra.mxu0 %v5217_v9  ;;  %v4950_v33 = vadd.f32 %v10908_v8, %v4290_v40  ;;  %v5163_v1 = vunpack.c.l.s8.bf16 %v5075_v60 }
 0x5be   :  { %v4953_v20 = vadd.f32 %v10903_v16, %v4297_v46  ;;  %5336 = vmatprep.subr.bf16.mxu0 %v5222_v39  ;;  %v5230_v46 = vunpack.c.h.s8.bf16 %v5106_v62  ;;  %v5080_v62 = vld [vmem:[%s12904_s13 + $0xf8] sm:$0xff] }
 0x5bf   :  { %v4954_v59 = vadd.f32 %v10908_v8, %v4298_v36  ;;  %5408 = vmatpush1.bf16.msra.mxu1 %v5155_v25 }
 0x5c0   :  { %5409 = vmatprep.subr.bf16.mxu1 %v5160_v51  ;;  %v10980_v9 = vpack.c.bf16 %v4953_v20, %v4949_v32  ;;  %v5110_v51 = vld [vmem:[%s12904_s13 + $0x1e8] sm:$0xff]  ;;  %v5168_v32 = vunpack.c.h.s8.bf16 %v5076_v56 }
 0x5c1   :  { %5337 = vmatpush1.bf16.msra.mxu0 %v5221_v55  ;;  %v4058_v19 = vpop.f32.mrb[116].mxu1  ;;  %v10982_v39 = vpack.c.bf16 %v4954_v59, %v4950_v33  ;;  %v5229_v33 = vunpack.c.h.s8.bf16 %v5105_v52  ;;  %v5167_v52 = vunpack.c.h.s8.bf16 %v5075_v60  ;;  %v5176_v60 = vunpack.c.h.s8.bf16 %v5080_v62 }
 0x5c2   :  { %v4305_v14 = vmul.f32 %v10887_v11, %v4058_v19  ;;  %v4060_v40 = vpop.f32.mrb[117].mxu1  ;;  %5338 = vmatprep.subr.bf16.mxu0 %v5226_v53  ;;  %v5079_v19 = vld [vmem:[%s12904_s13 + $0xf0] sm:$0xff] }
 0x5c3   :  { %v4306_v37 = vmul.f32 %v10895_v30, %v4060_v40  ;;  %v4062_v25 = vpop.f32.mrb[118].mxu1  ;;  %5410 = vmatpush1.bf16.msra.mxu1 %v5159_v61  ;;  %v5234_v61 = vunpack.c.l.s8.bf16 %v5110_v51  ;;  %v5238_v40 = vunpack.c.h.s8.bf16 %v5110_v51  ;;  %v5641_v51 = vld [vmem:[%s12905_s14] sm:$0xff] }
 0x5c4   :  { %v4313_v36 = vmul.f32 %v10887_v11, %v4062_v25  ;;  %v4064_v55 = vpop.f32.mrb[119].mxu1  ;;  %5411 = vmatprep.subr.bf16.mxu1 %v5164_v43  ;;  %v4957_v53 = vadd.f32 %v10903_v16, %v4305_v14  ;;  %v5109_v11 = vld [vmem:[%s12904_s13 + $0x1e0] sm:$0xff]  ;;  %v5172_v43 = vunpack.c.l.s8.bf16 %v5080_v62  ;;  %v5084_v25 = vld [vmem:[%s12904_s13 + $0x118] sm:$0xff] }
 0x5c5   :  { %v4314_v20 = vmul.f32 %v10895_v30, %v4064_v55  ;;  %5339 = vmatpush1.bf16.msra.mxu0 %v5225_v12  ;;  %v4958_v56 = vadd.f32 %v10908_v8, %v4306_v37  ;;  %v5237_v37 = vunpack.c.h.s8.bf16 %v5109_v11  ;;  %v5180_v55 = vunpack.c.l.s8.bf16 %v5084_v25 }
 0x5c6   :  { %v4961_v59 = vadd.f32 %v10903_v16, %v4313_v36  ;;  %5340 = vmatprep.subr.bf16.mxu0 %v5230_v46  ;;  %v5233_v16 = vunpack.c.l.s8.bf16 %v5109_v11  ;;  %v5171_v46 = vunpack.c.l.s8.bf16 %v5079_v19  ;;  %v5175_v36 = vunpack.c.h.s8.bf16 %v5079_v19  ;;  %v5088_v11 = vld [vmem:[%s12904_s13 + $0x138] sm:$0xff]  ;;  %v5087_v19 = vld [vmem:[%s12904_s13 + $0x130] sm:$0xff] }
 0x5c7   :  { %v4962_v30 = vadd.f32 %v10908_v8, %v4314_v20  ;;  %5412 = vmatpush1.bf16.msra.mxu1 %v5163_v1  ;;  %v5642_v8 = vld [vmem:[%s12905_s14 + $0x8] sm:$0xff]  ;;  %v5705_v20 = vunpack.c.l.s8.bf16 %v5641_v51 }
 0x5c8   :  { %5413 = vmatprep.subr.bf16.mxu1 %v5168_v32  ;;  %v11004_v12 = vpack.c.bf16 %v4961_v59, %v4957_v53  ;;  %v5706_v1 = vunpack.c.l.s8.bf16 %v5642_v8  ;;  %v5083_v32 = vld [vmem:[%s12904_s13 + $0x110] sm:$0xff]  ;;  %v5646_v53 = vld [vmem:[%s12905_s14 + $0x28] sm:$0xff]  ;;  %v5184_v59 = vunpack.c.h.s8.bf16 %v5084_v25  ;;  %v5649_v25 = vld [vmem:[%s12905_s14 + $0x40] sm:$0xff] }
 0x5c9   :  { %5341 = vmatpush1.bf16.msra.mxu0 %v5229_v33  ;;  %v11006_v14 = vpack.c.bf16 %v4962_v30, %v4958_v56  ;;  %v5710_v33 = vunpack.c.h.s8.bf16 %v5642_v8  ;;  %v5179_v62 = vunpack.c.l.s8.bf16 %v5083_v32  ;;  %v5714_v56 = vunpack.c.l.s8.bf16 %v5646_v53  ;;  %v5645_v30 = vld [vmem:[%s12905_s14 + $0x20] sm:$0xff] }
 0x5ca   :  { %5342 = vmatprep.subr.bf16.mxu0 %v5234_v61  ;;  %v5709_v61 = vunpack.c.h.s8.bf16 %v5641_v51  ;;  %v5717_v8 = vunpack.c.h.s8.bf16 %v5645_v30 }
 0x5cb   :  { %5414 = vmatpush1.bf16.msra.mxu1 %v5167_v52  ;;  %v5183_v52 = vunpack.c.h.s8.bf16 %v5083_v32 }
 0x5cc   :  { %5415 = vmatprep.subr.bf16.mxu1 %v5172_v43  ;;  %v5188_v43 = vunpack.c.l.s8.bf16 %v5088_v11 }
 0x5cd   :  { %5343 = vmatpush1.bf16.msra.mxu0 %v5233_v16  ;;  %v5713_v16 = vunpack.c.l.s8.bf16 %v5645_v30  ;;  %v5653_v30 = vld [vmem:[%s12905_s14 + $0x60] sm:$0xff] }
 0x5ce   :  { %5344 = vmatprep.subr.bf16.mxu0 %v5238_v40  ;;  %v5187_v40 = vunpack.c.l.s8.bf16 %v5087_v19 }
 0x5cf   :  { %5416 = vmatpush1.bf16.msra.mxu1 %v5171_v46  ;;  %v5650_v46 = vld [vmem:[%s12905_s14 + $0x48] sm:$0xff] }
 0x5d0   :  { %5417 = vmatprep.subr.bf16.mxu1 %v5176_v60  ;;  %v5092_v60 = vld [vmem:[%s12904_s13 + $0x158] sm:$0xff]  ;;  %v5726_v32 = vunpack.c.h.s8.bf16 %v5650_v46 }
 0x5d1   :  { %5345 = vmatpush1.bf16.msra.mxu0 %v5237_v37  ;;  %v5722_v37 = vunpack.c.l.s8.bf16 %v5650_v46  ;;  %v5196_v51 = vunpack.c.l.s8.bf16 %v5092_v60 }
 0x5d2   :  { %5833 = vmatprep.subr.bf16.mxu0 %v5706_v1  ;;  %v5191_v1 = vunpack.c.h.s8.bf16 %v5087_v19 }
 0x5d3   :  { %5418 = vmatpush1.bf16.msra.mxu1 %v5175_v36  ;;  %v5091_v36 = vld [vmem:[%s12904_s13 + $0x150] sm:$0xff] }
 0x5d4   :  { %5347 = vmatmul.mubr.bf16.vlgmr.msra.gmra.mrb[128].mxu0 %v10928_v3  ;;  %5460 = vmatprep.subr.bf16.mxu1 %v5180_v55  ;;  %v5721_v55 = vunpack.c.l.s8.bf16 %v5649_v25 }
 0x5d5   :  { %5356 = vmatprep.mubr.bf16.mxu0 %v10958_v24  ;;  %5834 = vmatpush1.bf16.msra.mxu0 %v5705_v20  ;;  %v5195_v20 = vunpack.c.l.s8.bf16 %v5091_v36 }
 0x5d6   :  { %5420 = vmatmul.mubr.bf16.vlgmr.msra.gmra.mrb[168].mxu1 %v10728_v7  ;;  %5835 = vmatprep.subr.bf16.mxu0 %v5710_v33  ;;  %v5718_v7 = vunpack.c.h.s8.bf16 %v5646_v53  ;;  %v11069_v53 = vld [vmem:[%s12962_s26 + $0x15] sm:$0xf] }
 0x5d7   :  { %5429 = vmatprep.mubr.bf16.mxu1 %v10768_v54  ;;  %5461 = vmatpush1.bf16.msra.mxu1 %v5179_v62  ;;  %v5192_v54 = vunpack.c.h.s8.bf16 %v5088_v11  ;;  %v5200_v62 = vunpack.c.h.s8.bf16 %v5092_v60  ;;  %v5096_v11 = vld [vmem:[%s12904_s13 + $0x178] sm:$0xff]  ;;  %v5729_v60 = vunpack.c.l.s8.bf16 %v5653_v30 }
 0x5d8   :  { %5462 = vmatprep.subr.bf16.mxu1 %v5184_v59 }
 0x5d9   :  { %5836 = vmatpush1.bf16.msra.mxu0 %v5709_v61  ;;  %v5725_v61 = vunpack.c.h.s8.bf16 %v5649_v25 }
 0x5da   :  { %5837 = vmatprep.subr.bf16.mxu0 %v5714_v56 }
 0x5db   :  { %5463 = vmatpush1.bf16.msra.mxu1 %v5183_v52 }
 0x5dc   :  { %5357 = vmatmul.mubr.bf16.gmra.mrb[132].mxu0 %v10956_v21  ;;  %5464 = vmatprep.subr.bf16.mxu1 %v5188_v43  ;;  %v5199_v43 = vunpack.c.h.s8.bf16 %v5091_v36 }
 0x5dd   :  { %5366 = vmatprep.mubr.bf16.mxu0 %v10982_v39  ;;  %5838 = vmatpush1.bf16.msra.mxu0 %v5713_v16  ;;  %v11086_v16 = vrot.slane %v11069_v53, %v8989_v0 }
 0x5de   :  { %5430 = vmatmul.mubr.bf16.gmra.mrb[172].mxu1 %v10764_v18  ;;  %5839 = vmatprep.subr.bf16.mxu0 %v5718_v7  ;;  %v11055_v18 = vld [vmem:[%s12960_s0 + $0x1b] sm:$0xff] }
 0x5df   :  { %5439 = vmatprep.mubr.bf16.mxu1 %v10800_v29  ;;  %5465 = vmatpush1.bf16.msra.mxu1 %v5187_v40  ;;  %v5654_v29 = vld [vmem:[%s12905_s14 + $0x68] sm:$0xff]  ;;  %v11063_v33 = vrot.slane %v11055_v18, %v8989_v0  ;;  %v11073_v59 = vrot.slane %v11055_v18, %v8997_v13  ;;  %v5095_v40 = vld [vmem:[%s12904_s13 + $0x170] sm:$0xff] }
 0x5e0   :  { %5466 = vmatprep.subr.bf16.mxu1 %v5192_v54  ;;  %v5730_v56 = vunpack.c.l.s8.bf16 %v5654_v29 }
 0x5e1   :  { %5840 = vmatpush1.bf16.msra.mxu0 %v5717_v8 }
 0x5e2   :  { %5841 = vmatprep.subr.bf16.mxu0 %v5722_v37 }
 0x5e3   :  { %5467 = vmatpush1.bf16.msra.mxu1 %v5191_v1 }
 0x5e4   :  { %5367 = vmatmul.mubr.bf16.gmra.mrb[136].mxu0 %v10980_v9  ;;  %5468 = vmatprep.subr.bf16.mxu1 %v5196_v51  ;;  %v5734_v51 = vunpack.c.h.s8.bf16 %v5654_v29  ;;  %v5208_v29 = vunpack.c.h.s8.bf16 %v5096_v11 }
 0x5e5   :  { %5376 = vmatprep.mubr.bf16.mxu0 %v11006_v14  ;;  %5842 = vmatpush1.bf16.msra.mxu0 %v5721_v55 }
 0x5e6   :  { %5440 = vmatmul.mubr.bf16.gmra.mrb[176].mxu1 %v10796_v48  ;;  %5843 = vmatprep.subr.bf16.mxu0 %v5726_v32  ;;  %v5204_v48 = vunpack.c.l.s8.bf16 %v5096_v11  ;;  %v5203_v32 = vunpack.c.l.s8.bf16 %v5095_v40  ;;  %v5657_v11 = vld [vmem:[%s12905_s14 + $0x80] sm:$0xff] }
 0x5e7   :  { %v4545_v52 = vpop.f32.mrb[96].mxu0  ;;  %5449 = vmatprep.mubr.bf16.mxu1 %v10830_v47  ;;  %5469 = vmatpush1.bf16.msra.mxu1 %v5195_v20  ;;  %v11094_v47 = vrot.slane %v11069_v53, %v8997_v13  ;;  %v5658_v20 = vld [vmem:[%s12905_s14 + $0x88] sm:$0xff] }
 0x5e8   :  { %v4845_v19 = vmul.f32 %v11063_v33, %v4545_v52  ;;  %v4547_v7 = vpop.f32.mrb[97].mxu0  ;;  %5470 = vmatprep.subr.bf16.mxu1 %v5200_v62 }
 0x5e9   :  { %v4846_v46 = vmul.f32 %v11073_v59, %v4547_v7  ;;  %5844 = vmatpush1.bf16.msra.mxu0 %v5725_v61  ;;  %v11096_v54 = vpop.f32.mrb[120].mxu1  ;;  %v4549_v8 = vpop.f32.mrb[98].mxu0 }
 0x5ea   :  { %12994 = vst [vmem:[#allocation35_spill] sm:$0xff] %v11096_v54  ;;  %v4853_v37 = vmul.f32 %v11063_v33, %v4549_v8  ;;  %v11099_v25 = vpop.f32.mrb[121].mxu1  ;;  %v4551_v1 = vpop.f32.mrb[99].mxu0  ;;  %5845 = vmatprep.subr.bf16.mxu0 %v5730_v56  ;;  %v5001_v62 = vadd.f32 %v11086_v16, %v4845_v19  ;;  %v5100_v8 = vld [vmem:[%s12904_s13 + $0x198] sm:$0xff]  ;;  %v5738_v19 = vunpack.c.l.s8.bf16 %v5658_v20 }
 0x5eb   :  { %12995 = vst [vmem:[#allocation36_spill] sm:$0xff] %v11099_v25  ;;  %v4854_v36 = vmul.f32 %v11073_v59, %v4551_v1  ;;  %v11102_v55 = vpop.f32.mrb[122].mxu1  ;;  %5471 = vmatpush1.bf16.msra.mxu1 %v5199_v43  ;;  %v5002_v56 = vadd.f32 %v11094_v47, %v4846_v46  ;;  %v5733_v43 = vunpack.c.h.s8.bf16 %v5653_v30  ;;  %v5207_v30 = vunpack.c.h.s8.bf16 %v5095_v40 }
 0x5ec   :  { %12996 = vst [vmem:[#allocation37_spill] sm:$0xff] %v11102_v55  ;;  %v5005_v61 = vadd.f32 %v11086_v16, %v4853_v37  ;;  %5377 = vmatmul.mubr.bf16.gmra.mrb[140].mxu0 %v11004_v12  ;;  %v11110_v52 = vpop.f32.mrb[123].mxu1  ;;  %5472 = vmatprep.subr.bf16.mxu1 %v5204_v48 }
 0x5ed   :  { %12997 = vst [vmem:[#allocation38_spill] sm:$0xff] %v11110_v52  ;;  %v5006_v7 = vadd.f32 %v11094_v47, %v4854_v36  ;;  %5846 = vmatpush1.bf16.msra.mxu0 %v5729_v60  ;;  %v5212_v36 = vunpack.c.l.s8.bf16 %v5100_v8 }
 0x5ee   :  { %v11117_v1 = vpack.c.bf16 %v5005_v61, %v5001_v62  ;;  %5450 = vmatmul.mubr.bf16.gmra.mrb[180].mxu1 %v10828_v42  ;;  %5847 = vmatprep.subr.bf16.mxu0 %v5734_v51  ;;  %v5099_v42 = vld [vmem:[%s12904_s13 + $0x190] sm:$0xff] }
 0x5ef   :  { %v4555_v48 = vpop.f32.mrb[100].mxu0  ;;  %5473 = vmatpush1.bf16.msra.mxu1 %v5203_v32  ;;  %5492 = vmatprep.mubr.bf16.mxu1 %v10933_v58  ;;  %v11124_v46 = vpack.c.bf16 %v5006_v7, %v5002_v56  ;;  %v5737_v58 = vunpack.c.l.s8.bf16 %v5657_v11 }
 0x5f0   :  { %v4861_v60 = vmul.f32 %v11063_v33, %v4555_v48  ;;  %v4557_v37 = vpop.f32.mrb[101].mxu0  ;;  %5474 = vmatprep.subr.bf16.mxu1 %v5208_v29  ;;  %v5742_v29 = vunpack.c.h.s8.bf16 %v5658_v20 }
 0x5f1   :  { %v4862_v51 = vmul.f32 %v11073_v59, %v4557_v37  ;;  %5848 = vmatpush1.bf16.msra.mxu0 %v5733_v43  ;;  %v11131_v62 = vpop.f32.mrb[124].mxu1  ;;  %v4559_v32 = vpop.f32.mrb[102].mxu0  ;;  %5865 = vmatprep.mubr.bf16.mxu0 %v11124_v46  ;;  %v5211_v37 = vunpack.c.l.s8.bf16 %v5099_v42  ;;  %v5662_v43 = vld [vmem:[%s12905_s14 + $0xa8] sm:$0xff] }
 0x5f2   :  { %12998 = vst [vmem:[#allocation39_spill] sm:$0xff] %v11131_v62  ;;  %v4869_v40 = vmul.f32 %v11063_v33, %v4559_v32  ;;  %v11135_v61 = vpop.f32.mrb[125].mxu1  ;;  %v4561_v56 = vpop.f32.mrb[103].mxu0  ;;  %5849 = vmatprep.subr.bf16.mxu0 %v5738_v19  ;;  %v5009_v62 = vadd.f32 %v11086_v16, %v4861_v60  ;;  %v5661_v60 = vld [vmem:[%s12905_s14 + $0xa0] sm:$0xff] }
 0x5f3   :  { %12999 = vst [vmem:[#allocation40_spill] sm:$0xff] %v11135_v61  ;;  %v4870_v7 = vmul.f32 %v11073_v59, %v4561_v56  ;;  %v11138_v48 = vpop.f32.mrb[126].mxu1  ;;  %5475 = vmatpush1.bf16.msra.mxu1 %v5207_v30  ;;  %v5216_v61 = vunpack.c.h.s8.bf16 %v5100_v8  ;;  %v5010_v20 = vadd.f32 %v11094_v47, %v4862_v51  ;;  %v5741_v56 = vunpack.c.h.s8.bf16 %v5657_v11  ;;  %v5104_v30 = vld [vmem:[%s12904_s13 + $0x1b8] sm:$0xff] }
 0x5f4   :  { %13000 = vst [vmem:[#allocation41_spill] sm:$0xff] %v11138_v48  ;;  %v5013_v52 = vadd.f32 %v11086_v16, %v4869_v40  ;;  %v11145_v32 = vpop.f32.mrb[127].mxu1  ;;  %5476 = vmatprep.subr.bf16.mxu1 %v5212_v36  ;;  %v5746_v48 = vunpack.c.l.s8.bf16 %v5662_v43  ;;  %v5215_v8 = vunpack.c.h.s8.bf16 %v5099_v42 }
 0x5f5   :  { %13001 = vst [vmem:[#allocation42_spill] sm:$0xff] %v11145_v32  ;;  %v5014_v19 = vadd.f32 %v11094_v47, %v4870_v7  ;;  %5850 = vmatpush1.bf16.msra.mxu0 %v5737_v58  ;;  %v5220_v7 = vunpack.c.l.s8.bf16 %v5104_v30 }
 0x5f6   :  { %5851 = vmatprep.subr.bf16.mxu0 %v5742_v29  ;;  %v11155_v40 = vpack.c.bf16 %v5013_v52, %v5009_v62  ;;  %v5103_v29 = vld [vmem:[%s12904_s13 + $0x1b0] sm:$0xff]  ;;  %v5745_v62 = vunpack.c.l.s8.bf16 %v5661_v60 }
 0x5f7   :  { %v4565_v36 = vpop.f32.mrb[104].mxu0  ;;  %5477 = vmatpush1.bf16.msra.mxu1 %v5211_v37  ;;  %v11157_v51 = vpack.c.bf16 %v5014_v19, %v5010_v20  ;;  %v5750_v19 = vunpack.c.h.s8.bf16 %v5662_v43  ;;  %v5219_v25 = vunpack.c.l.s8.bf16 %v5103_v29 }
 0x5f8   :  { %v4877_v58 = vmul.f32 %v11063_v33, %v4565_v36  ;;  %v4567_v11 = vpop.f32.mrb[105].mxu0  ;;  %5478 = vmatprep.subr.bf16.mxu1 %v5216_v61 }
 0x5f9   :  { %v4878_v32 = vmul.f32 %v11073_v59, %v4567_v11  ;;  %5852 = vmatpush1.bf16.msra.mxu0 %v5741_v56  ;;  %v11164_v55 = vpop.f32.mrb[128].mxu1  ;;  %v4569_v52 = vpop.f32.mrb[106].mxu0  ;;  %v5666_v56 = vld [vmem:[%s12905_s14 + $0xc8] sm:$0xff] }
 0x5fa   :  { %13002 = vst [vmem:[#allocation43_spill] sm:$0xff] %v11164_v55  ;;  %v4885_v42 = vmul.f32 %v11063_v33, %v4569_v52  ;;  %v11167_v37 = vpop.f32.mrb[129].mxu1  ;;  %v4571_v20 = vpop.f32.mrb[107].mxu0  ;;  %5853 = vmatprep.subr.bf16.mxu0 %v5746_v48  ;;  %v5017_v11 = vadd.f32 %v11086_v16, %v4877_v58  ;;  %v5665_v58 = vld [vmem:[%s12905_s14 + $0xc0] sm:$0xff] }
 0x5fb   :  { %13003 = vst [vmem:[#allocation44_spill] sm:$0xff] %v11167_v37  ;;  %v4886_v61 = vmul.f32 %v11073_v59, %v4571_v20  ;;  %v11170_v36 = vpop.f32.mrb[130].mxu1  ;;  %5479 = vmatpush1.bf16.msra.mxu1 %v5215_v8  ;;  %v5224_v37 = vunpack.c.h.s8.bf16 %v5104_v30  ;;  %v5018_v48 = vadd.f32 %v11094_v47, %v4878_v32  ;;  %v5749_v20 = vunpack.c.h.s8.bf16 %v5661_v60  ;;  %v5108_v8 = vld [vmem:[%s12904_s13 + $0x1d8] sm:$0xff] }
 0x5fc   :  { %13004 = vst [vmem:[#allocation45_spill] sm:$0xff] %v11170_v36  ;;  %v5021_v55 = vadd.f32 %v11086_v16, %v4885_v42  ;;  %v11177_v52 = vpop.f32.mrb[131].mxu1  ;;  %5480 = vmatprep.subr.bf16.mxu1 %v5220_v7  ;;  %v5754_v36 = vunpack.c.l.s8.bf16 %v5666_v56  ;;  %v5223_v30 = vunpack.c.h.s8.bf16 %v5103_v29 }
 0x5fd   :  { %13005 = vst [vmem:[#allocation46_spill] sm:$0xff] %v11177_v52  ;;  %v5022_v43 = vadd.f32 %v11094_v47, %v4886_v61  ;;  %5854 = vmatpush1.bf16.msra.mxu0 %v5745_v62  ;;  %v5228_v61 = vunpack.c.l.s8.bf16 %v5108_v8 }
 0x5fe   :  { %5855 = vmatprep.subr.bf16.mxu0 %v5750_v19  ;;  %v11187_v42 = vpack.c.bf16 %v5021_v55, %v5017_v11  ;;  %v5107_v19 = vld [vmem:[%s12904_s13 + $0x1d0] sm:$0xff]  ;;  %v5753_v11 = vunpack.c.l.s8.bf16 %v5665_v58 }
 0x5ff   :  { %v4575_v7 = vpop.f32.mrb[108].mxu0  ;;  %5481 = vmatpush1.bf16.msra.mxu1 %v5219_v25  ;;  %v11189_v32 = vpack.c.bf16 %v5022_v43, %v5018_v48  ;;  %v5758_v43 = vunpack.c.h.s8.bf16 %v5666_v56  ;;  %v5227_v31 = vunpack.c.l.s8.bf16 %v5107_v19  ;;  %v5757_v56 = vunpack.c.h.s8.bf16 %v5665_v58 }
 0x600   :  { %v4893_v62 = vmul.f32 %v11063_v33, %v4575_v7  ;;  %v4577_v60 = vpop.f32.mrb[109].mxu0  ;;  %5482 = vmatprep.subr.bf16.mxu1 %v5224_v37 }
 0x601   :  { %v4894_v52 = vmul.f32 %v11073_v59, %v4577_v60  ;;  %5856 = vmatpush1.bf16.msra.mxu0 %v5749_v20  ;;  %v11196_v54 = vpop.f32.mrb[132].mxu1  ;;  %v4579_v55 = vpop.f32.mrb[110].mxu0  ;;  %v5670_v20 = vld [vmem:[%s12905_s14 + $0xe8] sm:$0xff] }
 0x602   :  { %13006 = vst [vmem:[#allocation47_spill] sm:$0xff] %v11196_v54  ;;  %v4901_v25 = vmul.f32 %v11063_v33, %v4579_v55  ;;  %v11199_v29 = vpop.f32.mrb[133].mxu1  ;;  %v4581_v48 = vpop.f32.mrb[111].mxu0  ;;  %5857 = vmatprep.subr.bf16.mxu0 %v5754_v36  ;;  %v5025_v60 = vadd.f32 %v11086_v16, %v4893_v62  ;;  %v5232_v55 = vunpack.c.h.s8.bf16 %v5108_v8  ;;  %v5231_v8 = vunpack.c.h.s8.bf16 %v5107_v19 }
 0x603   :  { %v4902_v37 = vmul.f32 %v11073_v59, %v4581_v48  ;;  %v11202_v7 = vpop.f32.mrb[134].mxu1  ;;  %5483 = vmatpush1.bf16.msra.mxu1 %v5223_v30  ;;  %v5026_v36 = vadd.f32 %v11094_v47, %v4894_v52  ;;  %v5112_v30 = vld [vmem:[%s12904_s13 + $0x1f8] sm:$0xff]  ;;  %v5762_v48 = vunpack.c.l.s8.bf16 %v5670_v20  ;;  %v5111_v52 = vld [vmem:[%s12904_s13 + $0x1f0] sm:$0xff] }
 0x604   :  { %13007 = vst [vmem:[#allocation48_spill] sm:$0xff] %v11202_v7  ;;  %v5029_v54 = vadd.f32 %v11086_v16, %v4901_v25  ;;  %v11209_v33 = vpop.f32.mrb[135].mxu1  ;;  %5484 = vmatprep.subr.bf16.mxu1 %v5228_v61  ;;  %v5669_v16 = vld [vmem:[%s12905_s14 + $0xe0] sm:$0xff]  ;;  %v5235_v25 = vunpack.c.l.s8.bf16 %v5111_v52 }
 0x605   :  { %13008 = vst [vmem:[#allocation49_spill] sm:$0xff] %v11209_v33  ;;  %v5030_v59 = vadd.f32 %v11094_v47, %v4902_v37  ;;  %5858 = vmatpush1.bf16.msra.mxu0 %v5753_v11  ;;  %v5236_v47 = vunpack.c.l.s8.bf16 %v5112_v30  ;;  %v5761_v58 = vunpack.c.l.s8.bf16 %v5669_v16  ;;  %v5766_v11 = vunpack.c.h.s8.bf16 %v5670_v20  ;;  %v5673_v20 = vld [vmem:[%s12905_s14 + $0x100] sm:$0xff] }
 0x606   :  { %5859 = vmatprep.subr.bf16.mxu0 %v5758_v43  ;;  %v11219_v62 = vpack.c.bf16 %v5029_v54, %v5025_v60  ;;  %v5674_v54 = vld [vmem:[%s12905_s14 + $0x108] sm:$0xff]  ;;  %v5765_v19 = vunpack.c.h.s8.bf16 %v5669_v16  ;;  %v5644_v43 = vld [vmem:[%s12905_s14 + $0x18] sm:$0xff]  ;;  %v5239_v60 = vunpack.c.h.s8.bf16 %v5111_v52 }
 0x607   :  { %5485 = vmatpush1.bf16.msra.mxu1 %v5227_v31  ;;  %v11221_v61 = vpack.c.bf16 %v5030_v59, %v5026_v36  ;;  %v5240_v31 = vunpack.c.h.s8.bf16 %v5112_v30  ;;  %v5770_v37 = vunpack.c.l.s8.bf16 %v5674_v54  ;;  %v5643_v36 = vld [vmem:[%s12905_s14 + $0x10] sm:$0xff]  ;;  %v5769_v59 = vunpack.c.l.s8.bf16 %v5673_v20 }
 0x608   :  { %5486 = vmatprep.subr.bf16.mxu1 %v5232_v55  ;;  %v5708_v55 = vunpack.c.l.s8.bf16 %v5644_v43  ;;  %v5707_v30 = vunpack.c.l.s8.bf16 %v5643_v36  ;;  %v5712_v16 = vunpack.c.h.s8.bf16 %v5644_v43  ;;  %v5682_v43 = vld [vmem:[%s12905_s14 + $0x148] sm:$0xff] }
 0x609   :  { %5860 = vmatpush1.bf16.msra.mxu0 %v5757_v56  ;;  %v5774_v56 = vunpack.c.h.s8.bf16 %v5674_v54  ;;  %v5647_v54 = vld [vmem:[%s12905_s14 + $0x30] sm:$0xff] }
 0x60a   :  { %5861 = vmatprep.subr.bf16.mxu0 %v5762_v48  ;;  %v5678_v48 = vld [vmem:[%s12905_s14 + $0x128] sm:$0xff] }
 0x60b   :  { %5487 = vmatpush1.bf16.msra.mxu1 %v5231_v8  ;;  %v5773_v8 = vunpack.c.h.s8.bf16 %v5673_v20  ;;  %v5778_v52 = vunpack.c.l.s8.bf16 %v5678_v48  ;;  %v5652_v20 = vld [vmem:[%s12905_s14 + $0x58] sm:$0xff] }
 0x60c   :  { %5488 = vmatprep.subr.bf16.mxu1 %v5236_v47  ;;  %v5648_v47 = vld [vmem:[%s12905_s14 + $0x38] sm:$0xff] }
 0x60d   :  { %5862 = vmatpush1.bf16.msra.mxu0 %v5761_v58  ;;  %v5677_v58 = vld [vmem:[%s12905_s14 + $0x120] sm:$0xff] }
 0x60e   :  { %5863 = vmatprep.subr.bf16.mxu0 %v5766_v11  ;;  %v5711_v11 = vunpack.c.h.s8.bf16 %v5643_v36  ;;  %v5719_v36 = vunpack.c.h.s8.bf16 %v5647_v54 }
 0x60f   :  { %5489 = vmatpush1.bf16.msra.mxu1 %v5235_v25  ;;  %v5716_v25 = vunpack.c.l.s8.bf16 %v5648_v47 }
 0x610   :  { %5490 = vmatprep.subr.bf16.mxu1 %v5240_v31  ;;  %v5777_v31 = vunpack.c.l.s8.bf16 %v5677_v58 }
 0x611   :  { %5864 = vmatpush1.bf16.msra.mxu0 %v5765_v19  ;;  %v5715_v19 = vunpack.c.l.s8.bf16 %v5647_v54  ;;  %v11291_v54 = vrot.slane %v11055_v18, %v9237_v26 }
 0x612   :  { %5906 = vmatprep.subr.bf16.mxu0 %v5770_v37  ;;  %v5781_v37 = vunpack.c.h.s8.bf16 %v5677_v58 }
 0x613   :  { %5491 = vmatpush1.bf16.msra.mxu1 %v5239_v60  ;;  %v5786_v60 = vunpack.c.l.s8.bf16 %v5682_v43 }
 0x614   :  { %5866 = vmatmul.mubr.bf16.vlgmr.msra.gmra.mrb[144].mxu0 %v11117_v1  ;;  %5979 = vmatprep.subr.bf16.mxu1 %v5708_v55  ;;  %v5681_v55 = vld [vmem:[%s12905_s14 + $0x140] sm:$0xff] }
 0x615   :  { %5875 = vmatprep.mubr.bf16.mxu0 %v11157_v51  ;;  %5907 = vmatpush1.bf16.msra.mxu0 %v5769_v59  ;;  %v5724_v59 = vunpack.c.l.s8.bf16 %v5652_v20 }
 0x616   :  { %5493 = vmatmul.mubr.bf16.vlgmr.msra.gmra.mrb[168].mxu1 %v10928_v3  ;;  %5908 = vmatprep.subr.bf16.mxu0 %v5774_v56  ;;  %v5782_v3 = vunpack.c.h.s8.bf16 %v5678_v48  ;;  %v5651_v56 = vld [vmem:[%s12905_s14 + $0x50] sm:$0xff] }
 0x617   :  { %5502 = vmatprep.mubr.bf16.mxu1 %v10958_v24  ;;  %5980 = vmatpush1.bf16.msra.mxu1 %v5707_v30  ;;  %v5720_v24 = vunpack.c.h.s8.bf16 %v5648_v47  ;;  %v5785_v30 = vunpack.c.l.s8.bf16 %v5681_v55  ;;  %v5723_v48 = vunpack.c.l.s8.bf16 %v5651_v56  ;;  %v5656_v47 = vld [vmem:[%s12905_s14 + $0x78] sm:$0xff] }
 0x618   :  { %5981 = vmatprep.subr.bf16.mxu1 %v5712_v16  ;;  %v5686_v16 = vld [vmem:[%s12905_s14 + $0x168] sm:$0xff] }
 0x619   :  { %5909 = vmatpush1.bf16.msra.mxu0 %v5773_v8  ;;  %v5789_v8 = vunpack.c.h.s8.bf16 %v5681_v55  ;;  %v5794_v58 = vunpack.c.l.s8.bf16 %v5686_v16  ;;  %v5798_v55 = vunpack.c.h.s8.bf16 %v5686_v16  ;;  %v5736_v16 = vunpack.c.h.s8.bf16 %v5656_v47 }
 0x61a   :  { %5910 = vmatprep.subr.bf16.mxu0 %v5778_v52  ;;  %v11281_v52 = vrot.slane %v11055_v18, %v9234_v22  ;;  %v11303_v18 = vrot.slane %v11069_v53, %v9234_v22 }
 0x61b   :  { %5982 = vmatpush1.bf16.msra.mxu1 %v5711_v11  ;;  %v5685_v11 = vld [vmem:[%s12905_s14 + $0x160] sm:$0xff] }
 0x61c   :  { %5876 = vmatmul.mubr.bf16.gmra.mrb[148].mxu0 %v11155_v40  ;;  %5983 = vmatprep.subr.bf16.mxu1 %v5716_v25 }
 0x61d   :  { %5885 = vmatprep.mubr.bf16.mxu0 %v11189_v32  ;;  %5911 = vmatpush1.bf16.msra.mxu0 %v5777_v31 }
 0x61e   :  { %5503 = vmatmul.mubr.bf16.gmra.mrb[172].mxu1 %v10956_v21  ;;  %5912 = vmatprep.subr.bf16.mxu0 %v5782_v3  ;;  %v5790_v21 = vunpack.c.h.s8.bf16 %v5682_v43  ;;  %v5732_v3 = vunpack.c.l.s8.bf16 %v5656_v47  ;;  %v5689_v47 = vld [vmem:[%s12905_s14 + $0x180] sm:$0xff] }
 0x61f   :  { %5512 = vmatprep.mubr.bf16.mxu1 %v10982_v39  ;;  %5984 = vmatpush1.bf16.msra.mxu1 %v5715_v19  ;;  %v5728_v39 = vunpack.c.h.s8.bf16 %v5652_v20  ;;  %v5655_v19 = vld [vmem:[%s12905_s14 + $0x70] sm:$0xff] }
 0x620   :  { %5985 = vmatprep.subr.bf16.mxu1 %v5720_v24 }
 0x621   :  { %5913 = vmatpush1.bf16.msra.mxu0 %v5781_v37  ;;  %v5793_v37 = vunpack.c.l.s8.bf16 %v5685_v11 }
 0x622   :  { %5914 = vmatprep.subr.bf16.mxu0 %v5786_v60 }
 0x623   :  { %5986 = vmatpush1.bf16.msra.mxu1 %v5719_v36 }
 0x624   :  { %5886 = vmatmul.mubr.bf16.gmra.mrb[152].mxu0 %v11187_v42  ;;  %5987 = vmatprep.subr.bf16.mxu1 %v5724_v59  ;;  %v11310_v59 = vrot.slane %v11069_v53, %v9237_v26  ;;  %v5660_v53 = vld [vmem:[%s12905_s14 + $0x98] sm:$0xff] }
 0x625   :  { %5895 = vmatprep.mubr.bf16.mxu0 %v11221_v61  ;;  %5915 = vmatpush1.bf16.msra.mxu0 %v5785_v30  ;;  %v5731_v30 = vunpack.c.l.s8.bf16 %v5655_v19 }
 0x626   :  { %5513 = vmatmul.mubr.bf16.gmra.mrb[176].mxu1 %v10980_v9  ;;  %5916 = vmatprep.subr.bf16.mxu0 %v5790_v21  ;;  %v5727_v9 = vunpack.c.h.s8.bf16 %v5651_v56  ;;  %v5690_v21 = vld [vmem:[%s12905_s14 + $0x188] sm:$0xff] }
 0x627   :  { %v11286_v25 = vpop.f32.mrb[112].mxu0  ;;  %5522 = vmatprep.mubr.bf16.mxu1 %v11006_v14  ;;  %5988 = vmatpush1.bf16.msra.mxu1 %v5723_v48 }
 0x628   :  { %13009 = vst [vmem:[#allocation50_spill] sm:$0xff] %v11286_v25  ;;  %v11293_v31 = vpop.f32.mrb[113].mxu0  ;;  %5989 = vmatprep.subr.bf16.mxu1 %v5728_v39 }
 0x629   :  { %13010 = vst [vmem:[#allocation51_spill] sm:$0xff] %v11293_v31  ;;  %v11298_v43 = vpop.f32.mrb[114].mxu0  ;;  %5917 = vmatpush1.bf16.msra.mxu0 %v5789_v8  ;;  %v4618_v24 = vpop.f32.mrb[136].mxu1 }
 0x62a   :  { %13011 = vst [vmem:[#allocation52_spill] sm:$0xff] %v11298_v43  ;;  %v4847_v14 = vmul.f32 %v11281_v52, %v4618_v24  ;;  %v11305_v20 = vpop.f32.mrb[115].mxu0  ;;  %v4620_v60 = vpop.f32.mrb[137].mxu1  ;;  %5918 = vmatprep.subr.bf16.mxu0 %v5794_v58  ;;  %v5797_v58 = vunpack.c.h.s8.bf16 %v5685_v11 }
 0x62b   :  { %13012 = vst [vmem:[#allocation53_spill] sm:$0xff] %v11305_v20  ;;  %v4848_v36 = vmul.f32 %v11291_v54, %v4620_v60  ;;  %v4622_v56 = vpop.f32.mrb[138].mxu1  ;;  %5990 = vmatpush1.bf16.msra.mxu1 %v5727_v9  ;;  %v5802_v60 = vunpack.c.l.s8.bf16 %v5690_v21 }
 0x62c   :  { %v4855_v48 = vmul.f32 %v11281_v52, %v4622_v56  ;;  %5896 = vmatmul.mubr.bf16.gmra.mrb[156].mxu0 %v11219_v62  ;;  %v4624_v39 = vpop.f32.mrb[139].mxu1  ;;  %5991 = vmatprep.subr.bf16.mxu1 %v5732_v3  ;;  %v5003_v9 = vadd.f32 %v11303_v18, %v4847_v14  ;;  %v5735_v14 = vunpack.c.h.s8.bf16 %v5655_v19 }
 0x62d   :  { %v4856_v8 = vmul.f32 %v11291_v54, %v4624_v39  ;;  %5919 = vmatpush1.bf16.msra.mxu0 %v5793_v37  ;;  %v5004_v3 = vadd.f32 %v11310_v59, %v4848_v36 }
 0x62e   :  { %v5007_v24 = vadd.f32 %v11303_v18, %v4855_v48  ;;  %5523 = vmatmul.mubr.bf16.gmra.mrb[180].mxu1 %v11004_v12  ;;  %5920 = vmatprep.subr.bf16.mxu0 %v5798_v55  ;;  %v5740_v12 = vunpack.c.l.s8.bf16 %v5660_v53  ;;  %v5659_v55 = vld [vmem:[%s12905_s14 + $0x90] sm:$0xff] }
 0x62f   :  { %v5008_v11 = vadd.f32 %v11310_v59, %v4856_v8  ;;  %v11329_v37 = vpop.f32.mrb[116].mxu0  ;;  %5992 = vmatpush1.bf16.msra.mxu1 %v5731_v30  ;;  %6011 = vmatprep.mubr.bf16.mxu1 %v11124_v46  ;;  %v5801_v30 = vunpack.c.l.s8.bf16 %v5689_v47 }
 0x630   :  { %13013 = vst [vmem:[#allocation54_spill] sm:$0xff] %v11329_v37  ;;  %v11332_v56 = vpack.c.bf16 %v5007_v24, %v5003_v9  ;;  %v11334_v48 = vpop.f32.mrb[117].mxu0  ;;  %5993 = vmatprep.subr.bf16.mxu1 %v5736_v16  ;;  %v5806_v24 = vunpack.c.h.s8.bf16 %v5690_v21  ;;  %v5739_v37 = vunpack.c.l.s8.bf16 %v5659_v55  ;;  %v5805_v21 = vunpack.c.h.s8.bf16 %v5689_v47 }
 0x631   :  { %13014 = vst [vmem:[#allocation55_spill] sm:$0xff] %v11334_v48  ;;  %v11339_v39 = vpop.f32.mrb[118].mxu0  ;;  %5921 = vmatpush1.bf16.msra.mxu0 %v5797_v58  ;;  %v4628_v36 = vpop.f32.mrb[140].mxu1  ;;  %v11341_v8 = vpack.c.bf16 %v5008_v11, %v5004_v3  ;;  %v5694_v58 = vld [vmem:[%s12905_s14 + $0x1a8] sm:$0xff]  ;;  %v5743_v47 = vunpack.c.h.s8.bf16 %v5659_v55 }
 0x632   :  { %13015 = vst [vmem:[#allocation56_spill] sm:$0xff] %v11339_v39  ;;  %v4863_v46 = vmul.f32 %v11281_v52, %v4628_v36  ;;  %v11344_v19 = vpop.f32.mrb[119].mxu0  ;;  %v4630_v9 = vpop.f32.mrb[141].mxu1  ;;  %5922 = vmatprep.subr.bf16.mxu0 %v5802_v60  ;;  %v5744_v36 = vunpack.c.h.s8.bf16 %v5660_v53  ;;  %v5664_v60 = vld [vmem:[%s12905_s14 + $0xb8] sm:$0xff]  ;;  %v5810_v39 = vunpack.c.l.s8.bf16 %v5694_v58 }
 0x633   :  { %13016 = vst [vmem:[#allocation57_spill] sm:$0xff] %v11344_v19  ;;  %v4864_v16 = vmul.f32 %v11291_v54, %v4630_v9  ;;  %v4632_v48 = vpop.f32.mrb[142].mxu1  ;;  %5938 = vmatprep.mubr.bf16.mxu0 %v11341_v8  ;;  %5994 = vmatpush1.bf16.msra.mxu1 %v5735_v14 }
 0x634   :  { %v4871_v3 = vmul.f32 %v11281_v52, %v4632_v48  ;;  %v4634_v11 = vpop.f32.mrb[143].mxu1  ;;  %5995 = vmatprep.subr.bf16.mxu1 %v5740_v12  ;;  %v5011_v14 = vadd.f32 %v11303_v18, %v4863_v46  ;;  %v5693_v48 = vld [vmem:[%s12905_s14 + $0x1a0] sm:$0xff]  ;;  %v5748_v46 = vunpack.c.l.s8.bf16 %v5664_v60 }
 0x635   :  { %v4872_v19 = vmul.f32 %v11291_v54, %v4634_v11  ;;  %5923 = vmatpush1.bf16.msra.mxu0 %v5801_v30  ;;  %v5012_v53 = vadd.f32 %v11310_v59, %v4864_v16  ;;  %v5809_v43 = vunpack.c.l.s8.bf16 %v5693_v48 }
 0x636   :  { %v5015_v9 = vadd.f32 %v11303_v18, %v4871_v3  ;;  %5924 = vmatprep.subr.bf16.mxu0 %v5806_v24  ;;  %v5663_v24 = vld [vmem:[%s12905_s14 + $0xb0] sm:$0xff] }
 0x637   :  { %v5016_v12 = vadd.f32 %v11310_v59, %v4872_v19  ;;  %v11363_v30 = vpop.f32.mrb[120].mxu0  ;;  %5996 = vmatpush1.bf16.msra.mxu1 %v5739_v37 }
 0x638   :  { %13017 = vst [vmem:[#allocation58_spill] sm:$0xff] %v11363_v30  ;;  %v11365_v11 = vpop.f32.mrb[121].mxu0  ;;  %5997 = vmatprep.subr.bf16.mxu1 %v5744_v36  ;;  %v11370_v3 = vpack.c.bf16 %v5015_v9, %v5011_v14  ;;  %v5814_v36 = vunpack.c.h.s8.bf16 %v5694_v58  ;;  %v5747_v14 = vunpack.c.l.s8.bf16 %v5663_v24 }
 0x639   :  { %13018 = vst [vmem:[#allocation59_spill] sm:$0xff] %v11365_v11  ;;  %v11372_v20 = vpop.f32.mrb[122].mxu0  ;;  %5925 = vmatpush1.bf16.msra.mxu0 %v5805_v21  ;;  %v4638_v16 = vpop.f32.mrb[144].mxu1  ;;  %v11374_v19 = vpack.c.bf16 %v5016_v12, %v5012_v53  ;;  %v5698_v21 = vld [vmem:[%s12905_s14 + $0x1c8] sm:$0xff]  ;;  %v5752_v12 = vunpack.c.h.s8.bf16 %v5664_v60 }
 0x63a   :  { %13019 = vst [vmem:[#allocation60_spill] sm:$0xff] %v11372_v20  ;;  %v4879_v37 = vmul.f32 %v11281_v52, %v4638_v16  ;;  %v11377_v55 = vpop.f32.mrb[123].mxu0  ;;  %v4640_v11 = vpop.f32.mrb[145].mxu1  ;;  %5926 = vmatprep.subr.bf16.mxu0 %v5810_v39  ;;  %v5668_v39 = vld [vmem:[%s12905_s14 + $0xd8] sm:$0xff] }
 0x63b   :  { %13020 = vst [vmem:[#allocation61_spill] sm:$0xff] %v11377_v55  ;;  %v4880_v30 = vmul.f32 %v11291_v54, %v4640_v11  ;;  %v4642_v31 = vpop.f32.mrb[146].mxu1  ;;  %5998 = vmatpush1.bf16.msra.mxu1 %v5743_v47  ;;  %v5813_v55 = vunpack.c.h.s8.bf16 %v5693_v48  ;;  %v5818_v11 = vunpack.c.l.s8.bf16 %v5698_v21  ;;  %v5751_v48 = vunpack.c.h.s8.bf16 %v5663_v24 }
 0x63c   :  { %v4887_v9 = vmul.f32 %v11281_v52, %v4642_v31  ;;  %v4644_v53 = vpop.f32.mrb[147].mxu1  ;;  %5999 = vmatprep.subr.bf16.mxu1 %v5748_v46  ;;  %v5019_v58 = vadd.f32 %v11303_v18, %v4879_v37  ;;  %v5697_v31 = vld [vmem:[%s12905_s14 + $0x1c0] sm:$0xff]  ;;  %v5756_v37 = vunpack.c.l.s8.bf16 %v5668_v39 }
 0x63d   :  { %v4888_v16 = vmul.f32 %v11291_v54, %v4644_v53  ;;  %5927 = vmatpush1.bf16.msra.mxu0 %v5809_v43  ;;  %v5020_v60 = vadd.f32 %v11310_v59, %v4880_v30  ;;  %v5817_v25 = vunpack.c.l.s8.bf16 %v5697_v31 }
 0x63e   :  { %v5023_v47 = vadd.f32 %v11303_v18, %v4887_v9  ;;  %5928 = vmatprep.subr.bf16.mxu0 %v5814_v36  ;;  %v5667_v36 = vld [vmem:[%s12905_s14 + $0xd0] sm:$0xff] }
 0x63f   :  { %v5024_v46 = vadd.f32 %v11310_v59, %v4888_v16  ;;  %v11395_v43 = vpop.f32.mrb[124].mxu0  ;;  %6000 = vmatpush1.bf16.msra.mxu1 %v5747_v14 }
 0x640   :  { %13021 = vst [vmem:[#allocation62_spill] sm:$0xff] %v11395_v43  ;;  %v11397_v53 = vpop.f32.mrb[125].mxu0  ;;  %6001 = vmatprep.subr.bf16.mxu1 %v5752_v12  ;;  %v11402_v9 = vpack.c.bf16 %v5023_v47, %v5019_v58  ;;  %v5822_v12 = vunpack.c.h.s8.bf16 %v5698_v21  ;;  %v5755_v58 = vunpack.c.l.s8.bf16 %v5667_v36  ;;  %v5672_v21 = vld [vmem:[%s12905_s14 + $0xf8] sm:$0xff] }
 0x641   :  { %13022 = vst [vmem:[#allocation63_spill] sm:$0xff] %v11397_v53  ;;  %v11404_v20 = vpop.f32.mrb[126].mxu0  ;;  %5929 = vmatpush1.bf16.msra.mxu0 %v5813_v55  ;;  %v4648_v30 = vpop.f32.mrb[148].mxu1  ;;  %v11406_v16 = vpack.c.bf16 %v5024_v46, %v5020_v60  ;;  %v5702_v55 = vld [vmem:[%s12905_s14 + $0x1e8] sm:$0xff]  ;;  %v5760_v46 = vunpack.c.h.s8.bf16 %v5668_v39  ;;  %v5764_v39 = vunpack.c.l.s8.bf16 %v5672_v21 }
 0x642   :  { %13023 = vst [vmem:[#allocation64_spill] sm:$0xff] %v11404_v20  ;;  %v4895_v14 = vmul.f32 %v11281_v52, %v4648_v30  ;;  %v11409_v24 = vpop.f32.mrb[127].mxu0  ;;  %v4650_v53 = vpop.f32.mrb[149].mxu1  ;;  %5930 = vmatprep.subr.bf16.mxu0 %v5818_v11 }
 0x643   :  { %13024 = vst [vmem:[#allocation65_spill] sm:$0xff] %v11409_v24  ;;  %v4896_v43 = vmul.f32 %v11291_v54, %v4650_v53  ;;  %v4652_v33 = vpop.f32.mrb[150].mxu1  ;;  %6002 = vmatpush1.bf16.msra.mxu1 %v5751_v48  ;;  %v5821_v24 = vunpack.c.h.s8.bf16 %v5697_v31  ;;  %v5826_v53 = vunpack.c.l.s8.bf16 %v5702_v55  ;;  %v5671_v31 = vld [vmem:[%s12905_s14 + $0xf0] sm:$0xff] }
 0x644   :  { %v4903_v47 = vmul.f32 %v11281_v52, %v4652_v33  ;;  %v4654_v60 = vpop.f32.mrb[151].mxu1  ;;  %6003 = vmatprep.subr.bf16.mxu1 %v5756_v37  ;;  %v5027_v11 = vadd.f32 %v11303_v18, %v4895_v14  ;;  %v5701_v33 = vld [vmem:[%s12905_s14 + $0x1e0] sm:$0xff] }
 0x645   :  { %v4904_v30 = vmul.f32 %v11291_v54, %v4654_v60  ;;  %5931 = vmatpush1.bf16.msra.mxu0 %v5817_v25  ;;  %v5028_v52 = vadd.f32 %v11310_v59, %v4896_v43  ;;  %v5759_v25 = vunpack.c.h.s8.bf16 %v5667_v36  ;;  %v5763_v43 = vunpack.c.l.s8.bf16 %v5671_v31  ;;  %v5675_v60 = vld [vmem:[%s12905_s14 + $0x110] sm:$0xff] }
 0x646   :  { %v5031_v48 = vadd.f32 %v11303_v18, %v4903_v47  ;;  %5932 = vmatprep.subr.bf16.mxu0 %v5822_v12  ;;  %v5825_v18 = vunpack.c.l.s8.bf16 %v5701_v33  ;;  %v5830_v12 = vunpack.c.h.s8.bf16 %v5702_v55  ;;  %v5829_v36 = vunpack.c.h.s8.bf16 %v5701_v33 }
 0x647   :  { %v5032_v54 = vadd.f32 %v11310_v59, %v4904_v30  ;;  %6004 = vmatpush1.bf16.msra.mxu1 %v5755_v58  ;;  %v5768_v59 = vunpack.c.h.s8.bf16 %v5672_v21  ;;  %v5676_v58 = vld [vmem:[%s12905_s14 + $0x118] sm:$0xff]  ;;  %v5767_v47 = vunpack.c.h.s8.bf16 %v5671_v31  ;;  %v5771_v55 = vunpack.c.l.s8.bf16 %v5675_v60 }
 0x648   :  { %6005 = vmatprep.subr.bf16.mxu1 %v5760_v46  ;;  %v11430_v37 = vpack.c.bf16 %v5031_v48, %v5027_v11  ;;  %v5776_v46 = vunpack.c.h.s8.bf16 %v5676_v58  ;;  %v5680_v30 = vld [vmem:[%s12905_s14 + $0x138] sm:$0xff]  ;;  %v5775_v21 = vunpack.c.h.s8.bf16 %v5675_v60  ;;  %v5679_v48 = vld [vmem:[%s12905_s14 + $0x130] sm:$0xff] }
 0x649   :  { %5933 = vmatpush1.bf16.msra.mxu0 %v5821_v24  ;;  %v11432_v14 = vpack.c.bf16 %v5032_v54, %v5028_v52  ;;  %v5772_v24 = vunpack.c.l.s8.bf16 %v5676_v58  ;;  %v5780_v11 = vunpack.c.l.s8.bf16 %v5680_v30  ;;  %v5784_v33 = vunpack.c.h.s8.bf16 %v5680_v30  ;;  %v5683_v54 = vld [vmem:[%s12905_s14 + $0x150] sm:$0xff]  ;;  %v5692_v58 = vld [vmem:[%s12905_s14 + $0x198] sm:$0xff] }
 0x64a   :  { %5934 = vmatprep.subr.bf16.mxu0 %v5826_v53  ;;  %v5779_v53 = vunpack.c.l.s8.bf16 %v5679_v48  ;;  %v5691_v60 = vld [vmem:[%s12905_s14 + $0x190] sm:$0xff] }
 0x64b   :  { %6006 = vmatpush1.bf16.msra.mxu1 %v5759_v25  ;;  %v5787_v25 = vunpack.c.l.s8.bf16 %v5683_v54 }
 0x64c   :  { %6007 = vmatprep.subr.bf16.mxu1 %v5764_v39 }
 0x64d   :  { %5935 = vmatpush1.bf16.msra.mxu0 %v5825_v18  ;;  %v5687_v18 = vld [vmem:[%s12905_s14 + $0x170] sm:$0xff] }
 0x64e   :  { %5936 = vmatprep.subr.bf16.mxu0 %v5830_v12 }
 0x64f   :  { %6008 = vmatpush1.bf16.msra.mxu1 %v5763_v43 }
 0x650   :  { %6009 = vmatprep.subr.bf16.mxu1 %v5768_v59 }
 0x651   :  { %5937 = vmatpush1.bf16.msra.mxu0 %v5829_v36  ;;  %v5795_v36 = vunpack.c.l.s8.bf16 %v5687_v18 }
 0x653   :  { %6010 = vmatpush1.bf16.msra.mxu1 %v5767_v47  ;;  %v5799_v47 = vunpack.c.h.s8.bf16 %v5687_v18 }
 0x654   :  { %5939 = vmatmul.mubr.bf16.vlgmr.msra.gmra.mrb[144].mxu0 %v11332_v56  ;;  %6052 = vmatprep.subr.bf16.mxu1 %v5772_v24  ;;  %v5804_v24 = vunpack.c.l.s8.bf16 %v5692_v58 }
 0x655   :  { %5948 = vmatprep.mubr.bf16.mxu0 %v11374_v19 }
 0x656   :  { %6012 = vmatmul.mubr.bf16.vlgmr.msra.gmra.mrb[184].mxu1 %v11117_v1  ;;  %v5684_v1 = vld [vmem:[%s12905_s14 + $0x158] sm:$0xff] }
 0x657   :  { %6021 = vmatprep.mubr.bf16.mxu1 %v11157_v51  ;;  %6053 = vmatpush1.bf16.msra.mxu1 %v5771_v55  ;;  %v5783_v51 = vunpack.c.h.s8.bf16 %v5679_v48  ;;  %v5788_v52 = vunpack.c.l.s8.bf16 %v5684_v1  ;;  %v5792_v39 = vunpack.c.h.s8.bf16 %v5684_v1  ;;  %v5696_v1 = vld [vmem:[%s12905_s14 + $0x1b8] sm:$0xff] }
 0x658   :  { %6054 = vmatprep.subr.bf16.mxu1 %v5776_v46  ;;  %v6314_v46 = vld [vmem:[%s12906_s15 + $0x8] sm:$0xff] }
 0x65b   :  { %6055 = vmatpush1.bf16.msra.mxu1 %v5775_v21  ;;  %v6378_v21 = vunpack.c.l.s8.bf16 %v6314_v46 }
 0x65c   :  { %5949 = vmatmul.mubr.bf16.gmra.mrb[148].mxu0 %v11370_v3  ;;  %6056 = vmatprep.subr.bf16.mxu1 %v5780_v11  ;;  %v5803_v11 = vunpack.c.l.s8.bf16 %v5691_v60 }
 0x65d   :  { %5958 = vmatprep.mubr.bf16.mxu0 %v11406_v16  ;;  %6505 = vmatprep.subr.bf16.mxu0 %v6378_v21 }
 0x65e   :  { %6022 = vmatmul.mubr.bf16.gmra.mrb[188].mxu1 %v11155_v40  ;;  %v5688_v40 = vld [vmem:[%s12905_s14 + $0x178] sm:$0xff] }
 0x65f   :  { %6031 = vmatprep.mubr.bf16.mxu1 %v11189_v32  ;;  %6057 = vmatpush1.bf16.msra.mxu1 %v5779_v53  ;;  %v5791_v32 = vunpack.c.h.s8.bf16 %v5683_v54  ;;  %v5796_v31 = vunpack.c.l.s8.bf16 %v5688_v40 }
 0x660   :  { %6058 = vmatprep.subr.bf16.mxu1 %v5784_v33  ;;  %v5808_v33 = vunpack.c.h.s8.bf16 %v5692_v58 }
 0x663   :  { %6059 = vmatpush1.bf16.msra.mxu1 %v5783_v51  ;;  %v6382_v51 = vunpack.c.h.s8.bf16 %v6314_v46  ;;  %v5700_v46 = vld [vmem:[%s12905_s14 + $0x1d8] sm:$0xff] }
 0x664   :  { %5959 = vmatmul.mubr.bf16.gmra.mrb[152].mxu0 %v11402_v9  ;;  %6060 = vmatprep.subr.bf16.mxu1 %v5788_v52  ;;  %v5807_v52 = vunpack.c.h.s8.bf16 %v5691_v60  ;;  %v5816_v60 = vunpack.c.h.s8.bf16 %v5696_v1 }
 0x665   :  { %5968 = vmatprep.mubr.bf16.mxu0 %v11432_v14 }
 0x666   :  { %6032 = vmatmul.mubr.bf16.gmra.mrb[192].mxu1 %v11187_v42 }
 0x667   :  { %6041 = vmatprep.mubr.bf16.mxu1 %v11221_v61  ;;  %6061 = vmatpush1.bf16.msra.mxu1 %v5787_v25  ;;  %v5800_v61 = vunpack.c.h.s8.bf16 %v5688_v40  ;;  %v5812_v25 = vunpack.c.l.s8.bf16 %v5696_v1  ;;  %v6322_v1 = vld [vmem:[%s12906_s15 + $0x48] sm:$0xff] }
 0x668   :  { %6062 = vmatprep.subr.bf16.mxu1 %v5792_v39  ;;  %v5695_v39 = vld [vmem:[%s12905_s14 + $0x1b0] sm:$0xff] }
 0x669   :  { %v11470_v12 = vpop.f32.mrb[152].mxu1  ;;  %v5811_v58 = vunpack.c.l.s8.bf16 %v5695_v39 }
 0x66a   :  { %13025 = vst [vmem:[#allocation66_spill] sm:$0xff] %v11470_v12  ;;  %v11472_v43 = vpop.f32.mrb[153].mxu1 }
 0x66b   :  { %13026 = vst [vmem:[#allocation67_spill] sm:$0xff] %v11472_v43  ;;  %v11474_v59 = vpop.f32.mrb[154].mxu1  ;;  %6063 = vmatpush1.bf16.msra.mxu1 %v5791_v32  ;;  %v6318_v32 = vld [vmem:[%s12906_s15 + $0x28] sm:$0xff] }
 0x66c   :  { %13027 = vst [vmem:[#allocation68_spill] sm:$0xff] %v11474_v59  ;;  %5969 = vmatmul.mubr.bf16.gmra.mrb[156].mxu0 %v11430_v37  ;;  %v11477_v42 = vpop.f32.mrb[155].mxu1  ;;  %6064 = vmatprep.subr.bf16.mxu1 %v5796_v31  ;;  %v6386_v18 = vunpack.c.l.s8.bf16 %v6318_v32  ;;  %v6390_v21 = vunpack.c.h.s8.bf16 %v6318_v32  ;;  %v13056_v59 = vld [vmem:[#allocation22_spill] sm:$0xff] }
 0x66d   :  { %13028 = vst [vmem:[#allocation69_spill] sm:$0xff] %v11477_v42  ;;  %v2396_v43 = vmax.f32 %v13056_v59, 0.0 }
 0x66e   :  { %6042 = vmatmul.mubr.bf16.gmra.mrb[196].mxu1 %v11219_v62  ;;  %v6313_v62 = vld [vmem:[%s12906_s15] sm:$0xff] }
 0x66f   :  { %6065 = vmatpush1.bf16.msra.mxu1 %v5795_v36  ;;  %6084 = vmatprep.mubr.bf16.mxu1 %v11341_v8  ;;  %v6377_v48 = vunpack.c.l.s8.bf16 %v6313_v62  ;;  %v6381_v54 = vunpack.c.h.s8.bf16 %v6313_v62  ;;  %v6317_v36 = vld [vmem:[%s12906_s15 + $0x20] sm:$0xff]  ;;  %v5815_v62 = vunpack.c.h.s8.bf16 %v5695_v39 }
 0x670   :  { %6066 = vmatprep.subr.bf16.mxu1 %v5800_v61 }
 0x671   :  { %v11487_v55 = vpop.f32.mrb[156].mxu1  ;;  %6506 = vmatpush1.bf16.msra.mxu0 %v6377_v48  ;;  %v5820_v48 = vunpack.c.l.s8.bf16 %v5700_v46 }
 0x672   :  { %13029 = vst [vmem:[#allocation70_spill] sm:$0xff] %v11487_v55  ;;  %v11492_v30 = vpop.f32.mrb[157].mxu1  ;;  %6507 = vmatprep.subr.bf16.mxu0 %v6382_v51 }
 0x673   :  { %13030 = vst [vmem:[#allocation71_spill] sm:$0xff] %v11492_v30  ;;  %v11497_v8 = vpop.f32.mrb[158].mxu1  ;;  %6067 = vmatpush1.bf16.msra.mxu1 %v5799_v47  ;;  %v6385_v47 = vunpack.c.l.s8.bf16 %v6317_v36 }
 0x674   :  { %13031 = vst [vmem:[#allocation72_spill] sm:$0xff] %v11497_v8  ;;  %v11499_v53 = vpop.f32.mrb[159].mxu1  ;;  %6068 = vmatprep.subr.bf16.mxu1 %v5804_v24 }
 0x675   :  { %13032 = vst [vmem:[#allocation73_spill] sm:$0xff] %v11499_v53  ;;  %6508 = vmatpush1.bf16.msra.mxu0 %v6381_v54  ;;  %v6394_v54 = vunpack.c.l.s8.bf16 %v6322_v1 }
 0x676   :  { %6509 = vmatprep.subr.bf16.mxu0 %v6386_v18 }
 0x677   :  { %6069 = vmatpush1.bf16.msra.mxu1 %v5803_v11  ;;  %v6389_v11 = vunpack.c.h.s8.bf16 %v6317_v36 }
 0x678   :  { %6070 = vmatprep.subr.bf16.mxu1 %v5808_v33  ;;  %v5699_v33 = vld [vmem:[%s12905_s14 + $0x1d0] sm:$0xff] }
 0x679   :  { %v11507_v40 = vpop.f32.mrb[160].mxu1  ;;  %6510 = vmatpush1.bf16.msra.mxu0 %v6385_v47  ;;  %v5819_v32 = vunpack.c.l.s8.bf16 %v5699_v33  ;;  %v5704_v47 = vld [vmem:[%s12905_s14 + $0x1f8] sm:$0xff] }
 0x67a   :  { %13033 = vst [vmem:[#allocation74_spill] sm:$0xff] %v11507_v40  ;;  %v11512_v31 = vpop.f32.mrb[161].mxu1  ;;  %6511 = vmatprep.subr.bf16.mxu0 %v6390_v21  ;;  %v5823_v21 = vunpack.c.h.s8.bf16 %v5699_v33 }
 0x67b   :  { %13034 = vst [vmem:[#allocation75_spill] sm:$0xff] %v11512_v31  ;;  %v11517_v61 = vpop.f32.mrb[162].mxu1  ;;  %6071 = vmatpush1.bf16.msra.mxu1 %v5807_v52 }
 0x67c   :  { %13035 = vst [vmem:[#allocation76_spill] sm:$0xff] %v11517_v61  ;;  %v11519_v24 = vpop.f32.mrb[163].mxu1  ;;  %6072 = vmatprep.subr.bf16.mxu1 %v5812_v25  ;;  %v6321_v25 = vld [vmem:[%s12906_s15 + $0x40] sm:$0xff] }
 0x67d   :  { %13036 = vst [vmem:[#allocation77_spill] sm:$0xff] %v11519_v24  ;;  %6512 = vmatpush1.bf16.msra.mxu0 %v6389_v11  ;;  %v6393_v18 = vunpack.c.l.s8.bf16 %v6321_v25  ;;  %v6397_v11 = vunpack.c.h.s8.bf16 %v6321_v25 }
 0x67e   :  { %6513 = vmatprep.subr.bf16.mxu0 %v6394_v54 }
 0x67f   :  { %6073 = vmatpush1.bf16.msra.mxu1 %v5811_v58  ;;  %v5824_v58 = vunpack.c.h.s8.bf16 %v5700_v46  ;;  %v6326_v46 = vld [vmem:[%s12906_s15 + $0x68] sm:$0xff] }
 0x680   :  { %6074 = vmatprep.subr.bf16.mxu1 %v5816_v60  ;;  %v6398_v60 = vunpack.c.h.s8.bf16 %v6322_v1  ;;  %v6402_v1 = vunpack.c.l.s8.bf16 %v6326_v46  ;;  %v6406_v33 = vunpack.c.h.s8.bf16 %v6326_v46 }
 0x681   :  { %v11527_v51 = vpop.f32.mrb[164].mxu1  ;;  %6514 = vmatpush1.bf16.msra.mxu0 %v6393_v18  ;;  %v5832_v18 = vunpack.c.h.s8.bf16 %v5704_v47 }
 0x682   :  { %13037 = vst [vmem:[#allocation78_spill] sm:$0xff] %v11527_v51  ;;  %v11532_v52 = vpop.f32.mrb[165].mxu1  ;;  %6515 = vmatprep.subr.bf16.mxu0 %v6398_v60 }
 0x683   :  { %13038 = vst [vmem:[#allocation79_spill] sm:$0xff] %v11532_v52  ;;  %v11537_v39 = vpop.f32.mrb[166].mxu1  ;;  %6075 = vmatpush1.bf16.msra.mxu1 %v5815_v62  ;;  %v5828_v52 = vunpack.c.l.s8.bf16 %v5704_v47  ;;  %v5703_v62 = vld [vmem:[%s12905_s14 + $0x1f0] sm:$0xff] }
 0x684   :  { %13039 = vst [vmem:[#allocation80_spill] sm:$0xff] %v11537_v39  ;;  %v11539_v36 = vpop.f32.mrb[167].mxu1  ;;  %6076 = vmatprep.subr.bf16.mxu1 %v5820_v48  ;;  %v6325_v48 = vld [vmem:[%s12906_s15 + $0x60] sm:$0xff]  ;;  %v5827_v25 = vunpack.c.l.s8.bf16 %v5703_v62  ;;  %v5831_v46 = vunpack.c.h.s8.bf16 %v5703_v62  ;;  %v6320_v62 = vld [vmem:[%s12906_s15 + $0x38] sm:$0xff] }
 0x685   :  { %13040 = vst [vmem:[#allocation81_spill] sm:$0xff] %v11539_v36  ;;  %6516 = vmatpush1.bf16.msra.mxu0 %v6397_v11  ;;  %v6401_v54 = vunpack.c.l.s8.bf16 %v6325_v48  ;;  %v6405_v60 = vunpack.c.h.s8.bf16 %v6325_v48 }
 0x686   :  { %6517 = vmatprep.subr.bf16.mxu0 %v6402_v1 }
 0x687   :  { %6077 = vmatpush1.bf16.msra.mxu1 %v5819_v32  ;;  %v6330_v32 = vld [vmem:[%s12906_s15 + $0x88] sm:$0xff] }
 0x688   :  { %6078 = vmatprep.subr.bf16.mxu1 %v5824_v58  ;;  %v6316_v58 = vld [vmem:[%s12906_s15 + $0x18] sm:$0xff]  ;;  %v6410_v11 = vunpack.c.l.s8.bf16 %v6330_v32  ;;  %v6414_v1 = vunpack.c.h.s8.bf16 %v6330_v32  ;;  %v6333_v32 = vld [vmem:[%s12906_s15 + $0xa0] sm:$0xff] }
 0x689   :  { %6518 = vmatpush1.bf16.msra.mxu0 %v6401_v54  ;;  %v6380_v36 = vunpack.c.l.s8.bf16 %v6316_v58  ;;  %v6334_v54 = vld [vmem:[%s12906_s15 + $0xa8] sm:$0xff] }
 0x68a   :  { %6519 = vmatprep.subr.bf16.mxu0 %v6406_v33  ;;  %v6384_v33 = vunpack.c.h.s8.bf16 %v6316_v58  ;;  %v6319_v58 = vld [vmem:[%s12906_s15 + $0x30] sm:$0xff] }
 0x68b   :  { %6079 = vmatpush1.bf16.msra.mxu1 %v5823_v21  ;;  %v6329_v21 = vld [vmem:[%s12906_s15 + $0x80] sm:$0xff] }
 0x68c   :  { %6080 = vmatprep.subr.bf16.mxu1 %v5828_v52  ;;  %v6315_v52 = vld [vmem:[%s12906_s15 + $0x10] sm:$0xff]  ;;  %v6409_v47 = vunpack.c.l.s8.bf16 %v6329_v21 }
 0x68d   :  { %6520 = vmatpush1.bf16.msra.mxu0 %v6405_v60  ;;  %v6379_v48 = vunpack.c.l.s8.bf16 %v6315_v52  ;;  %v6383_v60 = vunpack.c.h.s8.bf16 %v6315_v52  ;;  %v6387_v52 = vunpack.c.l.s8.bf16 %v6319_v58 }
 0x68e   :  { %6521 = vmatprep.subr.bf16.mxu0 %v6410_v11  ;;  %v6417_v11 = vunpack.c.l.s8.bf16 %v6333_v32 }
 0x68f   :  { %6081 = vmatpush1.bf16.msra.mxu1 %v5827_v25  ;;  %v6413_v25 = vunpack.c.h.s8.bf16 %v6329_v21 }
 0x690   :  { %6082 = vmatprep.subr.bf16.mxu1 %v5832_v18  ;;  %v6418_v18 = vunpack.c.l.s8.bf16 %v6334_v54 }
 0x691   :  { %6522 = vmatpush1.bf16.msra.mxu0 %v6409_v47  ;;  %v6338_v47 = vld [vmem:[%s12906_s15 + $0xc8] sm:$0xff] }
 0x692   :  { %6523 = vmatprep.subr.bf16.mxu0 %v6414_v1  ;;  %v6392_v1 = vunpack.c.h.s8.bf16 %v6320_v62 }
 0x693   :  { %6083 = vmatpush1.bf16.msra.mxu1 %v5831_v46  ;;  %v6422_v46 = vunpack.c.h.s8.bf16 %v6334_v54 }
 0x694   :  { %6651 = vmatprep.subr.bf16.mxu1 %v6380_v36  ;;  %v6388_v36 = vunpack.c.l.s8.bf16 %v6320_v62  ;;  %v6426_v62 = vunpack.c.l.s8.bf16 %v6338_v47 }
 0x695   :  { %6524 = vmatpush1.bf16.msra.mxu0 %v6413_v25  ;;  %v8126_v25 = vld [vmem:[%s12962_s26 + $0x6] sm:$0xf] }
 0x696   :  { %6085 = vmatmul.mubr.bf16.vlgmr.msra.gmra.mrb[184].mxu1 %v11332_v56  ;;  %v8125_v56 = vld [vmem:[%s12960_s0 + $0x6] sm:$0xf]  ;;  %6525 = vmatprep.subr.bf16.mxu0 %v6418_v18  ;;  %v11600_v18 = vrot.slane %v8126_v25, %v8989_v0 }
 0x697   :  { %6094 = vmatprep.mubr.bf16.mxu1 %v11374_v19  ;;  %6652 = vmatpush1.bf16.msra.mxu1 %v6379_v48  ;;  %v11583_v21 = vrot.slane %v8125_v56, %v8989_v0  ;;  %v11586_v19 = vrot.slane %v8125_v56, %v8997_v13  ;;  %v6324_v48 = vld [vmem:[%s12906_s15 + $0x58] sm:$0xff]  ;;  %v6323_v56 = vld [vmem:[%s12906_s15 + $0x50] sm:$0xff] }
 0x698   :  { %6653 = vmatprep.subr.bf16.mxu1 %v6384_v33  ;;  %v6421_v33 = vunpack.c.h.s8.bf16 %v6333_v32  ;;  %v6399_v51 = vunpack.c.h.s8.bf16 %v6323_v56 }
 0x699   :  { %6526 = vmatpush1.bf16.msra.mxu0 %v6417_v11  ;;  %v2279_v54 = vmul.f32 %v11583_v21, %v9670_v41  ;;  %v2280_v32 = vmul.f32 %v11586_v19, %v9676_v44  ;;  %v11609_v41 = vrot.slane %v8126_v25, %v8997_v13  ;;  %v2283_v11 = vmul.f32 %v11583_v21, %v9679_v50  ;;  %v11622_v44 = vld [vmem:[%s12960_s0 + $0x23] sm:$0xf] }
 0x69a   :  { %6527 = vmatprep.subr.bf16.mxu0 %v6422_v46  ;;  %v2284_v46 = vmul.f32 %v11586_v19, %v9685_v57  ;;  %v11634_v25 = vrot.slane %v11622_v44, %v8989_v0 }
 0x69b   :  { %6654 = vmatpush1.bf16.msra.mxu1 %v6383_v60  ;;  %v6337_v60 = vld [vmem:[%s12906_s15 + $0xc0] sm:$0xff]  ;;  %v2334_v50 = vadd.f32 %v11609_v41, %v2280_v32  ;;  %v2337_v57 = vadd.f32 %v11600_v18, %v2283_v11  ;;  %v11644_v32 = vld [vmem:[%s12906_s15 + $0x78] sm:$0xff] }
 0x69c   :  { %6655 = vmatprep.subr.bf16.mxu1 %v6388_v36  ;;  %v6391_v36 = vunpack.c.h.s8.bf16 %v6319_v58  ;;  %v2333_v58 = vadd.f32 %v11600_v18, %v2279_v54  ;;  %v2338_v54 = vadd.f32 %v11609_v41, %v2284_v46  ;;  %v6429_v24 = vunpack.c.h.s8.bf16 %v6337_v60 }
 0x69d   :  { %6528 = vmatpush1.bf16.msra.mxu0 %v6421_v33  ;;  %v6400_v33 = vunpack.c.h.s8.bf16 %v6324_v48 }
 0x69e   :  { %6095 = vmatmul.mubr.bf16.gmra.mrb[188].mxu1 %v11370_v3  ;;  %v6396_v3 = vunpack.c.l.s8.bf16 %v6324_v48  ;;  %6529 = vmatprep.subr.bf16.mxu0 %v6426_v62  ;;  %v11639_v62 = vrot.slane %v11622_v44, %v8997_v13  ;;  %v6430_v48 = vunpack.c.h.s8.bf16 %v6338_v47  ;;  %v11663_v47 = vld [vmem:[%s12906_s15 + $0x70] sm:$0xff] }
 0x69f   :  { %6104 = vmatprep.mubr.bf16.mxu1 %v11406_v16  ;;  %6656 = vmatpush1.bf16.msra.mxu1 %v6387_v52  ;;  %v6425_v16 = vunpack.c.l.s8.bf16 %v6337_v60  ;;  %v11629_v52 = vld [vmem:[%s12962_s26 + $0x19] sm:$0xf]  ;;  %v2288_v60 = vmul.f32 %v11586_v19, %v9709_v4 }
 0x6a0   :  { %6657 = vmatprep.subr.bf16.mxu1 %v6392_v1  ;;  %v6395_v1 = vunpack.c.l.s8.bf16 %v6323_v56  ;;  %v11648_v11 = vrot.slane %v11629_v52, %v8989_v0  ;;  %v11653_v39 = vrot.slane %v11629_v52, %v8997_v13  ;;  %v2291_v56 = vmul.f32 %v11583_v21, %v9715_v28  ;;  %v6341_v28 = vld [vmem:[%s12906_s15 + $0xe0] sm:$0xff] }
 0x6a1   :  { %6530 = vmatpush1.bf16.msra.mxu0 %v6425_v16  ;;  %v2369_v16 = vmax.f32 %v2337_v57, 0.0  ;;  %v2292_v57 = vmul.f32 %v11586_v19, %v9721_v45  ;;  %v6433_v40 = vunpack.c.l.s8.bf16 %v6341_v28  ;;  %v2342_v8 = vadd.f32 %v11609_v41, %v2288_v60 }
 0x6a2   :  { %6531 = vmatprep.subr.bf16.mxu0 %v6430_v48 }
 0x6a3   :  { %6658 = vmatpush1.bf16.msra.mxu1 %v6391_v36  ;;  %v2365_v36 = vmax.f32 %v2333_v58, 0.0  ;;  %v2287_v58 = vmul.f32 %v11583_v21, %v9703_v10 }
 0x6a4   :  { %6659 = vmatprep.subr.bf16.mxu1 %v6396_v3  ;;  %v2366_v3 = vmax.f32 %v2334_v50, 0.0 }
 0x6a5   :  { %6532 = vmatpush1.bf16.msra.mxu0 %v6429_v24  ;;  %v2341_v45 = vadd.f32 %v11600_v18, %v2287_v58  ;;  %v6332_v58 = vld [vmem:[%s12906_s15 + $0x98] sm:$0xff] }
 0x6a6   :  { %6105 = vmatmul.mubr.bf16.gmra.mrb[192].mxu1 %v11402_v9  ;;  %v6404_v9 = vunpack.c.l.s8.bf16 %v11644_v32 }
 0x6a7   :  { %v5348_v46 = vpop.f32.mrb[128].mxu0  ;;  %6114 = vmatprep.mubr.bf16.mxu1 %v11432_v14  ;;  %6660 = vmatpush1.bf16.msra.mxu1 %v6395_v1  ;;  %v2370_v14 = vmax.f32 %v2338_v54, 0.0  ;;  %v6342_v1 = vld [vmem:[%s12906_s15 + $0xe8] sm:$0xff] }
 0x6a8   :  { %v5555_v61 = vmul.f32 %v11634_v25, %v5348_v46  ;;  %v5350_v31 = vpop.f32.mrb[129].mxu0  ;;  %6661 = vmatprep.subr.bf16.mxu1 %v6400_v33  ;;  %v6434_v4 = vunpack.c.l.s8.bf16 %v6342_v1  ;;  %v6403_v46 = vunpack.c.l.s8.bf16 %v11663_v47 }
 0x6a9   :  { %v5556_v10 = vmul.f32 %v11639_v62, %v5350_v31  ;;  %v5352_v50 = vpop.f32.mrb[130].mxu0 }
 0x6aa   :  { %v5609_v33 = vadd.f32 %v11648_v11, %v5555_v61  ;;  %v5559_v54 = vmul.f32 %v11634_v25, %v5352_v50  ;;  %v5354_v48 = vpop.f32.mrb[131].mxu0  ;;  %v6408_v50 = vunpack.c.h.s8.bf16 %v11644_v32  ;;  %6533 = vmatprep.subr.bf16.mxu0 %v6434_v4  ;;  %v6438_v32 = vunpack.c.h.s8.bf16 %v6342_v1 }
 0x6ab   :  { %v5610_v31 = vadd.f32 %v11653_v39, %v5556_v10  ;;  %v5560_v24 = vmul.f32 %v11639_v62, %v5354_v48  ;;  %6662 = vmatpush1.bf16.msra.mxu1 %v6399_v51  ;;  %v2345_v10 = vadd.f32 %v11600_v18, %v2291_v56  ;;  %6534 = vmatpush1.bf16.msra.mxu0 %v6433_v40  ;;  %v6407_v56 = vunpack.c.h.s8.bf16 %v11663_v47 }
 0x6ac   :  { %v11684_v53 = vadd.f32 %v5609_v33, %v2365_v36  ;;  %v5613_v61 = vadd.f32 %v11648_v11, %v5559_v54  ;;  %6663 = vmatprep.subr.bf16.mxu1 %v6404_v9  ;;  %v2346_v36 = vadd.f32 %v11609_v41, %v2292_v57  ;;  %v2295_v9 = vmul.f32 %v11583_v21, %v9733_v35 }
 0x6ad   :  { %v11690_v30 = vadd.f32 %v5610_v31, %v2366_v3  ;;  %v5614_v51 = vadd.f32 %v11653_v39, %v5560_v24  ;;  %v6437_v54 = vunpack.c.h.s8.bf16 %v6341_v28  ;;  %v2296_v40 = vmul.f32 %v11586_v19, %v9739_v38  ;;  %6535 = vmatprep.subr.bf16.mxu0 %v6438_v32  ;;  %v11726_v32 = vld [vmem:[%s12906_s15 + $0x108] sm:$0xff] }
 0x6ae   :  { %v11697_v33 = vadd.f32 %v5613_v61, %v2369_v16  ;;  %6115 = vmatmul.mubr.bf16.gmra.mrb[196].mxu1 %v11430_v37  ;;  %v6412_v48 = vunpack.c.l.s8.bf16 %v6332_v58  ;;  %v6331_v37 = vld [vmem:[%s12906_s15 + $0x90] sm:$0xff]  ;;  %v2373_v35 = vmax.f32 %v2341_v45, 0.0  ;;  %v2377_v1 = vmax.f32 %v2345_v10, 0.0 }
 0x6af   :  { %v11702_v60 = vadd.f32 %v5614_v51, %v2370_v14  ;;  %v5358_v3 = vpop.f32.mrb[132].mxu0  ;;  %6664 = vmatpush1.bf16.msra.mxu1 %v6403_v46  ;;  %v2374_v14 = vmax.f32 %v2342_v8, 0.0  ;;  %6536 = vmatpush1.bf16.msra.mxu0 %v6437_v54  ;;  %v2378_v28 = vmax.f32 %v2346_v36, 0.0  ;;  %v2299_v38 = vmul.f32 %v11583_v21, %v9745_v23  ;;  %v6336_v54 = vld [vmem:[%s12906_s15 + $0xb8] sm:$0xff] }
 0x6b0   :  { %v5563_v57 = vmul.f32 %v11634_v25, %v5358_v3  ;;  %v5360_v16 = vpop.f32.mrb[133].mxu0  ;;  %6665 = vmatprep.subr.bf16.mxu1 %v6408_v50  ;;  %v2349_v61 = vadd.f32 %v11600_v18, %v2295_v9  ;;  %v6411_v45 = vunpack.c.l.s8.bf16 %v6331_v37  ;;  %v2350_v10 = vadd.f32 %v11609_v41, %v2296_v40 }
 0x6b1   :  { %v5564_v4 = vmul.f32 %v11639_v62, %v5360_v16  ;;  %v5362_v47 = vpop.f32.mrb[134].mxu0  ;;  %v6416_v23 = vunpack.c.h.s8.bf16 %v6332_v58  ;;  %v2300_v9 = vmul.f32 %v11586_v19, %v9751_v49  ;;  %v6442_v40 = vunpack.c.l.s8.bf16 %v11726_v32 }
 0x6b2   :  { %v5617_v31 = vadd.f32 %v11648_v11, %v5563_v57  ;;  %v5567_v24 = vmul.f32 %v11634_v25, %v5362_v47  ;;  %v5364_v46 = vpop.f32.mrb[135].mxu0  ;;  %v2353_v58 = vadd.f32 %v11600_v18, %v2299_v38  ;;  %v6335_v47 = vld [vmem:[%s12906_s15 + $0xb0] sm:$0xff]  ;;  %v6446_v7 = vunpack.c.h.s8.bf16 %v11726_v32 }
 0x6b3   :  { %v5618_v50 = vadd.f32 %v11653_v39, %v5564_v4  ;;  %v5568_v8 = vmul.f32 %v11639_v62, %v5364_v46  ;;  %6666 = vmatpush1.bf16.msra.mxu1 %v6407_v56  ;;  %6578 = vmatprep.subr.bf16.mxu0 %v6442_v40  ;;  %v6420_v4 = vunpack.c.l.s8.bf16 %v6336_v54  ;;  %v6424_v40 = vunpack.c.h.s8.bf16 %v6336_v54 }
 0x6b4   :  { %v11720_v51 = vadd.f32 %v5617_v31, %v2373_v35  ;;  %v5621_v36 = vadd.f32 %v11648_v11, %v5567_v24  ;;  %6667 = vmatprep.subr.bf16.mxu1 %v6412_v48  ;;  %v6415_v35 = vunpack.c.h.s8.bf16 %v6331_v37  ;;  %v2381_v31 = vmax.f32 %v2349_v61, 0.0 }
 0x6b5   :  { %v11730_v3 = vadd.f32 %v5618_v50, %v2374_v14  ;;  %v5622_v56 = vadd.f32 %v11653_v39, %v5568_v8  ;;  %v2382_v24 = vmax.f32 %v2350_v10, 0.0  ;;  %v2385_v46 = vmax.f32 %v2353_v58, 0.0 }
 0x6b6   :  { %v11738_v57 = vadd.f32 %v5621_v36, %v2377_v1  ;;  %v2354_v1 = vadd.f32 %v11609_v41, %v2300_v9  ;;  %v2303_v37 = vmul.f32 %v11583_v21, %v9763_v63  ;;  %v2304_v36 = vmul.f32 %v11586_v19, %v9769_v5 }
 0x6b7   :  { %v11740_v16 = vadd.f32 %v5622_v56, %v2378_v28  ;;  %v5368_v48 = vpop.f32.mrb[136].mxu0  ;;  %6668 = vmatpush1.bf16.msra.mxu1 %v6411_v45  ;;  %v2307_v9 = vmul.f32 %v11583_v21, %v9775_v6 }
 0x6b8   :  { %v5571_v49 = vmul.f32 %v11634_v25, %v5368_v48  ;;  %v5370_v14 = vpop.f32.mrb[137].mxu0  ;;  %6669 = vmatprep.subr.bf16.mxu1 %v6416_v23  ;;  %v6419_v23 = vunpack.c.l.s8.bf16 %v6335_v47  ;;  %v2386_v58 = vmax.f32 %v2354_v1, 0.0  ;;  %v2308_v48 = vmul.f32 %v11586_v19, %v9781_v34 }
 0x6b9   :  { %v5572_v28 = vmul.f32 %v11639_v62, %v5370_v14  ;;  %v5372_v38 = vpop.f32.mrb[138].mxu0  ;;  %v2357_v6 = vadd.f32 %v11600_v18, %v2303_v37  ;;  %v2358_v14 = vadd.f32 %v11609_v41, %v2304_v36  ;;  %v2361_v34 = vadd.f32 %v11600_v18, %v2307_v9 }
 0x6ba   :  { %v5625_v50 = vadd.f32 %v11648_v11, %v5571_v49  ;;  %v5575_v8 = vmul.f32 %v11634_v25, %v5372_v38  ;;  %v5374_v45 = vpop.f32.mrb[139].mxu0  ;;  %v2362_v38 = vadd.f32 %v11609_v41, %v2308_v48  ;;  %v6344_v48 = vld [vmem:[%s12906_s15 + $0xf8] sm:$0xff] }
 0x6bb   :  { %v5626_v61 = vadd.f32 %v11653_v39, %v5572_v28  ;;  %v5576_v10 = vmul.f32 %v11639_v62, %v5374_v45  ;;  %6670 = vmatpush1.bf16.msra.mxu1 %v6415_v35  ;;  %v6340_v35 = vld [vmem:[%s12906_s15 + $0xd8] sm:$0xff]  ;;  %v6339_v28 = vld [vmem:[%s12906_s15 + $0xd0] sm:$0xff]  ;;  %v2390_v45 = vmax.f32 %v2358_v14, 0.0  ;;  %v6436_v14 = vunpack.c.l.s8.bf16 %v6344_v48 }
 0x6bc   :  { %v11758_v56 = vadd.f32 %v5625_v50, %v2381_v31  ;;  %v5629_v63 = vadd.f32 %v11648_v11, %v5575_v8  ;;  %6671 = vmatprep.subr.bf16.mxu1 %v6420_v4  ;;  %v6423_v31 = vunpack.c.h.s8.bf16 %v6335_v47  ;;  %v6428_v1 = vunpack.c.l.s8.bf16 %v6340_v35 }
 0x6bd   :  { %v11763_v5 = vadd.f32 %v5626_v61, %v2382_v24  ;;  %v5630_v49 = vadd.f32 %v11653_v39, %v5576_v10  ;;  %v2389_v50 = vmax.f32 %v2357_v6, 0.0  ;;  %v6427_v10 = vunpack.c.l.s8.bf16 %v6339_v28 }
 0x6be   :  { %v11770_v21 = vadd.f32 %v5629_v63, %v2385_v46  ;;  %v6432_v63 = vunpack.c.h.s8.bf16 %v6340_v35  ;;  %v6431_v6 = vunpack.c.h.s8.bf16 %v6339_v28 }
 0x6bf   :  { %v11773_v4 = vadd.f32 %v5630_v49, %v2386_v58  ;;  %v5378_v54 = vpop.f32.mrb[140].mxu0  ;;  %6672 = vmatpush1.bf16.msra.mxu1 %v6419_v23  ;;  %v2393_v23 = vmax.f32 %v2361_v34, 0.0 }
 0x6c0   :  { %v5579_v19 = vmul.f32 %v11634_v25, %v5378_v54  ;;  %v5380_v24 = vpop.f32.mrb[141].mxu0  ;;  %6673 = vmatprep.subr.bf16.mxu1 %v6424_v40  ;;  %v2394_v40 = vmax.f32 %v2362_v38, 0.0  ;;  %v11805_v54 = vld [vmem:[%s12906_s15 + $0x118] sm:$0xff]  ;;  %v11822_v38 = vrot.slane %v11629_v52, %v9237_v26 }
 0x6c1   :  { %v5580_v46 = vmul.f32 %v11639_v62, %v5380_v24  ;;  %v5382_v37 = vpop.f32.mrb[142].mxu0  ;;  %v6444_v34 = vunpack.c.l.s8.bf16 %v11805_v54  ;;  %v11814_v24 = vrot.slane %v11622_v44, %v9237_v26 }
 0x6c2   :  { %v5633_v8 = vadd.f32 %v11648_v11, %v5579_v19  ;;  %v5583_v47 = vmul.f32 %v11634_v25, %v5382_v37  ;;  %v5384_v18 = vpop.f32.mrb[143].mxu0  ;;  %v11810_v19 = vrot.slane %v11622_v44, %v9234_v22 }
 0x6c3   :  { %v5634_v36 = vadd.f32 %v11653_v39, %v5580_v46  ;;  %v5584_v61 = vmul.f32 %v11639_v62, %v5384_v18  ;;  %6674 = vmatpush1.bf16.msra.mxu1 %v6423_v31 }
 0x6c4   :  { %v11786_v9 = vadd.f32 %v5633_v8, %v2389_v50  ;;  %v5637_v41 = vadd.f32 %v11648_v11, %v5583_v47  ;;  %6675 = vmatprep.subr.bf16.mxu1 %v6428_v1  ;;  %v6343_v11 = vld [vmem:[%s12906_s15 + $0xf0] sm:$0xff]  ;;  %v11818_v1 = vrot.slane %v11629_v52, %v9234_v22  ;;  %v13041_v47 = vld [vmem:[#allocation7_spill] sm:$0xff] }
 0x6c5   :  { %v11789_v58 = vadd.f32 %v5634_v36, %v2390_v45  ;;  %v5638_v25 = vadd.f32 %v11653_v39, %v5584_v61  ;;  %v6435_v35 = vunpack.c.l.s8.bf16 %v6343_v11  ;;  %v6440_v39 = vunpack.c.h.s8.bf16 %v6344_v48  ;;  %v13042_v61 = vld [vmem:[#allocation8_spill] sm:$0xff]  ;;  %v13044_v48 = vld [vmem:[#allocation10_spill] sm:$0xff] }
 0x6c6   :  { %v11795_v49 = vadd.f32 %v5637_v41, %v2393_v23  ;;  %v6439_v31 = vunpack.c.h.s8.bf16 %v6343_v11  ;;  %v2367_v18 = vmax.f32 %v13041_v47, 0.0  ;;  %v13043_v41 = vld [vmem:[#allocation9_spill] sm:$0xff] }
 0x6c7   :  { %v11797_v62 = vadd.f32 %v5638_v25, %v2394_v40  ;;  %6676 = vmatpush1.bf16.msra.mxu1 %v6427_v10  ;;  %v2368_v10 = vmax.f32 %v13042_v61, 0.0 }
 0x6c8   :  { %6677 = vmatprep.subr.bf16.mxu1 %v6432_v63  ;;  %v2371_v63 = vmax.f32 %v13043_v41, 0.0 }
 0x6cb   :  { %6678 = vmatpush1.bf16.msra.mxu1 %v6431_v6  ;;  %v2372_v6 = vmax.f32 %v13044_v48, 0.0 }
 0x6cc   :  { %6679 = vmatprep.subr.bf16.mxu1 %v6436_v14 }
 0x6cf   :  { %6680 = vmatpush1.bf16.msra.mxu1 %v6435_v35 }
 0x6d0   :  { %6681 = vmatprep.subr.bf16.mxu1 %v6440_v39 }
 0x6d3   :  { %6682 = vmatpush1.bf16.msra.mxu1 %v6439_v31 }
 0x6d4   :  { %6724 = vmatprep.subr.bf16.mxu1 %v6444_v34 }
 0x6e9   :  { %v5494_v28 = vpop.f32.mrb[168].mxu1 }
 0x6ea   :  { %v5557_v46 = vmul.f32 %v11810_v19, %v5494_v28  ;;  %v5496_v37 = vpop.f32.mrb[169].mxu1 }
 0x6eb   :  { %v5558_v50 = vmul.f32 %v11814_v24, %v5496_v37  ;;  %v5498_v8 = vpop.f32.mrb[170].mxu1 }
 0x6ec   :  { %v5611_v44 = vadd.f32 %v11818_v1, %v5557_v46  ;;  %v5561_v45 = vmul.f32 %v11810_v19, %v5498_v8  ;;  %v5500_v36 = vpop.f32.mrb[171].mxu1 }
 0x6ed   :  { %v5612_v23 = vadd.f32 %v11822_v38, %v5558_v50  ;;  %v5562_v52 = vmul.f32 %v11814_v24, %v5500_v36  ;;  %v13045_v50 = vld [vmem:[#allocation11_spill] sm:$0xff] }
 0x6ee   :  { %v11833_v40 = vadd.f32 %v5611_v44, %v2367_v18  ;;  %v5615_v25 = vadd.f32 %v11818_v1, %v5561_v45  ;;  %v2375_v8 = vmax.f32 %v13045_v50, 0.0  ;;  %v13046_v45 = vld [vmem:[#allocation12_spill] sm:$0xff] }
 0x6ef   :  { %v11837_v14 = vadd.f32 %v5612_v23, %v2368_v10  ;;  %v5616_v11 = vadd.f32 %v11822_v38, %v5562_v52  ;;  %v2376_v36 = vmax.f32 %v13046_v45, 0.0  ;;  %v13047_v23 = vld [vmem:[#allocation13_spill] sm:$0xff] }
 0x6f0   :  { %v11840_v35 = vadd.f32 %v5615_v25, %v2371_v63  ;;  %v2379_v52 = vmax.f32 %v13047_v23, 0.0  ;;  %v13048_v25 = vld [vmem:[#allocation14_spill] sm:$0xff] }
 0x6f1   :  { %v11842_v39 = vadd.f32 %v5616_v11, %v2372_v6  ;;  %v5504_v31 = vpop.f32.mrb[172].mxu1  ;;  %v2380_v48 = vmax.f32 %v13048_v25, 0.0 }
 0x6f2   :  { %v5565_v34 = vmul.f32 %v11810_v19, %v5504_v31  ;;  %v5506_v28 = vpop.f32.mrb[173].mxu1 }
 0x6f3   :  { %v5566_v46 = vmul.f32 %v11814_v24, %v5506_v28  ;;  %v5508_v37 = vpop.f32.mrb[174].mxu1 }
 0x6f4   :  { %v5619_v47 = vadd.f32 %v11818_v1, %v5565_v34  ;;  %v5569_v18 = vmul.f32 %v11810_v19, %v5508_v37  ;;  %v5510_v44 = vpop.f32.mrb[175].mxu1 }
 0x6f5   :  { %v5620_v61 = vadd.f32 %v11822_v38, %v5566_v46  ;;  %v5570_v10 = vmul.f32 %v11814_v24, %v5510_v44 }
 0x6f6   :  { %v11853_v41 = vadd.f32 %v5619_v47, %v2375_v8  ;;  %v5623_v63 = vadd.f32 %v11818_v1, %v5569_v18  ;;  %v13049_v47 = vld [vmem:[#allocation15_spill] sm:$0xff] }
 0x6f7   :  { %v11857_v6 = vadd.f32 %v5620_v61, %v2376_v36  ;;  %v5624_v11 = vadd.f32 %v11822_v38, %v5570_v10  ;;  %v2383_v44 = vmax.f32 %v13049_v47, 0.0  ;;  %v13050_v61 = vld [vmem:[#allocation16_spill] sm:$0xff] }
 0x6f8   :  { %v11860_v31 = vadd.f32 %v5623_v63, %v2379_v52  ;;  %v2384_v10 = vmax.f32 %v13050_v61, 0.0  ;;  %v13051_v63 = vld [vmem:[#allocation17_spill] sm:$0xff] }
 0x6f9   :  { %v11862_v34 = vadd.f32 %v5624_v11, %v2380_v48  ;;  %v5514_v28 = vpop.f32.mrb[176].mxu1  ;;  %v2387_v25 = vmax.f32 %v13051_v63, 0.0 }
 0x6fa   :  { %v5573_v46 = vmul.f32 %v11810_v19, %v5514_v28  ;;  %v5516_v37 = vpop.f32.mrb[177].mxu1  ;;  %v13052_v28 = vld [vmem:[#allocation18_spill] sm:$0xff] }
 0x6fb   :  { %v5574_v50 = vmul.f32 %v11814_v24, %v5516_v37  ;;  %v5518_v8 = vpop.f32.mrb[178].mxu1  ;;  %v2388_v37 = vmax.f32 %v13052_v28, 0.0  ;;  %v13054_v28 = vld [vmem:[#allocation20_spill] sm:$0xff] }
 0x6fc   :  { %v5627_v18 = vadd.f32 %v11818_v1, %v5573_v46  ;;  %v5577_v45 = vmul.f32 %v11810_v19, %v5518_v8  ;;  %v5520_v36 = vpop.f32.mrb[179].mxu1 }
 0x6fd   :  { %v5628_v23 = vadd.f32 %v11822_v38, %v5574_v50  ;;  %v5578_v52 = vmul.f32 %v11814_v24, %v5520_v36 }
 0x6fe   :  { %v11873_v48 = vadd.f32 %v5627_v18, %v2383_v44  ;;  %v5631_v11 = vadd.f32 %v11818_v1, %v5577_v45  ;;  %v13053_v18 = vld [vmem:[#allocation19_spill] sm:$0xff] }
 0x6ff   :  { %v11877_v47 = vadd.f32 %v5628_v23, %v2384_v10  ;;  %v5632_v46 = vadd.f32 %v11822_v38, %v5578_v52  ;;  %v2391_v42 = vmax.f32 %v13053_v18, 0.0  ;;  %v2392_v52 = vmax.f32 %v13054_v28, 0.0 }
 0x700   :  { %v11880_v8 = vadd.f32 %v5631_v11, %v2387_v25 }
 0x701   :  { %v11882_v55 = vadd.f32 %v5632_v46, %v2388_v37  ;;  %v5524_v61 = vpop.f32.mrb[180].mxu1  ;;  %v13055_v37 = vld [vmem:[#allocation21_spill] sm:$0xff] }
 0x702   :  { %v5581_v50 = vmul.f32 %v11810_v19, %v5524_v61  ;;  %v5526_v36 = vpop.f32.mrb[181].mxu1  ;;  %v2395_v46 = vmax.f32 %v13055_v37, 0.0 }
 0x703   :  { %v5582_v63 = vmul.f32 %v11814_v24, %v5526_v36  ;;  %v5528_v44 = vpop.f32.mrb[182].mxu1 }
 0x704   :  { %v5635_v45 = vadd.f32 %v11818_v1, %v5581_v50  ;;  %v5585_v10 = vmul.f32 %v11810_v19, %v5528_v44  ;;  %v5530_v23 = vpop.f32.mrb[183].mxu1 }
 0x705   :  { %v5636_v25 = vadd.f32 %v11822_v38, %v5582_v63  ;;  %v5586_v11 = vmul.f32 %v11814_v24, %v5530_v23  ;;  %v11907_v24 = vld [vmem:[%s12960_s0 + $0x27] sm:$0xf] }
 0x706   :  { %v11893_v61 = vadd.f32 %v5635_v45, %v2391_v42  ;;  %v5639_v36 = vadd.f32 %v11818_v1, %v5585_v10  ;;  %v11912_v42 = vld [vmem:[%s12962_s26 + $0x1d] sm:$0xf]  ;;  %v11916_v59 = vrot.slane %v11907_v24, %v8989_v0  ;;  %v11920_v1 = vrot.slane %v11907_v24, %v8997_v13 }
 0x707   :  { %v11897_v18 = vadd.f32 %v5636_v25, %v2392_v52  ;;  %v5640_v50 = vadd.f32 %v11822_v38, %v5586_v11  ;;  %v11928_v63 = vrot.slane %v11912_v42, %v8997_v13 }
 0x708   :  { %v11900_v19 = vadd.f32 %v5639_v36, %v2395_v46 }
 0x709   :  { %v11902_v44 = vadd.f32 %v5640_v50, %v2396_v43  ;;  %v11924_v43 = vrot.slane %v11912_v42, %v8989_v0 }
 0x727   :  { %v5940_v38 = vpop.f32.mrb[144].mxu0 }
 0x728   :  { %v6147_v45 = vmul.f32 %v11916_v59, %v5940_v38  ;;  %v5942_v10 = vpop.f32.mrb[145].mxu0 }
 0x729   :  { %v6148_v23 = vmul.f32 %v11920_v1, %v5942_v10  ;;  %v5944_v28 = vpop.f32.mrb[146].mxu0 }
 0x72a   :  { %v6201_v52 = vadd.f32 %v11924_v43, %v6147_v45  ;;  %v6151_v25 = vmul.f32 %v11916_v59, %v5944_v28  ;;  %v5946_v11 = vpop.f32.mrb[147].mxu0  ;;  %v6345_v45 = vld [vmem:[%s12906_s15 + $0x100] sm:$0xff] }
 0x72b   :  { %v6202_v37 = vadd.f32 %v11928_v63, %v6148_v23  ;;  %v6152_v46 = vmul.f32 %v11920_v1, %v5946_v11  ;;  %v6347_v23 = vld [vmem:[%s12906_s15 + $0x110] sm:$0xff] }
 0x72c   :  { %v6265_v36 = vadd.f32 %v11684_v53, %v6201_v52  ;;  %v6205_v50 = vadd.f32 %v11924_v43, %v6151_v25 }
 0x72d   :  { %v6266_v13 = vadd.f32 %v11690_v30, %v6202_v37  ;;  %v6206_v38 = vadd.f32 %v11928_v63, %v6152_v46 }
 0x72e   :  { %v6269_v10 = vadd.f32 %v11697_v33, %v6205_v50  ;;  %v6441_v33 = vunpack.c.l.s8.bf16 %v6345_v45  ;;  %v6443_v50 = vunpack.c.l.s8.bf16 %v6347_v23 }
 0x72f   :  { %v6270_v28 = vadd.f32 %v11702_v60, %v6206_v38  ;;  %v5950_v11 = vpop.f32.mrb[148].mxu0  ;;  %v6448_v60 = vunpack.c.h.s8.bf16 %v11805_v54 }
 0x730   :  { %v6297_v53 = vpack.c.bf16 %v6269_v10, %v6265_v36  ;;  %v6155_v52 = vmul.f32 %v11916_v59, %v5950_v11  ;;  %v5952_v25 = vpop.f32.mrb[149].mxu0  ;;  %v6352_v10 = vld [vmem:[%s12906_s15 + $0x138] sm:$0xff]  ;;  %v6445_v11 = vunpack.c.h.s8.bf16 %v6345_v45 }
 0x731   :  { %v6156_v30 = vmul.f32 %v11920_v1, %v5952_v25  ;;  %v5954_v37 = vpop.f32.mrb[150].mxu0  ;;  %v6298_v46 = vpack.c.bf16 %v6270_v28, %v6266_v13  ;;  %v6350_v13 = vld [vmem:[%s12906_s15 + $0x128] sm:$0xff] }
 0x732   :  { %v6209_v0 = vadd.f32 %v11924_v43, %v6155_v52  ;;  %v6159_v12 = vmul.f32 %v11916_v59, %v5954_v37  ;;  %v5956_v20 = vpop.f32.mrb[151].mxu0  ;;  %v6447_v52 = vunpack.c.h.s8.bf16 %v6347_v23  ;;  %v6452_v37 = vunpack.c.l.s8.bf16 %v6352_v10 }
 0x733   :  { %v6210_v36 = vadd.f32 %v11928_v63, %v6156_v30  ;;  %v6160_v38 = vmul.f32 %v11920_v1, %v5956_v20  ;;  %6537 = vmatprep.mubr.bf16.mxu0 %v6298_v46  ;;  %6683 = vmatprep.mubr.bf16.mxu1 %v6298_v46  ;;  %v6450_v30 = vunpack.c.l.s8.bf16 %v6350_v13 }
 0x734   :  { %v6273_v28 = vadd.f32 %v11720_v51, %v6209_v0  ;;  %v6213_v32 = vadd.f32 %v11924_v43, %v6159_v12  ;;  %6538 = vmatmul.mubr.bf16.vlgmr.msra.gmra.mrb[160].mxu0 %v6297_v53  ;;  %6684 = vmatmul.mubr.bf16.vlgmr.msra.gmra.mrb[200].mxu1 %v6297_v53  ;;  %v6349_v0 = vld [vmem:[%s12906_s15 + $0x120] sm:$0xff]  ;;  %v6351_v12 = vld [vmem:[%s12906_s15 + $0x130] sm:$0xff] }
 0x735   :  { %v6274_v54 = vadd.f32 %v11730_v3, %v6210_v36  ;;  %v6214_v20 = vadd.f32 %v11928_v63, %v6160_v38  ;;  %6579 = vmatpush1.bf16.msra.mxu0 %v6441_v33  ;;  %6725 = vmatpush1.bf16.msra.mxu1 %v6443_v50  ;;  %v6449_v33 = vunpack.c.l.s8.bf16 %v6349_v0  ;;  %v6451_v50 = vunpack.c.l.s8.bf16 %v6351_v12 }
 0x736   :  { %v6277_v25 = vadd.f32 %v11738_v57, %v6213_v32  ;;  %6580 = vmatprep.subr.bf16.mxu0 %v6446_v7  ;;  %6726 = vmatprep.subr.bf16.mxu1 %v6448_v60  ;;  %v6456_v32 = vunpack.c.h.s8.bf16 %v6352_v10 }
 0x737   :  { %v6278_v51 = vadd.f32 %v11740_v16, %v6214_v20  ;;  %v5960_v3 = vpop.f32.mrb[152].mxu0  ;;  %v6454_v16 = vunpack.c.h.s8.bf16 %v6350_v13 }
 0x738   :  { %v6163_v45 = vmul.f32 %v11916_v59, %v5960_v3  ;;  %v5962_v23 = vpop.f32.mrb[153].mxu0  ;;  %v6301_v53 = vpack.c.bf16 %v6277_v25, %v6273_v28 }
 0x739   :  { %v6164_v7 = vmul.f32 %v11920_v1, %v5962_v23  ;;  %v5964_v57 = vpop.f32.mrb[154].mxu0  ;;  %v6302_v46 = vpack.c.bf16 %v6278_v51, %v6274_v54  ;;  %6581 = vmatpush1.bf16.msra.mxu0 %v6445_v11  ;;  %6727 = vmatpush1.bf16.msra.mxu1 %v6447_v52  ;;  %v6354_v54 = vld [vmem:[%s12906_s15 + $0x148] sm:$0xff]  ;;  %v6356_v11 = vld [vmem:[%s12906_s15 + $0x158] sm:$0xff] }
 0x73a   :  { %v6217_v60 = vadd.f32 %v11924_v43, %v6163_v45  ;;  %v6167_v36 = vmul.f32 %v11916_v59, %v5964_v57  ;;  %v5966_v38 = vpop.f32.mrb[155].mxu0  ;;  %6582 = vmatprep.subr.bf16.mxu0 %v6450_v30  ;;  %6728 = vmatprep.subr.bf16.mxu1 %v6452_v37  ;;  %v6453_v30 = vunpack.c.h.s8.bf16 %v6349_v0  ;;  %v6455_v37 = vunpack.c.h.s8.bf16 %v6351_v12 }
 0x73b   :  { %v6218_v20 = vadd.f32 %v11928_v63, %v6164_v7  ;;  %v6168_v28 = vmul.f32 %v11920_v1, %v5966_v38  ;;  %6547 = vmatprep.mubr.bf16.mxu0 %v6302_v46  ;;  %6693 = vmatprep.mubr.bf16.mxu1 %v6302_v46  ;;  %v6458_v3 = vunpack.c.l.s8.bf16 %v6354_v54  ;;  %v6460_v45 = vunpack.c.l.s8.bf16 %v6356_v11 }
 0x73c   :  { %v6281_v52 = vadd.f32 %v11758_v56, %v6217_v60  ;;  %v6221_v25 = vadd.f32 %v11924_v43, %v6167_v36  ;;  %6548 = vmatmul.mubr.bf16.gmra.mrb[164].mxu0 %v6301_v53  ;;  %6694 = vmatmul.mubr.bf16.gmra.mrb[204].mxu1 %v6301_v53  ;;  %v6353_v56 = vld [vmem:[%s12906_s15 + $0x140] sm:$0xff] }
 0x73d   :  { %v6282_v13 = vadd.f32 %v11763_v5, %v6218_v20  ;;  %v6222_v10 = vadd.f32 %v11928_v63, %v6168_v28  ;;  %6583 = vmatpush1.bf16.msra.mxu0 %v6449_v33  ;;  %6729 = vmatpush1.bf16.msra.mxu1 %v6451_v50  ;;  %v6355_v5 = vld [vmem:[%s12906_s15 + $0x150] sm:$0xff]  ;;  %v6457_v33 = vunpack.c.l.s8.bf16 %v6353_v56  ;;  %v6358_v28 = vld [vmem:[%s12906_s15 + $0x168] sm:$0xff] }
 0x73e   :  { %v6285_v51 = vadd.f32 %v11770_v21, %v6221_v25  ;;  %6584 = vmatprep.subr.bf16.mxu0 %v6454_v16  ;;  %6730 = vmatprep.subr.bf16.mxu1 %v6456_v32  ;;  %v6459_v50 = vunpack.c.l.s8.bf16 %v6355_v5  ;;  %v6464_v16 = vunpack.c.h.s8.bf16 %v6356_v11  ;;  %v6461_v11 = vunpack.c.h.s8.bf16 %v6353_v56 }
 0x73f   :  { %v6286_v23 = vadd.f32 %v11773_v4, %v6222_v10  ;;  %v5970_v53 = vpop.f32.mrb[156].mxu0  ;;  %v6462_v4 = vunpack.c.h.s8.bf16 %v6354_v54 }
 0x740   :  { %v6171_v0 = vmul.f32 %v11916_v59, %v5970_v53  ;;  %v5972_v12 = vpop.f32.mrb[157].mxu0  ;;  %v6305_v7 = vpack.c.bf16 %v6285_v51, %v6281_v52  ;;  %v6360_v52 = vld [vmem:[%s12906_s15 + $0x178] sm:$0xff] }
 0x741   :  { %v6172_v21 = vmul.f32 %v11920_v1, %v5972_v12  ;;  %v5974_v57 = vpop.f32.mrb[158].mxu0  ;;  %v6306_v46 = vpack.c.bf16 %v6286_v23, %v6282_v13  ;;  %6585 = vmatpush1.bf16.msra.mxu0 %v6453_v30  ;;  %6731 = vmatpush1.bf16.msra.mxu1 %v6455_v37  ;;  %v6463_v13 = vunpack.c.h.s8.bf16 %v6355_v5  ;;  %v6466_v30 = vunpack.c.l.s8.bf16 %v6358_v28  ;;  %v6362_v5 = vld [vmem:[%s12906_s15 + $0x188] sm:$0xff] }
 0x742   :  { %v6225_v60 = vadd.f32 %v11924_v43, %v6171_v0  ;;  %v6175_v36 = vmul.f32 %v11916_v59, %v5974_v57  ;;  %v5976_v38 = vpop.f32.mrb[159].mxu0  ;;  %6586 = vmatprep.subr.bf16.mxu0 %v6458_v3  ;;  %6732 = vmatprep.subr.bf16.mxu1 %v6460_v45  ;;  %v6468_v37 = vunpack.c.l.s8.bf16 %v6360_v52  ;;  %v6470_v45 = vunpack.c.h.s8.bf16 %v6358_v28  ;;  %v6367_v28 = vld [vmem:[%s12906_s15 + $0x1b0] sm:$0xff] }
 0x743   :  { %v6226_v32 = vadd.f32 %v11928_v63, %v6172_v21  ;;  %v6176_v20 = vmul.f32 %v11920_v1, %v5976_v38  ;;  %6557 = vmatprep.mubr.bf16.mxu0 %v6306_v46  ;;  %6703 = vmatprep.mubr.bf16.mxu1 %v6306_v46  ;;  %v6472_v56 = vunpack.c.h.s8.bf16 %v6360_v52  ;;  %v6474_v0 = vunpack.c.l.s8.bf16 %v6362_v5  ;;  %v6363_v21 = vld [vmem:[%s12906_s15 + $0x190] sm:$0xff] }
 0x744   :  { %v6289_v59 = vadd.f32 %v11786_v9, %v6225_v60  ;;  %v6229_v25 = vadd.f32 %v11924_v43, %v6175_v36  ;;  %6558 = vmatmul.mubr.bf16.gmra.mrb[168].mxu0 %v6305_v7  ;;  %6704 = vmatmul.mubr.bf16.gmra.mrb[208].mxu1 %v6305_v7  ;;  %v6357_v9 = vld [vmem:[%s12906_s15 + $0x160] sm:$0xff]  ;;  %v6475_v46 = vunpack.c.l.s8.bf16 %v6363_v21  ;;  %v6366_v60 = vld [vmem:[%s12906_s15 + $0x1a8] sm:$0xff]  ;;  %v6368_v36 = vld [vmem:[%s12906_s15 + $0x1b8] sm:$0xff] }
 0x745   :  { %v6290_v54 = vadd.f32 %v11789_v58, %v6226_v32  ;;  %v6230_v1 = vadd.f32 %v11928_v63, %v6176_v20  ;;  %6587 = vmatpush1.bf16.msra.mxu0 %v6457_v33  ;;  %6733 = vmatpush1.bf16.msra.mxu1 %v6459_v50  ;;  %v6359_v58 = vld [vmem:[%s12906_s15 + $0x170] sm:$0xff]  ;;  %v6465_v3 = vunpack.c.l.s8.bf16 %v6357_v9  ;;  %v6469_v23 = vunpack.c.h.s8.bf16 %v6357_v9  ;;  %v6361_v7 = vld [vmem:[%s12906_s15 + $0x180] sm:$0xff] }
 0x746   :  { %v6293_v10 = vadd.f32 %v11795_v49, %v6229_v25  ;;  %6588 = vmatprep.subr.bf16.mxu0 %v6462_v4  ;;  %6734 = vmatprep.subr.bf16.mxu1 %v6464_v16  ;;  %v6467_v49 = vunpack.c.l.s8.bf16 %v6359_v58  ;;  %v6471_v53 = vunpack.c.h.s8.bf16 %v6359_v58  ;;  %v6473_v57 = vunpack.c.l.s8.bf16 %v6361_v7  ;;  %v6365_v20 = vld [vmem:[%s12906_s15 + $0x1a0] sm:$0xff]  ;;  %v6371_v58 = vld [vmem:[%s12906_s15 + $0x1d0] sm:$0xff] }
 0x747   :  { %v6294_v43 = vadd.f32 %v11797_v62, %v6230_v1  ;;  %v6364_v62 = vld [vmem:[%s12906_s15 + $0x198] sm:$0xff]  ;;  %v6478_v33 = vunpack.c.h.s8.bf16 %v6362_v5  ;;  %v6477_v38 = vunpack.c.h.s8.bf16 %v6361_v7  ;;  %v6479_v4 = vunpack.c.h.s8.bf16 %v6363_v21  ;;  %v6370_v1 = vld [vmem:[%s12906_s15 + $0x1c8] sm:$0xff]  ;;  %v6369_v9 = vld [vmem:[%s12906_s15 + $0x1c0] sm:$0xff] }
 0x748   :  { %v6309_v63 = vpack.c.bf16 %v6293_v10, %v6289_v59  ;;  %v6476_v12 = vunpack.c.l.s8.bf16 %v6364_v62  ;;  %v6480_v50 = vunpack.c.h.s8.bf16 %v6364_v62  ;;  %v6482_v16 = vunpack.c.l.s8.bf16 %v6366_v60 }
 0x749   :  { %v6310_v51 = vpack.c.bf16 %v6294_v43, %v6290_v54  ;;  %6589 = vmatpush1.bf16.msra.mxu0 %v6461_v11  ;;  %6735 = vmatpush1.bf16.msra.mxu1 %v6463_v13  ;;  %v6484_v32 = vunpack.c.l.s8.bf16 %v6368_v36  ;;  %v6481_v52 = vunpack.c.l.s8.bf16 %v6365_v20  ;;  %v6483_v59 = vunpack.c.l.s8.bf16 %v6367_v28  ;;  %v6372_v11 = vld [vmem:[%s12906_s15 + $0x1d8] sm:$0xff] }
 0x74a   :  { %6590 = vmatprep.subr.bf16.mxu0 %v6466_v30  ;;  %6736 = vmatprep.subr.bf16.mxu1 %v6468_v37  ;;  %v6486_v25 = vunpack.c.h.s8.bf16 %v6366_v60  ;;  %v6488_v54 = vunpack.c.h.s8.bf16 %v6368_v36  ;;  %v6485_v13 = vunpack.c.h.s8.bf16 %v6365_v20  ;;  %v6487_v10 = vunpack.c.h.s8.bf16 %v6367_v28 }
 0x74b   :  { %6567 = vmatprep.mubr.bf16.mxu0 %v6310_v51  ;;  %6713 = vmatprep.mubr.bf16.mxu1 %v6310_v51  ;;  %v6490_v30 = vunpack.c.l.s8.bf16 %v6370_v1  ;;  %v6492_v37 = vunpack.c.l.s8.bf16 %v6372_v11  ;;  %v6489_v43 = vunpack.c.l.s8.bf16 %v6369_v9  ;;  %v6494_v51 = vunpack.c.h.s8.bf16 %v6370_v1 }
 0x74c   :  { %6568 = vmatmul.mubr.bf16.gmra.mrb[172].mxu0 %v6309_v63  ;;  %6714 = vmatmul.mubr.bf16.gmra.mrb[212].mxu1 %v6309_v63  ;;  %v6491_v63 = vunpack.c.l.s8.bf16 %v6371_v58  ;;  %v6495_v5 = vunpack.c.h.s8.bf16 %v6371_v58  ;;  %v12066_v62 = vrot.slane %v11907_v24, %v9234_v22  ;;  %v12076_v7 = vrot.slane %v11907_v24, %v9237_v26 }
 0x74d   :  { %6591 = vmatpush1.bf16.msra.mxu0 %v6465_v3  ;;  %6737 = vmatpush1.bf16.msra.mxu1 %v6467_v49  ;;  %v6496_v3 = vunpack.c.h.s8.bf16 %v6372_v11  ;;  %v6374_v49 = vld [vmem:[%s12906_s15 + $0x1e8] sm:$0xff]  ;;  %v12080_v21 = vrot.slane %v11912_v42, %v9234_v22 }
 0x74e   :  { %6592 = vmatprep.subr.bf16.mxu0 %v6470_v45  ;;  %6738 = vmatprep.subr.bf16.mxu1 %v6472_v56  ;;  %v6376_v45 = vld [vmem:[%s12906_s15 + $0x1f8] sm:$0xff]  ;;  %v6493_v56 = vunpack.c.h.s8.bf16 %v6369_v9  ;;  %v6502_v24 = vunpack.c.h.s8.bf16 %v6374_v49  ;;  %v7017_v9 = vld [vmem:[%s12907_s16] sm:$0xff] }
 0x751   :  { %6593 = vmatpush1.bf16.msra.mxu0 %v6469_v23  ;;  %6739 = vmatpush1.bf16.msra.mxu1 %v6471_v53  ;;  %v6498_v23 = vunpack.c.l.s8.bf16 %v6374_v49  ;;  %v6500_v53 = vunpack.c.l.s8.bf16 %v6376_v45 }
 0x752   :  { %6594 = vmatprep.subr.bf16.mxu0 %v6474_v0  ;;  %6740 = vmatprep.subr.bf16.mxu1 %v6476_v12  ;;  %v6373_v0 = vld [vmem:[%s12906_s15 + $0x1e0] sm:$0xff]  ;;  %v6375_v12 = vld [vmem:[%s12906_s15 + $0x1f0] sm:$0xff] }
 0x755   :  { %6595 = vmatpush1.bf16.msra.mxu0 %v6473_v57  ;;  %6741 = vmatpush1.bf16.msra.mxu1 %v6475_v46  ;;  %v12084_v46 = vrot.slane %v11912_v42, %v9237_v26 }
 0x756   :  { %6596 = vmatprep.subr.bf16.mxu0 %v6478_v33  ;;  %6742 = vmatprep.subr.bf16.mxu1 %v6480_v50  ;;  %v6497_v33 = vunpack.c.l.s8.bf16 %v6373_v0  ;;  %v6499_v50 = vunpack.c.l.s8.bf16 %v6375_v12 }
 0x759   :  { %6597 = vmatpush1.bf16.msra.mxu0 %v6477_v38  ;;  %6743 = vmatpush1.bf16.msra.mxu1 %v6479_v4  ;;  %v6504_v38 = vunpack.c.h.s8.bf16 %v6376_v45  ;;  %v7049_v45 = vunpack.c.l.s8.bf16 %v7017_v9 }
 0x75a   :  { %6598 = vmatprep.subr.bf16.mxu0 %v6482_v16  ;;  %6744 = vmatprep.subr.bf16.mxu1 %v6484_v32  ;;  %v7018_v32 = vld [vmem:[%s12907_s16 + $0x8] sm:$0xff] }
 0x75d   :  { %6599 = vmatpush1.bf16.msra.mxu0 %v6481_v52  ;;  %6745 = vmatpush1.bf16.msra.mxu1 %v6483_v59 }
 0x75e   :  { %6600 = vmatprep.subr.bf16.mxu0 %v6486_v25  ;;  %6746 = vmatprep.subr.bf16.mxu1 %v6488_v54  ;;  %v6501_v25 = vunpack.c.h.s8.bf16 %v6373_v0  ;;  %v6503_v54 = vunpack.c.h.s8.bf16 %v6375_v12  ;;  %v7020_v0 = vld [vmem:[%s12907_s16 + $0x18] sm:$0xff] }
 0x761   :  { %6601 = vmatpush1.bf16.msra.mxu0 %v6485_v13  ;;  %6747 = vmatpush1.bf16.msra.mxu1 %v6487_v10  ;;  %v7050_v13 = vunpack.c.l.s8.bf16 %v7018_v32 }
 0x762   :  { %6602 = vmatprep.subr.bf16.mxu0 %v6490_v30  ;;  %6748 = vmatprep.subr.bf16.mxu1 %v6492_v37 }
 0x765   :  { %6603 = vmatpush1.bf16.msra.mxu0 %v6489_v43  ;;  %6749 = vmatpush1.bf16.msra.mxu1 %v6491_v63 }
 0x766   :  { %6604 = vmatprep.subr.bf16.mxu0 %v6494_v51  ;;  %6750 = vmatprep.subr.bf16.mxu1 %v6496_v3 }
 0x769   :  { %v6086_v57 = vpop.f32.mrb[184].mxu1  ;;  %6605 = vmatpush1.bf16.msra.mxu0 %v6493_v56  ;;  %6751 = vmatpush1.bf16.msra.mxu1 %v6495_v5 }
 0x76a   :  { %v6149_v60 = vmul.f32 %v12066_v62, %v6086_v57  ;;  %v6088_v36 = vpop.f32.mrb[185].mxu1  ;;  %6606 = vmatprep.subr.bf16.mxu0 %v6498_v23  ;;  %6752 = vmatprep.subr.bf16.mxu1 %v6500_v53  ;;  %v7052_v23 = vunpack.c.h.s8.bf16 %v7018_v32 }
 0x76b   :  { %v6150_v4 = vmul.f32 %v12076_v7, %v6088_v36  ;;  %v6090_v16 = vpop.f32.mrb[186].mxu1 }
 0x76c   :  { %v6203_v42 = vadd.f32 %v12080_v21, %v6149_v60  ;;  %v6153_v20 = vmul.f32 %v12066_v62, %v6090_v16  ;;  %v6092_v28 = vpop.f32.mrb[187].mxu1  ;;  %v7051_v60 = vunpack.c.h.s8.bf16 %v7017_v9 }
 0x76d   :  { %v6204_v52 = vadd.f32 %v12084_v46, %v6150_v4  ;;  %v6154_v59 = vmul.f32 %v12076_v7, %v6092_v28  ;;  %6607 = vmatpush1.bf16.msra.mxu0 %v6497_v33  ;;  %6753 = vmatpush1.bf16.msra.mxu1 %v6499_v50 }
 0x76e   :  { %v6267_v1 = vadd.f32 %v11833_v40, %v6203_v42  ;;  %v6207_v11 = vadd.f32 %v12080_v21, %v6153_v20  ;;  %6608 = vmatprep.subr.bf16.mxu0 %v6502_v24  ;;  %6754 = vmatprep.subr.bf16.mxu1 %v6504_v38  ;;  %v7054_v24 = vunpack.c.l.s8.bf16 %v7020_v0  ;;  %v7019_v38 = vld [vmem:[%s12907_s16 + $0x10] sm:$0xff] }
 0x76f   :  { %v6268_v10 = vadd.f32 %v11837_v14, %v6204_v52  ;;  %v6208_v30 = vadd.f32 %v12084_v46, %v6154_v59  ;;  %v7053_v52 = vunpack.c.l.s8.bf16 %v7019_v38  ;;  %v7055_v9 = vunpack.c.h.s8.bf16 %v7019_v38 }
 0x770   :  { %v6271_v37 = vadd.f32 %v11840_v35, %v6207_v11  ;;  %v7022_v11 = vld [vmem:[%s12907_s16 + $0x28] sm:$0xff] }
 0x771   :  { %v6272_v58 = vadd.f32 %v11842_v39, %v6208_v30  ;;  %v6096_v43 = vpop.f32.mrb[188].mxu1  ;;  %6609 = vmatpush1.bf16.msra.mxu0 %v6501_v25  ;;  %6755 = vmatpush1.bf16.msra.mxu1 %v6503_v54  ;;  %v7056_v54 = vunpack.c.h.s8.bf16 %v7020_v0 }
 0x772   :  { %v6299_v40 = vpack.c.bf16 %v6271_v37, %v6267_v1  ;;  %v6157_v63 = vmul.f32 %v12066_v62, %v6096_v43  ;;  %v6098_v51 = vpop.f32.mrb[189].mxu1  ;;  %7113 = vmatprep.subr.bf16.mxu0 %v7050_v13  ;;  %v7058_v43 = vunpack.c.l.s8.bf16 %v7022_v11 }
 0x773   :  { %v6158_v14 = vmul.f32 %v12076_v7, %v6098_v51  ;;  %v6100_v3 = vpop.f32.mrb[190].mxu1  ;;  %v6300_v49 = vpack.c.bf16 %v6272_v58, %v6268_v10 }
 0x774   :  { %v6211_v35 = vadd.f32 %v12080_v21, %v6157_v63  ;;  %v6161_v56 = vmul.f32 %v12066_v62, %v6100_v3  ;;  %v6102_v5 = vpop.f32.mrb[191].mxu1 }
 0x775   :  { %v6212_v39 = vadd.f32 %v12084_v46, %v6158_v14  ;;  %v6162_v53 = vmul.f32 %v12076_v7, %v6102_v5  ;;  %6610 = vmatprep.mubr.bf16.mxu0 %v6300_v49  ;;  %6756 = vmatprep.mubr.bf16.mxu1 %v6300_v49 }
 0x776   :  { %v6275_v12 = vadd.f32 %v11853_v41, %v6211_v35  ;;  %v6215_v57 = vadd.f32 %v12080_v21, %v6161_v56  ;;  %6611 = vmatmul.mubr.bf16.vlgmr.msra.gmra.mrb[160].mxu0 %v6299_v40  ;;  %6757 = vmatmul.mubr.bf16.vlgmr.msra.gmra.mrb[200].mxu1 %v6299_v40  ;;  %v7021_v40 = vld [vmem:[%s12907_s16 + $0x20] sm:$0xff] }
 0x777   :  { %v6276_v33 = vadd.f32 %v11857_v6, %v6212_v39  ;;  %v6216_v50 = vadd.f32 %v12084_v46, %v6162_v53  ;;  %7114 = vmatpush1.bf16.msra.mxu0 %v7049_v45  ;;  %v7057_v35 = vunpack.c.l.s8.bf16 %v7021_v40  ;;  %v7024_v53 = vld [vmem:[%s12907_s16 + $0x38] sm:$0xff] }
 0x778   :  { %v6279_v36 = vadd.f32 %v11860_v31, %v6215_v57  ;;  %7115 = vmatprep.subr.bf16.mxu0 %v7052_v23  ;;  %v7060_v23 = vunpack.c.h.s8.bf16 %v7022_v11  ;;  %v7032_v11 = vld [vmem:[%s12907_s16 + $0x78] sm:$0xff] }
 0x779   :  { %v6280_v41 = vadd.f32 %v11862_v34, %v6216_v50  ;;  %v6106_v4 = vpop.f32.mrb[192].mxu1  ;;  %v7062_v50 = vunpack.c.l.s8.bf16 %v7024_v53 }
 0x77a   :  { %v6165_v16 = vmul.f32 %v12066_v62, %v6106_v4  ;;  %v6108_v32 = vpop.f32.mrb[193].mxu1  ;;  %v6303_v42 = vpack.c.bf16 %v6279_v36, %v6275_v12 }
 0x77b   :  { %v6166_v6 = vmul.f32 %v12076_v7, %v6108_v32  ;;  %v6110_v20 = vpop.f32.mrb[194].mxu1  ;;  %v6304_v28 = vpack.c.bf16 %v6280_v41, %v6276_v33  ;;  %7116 = vmatpush1.bf16.msra.mxu0 %v7051_v60  ;;  %v7059_v33 = vunpack.c.h.s8.bf16 %v7021_v40  ;;  %v7023_v60 = vld [vmem:[%s12907_s16 + $0x30] sm:$0xff] }
 0x77c   :  { %v6219_v31 = vadd.f32 %v12080_v21, %v6165_v16  ;;  %v6169_v59 = vmul.f32 %v12066_v62, %v6110_v20  ;;  %v6112_v25 = vpop.f32.mrb[195].mxu1  ;;  %7117 = vmatprep.subr.bf16.mxu0 %v7054_v24  ;;  %v7061_v24 = vunpack.c.l.s8.bf16 %v7023_v60  ;;  %v7028_v16 = vld [vmem:[%s12907_s16 + $0x58] sm:$0xff] }
 0x77d   :  { %v6220_v34 = vadd.f32 %v12084_v46, %v6166_v6  ;;  %v6170_v1 = vmul.f32 %v12076_v7, %v6112_v25  ;;  %6620 = vmatprep.mubr.bf16.mxu0 %v6304_v28  ;;  %6766 = vmatprep.mubr.bf16.mxu1 %v6304_v28  ;;  %v7027_v6 = vld [vmem:[%s12907_s16 + $0x50] sm:$0xff]  ;;  %v7072_v28 = vunpack.c.h.s8.bf16 %v7028_v16  ;;  %v7029_v25 = vld [vmem:[%s12907_s16 + $0x60] sm:$0xff] }
 0x77e   :  { %v6283_v13 = vadd.f32 %v11873_v48, %v6219_v31  ;;  %v6223_v10 = vadd.f32 %v12080_v21, %v6169_v59  ;;  %6621 = vmatmul.mubr.bf16.gmra.mrb[164].mxu0 %v6303_v42  ;;  %6767 = vmatmul.mubr.bf16.gmra.mrb[204].mxu1 %v6303_v42  ;;  %v7070_v42 = vunpack.c.l.s8.bf16 %v7028_v16  ;;  %v7069_v20 = vunpack.c.l.s8.bf16 %v7027_v6  ;;  %v7030_v31 = vld [vmem:[%s12907_s16 + $0x68] sm:$0xff]  ;;  %v8127_v40 = vld [vmem:[%s12960_s0 + $0x13] sm:$0xff] }
 0x77f   :  { %v6284_v30 = vadd.f32 %v11877_v47, %v6220_v34  ;;  %v6224_v37 = vadd.f32 %v12084_v46, %v6170_v1  ;;  %7118 = vmatpush1.bf16.msra.mxu0 %v7053_v52  ;;  %v7071_v52 = vunpack.c.h.s8.bf16 %v7027_v6  ;;  %v7074_v59 = vunpack.c.l.s8.bf16 %v7030_v31  ;;  %v13080_v6 = vld [vmem:[#allocation36_spill] sm:$0xff] }
 0x780   :  { %v6287_v58 = vadd.f32 %v11880_v8, %v6223_v10  ;;  %7119 = vmatprep.subr.bf16.mxu0 %v7056_v54  ;;  %v7073_v54 = vunpack.c.l.s8.bf16 %v7029_v25  ;;  %v7076_v34 = vunpack.c.h.s8.bf16 %v7030_v31  ;;  %v7075_v1 = vunpack.c.h.s8.bf16 %v7029_v25  ;;  %v7031_v10 = vld [vmem:[%s12907_s16 + $0x70] sm:$0xff]  ;;  %v13081_v31 = vld [vmem:[#allocation37_spill] sm:$0xff]  ;;  %v13082_v25 = vld [vmem:[#allocation38_spill] sm:$0xff] }
 0x781   :  { %v6288_v48 = vadd.f32 %v11882_v55, %v6224_v37  ;;  %v6116_v63 = vpop.f32.mrb[196].mxu1  ;;  %v7080_v37 = vunpack.c.h.s8.bf16 %v7032_v11 }
 0x782   :  { %v6173_v51 = vmul.f32 %v12066_v62, %v6116_v63  ;;  %v6118_v14 = vpop.f32.mrb[197].mxu1  ;;  %v6307_v3 = vpack.c.bf16 %v6287_v58, %v6283_v13  ;;  %v7078_v13 = vunpack.c.l.s8.bf16 %v7032_v11  ;;  %v12185_v58 = vld [vmem:[%s12907_s16 + $0x88] sm:$0xff]  ;;  %v13084_v11 = vld [vmem:[#allocation40_spill] sm:$0xff] }
 0x783   :  { %v6174_v47 = vmul.f32 %v12076_v7, %v6118_v14  ;;  %v6120_v49 = vpop.f32.mrb[198].mxu1  ;;  %v6308_v45 = vpack.c.bf16 %v6288_v48, %v6284_v30  ;;  %7120 = vmatpush1.bf16.msra.mxu0 %v7055_v9  ;;  %v7077_v30 = vunpack.c.l.s8.bf16 %v7031_v10  ;;  %v7079_v9 = vunpack.c.h.s8.bf16 %v7031_v10  ;;  %13057 = vst [vmem:[#allocation7_spill] sm:$0xff] %v12185_v58  ;;  %v13058_v48 = vld [vmem:[#allocation5_spill] sm:$0xff] }
 0x784   :  { %v6227_v8 = vadd.f32 %v12080_v21, %v6173_v51  ;;  %v6177_v56 = vmul.f32 %v12066_v62, %v6120_v49  ;;  %v6122_v5 = vpop.f32.mrb[199].mxu1  ;;  %7121 = vmatprep.subr.bf16.mxu0 %v7058_v43  ;;  %v7082_v43 = vunpack.c.l.s8.bf16 %v12185_v58  ;;  %v4234_v63 = vrot.slane %v8127_v40, %v13058_v48  ;;  %v13059_v51 = vld [vmem:[#allocation6_spill] sm:$0xff]  ;;  %v13085_v10 = vld [vmem:[#allocation41_spill] sm:$0xff] }
 0x785   :  { %v6228_v55 = vadd.f32 %v12084_v46, %v6174_v47  ;;  %v6178_v39 = vmul.f32 %v12076_v7, %v6122_v5  ;;  %6630 = vmatprep.mubr.bf16.mxu0 %v6308_v45  ;;  %6776 = vmatprep.mubr.bf16.mxu1 %v6308_v45  ;;  %v4238_v14 = vrot.slane %v8127_v40, %v13059_v51 }
 0x786   :  { %v6291_v0 = vadd.f32 %v11893_v61, %v6227_v8  ;;  %v6231_v12 = vadd.f32 %v12080_v21, %v6177_v56  ;;  %6631 = vmatmul.mubr.bf16.gmra.mrb[168].mxu0 %v6307_v3  ;;  %6777 = vmatmul.mubr.bf16.gmra.mrb[208].mxu1 %v6307_v3  ;;  %v13060_v3 = vld [vmem:[#allocation2_spill] sm:$0xff]  ;;  %v12196_v45 = vmul.f32 %v4234_v63, %v10692_v2 }
 0x787   :  { %v6292_v62 = vadd.f32 %v11897_v18, %v6228_v55  ;;  %v6232_v57 = vadd.f32 %v12084_v46, %v6178_v39  ;;  %7122 = vmatpush1.bf16.msra.mxu0 %v7057_v35  ;;  %v7064_v18 = vunpack.c.h.s8.bf16 %v7024_v53  ;;  %v7063_v46 = vunpack.c.h.s8.bf16 %v7023_v60  ;;  %v13061_v55 = vld [vmem:[#allocation23_spill] sm:$0xff]  ;;  %v13062_v53 = vld [vmem:[#allocation24_spill] sm:$0xff]  ;;  %v13069_v60 = vld [vmem:[#allocation30_spill] sm:$0xff] }
 0x788   :  { %v6295_v7 = vadd.f32 %v11900_v19, %v6231_v12  ;;  %7123 = vmatprep.subr.bf16.mxu0 %v7060_v23  ;;  %v7026_v19 = vld [vmem:[%s12907_s16 + $0x48] sm:$0xff]  ;;  %v4241_v47 = vsub.s32 6, %v13060_v3  ;;  %v4245_v49 = vsub.s32 7, %v13060_v3  ;;  %v12199_v35 = vmul.f32 %v4238_v14, %v10699_v17  ;;  %v13063_v12 = vld [vmem:[#allocation25_spill] sm:$0xff] }
 0x789   :  { %v6296_v61 = vadd.f32 %v11902_v44, %v6232_v57  ;;  %v7066_v38 = vunpack.c.l.s8.bf16 %v7026_v19  ;;  %v7025_v44 = vld [vmem:[%s12907_s16 + $0x40] sm:$0xff]  ;;  %v7068_v4 = vunpack.c.h.s8.bf16 %v7026_v19  ;;  %v12202_v5 = vmul.f32 %v4234_v63, %v10706_v15  ;;  %v13065_v57 = vld [vmem:[#allocation27_spill] sm:$0xff]  ;;  %v13066_v15 = vld [vmem:[#allocation28_spill] sm:$0xff] }
 0x78a   :  { %v6311_v36 = vpack.c.bf16 %v6295_v7, %v6291_v0  ;;  %v7065_v41 = vunpack.c.l.s8.bf16 %v7025_v44  ;;  %v7067_v32 = vunpack.c.h.s8.bf16 %v7025_v44  ;;  %v4242_v8 = vrot.slane %v8127_v40, %v4241_v47  ;;  %v13075_v19 = vld [vmem:[#allocation33_spill] sm:$0xff] }
 0x78b   :  { %v6312_v21 = vpack.c.bf16 %v6296_v61, %v6292_v62  ;;  %7124 = vmatpush1.bf16.msra.mxu0 %v7059_v33  ;;  %v4246_v56 = vrot.slane %v8127_v40, %v4245_v49  ;;  %v12205_v23 = vmul.f32 %v4238_v14, %v10713_v27  ;;  %v12208_v39 = vmul.f32 %v4234_v63, %v13061_v55  ;;  %v13064_v62 = vld [vmem:[#allocation26_spill] sm:$0xff]  ;;  %v13067_v27 = vld [vmem:[#allocation29_spill] sm:$0xff] }
 0x78c   :  { %7125 = vmatprep.subr.bf16.mxu0 %v7062_v50  ;;  %v12211_v0 = vmul.f32 %v4238_v14, %v13062_v53  ;;  %v12214_v2 = vmul.f32 %v4234_v63, %v13063_v12  ;;  %v12217_v17 = vmul.f32 %v4238_v14, %v13064_v62  ;;  %v12220_v33 = vmul.f32 %v4234_v63, %v13065_v57  ;;  %v13092_v3 = vld [vmem:[#allocation45_spill] sm:$0xff]  ;;  %v13096_v53 = vld [vmem:[#allocation47_spill] sm:$0xff] }
 0x78d   :  { %6640 = vmatprep.mubr.bf16.mxu0 %v6312_v21  ;;  %6786 = vmatprep.mubr.bf16.mxu1 %v6312_v21  ;;  %v12223_v7 = vmul.f32 %v4238_v14, %v13066_v15  ;;  %v12226_v50 = vmul.f32 %v4234_v63, %v13067_v27  ;;  %v12229_v61 = vmul.f32 %v4238_v14, %v13069_v60  ;;  %v13099_v15 = vld [vmem:[#allocation48_spill] sm:$0xff]  ;;  %v13101_v60 = vld [vmem:[#allocation49_spill] sm:$0xff] }
 0x78e   :  { %6641 = vmatmul.mubr.bf16.gmra.mrb[172].mxu0 %v6311_v36  ;;  %6787 = vmatmul.mubr.bf16.gmra.mrb[212].mxu1 %v6311_v36  ;;  %v13071_v36 = vld [vmem:[#allocation31_spill] sm:$0xff]  ;;  %v12299_v12 = vmul.f32 %v4242_v8, %v13096_v53  ;;  %v12303_v57 = vmul.f32 %v4246_v56, %v11199_v29  ;;  %v12306_v27 = vmul.f32 %v4242_v8, %v13099_v15  ;;  %v13112_v53 = vld [vmem:[#allocation58_spill] sm:$0xff] }
 0x78f   :  { %7126 = vmatpush1.bf16.msra.mxu0 %v7061_v24  ;;  %13068 = vst [vmem:[#allocation8_spill] sm:$0xff] %v12226_v50  ;;  %13070 = vst [vmem:[#allocation9_spill] sm:$0xff] %v12229_v61  ;;  %v12232_v21 = vmul.f32 %v4234_v63, %v13071_v36  ;;  %v13073_v24 = vld [vmem:[#allocation32_spill] sm:$0xff]  ;;  %v12309_v36 = vmul.f32 %v4246_v56, %v13101_v60  ;;  %v13114_v60 = vld [vmem:[#allocation59_spill] sm:$0xff] }
 0x790   :  { %7127 = vmatprep.subr.bf16.mxu0 %v7064_v18  ;;  %v12235_v18 = vmul.f32 %v4238_v14, %v13073_v24  ;;  %13097 = vst [vmem:[#allocation19_spill] sm:$0xff] %v12299_v12  ;;  %13098 = vst [vmem:[#allocation20_spill] sm:$0xff] %v12303_v57  ;;  %v13147_v12 = vld [vmem:[#allocation78_spill] sm:$0xff]  ;;  %v12501_v61 = vld [vmem:[%s12907_s16 + $0xa8] sm:$0xff] }
 0x791   :  { %13072 = vst [vmem:[#allocation10_spill] sm:$0xff] %v12232_v21  ;;  %13100 = vst [vmem:[#allocation21_spill] sm:$0xff] %v12306_v27 }
 0x792   :  { %13074 = vst [vmem:[#allocation11_spill] sm:$0xff] %v12235_v18  ;;  %13102 = vst [vmem:[#allocation22_spill] sm:$0xff] %v12309_v36  ;;  %v13126_v36 = vld [vmem:[#allocation65_spill] sm:$0xff] }
 0x793   :  { %7128 = vmatpush1.bf16.msra.mxu0 %v7063_v46  ;;  %v12238_v46 = vmul.f32 %v4234_v63, %v13075_v19  ;;  %v13103_v19 = vld [vmem:[#allocation50_spill] sm:$0xff]  ;;  %v13154_v18 = vld [vmem:[#allocation81_spill] sm:$0xff] }
 0x794   :  { %7129 = vmatprep.subr.bf16.mxu0 %v7066_v38  ;;  %v13077_v38 = vld [vmem:[#allocation34_spill] sm:$0xff] }
 0x795   :  { %13076 = vst [vmem:[#allocation12_spill] sm:$0xff] %v12238_v46  ;;  %v12241_v44 = vmul.f32 %v4238_v14, %v13077_v38  ;;  %v12290_v14 = vld [vmem:[%s12908_s17] sm:$0xff] }
 0x796   :  { %13091 = vst [vmem:[#allocation16_spill] sm:$0xff] %v12290_v14  ;;  %v12927_v24 = vunpack.c.l.s8.bf16 %v12290_v14 }
 0x797   :  { %7130 = vmatpush1.bf16.msra.mxu0 %v7065_v41  ;;  %13078 = vst [vmem:[#allocation13_spill] sm:$0xff] %v12241_v44  ;;  %v8128_v41 = vld [vmem:[%s12960_s0 + $0x1b] sm:$0xff] }
 0x798   :  { %7131 = vmatprep.subr.bf16.mxu0 %v7068_v4  ;;  %v4824_v4 = vrot.slane %v8128_v41, %v13058_v48  ;;  %v4828_v16 = vrot.slane %v8128_v41, %v13059_v51  ;;  %v13088_v48 = vld [vmem:[#allocation44_spill] sm:$0xff]  ;;  %v12285_v51 = vld [vmem:[%s12908_s17 + $0x20] sm:$0xff] }
 0x799   :  { %v12280_v63 = vmul.f32 %v4246_v56, %v13088_v48  ;;  %13090 = vst [vmem:[#allocation15_spill] sm:$0xff] %v12285_v51  ;;  %v12928_v62 = vunpack.c.l.s8.bf16 %v12285_v51  ;;  %v12929_v29 = vunpack.c.h.s8.bf16 %v12285_v51  ;;  %v12339_v48 = vld [vmem:[%s12908_s17 + $0x28] sm:$0xff]  ;;  %v13128_v44 = vld [vmem:[#allocation66_spill] sm:$0xff]  ;;  %v13134_v51 = vunpack.c.h.s8.bf16 %v12290_v14 }
 0x79a   :  { %v12313_v38 = vmul.f32 %v4824_v4, %v13103_v19  ;;  %13110 = vst [vmem:[#allocation5_spill] sm:$0xff] %v12339_v48  ;;  %v12347_v15 = vmul.f32 %v4824_v4, %v13112_v53  ;;  %v12350_v19 = vmul.f32 %v4828_v16, %v13114_v60 }
 0x79b   :  { %7132 = vmatpush1.bf16.msra.mxu0 %v7067_v32  ;;  %v13079_v32 = vld [vmem:[#allocation35_spill] sm:$0xff]  ;;  %13089 = vst [vmem:[#allocation14_spill] sm:$0xff] %v12280_v63  ;;  %7602 = vmatprep.subr.bf16.mxu1 %v12928_v62  ;;  %v13124_v62 = vld [vmem:[#allocation64_spill] sm:$0xff] }
 0x79c   :  { %7133 = vmatprep.subr.bf16.mxu0 %v7070_v42  ;;  %v12249_v42 = vmul.f32 %v4242_v8, %v13079_v32  ;;  %7610 = vmatpush3.bf16.msra.mxu1 %v12927_v24  ;;  %13113 = vst [vmem:[#allocation6_spill] sm:$0xff] %v12347_v15  ;;  %13115 = vst [vmem:[#allocation2_spill] sm:$0xff] %v12350_v19  ;;  %v12368_v60 = vmul.f32 %v4824_v4, %v13124_v62 }
 0x79d   :  { %7603 = vmatprep.subr.bf16.mxu1 %v12929_v29 }
 0x79e   :  { %13125 = vst [vmem:[#allocation27_spill] sm:$0xff] %v12368_v60 }
 0x79f   :  { %7134 = vmatpush1.bf16.msra.mxu0 %v7069_v20  ;;  %v12252_v20 = vmul.f32 %v4246_v56, %v13080_v6  ;;  %v13105_v6 = vld [vmem:[#allocation52_spill] sm:$0xff] }
 0x7a0   :  { %7135 = vmatprep.subr.bf16.mxu0 %v7072_v28  ;;  %v12254_v28 = vrot.slane %v8128_v41, %v4241_v47  ;;  %v12293_v47 = vmul.f32 %v4242_v8, %v13092_v3  ;;  %v13111_v3 = vld [vmem:[#allocation57_spill] sm:$0xff]  ;;  %7611 = vmatpush3.bf16.msra.mxu1 %v13134_v51  ;;  %v6797_v51 = vld [vmem:[%s12960_s0 + $0x2b] sm:$0xf] }
 0x7a2   :  { %13093 = vst [vmem:[#allocation17_spill] sm:$0xff] %v12293_v47  ;;  %v12375_v29 = vmul.f32 %v12254_v28, %v13128_v44  ;;  %v13133_v44 = vld [vmem:[#allocation70_spill] sm:$0xff] }
 0x7a3   :  { %7136 = vmatpush1.bf16.msra.mxu0 %v7071_v52  ;;  %v12256_v52 = vrot.slane %v8128_v41, %v4245_v49  ;;  %v13094_v49 = vld [vmem:[#allocation46_spill] sm:$0xff]  ;;  %v13104_v41 = vld [vmem:[#allocation51_spill] sm:$0xff] }
 0x7a4   :  { %7137 = vmatprep.subr.bf16.mxu0 %v7074_v59  ;;  %v12259_v59 = vmul.f32 %v4242_v8, %v13081_v31  ;;  %v12296_v55 = vmul.f32 %v4246_v56, %v13094_v49  ;;  %v12316_v32 = vmul.f32 %v4828_v16, %v13104_v41  ;;  %v12319_v31 = vmul.f32 %v4824_v4, %v13105_v6  ;;  %v13116_v41 = vld [vmem:[#allocation60_spill] sm:$0xff] }
 0x7a5   :  { %v12344_v49 = vmul.f32 %v4828_v16, %v13111_v3  ;;  %v12353_v6 = vmul.f32 %v4824_v4, %v13116_v41  ;;  %v13122_v3 = vld [vmem:[#allocation63_spill] sm:$0xff]  ;;  %v12371_v41 = vmul.f32 %v4828_v16, %v13126_v36 }
 0x7a6   :  { %13095 = vst [vmem:[#allocation18_spill] sm:$0xff] %v12296_v55  ;;  %v12364_v24 = vmul.f32 %v4828_v16, %v13122_v3  ;;  %v13130_v3 = vld [vmem:[#allocation67_spill] sm:$0xff]  ;;  %v12493_v55 = vrot.slane %v6797_v51, %v9237_v26 }
 0x7a7   :  { %7138 = vmatpush1.bf16.msra.mxu0 %v7073_v54  ;;  %v12262_v54 = vmul.f32 %v4246_v56, %v13082_v25  ;;  %13117 = vst [vmem:[#allocation23_spill] sm:$0xff] %v12353_v6  ;;  %13127 = vst [vmem:[#allocation28_spill] sm:$0xff] %v12371_v41  ;;  %v12385_v53 = vmul.f32 %v12256_v52, %v13130_v3  ;;  %v13135_v41 = vld [vmem:[#allocation71_spill] sm:$0xff]  ;;  %v13136_v3 = vld [vmem:[#allocation72_spill] sm:$0xff] }
 0x7a8   :  { %7139 = vmatprep.subr.bf16.mxu0 %v7076_v34  ;;  %v13083_v34 = vld [vmem:[#allocation39_spill] sm:$0xff]  ;;  %13123 = vst [vmem:[#allocation26_spill] sm:$0xff] %v12364_v24  ;;  %v12403_v60 = vmul.f32 %v12256_v52, %v13135_v41  ;;  %v12407_v27 = vmul.f32 %v12254_v28, %v13136_v3  ;;  %v13143_v3 = vld [vmem:[#allocation76_spill] sm:$0xff] }
 0x7a9   :  { %v13141_v41 = vld [vmem:[#allocation75_spill] sm:$0xff] }
 0x7aa   :  { %v12424_v14 = vmul.f32 %v12256_v52, %v13141_v41  ;;  %v13149_v41 = vld [vmem:[#allocation79_spill] sm:$0xff] }
 0x7ab   :  { %7140 = vmatpush1.bf16.msra.mxu0 %v7075_v1  ;;  %v12265_v1 = vmul.f32 %v4242_v8, %v13083_v34  ;;  %v12444_v21 = vmul.f32 %v12256_v52, %v13149_v41  ;;  %v12464_v41 = vrot.slane %v6797_v51, %v9234_v22 }
 0x7ac   :  { %7141 = vmatprep.subr.bf16.mxu0 %v7078_v13  ;;  %v12268_v13 = vmul.f32 %v4246_v56, %v13084_v11  ;;  %v13108_v11 = vld [vmem:[#allocation55_spill] sm:$0xff]  ;;  %13142 = vst [vmem:[#allocation31_spill] sm:$0xff] %v12424_v14 }
 0x7ad   :  { %13150 = vst [vmem:[#allocation35_spill] sm:$0xff] %v12444_v21  ;;  %v13157_v21 = vld [vmem:[#allocation4_spill] sm:$0xff] }
 0x7af   :  { %7142 = vmatpush1.bf16.msra.mxu0 %v7077_v30  ;;  %v12271_v30 = vmul.f32 %v4242_v8, %v13085_v10  ;;  %v12331_v10 = vmul.f32 %v4828_v16, %v13108_v11  ;;  %v13120_v11 = vld [vmem:[#allocation62_spill] sm:$0xff] }
 0x7b0   :  { %7143 = vmatprep.subr.bf16.mxu0 %v7080_v37  ;;  %v13086_v37 = vld [vmem:[#allocation42_spill] sm:$0xff] }
 0x7b3   :  { %7144 = vmatpush1.bf16.msra.mxu0 %v7079_v9  ;;  %v12274_v9 = vmul.f32 %v4246_v56, %v13086_v37  ;;  %v13107_v56 = vld [vmem:[#allocation54_spill] sm:$0xff]  ;;  %v13109_v37 = vld [vmem:[#allocation56_spill] sm:$0xff] }
 0x7b4   :  { %7186 = vmatprep.subr.bf16.mxu0 %v7082_v43  ;;  %v13087_v43 = vld [vmem:[#allocation43_spill] sm:$0xff]  ;;  %v12328_v34 = vmul.f32 %v4824_v4, %v13107_v56 }
 0x7b5   :  { %v12277_v40 = vmul.f32 %v4242_v8, %v13087_v43  ;;  %v13106_v8 = vld [vmem:[#allocation53_spill] sm:$0xff]  ;;  %v12334_v43 = vmul.f32 %v4824_v4, %v13109_v37  ;;  %v12361_v37 = vmul.f32 %v4824_v4, %v13120_v11  ;;  %v12381_v11 = vld [vmem:[%s12908_s17 + $0x8] sm:$0xff]  ;;  %v13131_v4 = vld [vmem:[#allocation68_spill] sm:$0xff] }
 0x7b6   :  { %v12325_v25 = vmul.f32 %v4828_v16, %v13106_v8  ;;  %v13118_v8 = vld [vmem:[#allocation61_spill] sm:$0xff]  ;;  %13129 = vst [vmem:[#allocation29_spill] sm:$0xff] %v12381_v11  ;;  %v12389_v62 = vmul.f32 %v12254_v28, %v13131_v4  ;;  %v12943_v47 = vunpack.c.h.s8.bf16 %v12381_v11 }
 0x7b7   :  { %v12358_v56 = vmul.f32 %v4828_v16, %v13118_v8  ;;  %13121 = vst [vmem:[#allocation25_spill] sm:$0xff] %v12361_v37  ;;  %v13132_v16 = vld [vmem:[#allocation69_spill] sm:$0xff]  ;;  %v12397_v8 = vmul.f32 %v12254_v28, %v13133_v44  ;;  %v13140_v44 = vunpack.c.l.s8.bf16 %v12339_v48  ;;  %v12428_v37 = vmul.f32 %v12254_v28, %v13143_v3  ;;  %v13151_v3 = vld [vmem:[#allocation80_spill] sm:$0xff] }
 0x7b8   :  { %v12393_v36 = vmul.f32 %v12256_v52, %v13132_v16  ;;  %v13137_v4 = vld [vmem:[#allocation73_spill] sm:$0xff]  ;;  %v13138_v16 = vld [vmem:[#allocation74_spill] sm:$0xff] }
 0x7b9   :  { %13119 = vst [vmem:[#allocation24_spill] sm:$0xff] %v12358_v56  ;;  %v12411_v24 = vmul.f32 %v12256_v52, %v13137_v4  ;;  %v12415_v46 = vmul.f32 %v12254_v28, %v13138_v16  ;;  %7604 = vmatprep.subr.bf16.mxu1 %v13140_v44  ;;  %13144 = vst [vmem:[#allocation32_spill] sm:$0xff] %v12428_v37  ;;  %v13145_v4 = vld [vmem:[#allocation77_spill] sm:$0xff]  ;;  %v6915_v16 = vld [vmem:[%s12962_s26 + $0x21] sm:$0xf]  ;;  %v12440_v44 = vmul.f32 %v12254_v28, %v13147_v12 }
 0x7ba   :  { %v12432_v57 = vmul.f32 %v12256_v52, %v13145_v4  ;;  %v12448_v56 = vmul.f32 %v12254_v28, %v13151_v3  ;;  %v12453_v4 = vld [vmem:[%s12907_s16 + $0x80] sm:$0xff]  ;;  %v12458_v37 = vmul.f32 %v12256_v52, %v13154_v18  ;;  %v13156_v12 = vld [vmem:[#allocation3_spill] sm:$0xff]  ;;  %v12467_v28 = vrot.slane %v6797_v51, %v13157_v21  ;;  %v12472_v3 = vld [vmem:[%s12907_s16 + $0x98] sm:$0xff] }
 0x7bb   :  { %13139 = vst [vmem:[#allocation30_spill] sm:$0xff] %v12415_v46  ;;  %13148 = vst [vmem:[#allocation34_spill] sm:$0xff] %v12440_v44  ;;  %v12461_v44 = vrot.slane %v6797_v51, %v13156_v12  ;;  %v12482_v18 = vld [vmem:[%s12908_s17 + $0x30] sm:$0xff]  ;;  %v13160_v52 = vunpack.c.l.s8.bf16 %v12381_v11  ;;  %v12496_v6 = vrot.slane %v6915_v16, %v13157_v21  ;;  %v12513_v21 = vrot.slane %v6915_v16, %v9237_v26 }
 0x7bc   :  { %13146 = vst [vmem:[#allocation33_spill] sm:$0xff] %v12432_v57  ;;  %13152 = vst [vmem:[#allocation36_spill] sm:$0xff] %v12448_v56  ;;  %v12477_v57 = vld [vmem:[%s12907_s16 + $0x90] sm:$0xff]  ;;  %v12490_v56 = vrot.slane %v6915_v16, %v9234_v22  ;;  %v13163_v50 = vunpack.c.l.s8.bf16 %v12482_v18 }
 0x7bd   :  { %13153 = vst [vmem:[#allocation37_spill] sm:$0xff] %v12453_v4  ;;  %13155 = vst [vmem:[#allocation38_spill] sm:$0xff] %v12458_v37  ;;  %7612 = vmatpush3.bf16.msra.mxu1 %v13160_v52  ;;  %v12487_v37 = vrot.slane %v6915_v16, %v13156_v12  ;;  %v12506_v52 = vld [vmem:[%s12907_s16 + $0xa0] sm:$0xff]  ;;  %v13162_v12 = vunpack.c.h.s8.bf16 %v12339_v48  ;;  %v12522_v48 = vld [vmem:[%s12907_s16 + $0xb8] sm:$0xff] }
 0x7be   :  { %13158 = vst [vmem:[#allocation39_spill] sm:$0xff] %v12477_v57  ;;  %13159 = vst [vmem:[#allocation40_spill] sm:$0xff] %v12482_v18  ;;  %v12528_v26 = vld [vmem:[%s12908_s17 + $0x10] sm:$0xff] }
 0x7bf   :  { %13161 = vst [vmem:[#allocation41_spill] sm:$0xff] %v12506_v52  ;;  %7605 = vmatprep.subr.bf16.mxu1 %v13162_v12 }
 0x7c1   :  { %7613 = vmatpush3.bf16.msra.mxu1 %v12943_v47 }
 0x7c2   :  { %7606 = vmatprep.subr.bf16.mxu1 %v13163_v50 }
 0x849   :  { %v6612_v16 = vpop.f32.mrb[160].mxu0  ;;  %v6758_v51 = vpop.f32.mrb[200].mxu1 }
 0x84a   :  { %v6819_v12 = vmul.f32 %v12461_v44, %v6612_v16  ;;  %v6821_v58 = vmul.f32 %v12464_v41, %v6758_v51  ;;  %v6614_v4 = vpop.f32.mrb[161].mxu0  ;;  %v6760_v46 = vpop.f32.mrb[201].mxu1  ;;  %v7351_v16 = vunpack.c.l.s8.bf16 %v12528_v26 }
 0x84b   :  { %v6820_v19 = vmul.f32 %v12467_v28, %v6614_v4  ;;  %v6822_v22 = vmul.f32 %v12493_v55, %v6760_v46  ;;  %v6616_v14 = vpop.f32.mrb[162].mxu0  ;;  %v6762_v11 = vpop.f32.mrb[202].mxu1 }
 0x84c   :  { %v6851_v51 = vadd.f32 %v6819_v12, %v12196_v45  ;;  %v6853_v57 = vadd.f32 %v6821_v58, %v12249_v42  ;;  %v6823_v15 = vmul.f32 %v12461_v44, %v6616_v14  ;;  %v6825_v63 = vmul.f32 %v12464_v41, %v6762_v11  ;;  %v6618_v18 = vpop.f32.mrb[163].mxu0  ;;  %v6764_v50 = vpop.f32.mrb[203].mxu1  ;;  %7614 = vmatpush3.bf16.msra.mxu1 %v7351_v16 }
 0x84d   :  { %v6852_v4 = vadd.f32 %v6820_v19, %v12199_v35  ;;  %v6854_v46 = vadd.f32 %v6822_v22, %v12252_v20  ;;  %v6824_v52 = vmul.f32 %v12467_v28, %v6618_v18  ;;  %v6826_v47 = vmul.f32 %v12493_v55, %v6764_v50 }
 0x84e   :  { %v6883_v45 = vadd.f32 %v6851_v51, %v12313_v38  ;;  %v6885_v58 = vadd.f32 %v6853_v57, %v12375_v29  ;;  %v6855_v42 = vadd.f32 %v6823_v15, %v12202_v5  ;;  %v6857_v14 = vadd.f32 %v6825_v63, %v12259_v59 }
 0x84f   :  { %v6884_v11 = vadd.f32 %v6852_v4, %v12316_v32  ;;  %v6886_v35 = vadd.f32 %v6854_v46, %v12385_v53  ;;  %v6856_v20 = vadd.f32 %v6824_v52, %v12205_v23  ;;  %v6858_v19 = vadd.f32 %v6826_v47, %v12262_v54 }
 0x850   :  { %v6937_v18 = vadd.f32 %v12487_v37, %v6883_v45  ;;  %v6939_v22 = vadd.f32 %v12490_v56, %v6885_v58  ;;  %v6887_v38 = vadd.f32 %v6855_v42, %v12319_v31  ;;  %v6889_v57 = vadd.f32 %v6857_v14, %v12389_v62 }
 0x851   :  { %v6888_v5 = vadd.f32 %v6856_v20, %v12325_v25  ;;  %v12570_v59 = vadd.f32 %v6858_v19, %v12393_v36  ;;  %v6622_v63 = vpop.f32.mrb[164].mxu0  ;;  %v6768_v32 = vpop.f32.mrb[204].mxu1  ;;  %v6938_v29 = vadd.f32 %v12496_v6, %v6884_v11  ;;  %v12574_v23 = vadd.f32 %v12513_v21, %v6886_v35 }
 0x852   :  { %v6969_v54 = vmax.f32 %v6937_v18, 0.0  ;;  %v6971_v47 = vmax.f32 %v6939_v22, 0.0  ;;  %v6941_v15 = vadd.f32 %v12487_v37, %v6887_v38  ;;  %v6943_v31 = vadd.f32 %v12490_v56, %v6889_v57  ;;  %v6624_v53 = vpop.f32.mrb[165].mxu0  ;;  %v6770_v62 = vpop.f32.mrb[205].mxu1 }
 0x853   :  { %v6827_v25 = vmul.f32 %v12461_v44, %v6622_v63  ;;  %v6829_v36 = vmul.f32 %v12464_v41, %v6768_v32  ;;  %v6828_v52 = vmul.f32 %v12467_v28, %v6624_v53  ;;  %v6830_v12 = vmul.f32 %v12493_v55, %v6770_v62  ;;  %v6626_v51 = vpop.f32.mrb[166].mxu0  ;;  %v6772_v50 = vpop.f32.mrb[206].mxu1 }
 0x854   :  { %v6973_v4 = vmax.f32 %v6941_v15, 0.0  ;;  %v6975_v46 = vmax.f32 %v6943_v31, 0.0  ;;  %v6831_v45 = vmul.f32 %v12461_v44, %v6626_v51  ;;  %v6833_v58 = vmul.f32 %v12464_v41, %v6772_v50  ;;  %v6628_v42 = vpop.f32.mrb[167].mxu0  ;;  %v6774_v14 = vpop.f32.mrb[207].mxu1 }
 0x855   :  { %v6859_v11 = vadd.f32 %v6827_v25, %v12208_v39  ;;  %v6861_v35 = vadd.f32 %v6829_v36, %v12265_v1  ;;  %v6860_v20 = vadd.f32 %v6828_v52, %v12211_v0  ;;  %v6862_v19 = vadd.f32 %v6830_v12, %v12268_v13 }
 0x856   :  { %v7001_v18 = vpack.c.bf16 %v6973_v4, %v6969_v54  ;;  %v12588_v22 = vpack.c.bf16 %v6975_v46, %v6971_v47  ;;  %v6863_v38 = vadd.f32 %v6831_v45, %v12214_v2  ;;  %v6865_v57 = vadd.f32 %v6833_v58, %v12271_v30 }
 0x857   :  { %v6891_v63 = vadd.f32 %v6859_v11, %v12328_v34  ;;  %v12594_v32 = vadd.f32 %v6861_v35, %v12397_v8  ;;  %v6892_v39 = vadd.f32 %v6860_v20, %v12331_v10  ;;  %v12598_v1 = vadd.f32 %v6862_v19, %v12403_v60  ;;  %v13165_v35 = vld [vmem:[#allocation6_spill] sm:$0xff] }
 0x858   :  { %v6895_v0 = vadd.f32 %v6863_v38, %v12334_v43  ;;  %v12602_v13 = vadd.f32 %v6865_v57, %v12407_v27  ;;  %v6832_v54 = vmul.f32 %v12467_v28, %v6628_v42  ;;  %v6834_v2 = vmul.f32 %v12493_v55, %v6774_v14  ;;  %v13164_v42 = vld [vmem:[#allocation14_spill] sm:$0xff]  ;;  %v13168_v57 = vld [vmem:[#allocation31_spill] sm:$0xff] }
 0x859   :  { %v6632_v30 = vpop.f32.mrb[168].mxu0  ;;  %v6778_v47 = vpop.f32.mrb[208].mxu1  ;;  %v6942_v34 = vadd.f32 %v12496_v6, %v6888_v5  ;;  %v6970_v8 = vmax.f32 %v6938_v29, 0.0  ;;  %v12608_v15 = vadd.f32 %v12496_v6, %v6892_v39  ;;  %v12611_v10 = vadd.f32 %v12487_v37, %v6891_v63 }
 0x85a   :  { %v6864_v43 = vadd.f32 %v6832_v54, %v12217_v17  ;;  %v6866_v27 = vadd.f32 %v6834_v2, %v12274_v9  ;;  %v6835_v60 = vmul.f32 %v12461_v44, %v6632_v30  ;;  %v6837_v31 = vmul.f32 %v12464_v41, %v6778_v47  ;;  %v6634_v53 = vpop.f32.mrb[169].mxu0  ;;  %v6780_v62 = vpop.f32.mrb[209].mxu1  ;;  %v13170_v2 = vld [vmem:[#allocation17_spill] sm:$0xff] }
 0x85b   :  { %v6974_v25 = vmax.f32 %v6942_v34, 0.0  ;;  %v6836_v5 = vmul.f32 %v12467_v28, %v6634_v53  ;;  %v6838_v29 = vmul.f32 %v12493_v55, %v6780_v62  ;;  %v6636_v36 = vpop.f32.mrb[170].mxu0  ;;  %v6782_v52 = vpop.f32.mrb[210].mxu1  ;;  %v6978_v12 = vmax.f32 %v12608_v15, 0.0  ;;  %v13171_v47 = vld [vmem:[#allocation9_spill] sm:$0xff]  ;;  %v13175_v53 = vld [vmem:[#allocation18_spill] sm:$0xff] }
 0x85c   :  { %v6896_v51 = vadd.f32 %v6864_v43, %v12344_v49  ;;  %v12622_v17 = vadd.f32 %v6866_v27, %v12411_v24  ;;  %v6867_v9 = vadd.f32 %v6835_v60, %v12220_v33  ;;  %v6869_v50 = vadd.f32 %v6837_v31, %v12277_v40  ;;  %v6638_v4 = vpop.f32.mrb[171].mxu0  ;;  %v6784_v46 = vpop.f32.mrb[211].mxu1  ;;  %v13166_v49 = vld [vmem:[#allocation30_spill] sm:$0xff]  ;;  %v13172_v43 = vld [vmem:[#allocation37_spill] sm:$0xff]  ;;  %v13174_v60 = vld [vmem:[#allocation23_spill] sm:$0xff] }
 0x85d   :  { %v7002_v45 = vpack.c.bf16 %v6974_v25, %v6970_v8  ;;  %v6868_v58 = vadd.f32 %v6836_v5, %v12223_v7  ;;  %v6870_v14 = vadd.f32 %v6838_v29, %v13164_v42  ;;  %v6839_v11 = vmul.f32 %v12461_v44, %v6636_v36  ;;  %v13167_v40 = vld [vmem:[#allocation2_spill] sm:$0xff]  ;;  %v13169_v7 = vld [vmem:[#allocation8_spill] sm:$0xff]  ;;  %v13180_v42 = vld [vmem:[#allocation33_spill] sm:$0xff] }
 0x85e   :  { %v12630_v20 = vadd.f32 %v6867_v9, %v13165_v35  ;;  %v12633_v19 = vadd.f32 %v6869_v50, %v13166_v49  ;;  %v6841_v24 = vmul.f32 %v12464_v41, %v6782_v52  ;;  %v6840_v33 = vmul.f32 %v12467_v28, %v6638_v4  ;;  %v13176_v36 = vld [vmem:[#allocation32_spill] sm:$0xff]  ;;  %v13178_v50 = vld [vmem:[#allocation7_spill] sm:$0xff] }
 0x85f   :  { %7145 = vmatprep.mubr.bf16.mxu0 %v7002_v45  ;;  %v6900_v38 = vadd.f32 %v6868_v58, %v13167_v40  ;;  %v12639_v63 = vadd.f32 %v6870_v14, %v13168_v57  ;;  %v6871_v39 = vadd.f32 %v6839_v11, %v13169_v7  ;;  %v6842_v54 = vmul.f32 %v12493_v55, %v6784_v46  ;;  %v13177_v9 = vld [vmem:[#allocation24_spill] sm:$0xff] }
 0x860   :  { %7146 = vmatmul.mubr.bf16.vlgmr.msra.gmra.mrb[176].mxu0 %v7001_v18  ;;  %v6873_v30 = vadd.f32 %v6841_v24, %v13170_v2  ;;  %v6872_v34 = vadd.f32 %v6840_v33, %v13171_v47  ;;  %v6950_v8 = vadd.f32 %v12496_v6, %v6896_v51  ;;  %v6949_v15 = vadd.f32 %v12487_v37, %v6895_v0  ;;  %v13181_v33 = vld [vmem:[#allocation10_spill] sm:$0xff] }
 0x861   :  { %v13173_v27 = vunpack.c.l.s8.bf16 %v13172_v43  ;;  %v6903_v31 = vadd.f32 %v6871_v39, %v13174_v60  ;;  %v6874_v62 = vadd.f32 %v6842_v54, %v13175_v53  ;;  %v6642_v25 = vpop.f32.mrb[172].mxu0  ;;  %v6788_v5 = vpop.f32.mrb[212].mxu1  ;;  %v6977_v29 = vmax.f32 %v12611_v10, 0.0 }
 0x862   :  { %v6954_v18 = vadd.f32 %v12496_v6, %v6900_v38  ;;  %v12654_v52 = vadd.f32 %v6873_v30, %v13176_v36  ;;  %v6904_v51 = vadd.f32 %v6872_v34, %v13177_v9  ;;  %v13179_v0 = vunpack.c.h.s8.bf16 %v13178_v50  ;;  %v6644_v45 = vpop.f32.mrb[173].mxu0  ;;  %v6790_v58 = vpop.f32.mrb[213].mxu1  ;;  %v13182_v38 = vld [vmem:[#allocation19_spill] sm:$0xff]  ;;  %v13189_v9 = vld [vmem:[#allocation12_spill] sm:$0xff] }
 0x863   :  { %7187 = vmatpush1.bf16.msra.mxu0 %v13173_v27  ;;  %v6843_v4 = vmul.f32 %v12461_v44, %v6642_v25  ;;  %v6845_v46 = vmul.f32 %v12464_v41, %v6788_v5  ;;  %v12662_v14 = vadd.f32 %v6874_v62, %v13180_v42  ;;  %v6982_v10 = vmax.f32 %v6950_v8, 0.0  ;;  %v6646_v49 = vpop.f32.mrb[174].mxu0  ;;  %v6792_v24 = vpop.f32.mrb[214].mxu1  ;;  %v13184_v34 = vld [vmem:[#allocation11_spill] sm:$0xff]  ;;  %v13185_v27 = vld [vmem:[#allocation20_spill] sm:$0xff]  ;;  %v13186_v62 = vld [vmem:[#allocation25_spill] sm:$0xff] }
 0x864   :  { %7188 = vmatprep.subr.bf16.mxu0 %v13179_v0  ;;  %v6844_v11 = vmul.f32 %v12467_v28, %v6644_v45  ;;  %v6846_v35 = vmul.f32 %v12493_v55, %v6790_v58  ;;  %v6981_v7 = vmax.f32 %v6949_v15, 0.0  ;;  %v6847_v39 = vmul.f32 %v12461_v44, %v6646_v49  ;;  %v6648_v54 = vpop.f32.mrb[175].mxu0  ;;  %v6794_v2 = vpop.f32.mrb[215].mxu1  ;;  %v13187_v5 = vld [vmem:[#allocation34_spill] sm:$0xff]  ;;  %v13191_v0 = vld [vmem:[#allocation35_spill] sm:$0xff] }
 0x865   :  { %v6875_v40 = vadd.f32 %v6843_v4, %v13181_v33  ;;  %v6877_v57 = vadd.f32 %v6845_v46, %v13182_v38  ;;  %v13183_v30 = vunpack.c.h.s8.bf16 %v13172_v43  ;;  %v7006_v47 = vpack.c.bf16 %v6982_v10, %v6978_v12  ;;  %v13190_v43 = vld [vmem:[#allocation26_spill] sm:$0xff]  ;;  %v13192_v46 = vld [vmem:[#allocation21_spill] sm:$0xff]  ;;  %v13193_v58 = vld [vmem:[#allocation27_spill] sm:$0xff] }
 0x866   :  { %v6876_v8 = vadd.f32 %v6844_v11, %v13184_v34  ;;  %v6878_v60 = vadd.f32 %v6846_v35, %v13185_v27  ;;  %v6849_v53 = vmul.f32 %v12464_v41, %v6792_v24  ;;  %v13188_v15 = vunpack.c.l.s8.bf16 %v12472_v3  ;;  %v13196_v24 = vld [vmem:[#allocation36_spill] sm:$0xff]  ;;  %v13201_v27 = vld [vmem:[#allocation38_spill] sm:$0xff] }
 0x867   :  { %7189 = vmatpush1.bf16.msra.mxu0 %v13183_v30  ;;  %v6907_v25 = vadd.f32 %v6875_v40, %v13186_v62  ;;  %v12676_v36 = vadd.f32 %v6877_v57, %v13187_v5  ;;  %v7005_v44 = vpack.c.bf16 %v6981_v7, %v6977_v29  ;;  %v6879_v50 = vadd.f32 %v6847_v39, %v13189_v9  ;;  %v13194_v29 = vld [vmem:[#allocation39_spill] sm:$0xff]  ;;  %v13197_v40 = vld [vmem:[#allocation13_spill] sm:$0xff]  ;;  %v13198_v7 = vld [vmem:[#allocation22_spill] sm:$0xff] }
 0x868   :  { %7190 = vmatprep.subr.bf16.mxu0 %v13188_v15  ;;  %7155 = vmatprep.mubr.bf16.mxu0 %v7006_v47  ;;  %v6908_v12 = vadd.f32 %v6876_v8, %v13190_v43  ;;  %v6910_v4 = vadd.f32 %v6878_v60, %v13191_v0  ;;  %v6881_v45 = vadd.f32 %v6849_v53, %v13192_v46  ;;  %v6986_v35 = vmax.f32 %v6954_v18, 0.0 }
 0x869   :  { %v6848_v41 = vmul.f32 %v12467_v28, %v6648_v54  ;;  %7156 = vmatmul.mubr.bf16.gmra.mrb[180].mxu0 %v7005_v44  ;;  %v6911_v42 = vadd.f32 %v6879_v50, %v13193_v58  ;;  %v6850_v10 = vmul.f32 %v12493_v55, %v6794_v2  ;;  %v6958_v11 = vadd.f32 %v12496_v6, %v6904_v51  ;;  %v13200_v2 = vld [vmem:[#allocation28_spill] sm:$0xff] }
 0x86a   :  { %v13195_v49 = vunpack.c.l.s8.bf16 %v13194_v29  ;;  %v6913_v33 = vadd.f32 %v6881_v45, %v13196_v24  ;;  %v6953_v57 = vadd.f32 %v12487_v37, %v12630_v20  ;;  %v6957_v28 = vadd.f32 %v12487_v37, %v6903_v31 }
 0x86b   :  { %v6880_v38 = vadd.f32 %v6848_v41, %v13197_v40  ;;  %v6882_v39 = vadd.f32 %v6850_v10, %v13198_v7  ;;  %v13199_v54 = vunpack.c.h.s8.bf16 %v12472_v3  ;;  %v6990_v55 = vmax.f32 %v6958_v11, 0.0 }
 0x86c   :  { %7191 = vmatpush1.bf16.msra.mxu0 %v13195_v49  ;;  %v6962_v18 = vadd.f32 %v12496_v6, %v6908_v12  ;;  %v6961_v51 = vadd.f32 %v12487_v37, %v6907_v25  ;;  %v6985_v47 = vmax.f32 %v6953_v57, 0.0  ;;  %v6989_v34 = vmax.f32 %v6957_v28, 0.0 }
 0x86d   :  { %7192 = vmatprep.subr.bf16.mxu0 %v13199_v54  ;;  %v6912_v30 = vadd.f32 %v6880_v38, %v13200_v2  ;;  %v6965_v8 = vadd.f32 %v12487_v37, %v6911_v42  ;;  %v6914_v20 = vadd.f32 %v6882_v39, %v13201_v27  ;;  %v7010_v60 = vpack.c.bf16 %v6990_v55, %v6986_v35  ;;  %v7044_v27 = vld [vmem:[%s12907_s16 + $0xd8] sm:$0xff] }
 0x86e   :  { %v6994_v31 = vmax.f32 %v6962_v18, 0.0  ;;  %v6993_v53 = vmax.f32 %v6961_v51, 0.0  ;;  %v13202_v62 = vunpack.c.h.s8.bf16 %v13194_v29  ;;  %v7009_v3 = vpack.c.bf16 %v6989_v34, %v6985_v47 }
 0x86f   :  { %v6966_v5 = vadd.f32 %v12496_v6, %v6912_v30  ;;  %v6997_v15 = vmax.f32 %v6965_v8, 0.0  ;;  %v6944_v25 = vadd.f32 %v12513_v21, %v12570_v59  ;;  %7165 = vmatprep.mubr.bf16.mxu0 %v7010_v60  ;;  %v13203_v44 = vunpack.c.l.s8.bf16 %v12501_v61 }
 0x870   :  { %7193 = vmatpush1.bf16.msra.mxu0 %v13202_v62  ;;  %v6972_v37 = vmax.f32 %v12574_v23, 0.0  ;;  %v6948_v9 = vadd.f32 %v12513_v21, %v12598_v1  ;;  %v6952_v50 = vadd.f32 %v12513_v21, %v12622_v17  ;;  %v6947_v43 = vadd.f32 %v12490_v56, %v12594_v32  ;;  %v13204_v1 = vld [vmem:[#allocation41_spill] sm:$0xff] }
 0x871   :  { %7194 = vmatprep.subr.bf16.mxu0 %v13203_v44  ;;  %v6998_v6 = vmax.f32 %v6966_v5, 0.0  ;;  %v7013_v12 = vpack.c.bf16 %v6997_v15, %v6993_v53  ;;  %v6976_v0 = vmax.f32 %v6944_v25, 0.0  ;;  %v6951_v59 = vadd.f32 %v12490_v56, %v12602_v13  ;;  %7166 = vmatmul.mubr.bf16.gmra.mrb[184].mxu0 %v7009_v3  ;;  %v7039_v13 = vld [vmem:[%s12907_s16 + $0xb0] sm:$0xff]  ;;  %v7046_v3 = vld [vmem:[%s12907_s16 + $0xe8] sm:$0xff]  ;;  %v7045_v25 = vld [vmem:[%s12907_s16 + $0xe0] sm:$0xff] }
 0x872   :  { %v6980_v46 = vmax.f32 %v6948_v9, 0.0  ;;  %v6984_v45 = vmax.f32 %v6952_v50, 0.0  ;;  %v6979_v41 = vmax.f32 %v6947_v43, 0.0  ;;  %v6956_v23 = vadd.f32 %v12513_v21, %v12639_v63  ;;  %v7048_v9 = vld [vmem:[%s12907_s16 + $0xf8] sm:$0xff] }
 0x873   :  { %v13205_v58 = vunpack.c.l.s8.bf16 %v13204_v1  ;;  %v7014_v17 = vpack.c.bf16 %v6998_v6, %v6994_v31  ;;  %v7004_v42 = vpack.c.bf16 %v6976_v0, %v6972_v37  ;;  %v6983_v10 = vmax.f32 %v6951_v59, 0.0  ;;  %v7043_v31 = vld [vmem:[%s12907_s16 + $0xd0] sm:$0xff] }
 0x874   :  { %v6960_v32 = vadd.f32 %v12513_v21, %v12662_v14  ;;  %v13206_v11 = vunpack.c.h.s8.bf16 %v12501_v61  ;;  %v12730_v35 = vpack.c.bf16 %v6984_v45, %v6980_v46  ;;  %v6988_v29 = vmax.f32 %v6956_v23, 0.0  ;;  %v7047_v6 = vld [vmem:[%s12907_s16 + $0xf0] sm:$0xff]  ;;  %v13209_v46 = vld [vmem:[#allocation15_spill] sm:$0xff] }
 0x875   :  { %7195 = vmatpush1.bf16.msra.mxu0 %v13205_v58  ;;  %v6955_v63 = vadd.f32 %v12490_v56, %v12633_v19  ;;  %v6959_v49 = vadd.f32 %v12490_v56, %v12654_v52  ;;  %7175 = vmatprep.mubr.bf16.mxu0 %v7014_v17  ;;  %v12736_v24 = vpack.c.bf16 %v6983_v10, %v6979_v41  ;;  %v13207_v19 = vunpack.c.h.s8.bf16 %v13204_v1  ;;  %v13211_v41 = vld [vmem:[#allocation16_spill] sm:$0xff]  ;;  %v13215_v17 = vld [vmem:[#allocation5_spill] sm:$0xff] }
 0x876   :  { %7196 = vmatprep.subr.bf16.mxu0 %v13206_v11  ;;  %v6992_v14 = vmax.f32 %v6960_v32, 0.0  ;;  %v6964_v61 = vadd.f32 %v12513_v21, %v6910_v4  ;;  %v6968_v40 = vadd.f32 %v12513_v21, %v6914_v20  ;;  %v6963_v28 = vadd.f32 %v12490_v56, %v12676_v36  ;;  %v13217_v10 = vld [vmem:[#allocation29_spill] sm:$0xff] }
 0x877   :  { %v6987_v38 = vmax.f32 %v6955_v63, 0.0  ;;  %v6991_v57 = vmax.f32 %v6959_v49, 0.0  ;;  %v6967_v7 = vadd.f32 %v12490_v56, %v6913_v33  ;;  %v7093_v39 = vunpack.c.l.s8.bf16 %v7039_v13  ;;  %v7042_v56 = vld [vmem:[%s12907_s16 + $0xc8] sm:$0xff]  ;;  %v7346_v49 = vld [vmem:[%s12908_s17 + $0x38] sm:$0xff] }
 0x878   :  { %v12745_v52 = vpack.c.bf16 %v6992_v14, %v6988_v29  ;;  %v6996_v54 = vmax.f32 %v6964_v61, 0.0  ;;  %v7000_v55 = vmax.f32 %v6968_v40, 0.0  ;;  %v13208_v18 = vunpack.c.l.s8.bf16 %v12522_v48 }
 0x879   :  { %7197 = vmatpush1.bf16.msra.mxu0 %v13207_v19  ;;  %v7096_v21 = vunpack.c.h.s8.bf16 %v12522_v48  ;;  %v12750_v4 = vpack.c.bf16 %v6991_v57, %v6987_v38  ;;  %v6995_v51 = vmax.f32 %v6963_v28, 0.0  ;;  %v6999_v2 = vmax.f32 %v6967_v7, 0.0  ;;  %v7041_v48 = vld [vmem:[%s12907_s16 + $0xc0] sm:$0xff]  ;;  %v13223_v57 = vld [vmem:[#allocation3_spill] sm:$0xff]  ;;  %v13224_v7 = vld [vmem:[#allocation4_spill] sm:$0xff] }
 0x87a   :  { %7198 = vmatprep.subr.bf16.mxu0 %v13208_v18  ;;  %v7016_v36 = vpack.c.bf16 %v7000_v55, %v6996_v54  ;;  %7176 = vmatmul.mubr.bf16.gmra.mrb[188].mxu0 %v7013_v12  ;;  %v7095_v30 = vunpack.c.h.s8.bf16 %v7039_v13  ;;  %v7098_v47 = vunpack.c.l.s8.bf16 %v7042_v56  ;;  %v7097_v34 = vunpack.c.l.s8.bf16 %v7041_v48  ;;  %v13221_v13 = vld [vmem:[#allocation40_spill] sm:$0xff]  ;;  %v7287_v38 = vld [vmem:[%s12962_s26 + $0x25] sm:$0x3] }
 0x87b   :  { %v7015_v33 = vpack.c.bf16 %v6999_v2, %v6995_v51  ;;  %7218 = vmatprep.mubr.bf16.mxu0 %v7004_v42  ;;  %v7100_v8 = vunpack.c.h.s8.bf16 %v7042_v56  ;;  %v7099_v20 = vunpack.c.h.s8.bf16 %v7041_v48  ;;  %v7102_v60 = vunpack.c.l.s8.bf16 %v7044_v27 }
 0x87c   :  { %v7101_v53 = vunpack.c.l.s8.bf16 %v7043_v31  ;;  %v7104_v62 = vunpack.c.h.s8.bf16 %v7044_v27  ;;  %v7103_v5 = vunpack.c.h.s8.bf16 %v7043_v31  ;;  %v7106_v15 = vunpack.c.l.s8.bf16 %v7046_v3 }
 0x87d   :  { %7199 = vmatpush1.bf16.msra.mxu0 %v7093_v39  ;;  %v7105_v44 = vunpack.c.l.s8.bf16 %v7045_v25  ;;  %v7108_v37 = vunpack.c.h.s8.bf16 %v7046_v3  ;;  %v7107_v50 = vunpack.c.h.s8.bf16 %v7045_v25  ;;  %v7110_v43 = vunpack.c.l.s8.bf16 %v7048_v9 }
 0x87e   :  { %7200 = vmatprep.subr.bf16.mxu0 %v7096_v21  ;;  %v7109_v12 = vunpack.c.l.s8.bf16 %v7047_v6  ;;  %v7112_v0 = vunpack.c.h.s8.bf16 %v7048_v9  ;;  %v7111_v59 = vunpack.c.h.s8.bf16 %v7047_v6  ;;  %v13210_v45 = vunpack.c.l.s8.bf16 %v13209_v46 }
 0x87f   :  { %v13212_v23 = vunpack.c.l.s8.bf16 %v13211_v41  ;;  %v13213_v1 = vunpack.c.h.s8.bf16 %v13209_v46  ;;  %v13214_v58 = vunpack.c.h.s8.bf16 %v13211_v41  ;;  %v13216_v42 = vunpack.c.l.s8.bf16 %v13215_v17 }
 0x880   :  { %v13219_v32 = vunpack.c.h.s8.bf16 %v13215_v17  ;;  %v13220_v11 = vunpack.c.h.s8.bf16 %v13217_v10  ;;  %v7360_v29 = vunpack.c.h.s8.bf16 %v13221_v13  ;;  %v7352_v63 = vunpack.c.h.s8.bf16 %v12528_v26  ;;  %v7259_v26 = vld [vmem:[%s12960_s0 + $0x2f] sm:$0x3] }
 0x881   :  { %7201 = vmatpush1.bf16.msra.mxu0 %v7095_v30  ;;  %v7361_v14 = vunpack.c.l.s8.bf16 %v7346_v49  ;;  %v12816_v28 = vrot.slane %v7259_v26, %v13223_v57  ;;  %v12819_v19 = vrot.slane %v7259_v26, %v13224_v7  ;;  %v12822_v39 = vrot.slane %v7287_v38, %v13223_v57 }
 0x882   :  { %7202 = vmatprep.subr.bf16.mxu0 %v7098_v47  ;;  %7607 = vmatprep.subr.bf16.mxu1 %v7360_v29  ;;  %v12825_v54 = vrot.slane %v7287_v38, %v13224_v7 }
 0x883   :  { %7615 = vmatpush3.bf16.msra.mxu1 %v7352_v63 }
 0x884   :  { %7608 = vmatprep.subr.bf16.mxu1 %v7361_v14 }
 0x885   :  { %7203 = vmatpush1.bf16.msra.mxu0 %v7097_v34 }
 0x886   :  { %7204 = vmatprep.subr.bf16.mxu0 %v7100_v8 }
 0x889   :  { %7205 = vmatpush1.bf16.msra.mxu0 %v7099_v20 }
 0x88a   :  { %7206 = vmatprep.subr.bf16.mxu0 %v7102_v60 }
 0x88d   :  { %7207 = vmatpush1.bf16.msra.mxu0 %v7101_v53 }
 0x88e   :  { %7208 = vmatprep.subr.bf16.mxu0 %v7104_v62 }
 0x891   :  { %7209 = vmatpush1.bf16.msra.mxu0 %v7103_v5 }
 0x892   :  { %7210 = vmatprep.subr.bf16.mxu0 %v7106_v15 }
 0x895   :  { %7211 = vmatpush1.bf16.msra.mxu0 %v7105_v44 }
 0x896   :  { %7212 = vmatprep.subr.bf16.mxu0 %v7108_v37 }
 0x899   :  { %7213 = vmatpush1.bf16.msra.mxu0 %v7107_v50 }
 0x89a   :  { %7214 = vmatprep.subr.bf16.mxu0 %v7110_v43 }
 0x89d   :  { %7215 = vmatpush1.bf16.msra.mxu0 %v7109_v12 }
 0x89e   :  { %7216 = vmatprep.subr.bf16.mxu0 %v7112_v0 }
 0x8a1   :  { %7217 = vmatpush1.bf16.msra.mxu0 %v7111_v59 }
 0x8a2   :  { %7546 = vmatprep.subr.bf16.mxu0 %v13210_v45 }
 0x8a4   :  { %7219 = vmatmul.mubr.bf16.vlgmr.msra.gmra.mrb[176].mxu0 %v12588_v22  ;;  %v13218_v22 = vunpack.c.l.s8.bf16 %v13217_v10 }
 0x8a5   :  { %7228 = vmatprep.mubr.bf16.mxu0 %v12730_v35  ;;  %7547 = vmatpush3.bf16.msra.mxu0 %v13212_v23  ;;  %v13222_v35 = vunpack.c.l.s8.bf16 %v13221_v13 }
 0x8a6   :  { %7548 = vmatprep.subr.bf16.mxu0 %v13213_v1 }
 0x8a9   :  { %7549 = vmatpush3.bf16.msra.mxu0 %v13214_v58 }
 0x8aa   :  { %7550 = vmatprep.subr.bf16.mxu0 %v13216_v42 }
 0x8ac   :  { %7229 = vmatmul.mubr.bf16.gmra.mrb[180].mxu0 %v12736_v24  ;;  %v7342_v24 = vld [vmem:[%s12908_s17 + $0x18] sm:$0xff] }
 0x8ad   :  { %7238 = vmatprep.mubr.bf16.mxu0 %v12745_v52  ;;  %7551 = vmatpush3.bf16.msra.mxu0 %v13218_v22  ;;  %v7353_v61 = vunpack.c.l.s8.bf16 %v7342_v24  ;;  %v7354_v40 = vunpack.c.h.s8.bf16 %v7342_v24 }
 0x8ae   :  { %7552 = vmatprep.subr.bf16.mxu0 %v13219_v32 }
 0x8af   :  { %7616 = vmatpush3.bf16.msra.mxu1 %v7353_v61 }
 0x8b1   :  { %7553 = vmatpush3.bf16.msra.mxu0 %v13220_v11 }
 0x8b2   :  { %7554 = vmatprep.subr.bf16.mxu0 %v13222_v35 }
 0x8b4   :  { %7239 = vmatmul.mubr.bf16.gmra.mrb[184].mxu0 %v12750_v4 }
 0x8b5   :  { %7248 = vmatprep.mubr.bf16.mxu0 %v7016_v36  ;;  %7555 = vmatpush3.bf16.msra.mxu0 %v7351_v16  ;;  %v7362_v16 = vunpack.c.h.s8.bf16 %v7346_v49 }
 0x8b6   :  { %7556 = vmatprep.subr.bf16.mxu0 %v7360_v29 }
 0x8b7   :  { %7609 = vmatprep.subr.bf16.mxu1 %v7362_v16 }
 0x8b8   :  { %7617 = vmatpush3.bf16.msra.mxu1 %v7354_v40 }
 0x8b9   :  { %7557 = vmatpush3.bf16.msra.mxu0 %v7352_v63 }
 0x8ba   :  { %7558 = vmatprep.subr.bf16.mxu0 %v7361_v14 }
 0x8bc   :  { %7249 = vmatmul.mubr.bf16.gmra.mrb[188].mxu0 %v7015_v33 }
 0x8bd   :  { %7559 = vmatpush3.bf16.msra.mxu0 %v7353_v61 }
 0x8be   :  { %7560 = vmatprep.subr.bf16.mxu0 %v7362_v16 }
 0x8c1   :  { %7561 = vmatpush3.bf16.msra.mxu0 %v7354_v40 }
 0x977   :  { %v7220_v52 = vpop.f32.mrb[176].mxu0 }
 0x978   :  { %v7271_v55 = vmul.f32 %v12816_v28, %v7220_v52  ;;  %v7222_v18 = vpop.f32.mrb[177].mxu0 }
 0x979   :  { %v7272_v21 = vmul.f32 %v12819_v19, %v7222_v18  ;;  %v7224_v4 = vpop.f32.mrb[178].mxu0 }
 0x97a   :  { %v7299_v51 = vadd.f32 %v12822_v39, %v7271_v55  ;;  %v7273_v2 = vmul.f32 %v12816_v28, %v7224_v4  ;;  %v7226_v56 = vpop.f32.mrb[179].mxu0 }
 0x97b   :  { %v7300_v36 = vadd.f32 %v12825_v54, %v7272_v21  ;;  %v7274_v33 = vmul.f32 %v12819_v19, %v7226_v56 }
 0x97c   :  { %v7301_v30 = vadd.f32 %v12822_v39, %v7273_v2  ;;  %v7315_v48 = vmax.f32 %v7299_v51, 0.0 }
 0x97d   :  { %v7302_v47 = vadd.f32 %v12825_v54, %v7274_v33  ;;  %v7316_v8 = vmax.f32 %v7300_v36, 0.0 }
 0x97e   :  { %v7317_v34 = vmax.f32 %v7301_v30, 0.0 }
 0x97f   :  { %v7318_v27 = vmax.f32 %v7302_v47, 0.0  ;;  %v7230_v20 = vpop.f32.mrb[180].mxu0 }
 0x980   :  { %v7331_v60 = vpack.c.bf16 %v7317_v34, %v7315_v48  ;;  %v7275_v31 = vmul.f32 %v12816_v28, %v7230_v20  ;;  %v7232_v53 = vpop.f32.mrb[181].mxu0 }
 0x981   :  { %v7276_v62 = vmul.f32 %v12819_v19, %v7232_v53  ;;  %v7234_v3 = vpop.f32.mrb[182].mxu0  ;;  %v7332_v5 = vpack.c.bf16 %v7318_v27, %v7316_v8 }
 0x982   :  { %v7303_v15 = vadd.f32 %v12822_v39, %v7275_v31  ;;  %v7277_v25 = vmul.f32 %v12816_v28, %v7234_v3  ;;  %v7236_v44 = vpop.f32.mrb[183].mxu0 }
 0x983   :  { %v7304_v37 = vadd.f32 %v12825_v54, %v7276_v62  ;;  %v7278_v9 = vmul.f32 %v12819_v19, %v7236_v44  ;;  %7395 = vmatprep.mubr.bf16.mxu0 %v7332_v5 }
 0x984   :  { %v7305_v50 = vadd.f32 %v12822_v39, %v7277_v25  ;;  %7396 = vmatmul.mubr.bf16.vlgmr.msra.gmra.mrb[192].mxu0 %v7331_v60  ;;  %v7319_v6 = vmax.f32 %v7303_v15, 0.0 }
 0x985   :  { %v7306_v43 = vadd.f32 %v12825_v54, %v7278_v9  ;;  %v7320_v0 = vmax.f32 %v7304_v37, 0.0 }
 0x986   :  { %v7321_v12 = vmax.f32 %v7305_v50, 0.0 }
 0x987   :  { %v7322_v59 = vmax.f32 %v7306_v43, 0.0  ;;  %v7240_v46 = vpop.f32.mrb[184].mxu0 }
 0x988   :  { %v7279_v45 = vmul.f32 %v12816_v28, %v7240_v46  ;;  %v7242_v41 = vpop.f32.mrb[185].mxu0  ;;  %v7333_v23 = vpack.c.bf16 %v7321_v12, %v7319_v6 }
 0x989   :  { %v7280_v1 = vmul.f32 %v12819_v19, %v7242_v41  ;;  %v7244_v58 = vpop.f32.mrb[186].mxu0  ;;  %v7334_v17 = vpack.c.bf16 %v7322_v59, %v7320_v0 }
 0x98a   :  { %v7307_v42 = vadd.f32 %v12822_v39, %v7279_v45  ;;  %v7281_v10 = vmul.f32 %v12816_v28, %v7244_v58  ;;  %v7246_v22 = vpop.f32.mrb[187].mxu0 }
 0x98b   :  { %v7308_v32 = vadd.f32 %v12825_v54, %v7280_v1  ;;  %v7282_v11 = vmul.f32 %v12819_v19, %v7246_v22  ;;  %7403 = vmatprep.mubr.bf16.mxu0 %v7334_v17 }
 0x98c   :  { %v7309_v13 = vadd.f32 %v12822_v39, %v7281_v10  ;;  %7404 = vmatmul.mubr.bf16.gmra.mrb[196].mxu0 %v7333_v23  ;;  %v7323_v29 = vmax.f32 %v7307_v42, 0.0 }
 0x98d   :  { %v7310_v35 = vadd.f32 %v12825_v54, %v7282_v11  ;;  %v7324_v49 = vmax.f32 %v7308_v32, 0.0 }
 0x98e   :  { %v7325_v63 = vmax.f32 %v7309_v13, 0.0 }
 0x98f   :  { %v7326_v24 = vmax.f32 %v7310_v35, 0.0  ;;  %v7250_v14 = vpop.f32.mrb[188].mxu0 }
 0x990   :  { %v7335_v61 = vpack.c.bf16 %v7325_v63, %v7323_v29  ;;  %v7283_v16 = vmul.f32 %v12816_v28, %v7250_v14  ;;  %v7252_v40 = vpop.f32.mrb[189].mxu0 }
 0x991   :  { %v7284_v26 = vmul.f32 %v12819_v19, %v7252_v40  ;;  %v7254_v38 = vpop.f32.mrb[190].mxu0  ;;  %v7336_v57 = vpack.c.bf16 %v7326_v24, %v7324_v49 }
 0x992   :  { %v7311_v7 = vadd.f32 %v12822_v39, %v7283_v16  ;;  %v7285_v52 = vmul.f32 %v12816_v28, %v7254_v38  ;;  %v7256_v55 = vpop.f32.mrb[191].mxu0 }
 0x993   :  { %v7312_v18 = vadd.f32 %v12825_v54, %v7284_v26  ;;  %v7286_v21 = vmul.f32 %v12819_v19, %v7256_v55  ;;  %7411 = vmatprep.mubr.bf16.mxu1 %v7336_v57  ;;  %v7536_v19 = vld [vmem:[%s12960_s0 + $0x31] ss:$0 sm:$0xff] }
 0x994   :  { %v7313_v4 = vadd.f32 %v12822_v39, %v7285_v52  ;;  %7412 = vmatmul.mubr.bf16.vlgmr.msra.gmra.mrb[216].mxu1 %v7335_v61  ;;  %v7327_v2 = vmax.f32 %v7311_v7, 0.0  ;;  %v7537_v39 = vld [vmem:[%s12962_s26 + $0x27] ss:$0 sm:$0xff] }
 0x995   :  { %v7314_v51 = vadd.f32 %v12825_v54, %v7286_v21  ;;  %v7328_v36 = vmax.f32 %v7312_v18, 0.0 }
 0x996   :  { %v7329_v56 = vmax.f32 %v7313_v4, 0.0 }
 0x997   :  { %v7330_v33 = vmax.f32 %v7314_v51, 0.0 }
 0x998   :  { %v7337_v30 = vpack.c.bf16 %v7329_v56, %v7327_v2 }
 0x999   :  { %v7338_v47 = vpack.c.bf16 %v7330_v33, %v7328_v36 }
 0x99b   :  { %7419 = vmatprep.mubr.bf16.mxu1 %v7338_v47 }
 0x99c   :  { %7420 = vmatmul.mubr.bf16.gmra.mrb[220].mxu1 %v7337_v30 }
 0xa57   :  { %v7562_v28 = vpop.f32.mrb[192].mxu0 }
 0xa58   :  { %v7563_v48 = vpop.f32.mrb[193].mxu0 }
 0xa59   :  { %v7564_v34 = vadd.f32 %v7563_v48, %v7562_v28  ;;  %v7565_v8 = vpop.f32.mrb[194].mxu0 }
 0xa5a   :  { %v7566_v54 = vpop.f32.mrb[195].mxu0 }
 0xa5b   :  { %v7435_v27 = vmul.f32 %v7564_v34, %v7536_v19  ;;  %v7567_v20 = vadd.f32 %v7566_v54, %v7565_v8 }
 0xa5d   :  { %v7450_v60 = vadd.f32 %v7537_v39, %v7435_v27  ;;  %v7436_v31 = vmul.f32 %v7567_v20, %v7536_v19 }
 0xa5f   :  { %7458 = vst [vmem:[%s12909_s20] sm:$0xff] %v7450_v60  ;;  %v7451_v53 = vadd.f32 %v7537_v39, %v7436_v31  ;;  %v7568_v62 = vpop.f32.mrb[196].mxu0 }
 0xa60   :  { %v7569_v3 = vpop.f32.mrb[197].mxu0 }
 0xa61   :  { %7459 = vst [vmem:[%s12909_s20 + $0x8] sm:$0xff] %v7451_v53  ;;  %v7570_v5 = vadd.f32 %v7569_v3, %v7568_v62  ;;  %v7571_v15 = vpop.f32.mrb[198].mxu0 }
 0xa62   :  { %v7572_v25 = vpop.f32.mrb[199].mxu0 }
 0xa63   :  { %v7437_v44 = vmul.f32 %v7570_v5, %v7536_v19  ;;  %v7573_v37 = vadd.f32 %v7572_v25, %v7571_v15 }
 0xa65   :  { %v7452_v9 = vadd.f32 %v7537_v39, %v7437_v44  ;;  %v7438_v50 = vmul.f32 %v7573_v37, %v7536_v19 }
 0xa67   :  { %7460 = vst [vmem:[%s12909_s20 + $0x10] sm:$0xff] %v7452_v9  ;;  %v7453_v43 = vadd.f32 %v7537_v39, %v7438_v50  ;;  %v7574_v6 = vpop.f32.mrb[216].mxu1 }
 0xa68   :  { %v7575_v12 = vpop.f32.mrb[217].mxu1 }
 0xa69   :  { %7461 = vst [vmem:[%s12909_s20 + $0x18] sm:$0xff] %v7453_v43  ;;  %v7576_v0 = vadd.f32 %v7575_v12, %v7574_v6  ;;  %v7577_v59 = vpop.f32.mrb[218].mxu1 }
 0xa6a   :  { %v7578_v46 = vpop.f32.mrb[219].mxu1 }
 0xa6b   :  { %v7439_v45 = vmul.f32 %v7576_v0, %v7536_v19  ;;  %v7579_v41 = vadd.f32 %v7578_v46, %v7577_v59 }
 0xa6d   :  { %v7454_v23 = vadd.f32 %v7537_v39, %v7439_v45  ;;  %v7440_v1 = vmul.f32 %v7579_v41, %v7536_v19 }
 0xa6f   :  { %7462 = vst [vmem:[%s12909_s20 + $0x20] sm:$0xff] %v7454_v23  ;;  %v7455_v58 = vadd.f32 %v7537_v39, %v7440_v1  ;;  %v7580_v17 = vpop.f32.mrb[220].mxu1 }
 0xa70   :  { %v7581_v42 = vpop.f32.mrb[221].mxu1 }
 0xa71   :  { %7463 = vst [vmem:[%s12909_s20 + $0x28] sm:$0xff] %v7455_v58  ;;  %v7582_v10 = vadd.f32 %v7581_v42, %v7580_v17  ;;  %v7583_v22 = vpop.f32.mrb[222].mxu1 }
 0xa72   :  { %v7584_v32 = vpop.f32.mrb[223].mxu1 }
 0xa73   :  { %v7441_v11 = vmul.f32 %v7582_v10, %v7536_v19  ;;  %v7585_v13 = vadd.f32 %v7584_v32, %v7583_v22 }
 0xa75   :  { %v7456_v35 = vadd.f32 %v7537_v39, %v7441_v11  ;;  %v7442_v29 = vmul.f32 %v7585_v13, %v7536_v19 }
 0xa77   :  { %7464 = vst [vmem:[%s12909_s20 + $0x30] sm:$0xff] %v7456_v35  ;;  %v7457_v63 = vadd.f32 %v7537_v39, %v7442_v29 }
 0xa79   :  { %7465 = vst [vmem:[%s12909_s20 + $0x38] sm:$0xff] %v7457_v63 }

</bundles_post_ra>
